<compile_context>
chip_gen: v6e
topology: v6e:2x2x1
jax: 0.10.0
libtpu: 0.0.40
codegen_flags: <defaults>
</compile_context>

<pallas_src>
import functools
import numpy as np
import jax
import jax.numpy as jnp
from jax import lax
from jax.experimental import pallas as pl
from jax.experimental.pallas import tpu as pltpu

D_LIST = (1, 2, 5, 7)          # dilation list from the module
LN_EPS = 1e-6                  # LayerNorm eps from the module


# ---------------------------------------------------------------- helpers
@functools.lru_cache(maxsize=None)
def _vmem_limit_bytes():
    # queried lazily (not at import time) so AOT compiles on non-TPU hosts are explicit
    try:
        cap = int(pltpu.get_tpu_info().vmem_capacity_bytes)
    except Exception:
        cap = 128 * 1024 * 1024
    return int(min(cap * 3 // 4, 96 * 1024 * 1024))


def _choose_sp_tile(n, max_tile=8192):
    """Largest spatial (lane) tile: full array if small, else a 128-multiple divisor."""
    if n <= max_tile:
        return n
    start = max_tile - (max_tile % 128)
    for cand in range(start, 127, -128):
        if n % cand == 0:
            return cand
    return n


def _interp_matrix(out_size, in_size):
    # bilinear, align_corners=True interpolation weights, shape (out_size, in_size)
    if out_size == 1:
        src = np.zeros((1,), np.float64)
    else:
        src = np.arange(out_size, dtype=np.float64) * ((in_size - 1) / (out_size - 1))
    i0 = np.clip(np.floor(src).astype(np.int64), 0, in_size - 1)
    i1 = np.minimum(i0 + 1, in_size - 1)
    w1 = (src - i0).astype(np.float32)
    w0 = (1.0 - w1).astype(np.float32)
    m = np.zeros((out_size, in_size), np.float32)
    rows = np.arange(out_size)
    m[rows, i0] += w0
    m[rows, i1] += w1
    return jnp.asarray(m)


# ---------------------------------------------------------------- kernel 1: pre_project (1x1 conv)
def _pre_project_kernel(x_ref, w_ref, b_ref, o_ref):
    # (Cout, Cin) @ (Cin, S) + (Cout, 1) ; S (spatial) is lane-dense on the MXU N axis.
    o_ref[0] = (jnp.dot(w_ref[...], x_ref[0],
                        preferred_element_type=jnp.float32) + b_ref[...])


def pre_project(x_bcs, w, b):
    B, Cin, S_all = x_bcs.shape
    Cout = w.shape[0]
    S = _choose_sp_tile(S_all)
    return pl.pallas_call(
        _pre_project_kernel,
        grid=(B, S_all // S),
        in_specs=[pl.BlockSpec((1, Cin, S), lambda b_, s_: (b_, 0, s_)),
                  pl.BlockSpec((Cout, Cin), lambda b_, s_: (0, 0)),
                  pl.BlockSpec((Cout, 1), lambda b_, s_: (0, 0))],
        out_specs=pl.BlockSpec((1, Cout, S), lambda b_, s_: (b_, 0, s_)),
        out_shape=jax.ShapeDtypeStruct((B, Cout, S_all), jnp.float32),
        compiler_params=pltpu.CompilerParams(
            dimension_semantics=("parallel", "parallel"),
            vmem_limit_bytes=_vmem_limit_bytes()),
    )(x_bcs, w, b)


# ---------------------------------------------------------------- kernel 2: separable bilinear upsample
def _make_upsample_kernel(C):
    def kernel(x_ref, wy_ref, wxt_ref, o_ref):
        # exact align_corners=True bilinear: out_c = Wy @ x_c @ Wx^T ; all C channels
        # are processed inside ONE grid step (no B*C grid of tiny launches).
        wy = wy_ref[...]
        wxt = wxt_ref[...]
        for c in range(C):                                   # statically unrolled
            t = jnp.dot(wy, x_ref[0, c], preferred_element_type=jnp.float32)   # (H, Wh)
            o_ref[0, c] = jnp.dot(t, wxt, preferred_element_type=jnp.float32)  # (H, W)
    return kernel


def bilinear_upsample(x_bchw, wy, wxt):
    B, C, Hh, Wh = x_bchw.shape
    H, W = wy.shape[0], wxt.shape[1]
    return pl.pallas_call(
        _make_upsample_kernel(C),
        grid=(B,),
        in_specs=[pl.BlockSpec((1, C, Hh, Wh), lambda b: (b, 0, 0, 0)),
                  pl.BlockSpec((H, Hh), lambda b: (0, 0)),
                  pl.BlockSpec((Wh, W), lambda b: (0, 0))],
        out_specs=pl.BlockSpec((1, C, H, W), lambda b: (b, 0, 0, 0)),
        out_shape=jax.ShapeDtypeStruct((B, C, H, W), jnp.float32),
        compiler_params=pltpu.CompilerParams(
            dimension_semantics=("parallel",), vmem_limit_bytes=_vmem_limit_bytes()),
    )(x_bchw, wy, wxt)


# ---------------------------------------------------------------- kernel 3: fused branches + tail
def _shift_lanes(v, off, S):
    """result[:, p] = v[:, p + off] if 0 <= p + off < S else 0  (zero-filled lane shift)."""
    if off == 0:
        return v
    n = v.shape[0]
    if abs(off) >= S:
        return jnp.zeros_like(v)
    z = jnp.zeros((n, abs(off)), v.dtype)
    if off > 0:
        return jnp.concatenate([v[:, off:], z], axis=1)
    return jnp.concatenate([z, v[:, :off]], axis=1)


def _make_branches_tail_kernel(q, gs, Cl, S, W, d_list):
    Ct = 4 * gs
    inv_gs = 1.0 / float(gs)
    inv_ct = 1.0 / float(Ct)

    def kernel(xh_ref, xl_ref, m_ref, xpos_ref,
               bg_ref, bb_ref, bw_ref, bbias_ref,
               tg_ref, tb_ref, tw_ref, tbias_ref,
               o_ref, y_ref):
        xpos = xpos_ref[...]                                 # (1, S) column index (float)
        m = m_ref[0]                                         # (1, S)

        # ---- four (LayerNorm + dilated depthwise 3x3) branches ----
        for i, d in enumerate(d_list):                       # statically unrolled
            xh_i = xh_ref[0, i]                              # (q, S)
            xl_i = xl_ref[0, i]                              # (q, S)
            # channels_first LayerNorm stats over the gs = 2q+1 channels,
            # without materializing the concat.
            s1 = (jnp.sum(xh_i, axis=0, keepdims=True)
                  + jnp.sum(xl_i, axis=0, keepdims=True) + m)
            s2 = (jnp.sum(xh_i * xh_i, axis=0, keepdims=True)
                  + jnp.sum(xl_i * xl_i, axis=0, keepdims=True) + m * m)
            u = s1 * inv_gs
            var = jnp.maximum(s2 * inv_gs - u * u, 0.0)
            rstd = lax.rsqrt(var + LN_EPS)                   # (1, S)

            g_i = bg_ref[i]                                  # (gs, 1)
            b_i = bb_ref[i]                                  # (gs, 1)
            w_i = bw_ref[i]                                  # (gs, 9)
            bias_i = bbias_ref[i]                            # (gs, 1)

            # per-dilation column-validity masks (W-direction boundary of the 2D conv)
            mask_l = jnp.where(xpos >= float(d), 1.0, 0.0)        # for dx = -d
            mask_r = jnp.where(xpos < float(W - d), 1.0, 0.0)     # for dx = +d

            pieces = ((xh_i, 0, q), (xl_i, q, q), (m, 2 * q, 1))
            for xp, roff, nch in pieces:
                gsl = g_i[roff:roff + nch]
                bsl = b_i[roff:roff + nch]
                xn = (xp - u) * rstd * gsl + bsl             # (nch, S)
                acc = jnp.broadcast_to(bias_i[roff:roff + nch], (nch, S))
                for kj in range(3):                          # W-direction tap
                    dx = (kj - 1) * d
                    xc = _shift_lanes(xn, dx, S)
                    if dx > 0:
                        xc = xc * mask_r
                    elif dx < 0:
                        xc = xc * mask_l
                    for ki in range(3):                      # H-direction tap (shift by dy*W)
                        t = ki * 3 + kj
                        acc = acc + (_shift_lanes(xc, (ki - 1) * d * W, S)
                                     * w_i[roff:roff + nch, t:t + 1])
                y_ref[i, roff:roff + nch, :] = acc           # stays resident in VMEM

        # ---- fused tail: channels_first LayerNorm over Ct channels + 1x1 conv ----
        s1 = jnp.zeros((1, S), jnp.float32)
        s2 = jnp.zeros((1, S), jnp.float32)
        for i in range(4):
            yi = y_ref[i]                                    # (gs, S)
            s1 = s1 + jnp.sum(yi, axis=0, keepdims=True)
            s2 = s2 + jnp.sum(yi * yi, axis=0, keepdims=True)
        u = s1 * inv_ct
        var = jnp.maximum(s2 * inv_ct - u * u, 0.0)
        rstd = lax.rsqrt(var + LN_EPS)

        out = jnp.broadcast_to(tbias_ref[...], (Cl, S))
        for i in range(4):
            yn = (y_ref[i] - u) * rstd * tg_ref[i] + tb_ref[i]          # (gs, S)
            out = out + jnp.dot(tw_ref[i], yn, preferred_element_type=jnp.float32)
        o_ref[0] = out                                        # lane-dense (Cl, S) store

    return kernel


def branches_and_tail(xh_up, xl, mask, bg, bb, bw, bbias, tg, tb, tw, tbias,
                      d_list=D_LIST):
    B, Cl, H, W = xl.shape
    q = Cl // 4
    gs = 2 * q + 1
    S = H * W

    xh4 = xh_up.reshape(B, 4, q, S)
    xl4 = xl.reshape(B, 4, q, S)
    m2 = mask.reshape(B, 1, S)
    xpos = (jnp.arange(S, dtype=jnp.int32) % W).astype(jnp.float32).reshape(1, S)

    out = pl.pallas_call(
        _make_branches_tail_kernel(q, gs, Cl, S, W, d_list),
        grid=(B,),
        in_specs=[pl.BlockSpec((1, 4, q, S), lambda b: (b, 0, 0, 0)),
                  pl.BlockSpec((1, 4, q, S), lambda b: (b, 0, 0, 0)),
                  pl.BlockSpec((1, 1, S), lambda b: (b, 0, 0)),
                  pl.BlockSpec((1, S), lambda b: (0, 0)),
                  pl.BlockSpec((4, gs, 1), lambda b: (0, 0, 0)),
                  pl.BlockSpec((4, gs, 1), lambda b: (0, 0, 0)),
                  pl.BlockSpec((4, gs, 9), lambda b: (0, 0, 0)),
                  pl.BlockSpec((4, gs, 1), lambda b: (0, 0, 0)),
                  pl.BlockSpec((4, gs, 1), lambda b: (0, 0, 0)),
                  pl.BlockSpec((4, gs, 1), lambda b: (0, 0, 0)),
                  pl.BlockSpec((4, Cl, gs), lambda b: (0, 0, 0)),
                  pl.BlockSpec((Cl, 1), lambda b: (0, 0))],
        out_specs=pl.BlockSpec((1, Cl, S), lambda b: (b, 0, 0)),
        out_shape=jax.ShapeDtypeStruct((B, Cl, S), jnp.float32),
        scratch_shapes=[pltpu.VMEM((4, gs, S), jnp.float32)],
        compiler_params=pltpu.CompilerParams(
            dimension_semantics=("parallel",), vmem_limit_bytes=_vmem_limit_bytes()),
    )(xh4, xl4, m2, xpos, bg, bb, bw, bbias, tg, tb, tw, tbias)
    return out.reshape(B, Cl, H, W)


# ---------------------------------------------------------------- forward (NCHW in, NCHW out)
def group_aggregation_bridge_forward(params, xh, xl, mask):
    # xh: (B, dim_xh, Hh, Wh), xl: (B, dim_xl, H, W), mask: (B, 1, H, W)
    B, Ch, Hh, Wh = xh.shape
    _, Cl, H, W = xl.shape
    assert Cl % 4 == 0
    q = Cl // 4
    gs = 2 * q + 1

    # 1) pre_project: 1x1 conv, spatial flattened onto lanes (free reshape)
    proj = pre_project(xh.reshape(B, Ch, Hh * Wh),
                       params["pre_w"], params["pre_b"].reshape(Cl, 1))

    # 2) bilinear upsample (align_corners=True), separable, all channels per grid step
    wy = _interp_matrix(H, Hh)
    wxt = _interp_matrix(W, Wh).T
    xh_up = bilinear_upsample(proj.reshape(B, Cl, Hh, Wh), wy, wxt)     # (B, Cl, H, W)

    # 3+4) one fused kernel: 4x (LN + dilated depthwise 3x3) + tail LN + 1x1 conv
    bg = jnp.stack([params[f"g{i}_ln_g"] for i in range(4)]).reshape(4, gs, 1)
    bb = jnp.stack([params[f"g{i}_ln_b"] for i in range(4)]).reshape(4, gs, 1)
    bw = jnp.stack([params[f"g{i}_w"].reshape(gs, 9) for i in range(4)])      # (4, gs, 9)
    bbias = jnp.stack([params[f"g{i}_b"] for i in range(4)]).reshape(4, gs, 1)
    tg = params["tail_ln_g"].reshape(4, gs, 1)
    tb = params["tail_ln_b"].reshape(4, gs, 1)
    tw = params["tail_w"].reshape(Cl, 4, gs).transpose(1, 0, 2)               # (4, Cl, gs)
    tbias = params["tail_b"].reshape(Cl, 1)

    return branches_and_tail(xh_up, xl, mask, bg, bb, bw, bbias, tg, tb, tw, tbias)


def init_params(key, dim_xh, dim_xl, gt_ds=True):
    assert gt_ds, "only the gt_ds=True (mask) variant is implemented"
    gs = dim_xl // 2 + 1
    Ct = 2 * dim_xl + 4
    ks = jax.random.split(key, 12)
    p = {
        "pre_w": jax.random.normal(ks[0], (dim_xl, dim_xh), jnp.float32) * 0.1,  # (Cout, Cin)
        "pre_b": jax.random.normal(ks[1], (dim_xl,), jnp.float32) * 0.1,
        "tail_ln_g": jnp.ones((Ct,), jnp.float32),
        "tail_ln_b": jnp.zeros((Ct,), jnp.float32),
        "tail_w": jax.random.normal(ks[2], (dim_xl, Ct), jnp.float32) * 0.1,     # (Cout, Cin)
        "tail_b": jax.random.normal(ks[3], (dim_xl,), jnp.float32) * 0.1,
    }
    for i in range(4):
        p[f"g{i}_ln_g"] = jnp.ones((gs,), jnp.float32)
        p[f"g{i}_ln_b"] = jnp.zeros((gs,), jnp.float32)
        p[f"g{i}_w"] = jax.random.normal(ks[4 + i], (gs, 3, 3), jnp.float32) * 0.1
        p[f"g{i}_b"] = jax.random.normal(ks[8 + i], (gs,), jnp.float32) * 0.1
    return p


# ---------------------------------------------------------------- pure-JAX reference (correctness check)
def _reference_forward(params, xh, xl, mask):
    B, Ch, Hh, Wh = xh.shape
    _, Cl, H, W = xl.shape
    q = Cl // 4
    gs = 2 * q + 1
    proj = (jnp.einsum("oc,bcs->bos", params["pre_w"], xh.reshape(B, Ch, Hh * Wh))
            + params["pre_b"][None, :, None]).reshape(B, Cl, Hh, Wh)
    wy = _interp_matrix(H, Hh)
    wx = _interp_matrix(W, Wh)
    up = jnp.einsum("yh,bchw->bcyw", wy, proj)
    up = jnp.einsum("xw,bchw->bchx", wx, up)
    outs = []
    for i in range(4):
        d = D_LIST[i]
        xi = jnp.concatenate([up[:, i * q:(i + 1) * q],
                              xl[:, i * q:(i + 1) * q], mask], axis=1)
        u = xi.mean(axis=1, keepdims=True)
        s = ((xi - u) ** 2).mean(axis=1, keepdims=True)
        xn = (xi - u) / jnp.sqrt(s + LN_EPS)
        xn = (xn * params[f"g{i}_ln_g"][None, :, None, None]
              + params[f"g{i}_ln_b"][None, :, None, None])
        y = jax.lax.conv_general_dilated(
            xn, params[f"g{i}_w"][:, None, :, :],
            window_strides=(1, 1), padding=((d, d), (d, d)),
            rhs_dilation=(d, d), feature_group_count=gs,
            dimension_numbers=("NCHW", "OIHW", "NCHW"))
        outs.append(y + params[f"g{i}_b"][None, :, None, None])
    x = jnp.concatenate(outs, axis=1)
    u = x.mean(axis=1, keepdims=True)
    s = ((x - u) ** 2).mean(axis=1, keepdims=True)
    xn = (x - u) / jnp.sqrt(s + LN_EPS)
    xn = (xn * params["tail_ln_g"][None, :, None, None]
          + params["tail_ln_b"][None, :, None, None])
    return (jnp.einsum("oc,bchw->bohw", params["tail_w"], xn)
            + params["tail_b"][None, :, None, None])


if __name__ == "__main__":
    key = jax.random.PRNGKey(0)
    k1, k2, k3, k4 = jax.random.split(key, 4)

    B, dim_xh, dim_xl = 2, 16, 8
    Hh = Wh = 8
    H = W = 16

    xh = jax.random.normal(k1, (B, dim_xh, Hh, Wh), jnp.float32)
    xl = jax.random.normal(k2, (B, dim_xl, H, W), jnp.float32)
    mask = jax.random.normal(k3, (B, 1, H, W), jnp.float32)
    params = init_params(k4, dim_xh, dim_xl, gt_ds=True)

    fwd = jax.jit(group_aggregation_bridge_forward)
    out = jax.block_until_ready(fwd(params, xh, xl, mask))
    assert out.shape == (B, dim_xl, H, W), out.shape
    assert bool(jnp.all(jnp.isfinite(out)))

    ref = jax.block_until_ready(jax.jit(_reference_forward)(params, xh, xl, mask))
    err = float(jnp.max(jnp.abs(out - ref)))
    assert err < 2e-2, f"max abs error vs reference: {err}"
    print("KERNEL_OK")
</pallas_src>

<mosaic_0001>
module attributes {stable_mosaic.version = 11 : i64} {
  func.func @_pre_project_kernel(%arg0: i32, %arg1: i32, %arg2: memref<1x16x64xf32, #tpu.memory_space<vmem>>, %arg3: memref<8x16xf32, #tpu.memory_space<vmem>>, %arg4: memref<8x1xf32, #tpu.memory_space<vmem>>, %arg5: memref<1x8x64xf32, #tpu.memory_space<vmem>>) attributes {dimension_semantics = [#tpu.dimension_semantics<parallel>, #tpu.dimension_semantics<parallel>], iteration_bounds = array<i64: 2, 1>, scalar_prefetch = 0 : i64, scratch_operands = 0 : i64, tpu.core_type = #tpu.core_type<tc>, window_params = [{transform_indices = @transform_0, window_bounds = array<i64: 1, 16, 64>}, {pipeline_mode = #tpu.pipeline_mode<synchronous>, transform_indices = @transform_1, window_bounds = array<i64: 8, 16>}, {pipeline_mode = #tpu.pipeline_mode<synchronous>, transform_indices = @transform_2, window_bounds = array<i64: 8, 1>}, {transform_indices = @transform_3, window_bounds = array<i64: 1, 8, 64>}]} {
    %c0 = arith.constant 0 : index
    %c0_0 = arith.constant 0 : index
    %0 = vector.load %arg3[%c0, %c0_0] : memref<8x16xf32, #tpu.memory_space<vmem>>, vector<8x16xf32>
    %c0_1 = arith.constant 0 : index
    %c0_2 = arith.constant 0 : index
    %c0_3 = arith.constant 0 : index
    %1 = vector.load %arg2[%c0_1, %c0_2, %c0_3] : memref<1x16x64xf32, #tpu.memory_space<vmem>>, vector<1x16x64xf32>
    %2 = vector.shape_cast %1 : vector<1x16x64xf32> to vector<16x64xf32>
    %cst = arith.constant dense<0.000000e+00> : vector<8x64xf32>
    %3 = tpu.matmul %0, %2, %cst {dimension_numbers = #tpu.dot_dimension_numbers<[1], [0], [0], [1], [0, 0, 1, 1], [], []>} : vector<8x16xf32>, vector<16x64xf32>, vector<8x64xf32> -> vector<8x64xf32>
    %c0_4 = arith.constant 0 : index
    %c0_5 = arith.constant 0 : index
    %4 = vector.load %arg4[%c0_4, %c0_5] : memref<8x1xf32, #tpu.memory_space<vmem>>, vector<8x1xf32>
    %5 = vector.broadcast %4 : vector<8x1xf32> to vector<8x64xf32>
    %6 = arith.addf %3, %5 : vector<8x64xf32>
    %c0_6 = arith.constant 0 : index
    %c0_7 = arith.constant 0 : index
    %c0_8 = arith.constant 0 : index
    %7 = vector.load %arg5[%c0_6, %c0_7, %c0_8] : memref<1x8x64xf32, #tpu.memory_space<vmem>>, vector<1x8x64xf32>
    %8 = vector.shape_cast %7 : vector<1x8x64xf32> to vector<8x64xf32>
    %9 = vector.shape_cast %6 : vector<8x64xf32> to vector<1x8x64xf32>
    tpu.vector_store %arg5[%c0_6, %c0_7, %c0_8], %9 {strides = array<i32>} : memref<1x8x64xf32, #tpu.memory_space<vmem>>, vector<1x8x64xf32>,
    return
  }
  func.func @transform_0(%arg0: i32, %arg1: i32) -> (i32, i32, i32) {
    %c0_i32 = arith.constant 0 : i32
    %c0_i32_0 = arith.constant 0 : i32
    return %arg0, %c0_i32, %arg1 : i32, i32, i32
  }
  func.func @transform_1(%arg0: i32, %arg1: i32) -> (i32, i32) {
    %c0_i32 = arith.constant 0 : i32
    %c0_i32_0 = arith.constant 0 : i32
    %c0_i32_1 = arith.constant 0 : i32
    return %c0_i32, %c0_i32_0 : i32, i32
  }
  func.func @transform_2(%arg0: i32, %arg1: i32) -> (i32, i32) {
    %c0_i32 = arith.constant 0 : i32
    %c0_i32_0 = arith.constant 0 : i32
    %c0_i32_1 = arith.constant 0 : i32
    return %c0_i32, %c0_i32_0 : i32, i32
  }
  func.func @transform_3(%arg0: i32, %arg1: i32) -> (i32, i32, i32) {
    %c0_i32 = arith.constant 0 : i32
    %c0_i32_0 = arith.constant 0 : i32
    return %arg0, %c0_i32, %arg1 : i32, i32, i32
  }
}

module attributes {stable_mosaic.version = 11 : i64} {
  func.func @kernel(%arg0: i32, %arg1: memref<1x8x8x8xf32, #tpu.memory_space<vmem>>, %arg2: memref<16x8xf32, #tpu.memory_space<vmem>>, %arg3: memref<8x16xf32, #tpu.memory_space<vmem>>, %arg4: memref<1x8x16x16xf32, #tpu.memory_space<vmem>>) attributes {dimension_semantics = [#tpu.dimension_semantics<parallel>], iteration_bounds = array<i64: 2>, scalar_prefetch = 0 : i64, scratch_operands = 0 : i64, tpu.core_type = #tpu.core_type<tc>, window_params = [{transform_indices = @transform_0, window_bounds = array<i64: 1, 8, 8, 8>}, {pipeline_mode = #tpu.pipeline_mode<synchronous>, transform_indices = @transform_1, window_bounds = array<i64: 16, 8>}, {pipeline_mode = #tpu.pipeline_mode<synchronous>, transform_indices = @transform_2, window_bounds = array<i64: 8, 16>}, {transform_indices = @transform_3, window_bounds = array<i64: 1, 8, 16, 16>}]} {
    %c0 = arith.constant 0 : index
    %c0_0 = arith.constant 0 : index
    %0 = vector.load %arg2[%c0, %c0_0] : memref<16x8xf32, #tpu.memory_space<vmem>>, vector<16x8xf32>
    %c0_1 = arith.constant 0 : index
    %c0_2 = arith.constant 0 : index
    %1 = vector.load %arg3[%c0_1, %c0_2] : memref<8x16xf32, #tpu.memory_space<vmem>>, vector<8x16xf32>
    %c0_3 = arith.constant 0 : index
    %c0_4 = arith.constant 0 : index
    %c0_5 = arith.constant 0 : index
    %c0_6 = arith.constant 0 : index
    %2 = vector.load %arg1[%c0_3, %c0_4, %c0_5, %c0_6] : memref<1x8x8x8xf32, #tpu.memory_space<vmem>>, vector<1x1x8x8xf32>
    %3 = vector.shape_cast %2 : vector<1x1x8x8xf32> to vector<8x8xf32>
    %cst = arith.constant dense<0.000000e+00> : vector<16x8xf32>
    %4 = tpu.matmul %0, %3, %cst {dimension_numbers = #tpu.dot_dimension_numbers<[1], [0], [0], [1], [0, 0, 1, 1], [], []>} : vector<16x8xf32>, vector<8x8xf32>, vector<16x8xf32> -> vector<16x8xf32>
    %cst_7 = arith.constant dense<0.000000e+00> : vector<16x16xf32>
    %5 = tpu.matmul %4, %1, %cst_7 {dimension_numbers = #tpu.dot_dimension_numbers<[1], [0], [0], [1], [0, 0, 1, 1], [], []>} : vector<16x8xf32>, vector<8x16xf32>, vector<16x16xf32> -> vector<16x16xf32>
    %c0_8 = arith.constant 0 : index
    %c0_9 = arith.constant 0 : index
    %c0_10 = arith.constant 0 : index
    %c0_11 = arith.constant 0 : index
    %6 = vector.load %arg4[%c0_8, %c0_9, %c0_10, %c0_11] : memref<1x8x16x16xf32, #tpu.memory_space<vmem>>, vector<1x1x16x16xf32>
    %7 = vector.shape_cast %6 : vector<1x1x16x16xf32> to vector<16x16xf32>
    %8 = vector.shape_cast %5 : vector<16x16xf32> to vector<1x1x16x16xf32>
    tpu.vector_store %arg4[%c0_8, %c0_9, %c0_10, %c0_11], %8 {strides = array<i32>} : memref<1x8x16x16xf32, #tpu.memory_space<vmem>>, vector<1x1x16x16xf32>,
    %c0_12 = arith.constant 0 : index
    %c1 = arith.constant 1 : index
    %c0_13 = arith.constant 0 : index
    %c0_14 = arith.constant 0 : index
    %9 = vector.load %arg1[%c0_12, %c1, %c0_13, %c0_14] : memref<1x8x8x8xf32, #tpu.memory_space<vmem>>, vector<1x1x8x8xf32>
    %10 = vector.shape_cast %9 : vector<1x1x8x8xf32> to vector<8x8xf32>
    %cst_15 = arith.constant dense<0.000000e+00> : vector<16x8xf32>
    %11 = tpu.matmul %0, %10, %cst_15 {dimension_numbers = #tpu.dot_dimension_numbers<[1], [0], [0], [1], [0, 0, 1, 1], [], []>} : vector<16x8xf32>, vector<8x8xf32>, vector<16x8xf32> -> vector<16x8xf32>
    %cst_16 = arith.constant dense<0.000000e+00> : vector<16x16xf32>
    %12 = tpu.matmul %11, %1, %cst_16 {dimension_numbers = #tpu.dot_dimension_numbers<[1], [0], [0], [1], [0, 0, 1, 1], [], []>} : vector<16x8xf32>, vector<8x16xf32>, vector<16x16xf32> -> vector<16x16xf32>
    %c0_17 = arith.constant 0 : index
    %c1_18 = arith.constant 1 : index
    %c0_19 = arith.constant 0 : index
    %c0_20 = arith.constant 0 : index
    %13 = vector.load %arg4[%c0_17, %c1_18, %c0_19, %c0_20] : memref<1x8x16x16xf32, #tpu.memory_space<vmem>>, vector<1x1x16x16xf32>
    %14 = vector.shape_cast %13 : vector<1x1x16x16xf32> to vector<16x16xf32>
    %15 = vector.shape_cast %12 : vector<16x16xf32> to vector<1x1x16x16xf32>
    tpu.vector_store %arg4[%c0_17, %c1_18, %c0_19, %c0_20], %15 {strides = array<i32>} : memref<1x8x16x16xf32, #tpu.memory_space<vmem>>, vector<1x1x16x16xf32>,
    %c0_21 = arith.constant 0 : index
    %c2 = arith.constant 2 : index
    %c0_22 = arith.constant 0 : index
    %c0_23 = arith.constant 0 : index
    %16 = vector.load %arg1[%c0_21, %c2, %c0_22, %c0_23] : memref<1x8x8x8xf32, #tpu.memory_space<vmem>>, vector<1x1x8x8xf32>
    %17 = vector.shape_cast %16 : vector<1x1x8x8xf32> to vector<8x8xf32>
    %cst_24 = arith.constant dense<0.000000e+00> : vector<16x8xf32>
    %18 = tpu.matmul %0, %17, %cst_24 {dimension_numbers = #tpu.dot_dimension_numbers<[1], [0], [0], [1], [0, 0, 1, 1], [], []>} : vector<16x8xf32>, vector<8x8xf32>, vector<16x8xf32> -> vector<16x8xf32>
    %cst_25 = arith.constant dense<0.000000e+00> : vector<16x16xf32>
    %19 = tpu.matmul %18, %1, %cst_25 {dimension_numbers = #tpu.dot_dimension_numbers<[1], [0], [0], [1], [0, 0, 1, 1], [], []>} : vector<16x8xf32>, vector<8x16xf32>, vector<16x16xf32> -> vector<16x16xf32>
    %c0_26 = arith.constant 0 : index
    %c2_27 = arith.constant 2 : index
    %c0_28 = arith.constant 0 : index
    %c0_29 = arith.constant 0 : index
    %20 = vector.load %arg4[%c0_26, %c2_27, %c0_28, %c0_29] : memref<1x8x16x16xf32, #tpu.memory_space<vmem>>, vector<1x1x16x16xf32>
    %21 = vector.shape_cast %20 : vector<1x1x16x16xf32> to vector<16x16xf32>
    %22 = vector.shape_cast %19 : vector<16x16xf32> to vector<1x1x16x16xf32>
    tpu.vector_store %arg4[%c0_26, %c2_27, %c0_28, %c0_29], %22 {strides = array<i32>} : memref<1x8x16x16xf32, #tpu.memory_space<vmem>>, vector<1x1x16x16xf32>,
    %c0_30 = arith.constant 0 : index
    %c3 = arith.constant 3 : index
    %c0_31 = arith.constant 0 : index
    %c0_32 = arith.constant 0 : index
    %23 = vector.load %arg1[%c0_30, %c3, %c0_31, %c0_32] : memref<1x8x8x8xf32, #tpu.memory_space<vmem>>, vector<1x1x8x8xf32>
    %24 = vector.shape_cast %23 : vector<1x1x8x8xf32> to vector<8x8xf32>
    %cst_33 = arith.constant dense<0.000000e+00> : vector<16x8xf32>
    %25 = tpu.matmul %0, %24, %cst_33 {dimension_numbers = #tpu.dot_dimension_numbers<[1], [0], [0], [1], [0, 0, 1, 1], [], []>} : vector<16x8xf32>, vector<8x8xf32>, vector<16x8xf32> -> vector<16x8xf32>
    %cst_34 = arith.constant dense<0.000000e+00> : vector<16x16xf32>
    %26 = tpu.matmul %25, %1, %cst_34 {dimension_numbers = #tpu.dot_dimension_numbers<[1], [0], [0], [1], [0, 0, 1, 1], [], []>} : vector<16x8xf32>, vector<8x16xf32>, vector<16x16xf32> -> vector<16x16xf32>
    %c0_35 = arith.constant 0 : index
    %c3_36 = arith.constant 3 : index
    %c0_37 = arith.constant 0 : index
    %c0_38 = arith.constant 0 : index
    %27 = vector.load %arg4[%c0_35, %c3_36, %c0_37, %c0_38] : memref<1x8x16x16xf32, #tpu.memory_space<vmem>>, vector<1x1x16x16xf32>
    %28 = vector.shape_cast %27 : vector<1x1x16x16xf32> to vector<16x16xf32>
    %29 = vector.shape_cast %26 : vector<16x16xf32> to vector<1x1x16x16xf32>
    tpu.vector_store %arg4[%c0_35, %c3_36, %c0_37, %c0_38], %29 {strides = array<i32>} : memref<1x8x16x16xf32, #tpu.memory_space<vmem>>, vector<1x1x16x16xf32>,
    %c0_39 = arith.constant 0 : index
    %c4 = arith.constant 4 : index
    %c0_40 = arith.constant 0 : index
    %c0_41 = arith.constant 0 : index
    %30 = vector.load %arg1[%c0_39, %c4, %c0_40, %c0_41] : memref<1x8x8x8xf32, #tpu.memory_space<vmem>>, vector<1x1x8x8xf32>
    %31 = vector.shape_cast %30 : vector<1x1x8x8xf32> to vector<8x8xf32>
    %cst_42 = arith.constant dense<0.000000e+00> : vector<16x8xf32>
    %32 = tpu.matmul %0, %31, %cst_42 {dimension_numbers = #tpu.dot_dimension_numbers<[1], [0], [0], [1], [0, 0, 1, 1], [], []>} : vector<16x8xf32>, vector<8x8xf32>, vector<16x8xf32> -> vector<16x8xf32>
    %cst_43 = arith.constant dense<0.000000e+00> : vector<16x16xf32>
    %33 = tpu.matmul %32, %1, %cst_43 {dimension_numbers = #tpu.dot_dimension_numbers<[1], [0], [0], [1], [0, 0, 1, 1], [], []>} : vector<16x8xf32>, vector<8x16xf32>, vector<16x16xf32> -> vector<16x16xf32>
    %c0_44 = arith.constant 0 : index
    %c4_45 = arith.constant 4 : index
    %c0_46 = arith.constant 0 : index
    %c0_47 = arith.constant 0 : index
    %34 = vector.load %arg4[%c0_44, %c4_45, %c0_46, %c0_47] : memref<1x8x16x16xf32, #tpu.memory_space<vmem>>, vector<1x1x16x16xf32>
    %35 = vector.shape_cast %34 : vector<1x1x16x16xf32> to vector<16x16xf32>
    %36 = vector.shape_cast %33 : vector<16x16xf32> to vector<1x1x16x16xf32>
    tpu.vector_store %arg4[%c0_44, %c4_45, %c0_46, %c0_47], %36 {strides = array<i32>} : memref<1x8x16x16xf32, #tpu.memory_space<vmem>>, vector<1x1x16x16xf32>,
    %c0_48 = arith.constant 0 : index
    %c5 = arith.constant 5 : index
    %c0_49 = arith.constant 0 : index
    %c0_50 = arith.constant 0 : index
    %37 = vector.load %arg1[%c0_48, %c5, %c0_49, %c0_50] : memref<1x8x8x8xf32, #tpu.memory_space<vmem>>, vector<1x1x8x8xf32>
    %38 = vector.shape_cast %37 : vector<1x1x8x8xf32> to vector<8x8xf32>
    %cst_51 = arith.constant dense<0.000000e+00> : vector<16x8xf32>
    %39 = tpu.matmul %0, %38, %cst_51 {dimension_numbers = #tpu.dot_dimension_numbers<[1], [0], [0], [1], [0, 0, 1, 1], [], []>} : vector<16x8xf32>, vector<8x8xf32>, vector<16x8xf32> -> vector<16x8xf32>
    %cst_52 = arith.constant dense<0.000000e+00> : vector<16x16xf32>
    %40 = tpu.matmul %39, %1, %cst_52 {dimension_numbers = #tpu.dot_dimension_numbers<[1], [0], [0], [1], [0, 0, 1, 1], [], []>} : vector<16x8xf32>, vector<8x16xf32>, vector<16x16xf32> -> vector<16x16xf32>
    %c0_53 = arith.constant 0 : index
    %c5_54 = arith.constant 5 : index
    %c0_55 = arith.constant 0 : index
    %c0_56 = arith.constant 0 : index
    %41 = vector.load %arg4[%c0_53, %c5_54, %c0_55, %c0_56] : memref<1x8x16x16xf32, #tpu.memory_space<vmem>>, vector<1x1x16x16xf32>
    %42 = vector.shape_cast %41 : vector<1x1x16x16xf32> to vector<16x16xf32>
    %43 = vector.shape_cast %40 : vector<16x16xf32> to vector<1x1x16x16xf32>
    tpu.vector_store %arg4[%c0_53, %c5_54, %c0_55, %c0_56], %43 {strides = array<i32>} : memref<1x8x16x16xf32, #tpu.memory_space<vmem>>, vector<1x1x16x16xf32>,
    %c0_57 = arith.constant 0 : index
    %c6 = arith.constant 6 : index
    %c0_58 = arith.constant 0 : index
    %c0_59 = arith.constant 0 : index
    %44 = vector.load %arg1[%c0_57, %c6, %c0_58, %c0_59] : memref<1x8x8x8xf32, #tpu.memory_space<vmem>>, vector<1x1x8x8xf32>
    %45 = vector.shape_cast %44 : vector<1x1x8x8xf32> to vector<8x8xf32>
    %cst_60 = arith.constant dense<0.000000e+00> : vector<16x8xf32>
    %46 = tpu.matmul %0, %45, %cst_60 {dimension_numbers = #tpu.dot_dimension_numbers<[1], [0], [0], [1], [0, 0, 1, 1], [], []>} : vector<16x8xf32>, vector<8x8xf32>, vector<16x8xf32> -> vector<16x8xf32>
    %cst_61 = arith.constant dense<0.000000e+00> : vector<16x16xf32>
    %47 = tpu.matmul %46, %1, %cst_61 {dimension_numbers = #tpu.dot_dimension_numbers<[1], [0], [0], [1], [0, 0, 1, 1], [], []>} : vector<16x8xf32>, vector<8x16xf32>, vector<16x16xf32> -> vector<16x16xf32>
    %c0_62 = arith.constant 0 : index
    %c6_63 = arith.constant 6 : index
    %c0_64 = arith.constant 0 : index
    %c0_65 = arith.constant 0 : index
    %48 = vector.load %arg4[%c0_62, %c6_63, %c0_64, %c0_65] : memref<1x8x16x16xf32, #tpu.memory_space<vmem>>, vector<1x1x16x16xf32>
    %49 = vector.shape_cast %48 : vector<1x1x16x16xf32> to vector<16x16xf32>
    %50 = vector.shape_cast %47 : vector<16x16xf32> to vector<1x1x16x16xf32>
    tpu.vector_store %arg4[%c0_62, %c6_63, %c0_64, %c0_65], %50 {strides = array<i32>} : memref<1x8x16x16xf32, #tpu.memory_space<vmem>>, vector<1x1x16x16xf32>,
    %c0_66 = arith.constant 0 : index
    %c7 = arith.constant 7 : index
    %c0_67 = arith.constant 0 : index
    %c0_68 = arith.constant 0 : index
    %51 = vector.load %arg1[%c0_66, %c7, %c0_67, %c0_68] : memref<1x8x8x8xf32, #tpu.memory_space<vmem>>, vector<1x1x8x8xf32>
    %52 = vector.shape_cast %51 : vector<1x1x8x8xf32> to vector<8x8xf32>
    %cst_69 = arith.constant dense<0.000000e+00> : vector<16x8xf32>
    %53 = tpu.matmul %0, %52, %cst_69 {dimension_numbers = #tpu.dot_dimension_numbers<[1], [0], [0], [1], [0, 0, 1, 1], [], []>} : vector<16x8xf32>, vector<8x8xf32>, vector<16x8xf32> -> vector<16x8xf32>
    %cst_70 = arith.constant dense<0.000000e+00> : vector<16x16xf32>
    %54 = tpu.matmul %53, %1, %cst_70 {dimension_numbers = #tpu.dot_dimension_numbers<[1], [0], [0], [1], [0, 0, 1, 1], [], []>} : vector<16x8xf32>, vector<8x16xf32>, vector<16x16xf32> -> vector<16x16xf32>
    %c0_71 = arith.constant 0 : index
    %c7_72 = arith.constant 7 : index
    %c0_73 = arith.constant 0 : index
    %c0_74 = arith.constant 0 : index
    %55 = vector.load %arg4[%c0_71, %c7_72, %c0_73, %c0_74] : memref<1x8x16x16xf32, #tpu.memory_space<vmem>>, vector<1x1x16x16xf32>
    %56 = vector.shape_cast %55 : vector<1x1x16x16xf32> to vector<16x16xf32>
    %57 = vector.shape_cast %54 : vector<16x16xf32> to vector<1x1x16x16xf32>
    tpu.vector_store %arg4[%c0_71, %c7_72, %c0_73, %c0_74], %57 {strides = array<i32>} : memref<1x8x16x16xf32, #tpu.memory_space<vmem>>, vector<1x1x16x16xf32>,
    return
  }
  func.func @transform_0(%arg0: i32) -> (i32, i32, i32, i32) {
    %c0_i32 = arith.constant 0 : i32
    %c0_i32_0 = arith.constant 0 : i32
    %c0_i32_1 = arith.constant 0 : i32
    %c0_i32_2 = arith.constant 0 : i32
    return %arg0, %c0_i32, %c0_i32_0, %c0_i32_1 : i32, i32, i32, i32
  }
  func.func @transform_1(%arg0: i32) -> (i32, i32) {
    %c0_i32 = arith.constant 0 : i32
    %c0_i32_0 = arith.constant 0 : i32
    %c0_i32_1 = arith.constant 0 : i32
    return %c0_i32, %c0_i32_0 : i32, i32
  }
  func.func @transform_2(%arg0: i32) -> (i32, i32) {
    %c0_i32 = arith.constant 0 : i32
    %c0_i32_0 = arith.constant 0 : i32
    %c0_i32_1 = arith.constant 0 : i32
    return %c0_i32, %c0_i32_0 : i32, i32
  }
  func.func @transform_3(%arg0: i32) -> (i32, i32, i32, i32) {
    %c0_i32 = arith.constant 0 : i32
    %c0_i32_0 = arith.constant 0 : i32
    %c0_i32_1 = arith.constant 0 : i32
    %c0_i32_2 = arith.constant 0 : i32
    return %arg0, %c0_i32, %c0_i32_0, %c0_i32_1 : i32, i32, i32, i32
  }
}

module attributes {stable_mosaic.version = 11 : i64} {
  func.func @kernel(%arg0: i32, %arg1: memref<1x4x2x256xf32, #tpu.memory_space<vmem>>, %arg2: memref<1x4x2x256xf32, #tpu.memory_space<vmem>>, %arg3: memref<1x1x256xf32, #tpu.memory_space<vmem>>, %arg4: memref<1x256xf32, #tpu.memory_space<vmem>>, %arg5: memref<4x5x1xf32, #tpu.memory_space<vmem>>, %arg6: memref<4x5x1xf32, #tpu.memory_space<vmem>>, %arg7: memref<4x5x9xf32, #tpu.memory_space<vmem>>, %arg8: memref<4x5x1xf32, #tpu.memory_space<vmem>>, %arg9: memref<4x5x1xf32, #tpu.memory_space<vmem>>, %arg10: memref<4x5x1xf32, #tpu.memory_space<vmem>>, %arg11: memref<4x8x5xf32, #tpu.memory_space<vmem>>, %arg12: memref<8x1xf32, #tpu.memory_space<vmem>>, %arg13: memref<1x8x256xf32, #tpu.memory_space<vmem>>, %arg14: memref<4x5x256xf32, #tpu.memory_space<vmem>>) attributes {dimension_semantics = [#tpu.dimension_semantics<parallel>], iteration_bounds = array<i64: 2>, scalar_prefetch = 0 : i64, scratch_operands = 1 : i64, tpu.core_type = #tpu.core_type<tc>, window_params = [{transform_indices = @transform_0, window_bounds = array<i64: 1, 4, 2, 256>}, {transform_indices = @transform_1, window_bounds = array<i64: 1, 4, 2, 256>}, {transform_indices = @transform_2, window_bounds = array<i64: 1, 1, 256>}, {pipeline_mode = #tpu.pipeline_mode<synchronous>, transform_indices = @transform_3, window_bounds = array<i64: 1, 256>}, {pipeline_mode = #tpu.pipeline_mode<synchronous>, transform_indices = @transform_4, window_bounds = array<i64: 4, 5, 1>}, {pipeline_mode = #tpu.pipeline_mode<synchronous>, transform_indices = @transform_5, window_bounds = array<i64: 4, 5, 1>}, {pipeline_mode = #tpu.pipeline_mode<synchronous>, transform_indices = @transform_6, window_bounds = array<i64: 4, 5, 9>}, {pipeline_mode = #tpu.pipeline_mode<synchronous>, transform_indices = @transform_7, window_bounds = array<i64: 4, 5, 1>}, {pipeline_mode = #tpu.pipeline_mode<synchronous>, transform_indices = @transform_8, window_bounds = array<i64: 4, 5, 1>}, {pipeline_mode = #tpu.pipeline_mode<synchronous>, transform_indices = @transform_9, window_bounds = array<i64: 4, 5, 1>}, {pipeline_mode = #tpu.pipeline_mode<synchronous>, transform_indices = @transform_10, window_bounds = array<i64: 4, 8, 5>}, {pipeline_mode = #tpu.pipeline_mode<synchronous>, transform_indices = @transform_11, window_bounds = array<i64: 8, 1>}, {transform_indices = @transform_12, window_bounds = array<i64: 1, 8, 256>}]} {
    %c0 = arith.constant 0 : index
    %c0_0 = arith.constant 0 : index
    %0 = vector.load %arg4[%c0, %c0_0] : memref<1x256xf32, #tpu.memory_space<vmem>>, vector<1x256xf32>
    %c0_1 = arith.constant 0 : index
    %c0_2 = arith.constant 0 : index
    %c0_3 = arith.constant 0 : index
    %1 = vector.load %arg3[%c0_1, %c0_2, %c0_3] : memref<1x1x256xf32, #tpu.memory_space<vmem>>, vector<1x1x256xf32>
    %2 = vector.shape_cast %1 : vector<1x1x256xf32> to vector<1x256xf32>
    %c0_4 = arith.constant 0 : index
    %c0_5 = arith.constant 0 : index
    %c0_6 = arith.constant 0 : index
    %c0_7 = arith.constant 0 : index
    %3 = vector.load %arg1[%c0_4, %c0_5, %c0_6, %c0_7] : memref<1x4x2x256xf32, #tpu.memory_space<vmem>>, vector<1x1x2x256xf32>
    %4 = vector.shape_cast %3 : vector<1x1x2x256xf32> to vector<2x256xf32>
    %c0_8 = arith.constant 0 : index
    %c0_9 = arith.constant 0 : index
    %c0_10 = arith.constant 0 : index
    %c0_11 = arith.constant 0 : index
    %5 = vector.load %arg2[%c0_8, %c0_9, %c0_10, %c0_11] : memref<1x4x2x256xf32, #tpu.memory_space<vmem>>, vector<1x1x2x256xf32>
    %6 = vector.shape_cast %5 : vector<1x1x2x256xf32> to vector<2x256xf32>
    %cst = arith.constant dense<0.000000e+00> : vector<256xf32>
    %7 = vector.multi_reduction <add>, %4, %cst [0] : vector<2x256xf32> to vector<256xf32>
    %8 = vector.shape_cast %7 : vector<256xf32> to vector<1x256xf32>
    %cst_12 = arith.constant dense<0.000000e+00> : vector<256xf32>
    %9 = vector.multi_reduction <add>, %6, %cst_12 [0] : vector<2x256xf32> to vector<256xf32>
    %10 = vector.shape_cast %9 : vector<256xf32> to vector<1x256xf32>
    %11 = arith.addf %8, %10 : vector<1x256xf32>
    %12 = arith.addf %11, %2 : vector<1x256xf32>
    %13 = arith.mulf %4, %4 : vector<2x256xf32>
    %cst_13 = arith.constant dense<0.000000e+00> : vector<256xf32>
    %14 = vector.multi_reduction <add>, %13, %cst_13 [0] : vector<2x256xf32> to vector<256xf32>
    %15 = vector.shape_cast %14 : vector<256xf32> to vector<1x256xf32>
    %16 = arith.mulf %6, %6 : vector<2x256xf32>
    %cst_14 = arith.constant dense<0.000000e+00> : vector<256xf32>
    %17 = vector.multi_reduction <add>, %16, %cst_14 [0] : vector<2x256xf32> to vector<256xf32>
    %18 = vector.shape_cast %17 : vector<256xf32> to vector<1x256xf32>
    %19 = arith.addf %15, %18 : vector<1x256xf32>
    %20 = arith.mulf %2, %2 : vector<1x256xf32>
    %21 = arith.addf %19, %20 : vector<1x256xf32>
    %cst_15 = arith.constant 2.000000e-01 : f32
    %22 = vector.broadcast %cst_15 : f32 to vector<1x256xf32>
    %23 = arith.mulf %12, %22 : vector<1x256xf32>
    %cst_16 = arith.constant 2.000000e-01 : f32
    %24 = vector.broadcast %cst_16 : f32 to vector<1x256xf32>
    %25 = arith.mulf %21, %24 : vector<1x256xf32>
    %26 = arith.mulf %23, %23 : vector<1x256xf32>
    %27 = arith.subf %25, %26 : vector<1x256xf32>
    %cst_17 = arith.constant 0.000000e+00 : f32
    %28 = vector.broadcast %cst_17 : f32 to vector<1x256xf32>
    %29 = arith.maximumf %27, %28 : vector<1x256xf32>
    %cst_18 = arith.constant 9.99999997E-7 : f32
    %30 = vector.broadcast %cst_18 : f32 to vector<1x256xf32>
    %31 = arith.addf %29, %30 : vector<1x256xf32>
    %32 = math.rsqrt %31 : vector<1x256xf32>
    %c0_19 = arith.constant 0 : index
    %c0_20 = arith.constant 0 : index
    %c0_21 = arith.constant 0 : index
    %33 = vector.load %arg5[%c0_19, %c0_20, %c0_21] : memref<4x5x1xf32, #tpu.memory_space<vmem>>, vector<1x5x1xf32>
    %34 = vector.shape_cast %33 : vector<1x5x1xf32> to vector<5x1xf32>
    %c0_22 = arith.constant 0 : index
    %c0_23 = arith.constant 0 : index
    %c0_24 = arith.constant 0 : index
    %35 = vector.load %arg6[%c0_22, %c0_23, %c0_24] : memref<4x5x1xf32, #tpu.memory_space<vmem>>, vector<1x5x1xf32>
    %36 = vector.shape_cast %35 : vector<1x5x1xf32> to vector<5x1xf32>
    %c0_25 = arith.constant 0 : index
    %c0_26 = arith.constant 0 : index
    %c0_27 = arith.constant 0 : index
    %37 = vector.load %arg7[%c0_25, %c0_26, %c0_27] : memref<4x5x9xf32, #tpu.memory_space<vmem>>, vector<1x5x9xf32>
    %38 = vector.shape_cast %37 : vector<1x5x9xf32> to vector<5x9xf32>
    %c0_28 = arith.constant 0 : index
    %c0_29 = arith.constant 0 : index
    %c0_30 = arith.constant 0 : index
    %39 = vector.load %arg8[%c0_28, %c0_29, %c0_30] : memref<4x5x1xf32, #tpu.memory_space<vmem>>, vector<1x5x1xf32>
    %40 = vector.shape_cast %39 : vector<1x5x1xf32> to vector<5x1xf32>
    %cst_31 = arith.constant 1.000000e+00 : f32
    %41 = vector.broadcast %cst_31 : f32 to vector<1x256xf32>
    %42 = arith.cmpf oge, %0, %41 : vector<1x256xf32>
    %cst_32 = arith.constant 1.000000e+00 : f32
    %cst_33 = arith.constant 0.000000e+00 : f32
    %43 = vector.broadcast %cst_32 : f32 to vector<1x256xf32>
    %44 = vector.broadcast %cst_33 : f32 to vector<1x256xf32>
    %45 = arith.select %42, %43, %44 : vector<1x256xi1>, vector<1x256xf32>
    %cst_34 = arith.constant 1.500000e+01 : f32
    %46 = vector.broadcast %cst_34 : f32 to vector<1x256xf32>
    %47 = arith.cmpf olt, %0, %46 : vector<1x256xf32>
    %cst_35 = arith.constant 1.000000e+00 : f32
    %cst_36 = arith.constant 0.000000e+00 : f32
    %48 = vector.broadcast %cst_35 : f32 to vector<1x256xf32>
    %49 = vector.broadcast %cst_36 : f32 to vector<1x256xf32>
    %50 = arith.select %47, %48, %49 : vector<1x256xi1>, vector<1x256xf32>
    %51 = vector.extract_strided_slice %34 {offsets = [0, 0], sizes = [2, 1], strides = [1, 1]} : vector<5x1xf32> to vector<2x1xf32>
    %52 = vector.extract_strided_slice %36 {offsets = [0, 0], sizes = [2, 1], strides = [1, 1]} : vector<5x1xf32> to vector<2x1xf32>
    %53 = vector.broadcast %23 : vector<1x256xf32> to vector<2x256xf32>
    %54 = arith.subf %4, %53 : vector<2x256xf32>
    %55 = vector.broadcast %32 : vector<1x256xf32> to vector<2x256xf32>
    %56 = arith.mulf %54, %55 : vector<2x256xf32>
    %57 = vector.broadcast %51 : vector<2x1xf32> to vector<2x256xf32>
    %58 = arith.mulf %56, %57 : vector<2x256xf32>
    %59 = vector.broadcast %52 : vector<2x1xf32> to vector<2x256xf32>
    %60 = arith.addf %58, %59 : vector<2x256xf32>
    %61 = vector.extract_strided_slice %40 {offsets = [0, 0], sizes = [2, 1], strides = [1, 1]} : vector<5x1xf32> to vector<2x1xf32>
    %62 = vector.shape_cast %61 : vector<2x1xf32> to vector<2x1xf32>
    %63 = vector.broadcast %62 : vector<2x1xf32> to vector<2x256xf32>
    %cst_37 = arith.constant 0.000000e+00 : f32
    %64 = vector.broadcast %cst_37 : f32 to vector<2x1xf32>
    %65 = vector.extract_strided_slice %60 {offsets = [0, 0], sizes = [2, 255], strides = [1, 1]} : vector<2x256xf32> to vector<2x255xf32>
    %66 = tpu.concatenate %64, %65 in 1 : vector<2x1xf32>, vector<2x255xf32> -> vector<2x256xf32>
    %67 = vector.broadcast %45 : vector<1x256xf32> to vector<2x256xf32>
    %68 = arith.mulf %66, %67 : vector<2x256xf32>
    %cst_38 = arith.constant 0.000000e+00 : f32
    %69 = vector.broadcast %cst_38 : f32 to vector<2x16xf32>
    %70 = vector.extract_strided_slice %68 {offsets = [0, 0], sizes = [2, 240], strides = [1, 1]} : vector<2x256xf32> to vector<2x240xf32>
    %71 = tpu.concatenate %69, %70 in 1 : vector<2x16xf32>, vector<2x240xf32> -> vector<2x256xf32>
    %72 = vector.extract_strided_slice %38 {offsets = [0, 0], sizes = [2, 1], strides = [1, 1]} : vector<5x9xf32> to vector<2x1xf32>
    %73 = vector.broadcast %72 : vector<2x1xf32> to vector<2x256xf32>
    %74 = arith.mulf %71, %73 : vector<2x256xf32>
    %75 = arith.addf %63, %74 : vector<2x256xf32>
    %76 = vector.extract_strided_slice %38 {offsets = [0, 3], sizes = [2, 1], strides = [1, 1]} : vector<5x9xf32> to vector<2x1xf32>
    %77 = vector.broadcast %76 : vector<2x1xf32> to vector<2x256xf32>
    %78 = arith.mulf %68, %77 : vector<2x256xf32>
    %79 = arith.addf %75, %78 : vector<2x256xf32>
    %cst_39 = arith.constant 0.000000e+00 : f32
    %80 = vector.broadcast %cst_39 : f32 to vector<2x16xf32>
    %81 = vector.extract_strided_slice %68 {offsets = [0, 16], sizes = [2, 240], strides = [1, 1]} : vector<2x256xf32> to vector<2x240xf32>
    %82 = tpu.concatenate %81, %80 in 1 : vector<2x240xf32>, vector<2x16xf32> -> vector<2x256xf32>
    %83 = vector.extract_strided_slice %38 {offsets = [0, 6], sizes = [2, 1], strides = [1, 1]} : vector<5x9xf32> to vector<2x1xf32>
    %84 = vector.broadcast %83 : vector<2x1xf32> to vector<2x256xf32>
    %85 = arith.mulf %82, %84 : vector<2x256xf32>
    %86 = arith.addf %79, %85 : vector<2x256xf32>
    %cst_40 = arith.constant 0.000000e+00 : f32
    %87 = vector.broadcast %cst_40 : f32 to vector<2x16xf32>
    %88 = vector.extract_strided_slice %60 {offsets = [0, 0], sizes = [2, 240], strides = [1, 1]} : vector<2x256xf32> to vector<2x240xf32>
    %89 = tpu.concatenate %87, %88 in 1 : vector<2x16xf32>, vector<2x240xf32> -> vector<2x256xf32>
    %90 = vector.extract_strided_slice %38 {offsets = [0, 1], sizes = [2, 1], strides = [1, 1]} : vector<5x9xf32> to vector<2x1xf32>
    %91 = vector.broadcast %90 : vector<2x1xf32> to vector<2x256xf32>
    %92 = arith.mulf %89, %91 : vector<2x256xf32>
    %93 = arith.addf %86, %92 : vector<2x256xf32>
    %94 = vector.extract_strided_slice %38 {offsets = [0, 4], sizes = [2, 1], strides = [1, 1]} : vector<5x9xf32> to vector<2x1xf32>
    %95 = vector.broadcast %94 : vector<2x1xf32> to vector<2x256xf32>
    %96 = arith.mulf %60, %95 : vector<2x256xf32>
    %97 = arith.addf %93, %96 : vector<2x256xf32>
    %cst_41 = arith.constant 0.000000e+00 : f32
    %98 = vector.broadcast %cst_41 : f32 to vector<2x16xf32>
    %99 = vector.extract_strided_slice %60 {offsets = [0, 16], sizes = [2, 240], strides = [1, 1]} : vector<2x256xf32> to vector<2x240xf32>
    %100 = tpu.concatenate %99, %98 in 1 : vector<2x240xf32>, vector<2x16xf32> -> vector<2x256xf32>
    %101 = vector.extract_strided_slice %38 {offsets = [0, 7], sizes = [2, 1], strides = [1, 1]} : vector<5x9xf32> to vector<2x1xf32>
    %102 = vector.broadcast %101 : vector<2x1xf32> to vector<2x256xf32>
    %103 = arith.mulf %100, %102 : vector<2x256xf32>
    %104 = arith.addf %97, %103 : vector<2x256xf32>
    %cst_42 = arith.constant 0.000000e+00 : f32
    %105 = vector.broadcast %cst_42 : f32 to vector<2x1xf32>
    %106 = vector.extract_strided_slice %60 {offsets = [0, 1], sizes = [2, 255], strides = [1, 1]} : vector<2x256xf32> to vector<2x255xf32>
    %107 = tpu.concatenate %106, %105 in 1 : vector<2x255xf32>, vector<2x1xf32> -> vector<2x256xf32>
    %108 = vector.broadcast %50 : vector<1x256xf32> to vector<2x256xf32>
    %109 = arith.mulf %107, %108 : vector<2x256xf32>
    %cst_43 = arith.constant 0.000000e+00 : f32
    %110 = vector.broadcast %cst_43 : f32 to vector<2x16xf32>
    %111 = vector.extract_strided_slice %109 {offsets = [0, 0], sizes = [2, 240], strides = [1, 1]} : vector<2x256xf32> to vector<2x240xf32>
    %112 = tpu.concatenate %110, %111 in 1 : vector<2x16xf32>, vector<2x240xf32> -> vector<2x256xf32>
    %113 = vector.extract_strided_slice %38 {offsets = [0, 2], sizes = [2, 1], strides = [1, 1]} : vector<5x9xf32> to vector<2x1xf32>
    %114 = vector.broadcast %113 : vector<2x1xf32> to vector<2x256xf32>
    %115 = arith.mulf %112, %114 : vector<2x256xf32>
    %116 = arith.addf %104, %115 : vector<2x256xf32>
    %117 = vector.extract_strided_slice %38 {offsets = [0, 5], sizes = [2, 1], strides = [1, 1]} : vector<5x9xf32> to vector<2x1xf32>
    %118 = vector.broadcast %117 : vector<2x1xf32> to vector<2x256xf32>
    %119 = arith.mulf %109, %118 : vector<2x256xf32>
    %120 = arith.addf %116, %119 : vector<2x256xf32>
    %cst_44 = arith.constant 0.000000e+00 : f32
    %121 = vector.broadcast %cst_44 : f32 to vector<2x16xf32>
    %122 = vector.extract_strided_slice %109 {offsets = [0, 16], sizes = [2, 240], strides = [1, 1]} : vector<2x256xf32> to vector<2x240xf32>
    %123 = tpu.concatenate %122, %121 in 1 : vector<2x240xf32>, vector<2x16xf32> -> vector<2x256xf32>
    %124 = vector.extract_strided_slice %38 {offsets = [0, 8], sizes = [2, 1], strides = [1, 1]} : vector<5x9xf32> to vector<2x1xf32>
    %125 = vector.broadcast %124 : vector<2x1xf32> to vector<2x256xf32>
    %126 = arith.mulf %123, %125 : vector<2x256xf32>
    %127 = arith.addf %120, %126 : vector<2x256xf32>
    %c0_45 = arith.constant 0 : index
    %c0_46 = arith.constant 0 : index
    %c0_47 = arith.constant 0 : index
    %128 = vector.load %arg14[%c0_45, %c0_46, %c0_47] : memref<4x5x256xf32, #tpu.memory_space<vmem>>, vector<1x2x256xf32>
    %129 = vector.shape_cast %128 : vector<1x2x256xf32> to vector<2x256xf32>
    %130 = vector.shape_cast %127 : vector<2x256xf32> to vector<1x2x256xf32>
    tpu.vector_store %arg14[%c0_45, %c0_46, %c0_47], %130 {strides = array<i32>} : memref<4x5x256xf32, #tpu.memory_space<vmem>>, vector<1x2x256xf32>,
    %131 = vector.extract_strided_slice %34 {offsets = [2, 0], sizes = [2, 1], strides = [1, 1]} : vector<5x1xf32> to vector<2x1xf32>
    %132 = vector.extract_strided_slice %36 {offsets = [2, 0], sizes = [2, 1], strides = [1, 1]} : vector<5x1xf32> to vector<2x1xf32>
    %133 = vector.broadcast %23 : vector<1x256xf32> to vector<2x256xf32>
    %134 = arith.subf %6, %133 : vector<2x256xf32>
    %135 = vector.broadcast %32 : vector<1x256xf32> to vector<2x256xf32>
    %136 = arith.mulf %134, %135 : vector<2x256xf32>
    %137 = vector.broadcast %131 : vector<2x1xf32> to vector<2x256xf32>
    %138 = arith.mulf %136, %137 : vector<2x256xf32>
    %139 = vector.broadcast %132 : vector<2x1xf32> to vector<2x256xf32>
    %140 = arith.addf %138, %139 : vector<2x256xf32>
    %141 = vector.extract_strided_slice %40 {offsets = [2, 0], sizes = [2, 1], strides = [1, 1]} : vector<5x1xf32> to vector<2x1xf32>
    %142 = vector.shape_cast %141 : vector<2x1xf32> to vector<2x1xf32>
    %143 = vector.broadcast %142 : vector<2x1xf32> to vector<2x256xf32>
    %cst_48 = arith.constant 0.000000e+00 : f32
    %144 = vector.broadcast %cst_48 : f32 to vector<2x1xf32>
    %145 = vector.extract_strided_slice %140 {offsets = [0, 0], sizes = [2, 255], strides = [1, 1]} : vector<2x256xf32> to vector<2x255xf32>
    %146 = tpu.concatenate %144, %145 in 1 : vector<2x1xf32>, vector<2x255xf32> -> vector<2x256xf32>
    %147 = vector.broadcast %45 : vector<1x256xf32> to vector<2x256xf32>
    %148 = arith.mulf %146, %147 : vector<2x256xf32>
    %cst_49 = arith.constant 0.000000e+00 : f32
    %149 = vector.broadcast %cst_49 : f32 to vector<2x16xf32>
    %150 = vector.extract_strided_slice %148 {offsets = [0, 0], sizes = [2, 240], strides = [1, 1]} : vector<2x256xf32> to vector<2x240xf32>
    %151 = tpu.concatenate %149, %150 in 1 : vector<2x16xf32>, vector<2x240xf32> -> vector<2x256xf32>
    %152 = vector.extract_strided_slice %38 {offsets = [2, 0], sizes = [2, 1], strides = [1, 1]} : vector<5x9xf32> to vector<2x1xf32>
    %153 = vector.broadcast %152 : vector<2x1xf32> to vector<2x256xf32>
    %154 = arith.mulf %151, %153 : vector<2x256xf32>
    %155 = arith.addf %143, %154 : vector<2x256xf32>
    %156 = vector.extract_strided_slice %38 {offsets = [2, 3], sizes = [2, 1], strides = [1, 1]} : vector<5x9xf32> to vector<2x1xf32>
    %157 = vector.broadcast %156 : vector<2x1xf32> to vector<2x256xf32>
    %158 = arith.mulf %148, %157 : vector<2x256xf32>
    %159 = arith.addf %155, %158 : vector<2x256xf32>
    %cst_50 = arith.constant 0.000000e+00 : f32
    %160 = vector.broadcast %cst_50 : f32 to vector<2x16xf32>
    %161 = vector.extract_strided_slice %148 {offsets = [0, 16], sizes = [2, 240], strides = [1, 1]} : vector<2x256xf32> to vector<2x240xf32>
    %162 = tpu.concatenate %161, %160 in 1 : vector<2x240xf32>, vector<2x16xf32> -> vector<2x256xf32>
    %163 = vector.extract_strided_slice %38 {offsets = [2, 6], sizes = [2, 1], strides = [1, 1]} : vector<5x9xf32> to vector<2x1xf32>
    %164 = vector.broadcast %163 : vector<2x1xf32> to vector<2x256xf32>
    %165 = arith.mulf %162, %164 : vector<2x256xf32>
    %166 = arith.addf %159, %165 : vector<2x256xf32>
    %cst_51 = arith.constant 0.000000e+00 : f32
    %167 = vector.broadcast %cst_51 : f32 to vector<2x16xf32>
    %168 = vector.extract_strided_slice %140 {offsets = [0, 0], sizes = [2, 240], strides = [1, 1]} : vector<2x256xf32> to vector<2x240xf32>
    %169 = tpu.concatenate %167, %168 in 1 : vector<2x16xf32>, vector<2x240xf32> -> vector<2x256xf32>
    %170 = vector.extract_strided_slice %38 {offsets = [2, 1], sizes = [2, 1], strides = [1, 1]} : vector<5x9xf32> to vector<2x1xf32>
    %171 = vector.broadcast %170 : vector<2x1xf32> to vector<2x256xf32>
    %172 = arith.mulf %169, %171 : vector<2x256xf32>
    %173 = arith.addf %166, %172 : vector<2x256xf32>
    %174 = vector.extract_strided_slice %38 {offsets = [2, 4], sizes = [2, 1], strides = [1, 1]} : vector<5x9xf32> to vector<2x1xf32>
    %175 = vector.broadcast %174 : vector<2x1xf32> to vector<2x256xf32>
    %176 = arith.mulf %140, %175 : vector<2x256xf32>
    %177 = arith.addf %173, %176 : vector<2x256xf32>
    %cst_52 = arith.constant 0.000000e+00 : f32
    %178 = vector.broadcast %cst_52 : f32 to vector<2x16xf32>
    %179 = vector.extract_strided_slice %140 {offsets = [0, 16], sizes = [2, 240], strides = [1, 1]} : vector<2x256xf32> to vector<2x240xf32>
    %180 = tpu.concatenate %179, %178 in 1 : vector<2x240xf32>, vector<2x16xf32> -> vector<2x256xf32>
    %181 = vector.extract_strided_slice %38 {offsets = [2, 7], sizes = [2, 1], strides = [1, 1]} : vector<5x9xf32> to vector<2x1xf32>
    %182 = vector.broadcast %181 : vector<2x1xf32> to vector<2x256xf32>
    %183 = arith.mulf %180, %182 : vector<2x256xf32>
    %184 = arith.addf %177, %183 : vector<2x256xf32>
    %cst_53 = arith.constant 0.000000e+00 : f32
    %185 = vector.broadcast %cst_53 : f32 to vector<2x1xf32>
    %186 = vector.extract_strided_slice %140 {offsets = [0, 1], sizes = [2, 255], strides = [1, 1]} : vector<2x256xf32> to vector<2x255xf32>
    %187 = tpu.concatenate %186, %185 in 1 : vector<2x255xf32>, vector<2x1xf32> -> vector<2x256xf32>
    %188 = vector.broadcast %50 : vector<1x256xf32> to vector<2x256xf32>
    %189 = arith.mulf %187, %188 : vector<2x256xf32>
    %cst_54 = arith.constant 0.000000e+00 : f32
    %190 = vector.broadcast %cst_54 : f32 to vector<2x16xf32>
    %191 = vector.extract_strided_slice %189 {offsets = [0, 0], sizes = [2, 240], strides = [1, 1]} : vector<2x256xf32> to vector<2x240xf32>
    %192 = tpu.concatenate %190, %191 in 1 : vector<2x16xf32>, vector<2x240xf32> -> vector<2x256xf32>
    %193 = vector.extract_strided_slice %38 {offsets = [2, 2], sizes = [2, 1], strides = [1, 1]} : vector<5x9xf32> to vector<2x1xf32>
    %194 = vector.broadcast %193 : vector<2x1xf32> to vector<2x256xf32>
    %195 = arith.mulf %192, %194 : vector<2x256xf32>
    %196 = arith.addf %184, %195 : vector<2x256xf32>
    %197 = vector.extract_strided_slice %38 {offsets = [2, 5], sizes = [2, 1], strides = [1, 1]} : vector<5x9xf32> to vector<2x1xf32>
    %198 = vector.broadcast %197 : vector<2x1xf32> to vector<2x256xf32>
    %199 = arith.mulf %189, %198 : vector<2x256xf32>
    %200 = arith.addf %196, %199 : vector<2x256xf32>
    %cst_55 = arith.constant 0.000000e+00 : f32
    %201 = vector.broadcast %cst_55 : f32 to vector<2x16xf32>
    %202 = vector.extract_strided_slice %189 {offsets = [0, 16], sizes = [2, 240], strides = [1, 1]} : vector<2x256xf32> to vector<2x240xf32>
    %203 = tpu.concatenate %202, %201 in 1 : vector<2x240xf32>, vector<2x16xf32> -> vector<2x256xf32>
    %204 = vector.extract_strided_slice %38 {offsets = [2, 8], sizes = [2, 1], strides = [1, 1]} : vector<5x9xf32> to vector<2x1xf32>
    %205 = vector.broadcast %204 : vector<2x1xf32> to vector<2x256xf32>
    %206 = arith.mulf %203, %205 : vector<2x256xf32>
    %207 = arith.addf %200, %206 : vector<2x256xf32>
    %c0_56 = arith.constant 0 : index
    %c2 = arith.constant 2 : index
    %c0_57 = arith.constant 0 : index
    %208 = vector.load %arg14[%c0_56, %c2, %c0_57] : memref<4x5x256xf32, #tpu.memory_space<vmem>>, vector<1x2x256xf32>
    %209 = vector.shape_cast %208 : vector<1x2x256xf32> to vector<2x256xf32>
    %210 = vector.shape_cast %207 : vector<2x256xf32> to vector<1x2x256xf32>
    tpu.vector_store %arg14[%c0_56, %c2, %c0_57], %210 {strides = array<i32>} : memref<4x5x256xf32, #tpu.memory_space<vmem>>, vector<1x2x256xf32>,
    %211 = vector.extract_strided_slice %34 {offsets = [4, 0], sizes = [1, 1], strides = [1, 1]} : vector<5x1xf32> to vector<1x1xf32>
    %212 = vector.extract_strided_slice %36 {offsets = [4, 0], sizes = [1, 1], strides = [1, 1]} : vector<5x1xf32> to vector<1x1xf32>
    %213 = arith.subf %2, %23 : vector<1x256xf32>
    %214 = arith.mulf %213, %32 : vector<1x256xf32>
    %215 = vector.broadcast %211 : vector<1x1xf32> to vector<1x256xf32>
    %216 = arith.mulf %214, %215 : vector<1x256xf32>
    %217 = vector.broadcast %212 : vector<1x1xf32> to vector<1x256xf32>
    %218 = arith.addf %216, %217 : vector<1x256xf32>
    %219 = vector.extract_strided_slice %40 {offsets = [4, 0], sizes = [1, 1], strides = [1, 1]} : vector<5x1xf32> to vector<1x1xf32>
    %220 = vector.shape_cast %219 : vector<1x1xf32> to vector<1x1xf32>
    %221 = vector.broadcast %220 : vector<1x1xf32> to vector<1x256xf32>
    %cst_58 = arith.constant 0.000000e+00 : f32
    %222 = vector.broadcast %cst_58 : f32 to vector<1x1xf32>
    %223 = vector.extract_strided_slice %218 {offsets = [0, 0], sizes = [1, 255], strides = [1, 1]} : vector<1x256xf32> to vector<1x255xf32>
    %224 = tpu.concatenate %222, %223 in 1 : vector<1x1xf32>, vector<1x255xf32> -> vector<1x256xf32>
    %225 = arith.mulf %224, %45 : vector<1x256xf32>
    %cst_59 = arith.constant 0.000000e+00 : f32
    %226 = vector.broadcast %cst_59 : f32 to vector<1x16xf32>
    %227 = vector.extract_strided_slice %225 {offsets = [0, 0], sizes = [1, 240], strides = [1, 1]} : vector<1x256xf32> to vector<1x240xf32>
    %228 = tpu.concatenate %226, %227 in 1 : vector<1x16xf32>, vector<1x240xf32> -> vector<1x256xf32>
    %229 = vector.extract_strided_slice %38 {offsets = [4, 0], sizes = [1, 1], strides = [1, 1]} : vector<5x9xf32> to vector<1x1xf32>
    %230 = vector.broadcast %229 : vector<1x1xf32> to vector<1x256xf32>
    %231 = arith.mulf %228, %230 : vector<1x256xf32>
    %232 = arith.addf %221, %231 : vector<1x256xf32>
    %233 = vector.extract_strided_slice %38 {offsets = [4, 3], sizes = [1, 1], strides = [1, 1]} : vector<5x9xf32> to vector<1x1xf32>
    %234 = vector.broadcast %233 : vector<1x1xf32> to vector<1x256xf32>
    %235 = arith.mulf %225, %234 : vector<1x256xf32>
    %236 = arith.addf %232, %235 : vector<1x256xf32>
    %cst_60 = arith.constant 0.000000e+00 : f32
    %237 = vector.broadcast %cst_60 : f32 to vector<1x16xf32>
    %238 = vector.extract_strided_slice %225 {offsets = [0, 16], sizes = [1, 240], strides = [1, 1]} : vector<1x256xf32> to vector<1x240xf32>
    %239 = tpu.concatenate %238, %237 in 1 : vector<1x240xf32>, vector<1x16xf32> -> vector<1x256xf32>
    %240 = vector.extract_strided_slice %38 {offsets = [4, 6], sizes = [1, 1], strides = [1, 1]} : vector<5x9xf32> to vector<1x1xf32>
    %241 = vector.broadcast %240 : vector<1x1xf32> to vector<1x256xf32>
    %242 = arith.mulf %239, %241 : vector<1x256xf32>
    %243 = arith.addf %236, %242 : vector<1x256xf32>
    %cst_61 = arith.constant 0.000000e+00 : f32
    %244 = vector.broadcast %cst_61 : f32 to vector<1x16xf32>
    %245 = vector.extract_strided_slice %218 {offsets = [0, 0], sizes = [1, 240], strides = [1, 1]} : vector<1x256xf32> to vector<1x240xf32>
    %246 = tpu.concatenate %244, %245 in 1 : vector<1x16xf32>, vector<1x240xf32> -> vector<1x256xf32>
    %247 = vector.extract_strided_slice %38 {offsets = [4, 1], sizes = [1, 1], strides = [1, 1]} : vector<5x9xf32> to vector<1x1xf32>
    %248 = vector.broadcast %247 : vector<1x1xf32> to vector<1x256xf32>
    %249 = arith.mulf %246, %248 : vector<1x256xf32>
    %250 = arith.addf %243, %249 : vector<1x256xf32>
    %251 = vector.extract_strided_slice %38 {offsets = [4, 4], sizes = [1, 1], strides = [1, 1]} : vector<5x9xf32> to vector<1x1xf32>
    %252 = vector.broadcast %251 : vector<1x1xf32> to vector<1x256xf32>
    %253 = arith.mulf %218, %252 : vector<1x256xf32>
    %254 = arith.addf %250, %253 : vector<1x256xf32>
    %cst_62 = arith.constant 0.000000e+00 : f32
    %255 = vector.broadcast %cst_62 : f32 to vector<1x16xf32>
    %256 = vector.extract_strided_slice %218 {offsets = [0, 16], sizes = [1, 240], strides = [1, 1]} : vector<1x256xf32> to vector<1x240xf32>
    %257 = tpu.concatenate %256, %255 in 1 : vector<1x240xf32>, vector<1x16xf32> -> vector<1x256xf32>
    %258 = vector.extract_strided_slice %38 {offsets = [4, 7], sizes = [1, 1], strides = [1, 1]} : vector<5x9xf32> to vector<1x1xf32>
    %259 = vector.broadcast %258 : vector<1x1xf32> to vector<1x256xf32>
    %260 = arith.mulf %257, %259 : vector<1x256xf32>
    %261 = arith.addf %254, %260 : vector<1x256xf32>
    %cst_63 = arith.constant 0.000000e+00 : f32
    %262 = vector.broadcast %cst_63 : f32 to vector<1x1xf32>
    %263 = vector.extract_strided_slice %218 {offsets = [0, 1], sizes = [1, 255], strides = [1, 1]} : vector<1x256xf32> to vector<1x255xf32>
    %264 = tpu.concatenate %263, %262 in 1 : vector<1x255xf32>, vector<1x1xf32> -> vector<1x256xf32>
    %265 = arith.mulf %264, %50 : vector<1x256xf32>
    %cst_64 = arith.constant 0.000000e+00 : f32
    %266 = vector.broadcast %cst_64 : f32 to vector<1x16xf32>
    %267 = vector.extract_strided_slice %265 {offsets = [0, 0], sizes = [1, 240], strides = [1, 1]} : vector<1x256xf32> to vector<1x240xf32>
    %268 = tpu.concatenate %266, %267 in 1 : vector<1x16xf32>, vector<1x240xf32> -> vector<1x256xf32>
    %269 = vector.extract_strided_slice %38 {offsets = [4, 2], sizes = [1, 1], strides = [1, 1]} : vector<5x9xf32> to vector<1x1xf32>
    %270 = vector.broadcast %269 : vector<1x1xf32> to vector<1x256xf32>
    %271 = arith.mulf %268, %270 : vector<1x256xf32>
    %272 = arith.addf %261, %271 : vector<1x256xf32>
    %273 = vector.extract_strided_slice %38 {offsets = [4, 5], sizes = [1, 1], strides = [1, 1]} : vector<5x9xf32> to vector<1x1xf32>
    %274 = vector.broadcast %273 : vector<1x1xf32> to vector<1x256xf32>
    %275 = arith.mulf %265, %274 : vector<1x256xf32>
    %276 = arith.addf %272, %275 : vector<1x256xf32>
    %cst_65 = arith.constant 0.000000e+00 : f32
    %277 = vector.broadcast %cst_65 : f32 to vector<1x16xf32>
    %278 = vector.extract_strided_slice %265 {offsets = [0, 16], sizes = [1, 240], strides = [1, 1]} : vector<1x256xf32> to vector<1x240xf32>
    %279 = tpu.concatenate %278, %277 in 1 : vector<1x240xf32>, vector<1x16xf32> -> vector<1x256xf32>
    %280 = vector.extract_strided_slice %38 {offsets = [4, 8], sizes = [1, 1], strides = [1, 1]} : vector<5x9xf32> to vector<1x1xf32>
    %281 = vector.broadcast %280 : vector<1x1xf32> to vector<1x256xf32>
    %282 = arith.mulf %279, %281 : vector<1x256xf32>
    %283 = arith.addf %276, %282 : vector<1x256xf32>
    %c0_66 = arith.constant 0 : index
    %c4 = arith.constant 4 : index
    %c0_67 = arith.constant 0 : index
    %284 = vector.load %arg14[%c0_66, %c4, %c0_67] : memref<4x5x256xf32, #tpu.memory_space<vmem>>, vector<1x1x256xf32>
    %285 = vector.shape_cast %284 : vector<1x1x256xf32> to vector<1x256xf32>
    %286 = vector.shape_cast %283 : vector<1x256xf32> to vector<1x1x256xf32>
    tpu.vector_store %arg14[%c0_66, %c4, %c0_67], %286 {strides = array<i32>} : memref<4x5x256xf32, #tpu.memory_space<vmem>>, vector<1x1x256xf32>,
    %c0_68 = arith.constant 0 : index
    %c1 = arith.constant 1 : index
    %c0_69 = arith.constant 0 : index
    %c0_70 = arith.constant 0 : index
    %287 = vector.load %arg1[%c0_68, %c1, %c0_69, %c0_70] : memref<1x4x2x256xf32, #tpu.memory_space<vmem>>, vector<1x1x2x256xf32>
    %288 = vector.shape_cast %287 : vector<1x1x2x256xf32> to vector<2x256xf32>
    %c0_71 = arith.constant 0 : index
    %c1_72 = arith.constant 1 : index
    %c0_73 = arith.constant 0 : index
    %c0_74 = arith.constant 0 : index
    %289 = vector.load %arg2[%c0_71, %c1_72, %c0_73, %c0_74] : memref<1x4x2x256xf32, #tpu.memory_space<vmem>>, vector<1x1x2x256xf32>
    %290 = vector.shape_cast %289 : vector<1x1x2x256xf32> to vector<2x256xf32>
    %cst_75 = arith.constant dense<0.000000e+00> : vector<256xf32>
    %291 = vector.multi_reduction <add>, %288, %cst_75 [0] : vector<2x256xf32> to vector<256xf32>
    %292 = vector.shape_cast %291 : vector<256xf32> to vector<1x256xf32>
    %cst_76 = arith.constant dense<0.000000e+00> : vector<256xf32>
    %293 = vector.multi_reduction <add>, %290, %cst_76 [0] : vector<2x256xf32> to vector<256xf32>
    %294 = vector.shape_cast %293 : vector<256xf32> to vector<1x256xf32>
    %295 = arith.addf %292, %294 : vector<1x256xf32>
    %296 = arith.addf %295, %2 : vector<1x256xf32>
    %297 = arith.mulf %288, %288 : vector<2x256xf32>
    %cst_77 = arith.constant dense<0.000000e+00> : vector<256xf32>
    %298 = vector.multi_reduction <add>, %297, %cst_77 [0] : vector<2x256xf32> to vector<256xf32>
    %299 = vector.shape_cast %298 : vector<256xf32> to vector<1x256xf32>
    %300 = arith.mulf %290, %290 : vector<2x256xf32>
    %cst_78 = arith.constant dense<0.000000e+00> : vector<256xf32>
    %301 = vector.multi_reduction <add>, %300, %cst_78 [0] : vector<2x256xf32> to vector<256xf32>
    %302 = vector.shape_cast %301 : vector<256xf32> to vector<1x256xf32>
    %303 = arith.addf %299, %302 : vector<1x256xf32>
    %304 = arith.mulf %2, %2 : vector<1x256xf32>
    %305 = arith.addf %303, %304 : vector<1x256xf32>
    %cst_79 = arith.constant 2.000000e-01 : f32
    %306 = vector.broadcast %cst_79 : f32 to vector<1x256xf32>
    %307 = arith.mulf %296, %306 : vector<1x256xf32>
    %cst_80 = arith.constant 2.000000e-01 : f32
    %308 = vector.broadcast %cst_80 : f32 to vector<1x256xf32>
    %309 = arith.mulf %305, %308 : vector<1x256xf32>
    %310 = arith.mulf %307, %307 : vector<1x256xf32>
    %311 = arith.subf %309, %310 : vector<1x256xf32>
    %cst_81 = arith.constant 0.000000e+00 : f32
    %312 = vector.broadcast %cst_81 : f32 to vector<1x256xf32>
    %313 = arith.maximumf %311, %312 : vector<1x256xf32>
    %cst_82 = arith.constant 9.99999997E-7 : f32
    %314 = vector.broadcast %cst_82 : f32 to vector<1x256xf32>
    %315 = arith.addf %313, %314 : vector<1x256xf32>
    %316 = math.rsqrt %315 : vector<1x256xf32>
    %c1_83 = arith.constant 1 : index
    %c0_84 = arith.constant 0 : index
    %c0_85 = arith.constant 0 : index
    %317 = vector.load %arg5[%c1_83, %c0_84, %c0_85] : memref<4x5x1xf32, #tpu.memory_space<vmem>>, vector<1x5x1xf32>
    %318 = vector.shape_cast %317 : vector<1x5x1xf32> to vector<5x1xf32>
    %c1_86 = arith.constant 1 : index
    %c0_87 = arith.constant 0 : index
    %c0_88 = arith.constant 0 : index
    %319 = vector.load %arg6[%c1_86, %c0_87, %c0_88] : memref<4x5x1xf32, #tpu.memory_space<vmem>>, vector<1x5x1xf32>
    %320 = vector.shape_cast %319 : vector<1x5x1xf32> to vector<5x1xf32>
    %c1_89 = arith.constant 1 : index
    %c0_90 = arith.constant 0 : index
    %c0_91 = arith.constant 0 : index
    %321 = vector.load %arg7[%c1_89, %c0_90, %c0_91] : memref<4x5x9xf32, #tpu.memory_space<vmem>>, vector<1x5x9xf32>
    %322 = vector.shape_cast %321 : vector<1x5x9xf32> to vector<5x9xf32>
    %c1_92 = arith.constant 1 : index
    %c0_93 = arith.constant 0 : index
    %c0_94 = arith.constant 0 : index
    %323 = vector.load %arg8[%c1_92, %c0_93, %c0_94] : memref<4x5x1xf32, #tpu.memory_space<vmem>>, vector<1x5x1xf32>
    %324 = vector.shape_cast %323 : vector<1x5x1xf32> to vector<5x1xf32>
    %cst_95 = arith.constant 2.000000e+00 : f32
    %325 = vector.broadcast %cst_95 : f32 to vector<1x256xf32>
    %326 = arith.cmpf oge, %0, %325 : vector<1x256xf32>
    %cst_96 = arith.constant 1.000000e+00 : f32
    %cst_97 = arith.constant 0.000000e+00 : f32
    %327 = vector.broadcast %cst_96 : f32 to vector<1x256xf32>
    %328 = vector.broadcast %cst_97 : f32 to vector<1x256xf32>
    %329 = arith.select %326, %327, %328 : vector<1x256xi1>, vector<1x256xf32>
    %cst_98 = arith.constant 1.400000e+01 : f32
    %330 = vector.broadcast %cst_98 : f32 to vector<1x256xf32>
    %331 = arith.cmpf olt, %0, %330 : vector<1x256xf32>
    %cst_99 = arith.constant 1.000000e+00 : f32
    %cst_100 = arith.constant 0.000000e+00 : f32
    %332 = vector.broadcast %cst_99 : f32 to vector<1x256xf32>
    %333 = vector.broadcast %cst_100 : f32 to vector<1x256xf32>
    %334 = arith.select %331, %332, %333 : vector<1x256xi1>, vector<1x256xf32>
    %335 = vector.extract_strided_slice %318 {offsets = [0, 0], sizes = [2, 1], strides = [1, 1]} : vector<5x1xf32> to vector<2x1xf32>
    %336 = vector.extract_strided_slice %320 {offsets = [0, 0], sizes = [2, 1], strides = [1, 1]} : vector<5x1xf32> to vector<2x1xf32>
    %337 = vector.broadcast %307 : vector<1x256xf32> to vector<2x256xf32>
    %338 = arith.subf %288, %337 : vector<2x256xf32>
    %339 = vector.broadcast %316 : vector<1x256xf32> to vector<2x256xf32>
    %340 = arith.mulf %338, %339 : vector<2x256xf32>
    %341 = vector.broadcast %335 : vector<2x1xf32> to vector<2x256xf32>
    %342 = arith.mulf %340, %341 : vector<2x256xf32>
    %343 = vector.broadcast %336 : vector<2x1xf32> to vector<2x256xf32>
    %344 = arith.addf %342, %343 : vector<2x256xf32>
    %345 = vector.extract_strided_slice %324 {offsets = [0, 0], sizes = [2, 1], strides = [1, 1]} : vector<5x1xf32> to vector<2x1xf32>
    %346 = vector.shape_cast %345 : vector<2x1xf32> to vector<2x1xf32>
    %347 = vector.broadcast %346 : vector<2x1xf32> to vector<2x256xf32>
    %cst_101 = arith.constant 0.000000e+00 : f32
    %348 = vector.broadcast %cst_101 : f32 to vector<2x2xf32>
    %349 = vector.extract_strided_slice %344 {offsets = [0, 0], sizes = [2, 254], strides = [1, 1]} : vector<2x256xf32> to vector<2x254xf32>
    %350 = tpu.concatenate %348, %349 in 1 : vector<2x2xf32>, vector<2x254xf32> -> vector<2x256xf32>
    %351 = vector.broadcast %329 : vector<1x256xf32> to vector<2x256xf32>
    %352 = arith.mulf %350, %351 : vector<2x256xf32>
    %cst_102 = arith.constant 0.000000e+00 : f32
    %353 = vector.broadcast %cst_102 : f32 to vector<2x32xf32>
    %354 = vector.extract_strided_slice %352 {offsets = [0, 0], sizes = [2, 224], strides = [1, 1]} : vector<2x256xf32> to vector<2x224xf32>
    %355 = tpu.concatenate %353, %354 in 1 : vector<2x32xf32>, vector<2x224xf32> -> vector<2x256xf32>
    %356 = vector.extract_strided_slice %322 {offsets = [0, 0], sizes = [2, 1], strides = [1, 1]} : vector<5x9xf32> to vector<2x1xf32>
    %357 = vector.broadcast %356 : vector<2x1xf32> to vector<2x256xf32>
    %358 = arith.mulf %355, %357 : vector<2x256xf32>
    %359 = arith.addf %347, %358 : vector<2x256xf32>
    %360 = vector.extract_strided_slice %322 {offsets = [0, 3], sizes = [2, 1], strides = [1, 1]} : vector<5x9xf32> to vector<2x1xf32>
    %361 = vector.broadcast %360 : vector<2x1xf32> to vector<2x256xf32>
    %362 = arith.mulf %352, %361 : vector<2x256xf32>
    %363 = arith.addf %359, %362 : vector<2x256xf32>
    %cst_103 = arith.constant 0.000000e+00 : f32
    %364 = vector.broadcast %cst_103 : f32 to vector<2x32xf32>
    %365 = vector.extract_strided_slice %352 {offsets = [0, 32], sizes = [2, 224], strides = [1, 1]} : vector<2x256xf32> to vector<2x224xf32>
    %366 = tpu.concatenate %365, %364 in 1 : vector<2x224xf32>, vector<2x32xf32> -> vector<2x256xf32>
    %367 = vector.extract_strided_slice %322 {offsets = [0, 6], sizes = [2, 1], strides = [1, 1]} : vector<5x9xf32> to vector<2x1xf32>
    %368 = vector.broadcast %367 : vector<2x1xf32> to vector<2x256xf32>
    %369 = arith.mulf %366, %368 : vector<2x256xf32>
    %370 = arith.addf %363, %369 : vector<2x256xf32>
    %cst_104 = arith.constant 0.000000e+00 : f32
    %371 = vector.broadcast %cst_104 : f32 to vector<2x32xf32>
    %372 = vector.extract_strided_slice %344 {offsets = [0, 0], sizes = [2, 224], strides = [1, 1]} : vector<2x256xf32> to vector<2x224xf32>
    %373 = tpu.concatenate %371, %372 in 1 : vector<2x32xf32>, vector<2x224xf32> -> vector<2x256xf32>
    %374 = vector.extract_strided_slice %322 {offsets = [0, 1], sizes = [2, 1], strides = [1, 1]} : vector<5x9xf32> to vector<2x1xf32>
    %375 = vector.broadcast %374 : vector<2x1xf32> to vector<2x256xf32>
    %376 = arith.mulf %373, %375 : vector<2x256xf32>
    %377 = arith.addf %370, %376 : vector<2x256xf32>
    %378 = vector.extract_strided_slice %322 {offsets = [0, 4], sizes = [2, 1], strides = [1, 1]} : vector<5x9xf32> to vector<2x1xf32>
    %379 = vector.broadcast %378 : vector<2x1xf32> to vector<2x256xf32>
    %380 = arith.mulf %344, %379 : vector<2x256xf32>
    %381 = arith.addf %377, %380 : vector<2x256xf32>
    %cst_105 = arith.constant 0.000000e+00 : f32
    %382 = vector.broadcast %cst_105 : f32 to vector<2x32xf32>
    %383 = vector.extract_strided_slice %344 {offsets = [0, 32], sizes = [2, 224], strides = [1, 1]} : vector<2x256xf32> to vector<2x224xf32>
    %384 = tpu.concatenate %383, %382 in 1 : vector<2x224xf32>, vector<2x32xf32> -> vector<2x256xf32>
    %385 = vector.extract_strided_slice %322 {offsets = [0, 7], sizes = [2, 1], strides = [1, 1]} : vector<5x9xf32> to vector<2x1xf32>
    %386 = vector.broadcast %385 : vector<2x1xf32> to vector<2x256xf32>
    %387 = arith.mulf %384, %386 : vector<2x256xf32>
    %388 = arith.addf %381, %387 : vector<2x256xf32>
    %cst_106 = arith.constant 0.000000e+00 : f32
    %389 = vector.broadcast %cst_106 : f32 to vector<2x2xf32>
    %390 = vector.extract_strided_slice %344 {offsets = [0, 2], sizes = [2, 254], strides = [1, 1]} : vector<2x256xf32> to vector<2x254xf32>
    %391 = tpu.concatenate %390, %389 in 1 : vector<2x254xf32>, vector<2x2xf32> -> vector<2x256xf32>
    %392 = vector.broadcast %334 : vector<1x256xf32> to vector<2x256xf32>
    %393 = arith.mulf %391, %392 : vector<2x256xf32>
    %cst_107 = arith.constant 0.000000e+00 : f32
    %394 = vector.broadcast %cst_107 : f32 to vector<2x32xf32>
    %395 = vector.extract_strided_slice %393 {offsets = [0, 0], sizes = [2, 224], strides = [1, 1]} : vector<2x256xf32> to vector<2x224xf32>
    %396 = tpu.concatenate %394, %395 in 1 : vector<2x32xf32>, vector<2x224xf32> -> vector<2x256xf32>
    %397 = vector.extract_strided_slice %322 {offsets = [0, 2], sizes = [2, 1], strides = [1, 1]} : vector<5x9xf32> to vector<2x1xf32>
    %398 = vector.broadcast %397 : vector<2x1xf32> to vector<2x256xf32>
    %399 = arith.mulf %396, %398 : vector<2x256xf32>
    %400 = arith.addf %388, %399 : vector<2x256xf32>
    %401 = vector.extract_strided_slice %322 {offsets = [0, 5], sizes = [2, 1], strides = [1, 1]} : vector<5x9xf32> to vector<2x1xf32>
    %402 = vector.broadcast %401 : vector<2x1xf32> to vector<2x256xf32>
    %403 = arith.mulf %393, %402 : vector<2x256xf32>
    %404 = arith.addf %400, %403 : vector<2x256xf32>
    %cst_108 = arith.constant 0.000000e+00 : f32
    %405 = vector.broadcast %cst_108 : f32 to vector<2x32xf32>
    %406 = vector.extract_strided_slice %393 {offsets = [0, 32], sizes = [2, 224], strides = [1, 1]} : vector<2x256xf32> to vector<2x224xf32>
    %407 = tpu.concatenate %406, %405 in 1 : vector<2x224xf32>, vector<2x32xf32> -> vector<2x256xf32>
    %408 = vector.extract_strided_slice %322 {offsets = [0, 8], sizes = [2, 1], strides = [1, 1]} : vector<5x9xf32> to vector<2x1xf32>
    %409 = vector.broadcast %408 : vector<2x1xf32> to vector<2x256xf32>
    %410 = arith.mulf %407, %409 : vector<2x256xf32>
    %411 = arith.addf %404, %410 : vector<2x256xf32>
    %c1_109 = arith.constant 1 : index
    %c0_110 = arith.constant 0 : index
    %c0_111 = arith.constant 0 : index
    %412 = vector.load %arg14[%c1_109, %c0_110, %c0_111] : memref<4x5x256xf32, #tpu.memory_space<vmem>>, vector<1x2x256xf32>
    %413 = vector.shape_cast %412 : vector<1x2x256xf32> to vector<2x256xf32>
    %414 = vector.shape_cast %411 : vector<2x256xf32> to vector<1x2x256xf32>
    tpu.vector_store %arg14[%c1_109, %c0_110, %c0_111], %414 {strides = array<i32>} : memref<4x5x256xf32, #tpu.memory_space<vmem>>, vector<1x2x256xf32>,
    %415 = vector.extract_strided_slice %318 {offsets = [2, 0], sizes = [2, 1], strides = [1, 1]} : vector<5x1xf32> to vector<2x1xf32>
    %416 = vector.extract_strided_slice %320 {offsets = [2, 0], sizes = [2, 1], strides = [1, 1]} : vector<5x1xf32> to vector<2x1xf32>
    %417 = vector.broadcast %307 : vector<1x256xf32> to vector<2x256xf32>
    %418 = arith.subf %290, %417 : vector<2x256xf32>
    %419 = vector.broadcast %316 : vector<1x256xf32> to vector<2x256xf32>
    %420 = arith.mulf %418, %419 : vector<2x256xf32>
    %421 = vector.broadcast %415 : vector<2x1xf32> to vector<2x256xf32>
    %422 = arith.mulf %420, %421 : vector<2x256xf32>
    %423 = vector.broadcast %416 : vector<2x1xf32> to vector<2x256xf32>
    %424 = arith.addf %422, %423 : vector<2x256xf32>
    %425 = vector.extract_strided_slice %324 {offsets = [2, 0], sizes = [2, 1], strides = [1, 1]} : vector<5x1xf32> to vector<2x1xf32>
    %426 = vector.shape_cast %425 : vector<2x1xf32> to vector<2x1xf32>
    %427 = vector.broadcast %426 : vector<2x1xf32> to vector<2x256xf32>
    %cst_112 = arith.constant 0.000000e+00 : f32
    %428 = vector.broadcast %cst_112 : f32 to vector<2x2xf32>
    %429 = vector.extract_strided_slice %424 {offsets = [0, 0], sizes = [2, 254], strides = [1, 1]} : vector<2x256xf32> to vector<2x254xf32>
    %430 = tpu.concatenate %428, %429 in 1 : vector<2x2xf32>, vector<2x254xf32> -> vector<2x256xf32>
    %431 = vector.broadcast %329 : vector<1x256xf32> to vector<2x256xf32>
    %432 = arith.mulf %430, %431 : vector<2x256xf32>
    %cst_113 = arith.constant 0.000000e+00 : f32
    %433 = vector.broadcast %cst_113 : f32 to vector<2x32xf32>
    %434 = vector.extract_strided_slice %432 {offsets = [0, 0], sizes = [2, 224], strides = [1, 1]} : vector<2x256xf32> to vector<2x224xf32>
    %435 = tpu.concatenate %433, %434 in 1 : vector<2x32xf32>, vector<2x224xf32> -> vector<2x256xf32>
    %436 = vector.extract_strided_slice %322 {offsets = [2, 0], sizes = [2, 1], strides = [1, 1]} : vector<5x9xf32> to vector<2x1xf32>
    %437 = vector.broadcast %436 : vector<2x1xf32> to vector<2x256xf32>
    %438 = arith.mulf %435, %437 : vector<2x256xf32>
    %439 = arith.addf %427, %438 : vector<2x256xf32>
    %440 = vector.extract_strided_slice %322 {offsets = [2, 3], sizes = [2, 1], strides = [1, 1]} : vector<5x9xf32> to vector<2x1xf32>
    %441 = vector.broadcast %440 : vector<2x1xf32> to vector<2x256xf32>
    %442 = arith.mulf %432, %441 : vector<2x256xf32>
    %443 = arith.addf %439, %442 : vector<2x256xf32>
    %cst_114 = arith.constant 0.000000e+00 : f32
    %444 = vector.broadcast %cst_114 : f32 to vector<2x32xf32>
    %445 = vector.extract_strided_slice %432 {offsets = [0, 32], sizes = [2, 224], strides = [1, 1]} : vector<2x256xf32> to vector<2x224xf32>
    %446 = tpu.concatenate %445, %444 in 1 : vector<2x224xf32>, vector<2x32xf32> -> vector<2x256xf32>
    %447 = vector.extract_strided_slice %322 {offsets = [2, 6], sizes = [2, 1], strides = [1, 1]} : vector<5x9xf32> to vector<2x1xf32>
    %448 = vector.broadcast %447 : vector<2x1xf32> to vector<2x256xf32>
    %449 = arith.mulf %446, %448 : vector<2x256xf32>
    %450 = arith.addf %443, %449 : vector<2x256xf32>
    %cst_115 = arith.constant 0.000000e+00 : f32
    %451 = vector.broadcast %cst_115 : f32 to vector<2x32xf32>
    %452 = vector.extract_strided_slice %424 {offsets = [0, 0], sizes = [2, 224], strides = [1, 1]} : vector<2x256xf32> to vector<2x224xf32>
    %453 = tpu.concatenate %451, %452 in 1 : vector<2x32xf32>, vector<2x224xf32> -> vector<2x256xf32>
    %454 = vector.extract_strided_slice %322 {offsets = [2, 1], sizes = [2, 1], strides = [1, 1]} : vector<5x9xf32> to vector<2x1xf32>
    %455 = vector.broadcast %454 : vector<2x1xf32> to vector<2x256xf32>
    %456 = arith.mulf %453, %455 : vector<2x256xf32>
    %457 = arith.addf %450, %456 : vector<2x256xf32>
    %458 = vector.extract_strided_slice %322 {offsets = [2, 4], sizes = [2, 1], strides = [1, 1]} : vector<5x9xf32> to vector<2x1xf32>
    %459 = vector.broadcast %458 : vector<2x1xf32> to vector<2x256xf32>
    %460 = arith.mulf %424, %459 : vector<2x256xf32>
    %461 = arith.addf %457, %460 : vector<2x256xf32>
    %cst_116 = arith.constant 0.000000e+00 : f32
    %462 = vector.broadcast %cst_116 : f32 to vector<2x32xf32>
    %463 = vector.extract_strided_slice %424 {offsets = [0, 32], sizes = [2, 224], strides = [1, 1]} : vector<2x256xf32> to vector<2x224xf32>
    %464 = tpu.concatenate %463, %462 in 1 : vector<2x224xf32>, vector<2x32xf32> -> vector<2x256xf32>
    %465 = vector.extract_strided_slice %322 {offsets = [2, 7], sizes = [2, 1], strides = [1, 1]} : vector<5x9xf32> to vector<2x1xf32>
    %466 = vector.broadcast %465 : vector<2x1xf32> to vector<2x256xf32>
    %467 = arith.mulf %464, %466 : vector<2x256xf32>
    %468 = arith.addf %461, %467 : vector<2x256xf32>
    %cst_117 = arith.constant 0.000000e+00 : f32
    %469 = vector.broadcast %cst_117 : f32 to vector<2x2xf32>
    %470 = vector.extract_strided_slice %424 {offsets = [0, 2], sizes = [2, 254], strides = [1, 1]} : vector<2x256xf32> to vector<2x254xf32>
    %471 = tpu.concatenate %470, %469 in 1 : vector<2x254xf32>, vector<2x2xf32> -> vector<2x256xf32>
    %472 = vector.broadcast %334 : vector<1x256xf32> to vector<2x256xf32>
    %473 = arith.mulf %471, %472 : vector<2x256xf32>
    %cst_118 = arith.constant 0.000000e+00 : f32
    %474 = vector.broadcast %cst_118 : f32 to vector<2x32xf32>
    %475 = vector.extract_strided_slice %473 {offsets = [0, 0], sizes = [2, 224], strides = [1, 1]} : vector<2x256xf32> to vector<2x224xf32>
    %476 = tpu.concatenate %474, %475 in 1 : vector<2x32xf32>, vector<2x224xf32> -> vector<2x256xf32>
    %477 = vector.extract_strided_slice %322 {offsets = [2, 2], sizes = [2, 1], strides = [1, 1]} : vector<5x9xf32> to vector<2x1xf32>
    %478 = vector.broadcast %477 : vector<2x1xf32> to vector<2x256xf32>
    %479 = arith.mulf %476, %478 : vector<2x256xf32>
    %480 = arith.addf %468, %479 : vector<2x256xf32>
    %481 = vector.extract_strided_slice %322 {offsets = [2, 5], sizes = [2, 1], strides = [1, 1]} : vector<5x9xf32> to vector<2x1xf32>
    %482 = vector.broadcast %481 : vector<2x1xf32> to vector<2x256xf32>
    %483 = arith.mulf %473, %482 : vector<2x256xf32>
    %484 = arith.addf %480, %483 : vector<2x256xf32>
    %cst_119 = arith.constant 0.000000e+00 : f32
    %485 = vector.broadcast %cst_119 : f32 to vector<2x32xf32>
    %486 = vector.extract_strided_slice %473 {offsets = [0, 32], sizes = [2, 224], strides = [1, 1]} : vector<2x256xf32> to vector<2x224xf32>
    %487 = tpu.concatenate %486, %485 in 1 : vector<2x224xf32>, vector<2x32xf32> -> vector<2x256xf32>
    %488 = vector.extract_strided_slice %322 {offsets = [2, 8], sizes = [2, 1], strides = [1, 1]} : vector<5x9xf32> to vector<2x1xf32>
    %489 = vector.broadcast %488 : vector<2x1xf32> to vector<2x256xf32>
    %490 = arith.mulf %487, %489 : vector<2x256xf32>
    %491 = arith.addf %484, %490 : vector<2x256xf32>
    %c1_120 = arith.constant 1 : index
    %c2_121 = arith.constant 2 : index
    %c0_122 = arith.constant 0 : index
    %492 = vector.load %arg14[%c1_120, %c2_121, %c0_122] : memref<4x5x256xf32, #tpu.memory_space<vmem>>, vector<1x2x256xf32>
    %493 = vector.shape_cast %492 : vector<1x2x256xf32> to vector<2x256xf32>
    %494 = vector.shape_cast %491 : vector<2x256xf32> to vector<1x2x256xf32>
    tpu.vector_store %arg14[%c1_120, %c2_121, %c0_122], %494 {strides = array<i32>} : memref<4x5x256xf32, #tpu.memory_space<vmem>>, vector<1x2x256xf32>,
    %495 = vector.extract_strided_slice %318 {offsets = [4, 0], sizes = [1, 1], strides = [1, 1]} : vector<5x1xf32> to vector<1x1xf32>
    %496 = vector.extract_strided_slice %320 {offsets = [4, 0], sizes = [1, 1], strides = [1, 1]} : vector<5x1xf32> to vector<1x1xf32>
    %497 = arith.subf %2, %307 : vector<1x256xf32>
    %498 = arith.mulf %497, %316 : vector<1x256xf32>
    %499 = vector.broadcast %495 : vector<1x1xf32> to vector<1x256xf32>
    %500 = arith.mulf %498, %499 : vector<1x256xf32>
    %501 = vector.broadcast %496 : vector<1x1xf32> to vector<1x256xf32>
    %502 = arith.addf %500, %501 : vector<1x256xf32>
    %503 = vector.extract_strided_slice %324 {offsets = [4, 0], sizes = [1, 1], strides = [1, 1]} : vector<5x1xf32> to vector<1x1xf32>
    %504 = vector.shape_cast %503 : vector<1x1xf32> to vector<1x1xf32>
    %505 = vector.broadcast %504 : vector<1x1xf32> to vector<1x256xf32>
    %cst_123 = arith.constant 0.000000e+00 : f32
    %506 = vector.broadcast %cst_123 : f32 to vector<1x2xf32>
    %507 = vector.extract_strided_slice %502 {offsets = [0, 0], sizes = [1, 254], strides = [1, 1]} : vector<1x256xf32> to vector<1x254xf32>
    %508 = tpu.concatenate %506, %507 in 1 : vector<1x2xf32>, vector<1x254xf32> -> vector<1x256xf32>
    %509 = arith.mulf %508, %329 : vector<1x256xf32>
    %cst_124 = arith.constant 0.000000e+00 : f32
    %510 = vector.broadcast %cst_124 : f32 to vector<1x32xf32>
    %511 = vector.extract_strided_slice %509 {offsets = [0, 0], sizes = [1, 224], strides = [1, 1]} : vector<1x256xf32> to vector<1x224xf32>
    %512 = tpu.concatenate %510, %511 in 1 : vector<1x32xf32>, vector<1x224xf32> -> vector<1x256xf32>
    %513 = vector.extract_strided_slice %322 {offsets = [4, 0], sizes = [1, 1], strides = [1, 1]} : vector<5x9xf32> to vector<1x1xf32>
    %514 = vector.broadcast %513 : vector<1x1xf32> to vector<1x256xf32>
    %515 = arith.mulf %512, %514 : vector<1x256xf32>
    %516 = arith.addf %505, %515 : vector<1x256xf32>
    %517 = vector.extract_strided_slice %322 {offsets = [4, 3], sizes = [1, 1], strides = [1, 1]} : vector<5x9xf32> to vector<1x1xf32>
    %518 = vector.broadcast %517 : vector<1x1xf32> to vector<1x256xf32>
    %519 = arith.mulf %509, %518 : vector<1x256xf32>
    %520 = arith.addf %516, %519 : vector<1x256xf32>
    %cst_125 = arith.constant 0.000000e+00 : f32
    %521 = vector.broadcast %cst_125 : f32 to vector<1x32xf32>
    %522 = vector.extract_strided_slice %509 {offsets = [0, 32], sizes = [1, 224], strides = [1, 1]} : vector<1x256xf32> to vector<1x224xf32>
    %523 = tpu.concatenate %522, %521 in 1 : vector<1x224xf32>, vector<1x32xf32> -> vector<1x256xf32>
    %524 = vector.extract_strided_slice %322 {offsets = [4, 6], sizes = [1, 1], strides = [1, 1]} : vector<5x9xf32> to vector<1x1xf32>
    %525 = vector.broadcast %524 : vector<1x1xf32> to vector<1x256xf32>
    %526 = arith.mulf %523, %525 : vector<1x256xf32>
    %527 = arith.addf %520, %526 : vector<1x256xf32>
    %cst_126 = arith.constant 0.000000e+00 : f32
    %528 = vector.broadcast %cst_126 : f32 to vector<1x32xf32>
    %529 = vector.extract_strided_slice %502 {offsets = [0, 0], sizes = [1, 224], strides = [1, 1]} : vector<1x256xf32> to vector<1x224xf32>
    %530 = tpu.concatenate %528, %529 in 1 : vector<1x32xf32>, vector<1x224xf32> -> vector<1x256xf32>
    %531 = vector.extract_strided_slice %322 {offsets = [4, 1], sizes = [1, 1], strides = [1, 1]} : vector<5x9xf32> to vector<1x1xf32>
    %532 = vector.broadcast %531 : vector<1x1xf32> to vector<1x256xf32>
    %533 = arith.mulf %530, %532 : vector<1x256xf32>
    %534 = arith.addf %527, %533 : vector<1x256xf32>
    %535 = vector.extract_strided_slice %322 {offsets = [4, 4], sizes = [1, 1], strides = [1, 1]} : vector<5x9xf32> to vector<1x1xf32>
    %536 = vector.broadcast %535 : vector<1x1xf32> to vector<1x256xf32>
    %537 = arith.mulf %502, %536 : vector<1x256xf32>
    %538 = arith.addf %534, %537 : vector<1x256xf32>
    %cst_127 = arith.constant 0.000000e+00 : f32
    %539 = vector.broadcast %cst_127 : f32 to vector<1x32xf32>
    %540 = vector.extract_strided_slice %502 {offsets = [0, 32], sizes = [1, 224], strides = [1, 1]} : vector<1x256xf32> to vector<1x224xf32>
    %541 = tpu.concatenate %540, %539 in 1 : vector<1x224xf32>, vector<1x32xf32> -> vector<1x256xf32>
    %542 = vector.extract_strided_slice %322 {offsets = [4, 7], sizes = [1, 1], strides = [1, 1]} : vector<5x9xf32> to vector<1x1xf32>
    %543 = vector.broadcast %542 : vector<1x1xf32> to vector<1x256xf32>
    %544 = arith.mulf %541, %543 : vector<1x256xf32>
    %545 = arith.addf %538, %544 : vector<1x256xf32>
    %cst_128 = arith.constant 0.000000e+00 : f32
    %546 = vector.broadcast %cst_128 : f32 to vector<1x2xf32>
    %547 = vector.extract_strided_slice %502 {offsets = [0, 2], sizes = [1, 254], strides = [1, 1]} : vector<1x256xf32> to vector<1x254xf32>
    %548 = tpu.concatenate %547, %546 in 1 : vector<1x254xf32>, vector<1x2xf32> -> vector<1x256xf32>
    %549 = arith.mulf %548, %334 : vector<1x256xf32>
    %cst_129 = arith.constant 0.000000e+00 : f32
    %550 = vector.broadcast %cst_129 : f32 to vector<1x32xf32>
    %551 = vector.extract_strided_slice %549 {offsets = [0, 0], sizes = [1, 224], strides = [1, 1]} : vector<1x256xf32> to vector<1x224xf32>
    %552 = tpu.concatenate %550, %551 in 1 : vector<1x32xf32>, vector<1x224xf32> -> vector<1x256xf32>
    %553 = vector.extract_strided_slice %322 {offsets = [4, 2], sizes = [1, 1], strides = [1, 1]} : vector<5x9xf32> to vector<1x1xf32>
    %554 = vector.broadcast %553 : vector<1x1xf32> to vector<1x256xf32>
    %555 = arith.mulf %552, %554 : vector<1x256xf32>
    %556 = arith.addf %545, %555 : vector<1x256xf32>
    %557 = vector.extract_strided_slice %322 {offsets = [4, 5], sizes = [1, 1], strides = [1, 1]} : vector<5x9xf32> to vector<1x1xf32>
    %558 = vector.broadcast %557 : vector<1x1xf32> to vector<1x256xf32>
    %559 = arith.mulf %549, %558 : vector<1x256xf32>
    %560 = arith.addf %556, %559 : vector<1x256xf32>
    %cst_130 = arith.constant 0.000000e+00 : f32
    %561 = vector.broadcast %cst_130 : f32 to vector<1x32xf32>
    %562 = vector.extract_strided_slice %549 {offsets = [0, 32], sizes = [1, 224], strides = [1, 1]} : vector<1x256xf32> to vector<1x224xf32>
    %563 = tpu.concatenate %562, %561 in 1 : vector<1x224xf32>, vector<1x32xf32> -> vector<1x256xf32>
    %564 = vector.extract_strided_slice %322 {offsets = [4, 8], sizes = [1, 1], strides = [1, 1]} : vector<5x9xf32> to vector<1x1xf32>
    %565 = vector.broadcast %564 : vector<1x1xf32> to vector<1x256xf32>
    %566 = arith.mulf %563, %565 : vector<1x256xf32>
    %567 = arith.addf %560, %566 : vector<1x256xf32>
    %c1_131 = arith.constant 1 : index
    %c4_132 = arith.constant 4 : index
    %c0_133 = arith.constant 0 : index
    %568 = vector.load %arg14[%c1_131, %c4_132, %c0_133] : memref<4x5x256xf32, #tpu.memory_space<vmem>>, vector<1x1x256xf32>
    %569 = vector.shape_cast %568 : vector<1x1x256xf32> to vector<1x256xf32>
    %570 = vector.shape_cast %567 : vector<1x256xf32> to vector<1x1x256xf32>
    tpu.vector_store %arg14[%c1_131, %c4_132, %c0_133], %570 {strides = array<i32>} : memref<4x5x256xf32, #tpu.memory_space<vmem>>, vector<1x1x256xf32>,
    %c0_134 = arith.constant 0 : index
    %c2_135 = arith.constant 2 : index
    %c0_136 = arith.constant 0 : index
    %c0_137 = arith.constant 0 : index
    %571 = vector.load %arg1[%c0_134, %c2_135, %c0_136, %c0_137] : memref<1x4x2x256xf32, #tpu.memory_space<vmem>>, vector<1x1x2x256xf32>
    %572 = vector.shape_cast %571 : vector<1x1x2x256xf32> to vector<2x256xf32>
    %c0_138 = arith.constant 0 : index
    %c2_139 = arith.constant 2 : index
    %c0_140 = arith.constant 0 : index
    %c0_141 = arith.constant 0 : index
    %573 = vector.load %arg2[%c0_138, %c2_139, %c0_140, %c0_141] : memref<1x4x2x256xf32, #tpu.memory_space<vmem>>, vector<1x1x2x256xf32>
    %574 = vector.shape_cast %573 : vector<1x1x2x256xf32> to vector<2x256xf32>
    %cst_142 = arith.constant dense<0.000000e+00> : vector<256xf32>
    %575 = vector.multi_reduction <add>, %572, %cst_142 [0] : vector<2x256xf32> to vector<256xf32>
    %576 = vector.shape_cast %575 : vector<256xf32> to vector<1x256xf32>
    %cst_143 = arith.constant dense<0.000000e+00> : vector<256xf32>
    %577 = vector.multi_reduction <add>, %574, %cst_143 [0] : vector<2x256xf32> to vector<256xf32>
    %578 = vector.shape_cast %577 : vector<256xf32> to vector<1x256xf32>
    %579 = arith.addf %576, %578 : vector<1x256xf32>
    %580 = arith.addf %579, %2 : vector<1x256xf32>
    %581 = arith.mulf %572, %572 : vector<2x256xf32>
    %cst_144 = arith.constant dense<0.000000e+00> : vector<256xf32>
    %582 = vector.multi_reduction <add>, %581, %cst_144 [0] : vector<2x256xf32> to vector<256xf32>
    %583 = vector.shape_cast %582 : vector<256xf32> to vector<1x256xf32>
    %584 = arith.mulf %574, %574 : vector<2x256xf32>
    %cst_145 = arith.constant dense<0.000000e+00> : vector<256xf32>
    %585 = vector.multi_reduction <add>, %584, %cst_145 [0] : vector<2x256xf32> to vector<256xf32>
    %586 = vector.shape_cast %585 : vector<256xf32> to vector<1x256xf32>
    %587 = arith.addf %583, %586 : vector<1x256xf32>
    %588 = arith.mulf %2, %2 : vector<1x256xf32>
    %589 = arith.addf %587, %588 : vector<1x256xf32>
    %cst_146 = arith.constant 2.000000e-01 : f32
    %590 = vector.broadcast %cst_146 : f32 to vector<1x256xf32>
    %591 = arith.mulf %580, %590 : vector<1x256xf32>
    %cst_147 = arith.constant 2.000000e-01 : f32
    %592 = vector.broadcast %cst_147 : f32 to vector<1x256xf32>
    %593 = arith.mulf %589, %592 : vector<1x256xf32>
    %594 = arith.mulf %591, %591 : vector<1x256xf32>
    %595 = arith.subf %593, %594 : vector<1x256xf32>
    %cst_148 = arith.constant 0.000000e+00 : f32
    %596 = vector.broadcast %cst_148 : f32 to vector<1x256xf32>
    %597 = arith.maximumf %595, %596 : vector<1x256xf32>
    %cst_149 = arith.constant 9.99999997E-7 : f32
    %598 = vector.broadcast %cst_149 : f32 to vector<1x256xf32>
    %599 = arith.addf %597, %598 : vector<1x256xf32>
    %600 = math.rsqrt %599 : vector<1x256xf32>
    %c2_150 = arith.constant 2 : index
    %c0_151 = arith.constant 0 : index
    %c0_152 = arith.constant 0 : index
    %601 = vector.load %arg5[%c2_150, %c0_151, %c0_152] : memref<4x5x1xf32, #tpu.memory_space<vmem>>, vector<1x5x1xf32>
    %602 = vector.shape_cast %601 : vector<1x5x1xf32> to vector<5x1xf32>
    %c2_153 = arith.constant 2 : index
    %c0_154 = arith.constant 0 : index
    %c0_155 = arith.constant 0 : index
    %603 = vector.load %arg6[%c2_153, %c0_154, %c0_155] : memref<4x5x1xf32, #tpu.memory_space<vmem>>, vector<1x5x1xf32>
    %604 = vector.shape_cast %603 : vector<1x5x1xf32> to vector<5x1xf32>
    %c2_156 = arith.constant 2 : index
    %c0_157 = arith.constant 0 : index
    %c0_158 = arith.constant 0 : index
    %605 = vector.load %arg7[%c2_156, %c0_157, %c0_158] : memref<4x5x9xf32, #tpu.memory_space<vmem>>, vector<1x5x9xf32>
    %606 = vector.shape_cast %605 : vector<1x5x9xf32> to vector<5x9xf32>
    %c2_159 = arith.constant 2 : index
    %c0_160 = arith.constant 0 : index
    %c0_161 = arith.constant 0 : index
    %607 = vector.load %arg8[%c2_159, %c0_160, %c0_161] : memref<4x5x1xf32, #tpu.memory_space<vmem>>, vector<1x5x1xf32>
    %608 = vector.shape_cast %607 : vector<1x5x1xf32> to vector<5x1xf32>
    %cst_162 = arith.constant 5.000000e+00 : f32
    %609 = vector.broadcast %cst_162 : f32 to vector<1x256xf32>
    %610 = arith.cmpf oge, %0, %609 : vector<1x256xf32>
    %cst_163 = arith.constant 1.000000e+00 : f32
    %cst_164 = arith.constant 0.000000e+00 : f32
    %611 = vector.broadcast %cst_163 : f32 to vector<1x256xf32>
    %612 = vector.broadcast %cst_164 : f32 to vector<1x256xf32>
    %613 = arith.select %610, %611, %612 : vector<1x256xi1>, vector<1x256xf32>
    %cst_165 = arith.constant 1.100000e+01 : f32
    %614 = vector.broadcast %cst_165 : f32 to vector<1x256xf32>
    %615 = arith.cmpf olt, %0, %614 : vector<1x256xf32>
    %cst_166 = arith.constant 1.000000e+00 : f32
    %cst_167 = arith.constant 0.000000e+00 : f32
    %616 = vector.broadcast %cst_166 : f32 to vector<1x256xf32>
    %617 = vector.broadcast %cst_167 : f32 to vector<1x256xf32>
    %618 = arith.select %615, %616, %617 : vector<1x256xi1>, vector<1x256xf32>
    %619 = vector.extract_strided_slice %602 {offsets = [0, 0], sizes = [2, 1], strides = [1, 1]} : vector<5x1xf32> to vector<2x1xf32>
    %620 = vector.extract_strided_slice %604 {offsets = [0, 0], sizes = [2, 1], strides = [1, 1]} : vector<5x1xf32> to vector<2x1xf32>
    %621 = vector.broadcast %591 : vector<1x256xf32> to vector<2x256xf32>
    %622 = arith.subf %572, %621 : vector<2x256xf32>
    %623 = vector.broadcast %600 : vector<1x256xf32> to vector<2x256xf32>
    %624 = arith.mulf %622, %623 : vector<2x256xf32>
    %625 = vector.broadcast %619 : vector<2x1xf32> to vector<2x256xf32>
    %626 = arith.mulf %624, %625 : vector<2x256xf32>
    %627 = vector.broadcast %620 : vector<2x1xf32> to vector<2x256xf32>
    %628 = arith.addf %626, %627 : vector<2x256xf32>
    %629 = vector.extract_strided_slice %608 {offsets = [0, 0], sizes = [2, 1], strides = [1, 1]} : vector<5x1xf32> to vector<2x1xf32>
    %630 = vector.shape_cast %629 : vector<2x1xf32> to vector<2x1xf32>
    %631 = vector.broadcast %630 : vector<2x1xf32> to vector<2x256xf32>
    %cst_168 = arith.constant 0.000000e+00 : f32
    %632 = vector.broadcast %cst_168 : f32 to vector<2x5xf32>
    %633 = vector.extract_strided_slice %628 {offsets = [0, 0], sizes = [2, 251], strides = [1, 1]} : vector<2x256xf32> to vector<2x251xf32>
    %634 = tpu.concatenate %632, %633 in 1 : vector<2x5xf32>, vector<2x251xf32> -> vector<2x256xf32>
    %635 = vector.broadcast %613 : vector<1x256xf32> to vector<2x256xf32>
    %636 = arith.mulf %634, %635 : vector<2x256xf32>
    %cst_169 = arith.constant 0.000000e+00 : f32
    %637 = vector.broadcast %cst_169 : f32 to vector<2x80xf32>
    %638 = vector.extract_strided_slice %636 {offsets = [0, 0], sizes = [2, 176], strides = [1, 1]} : vector<2x256xf32> to vector<2x176xf32>
    %639 = tpu.concatenate %637, %638 in 1 : vector<2x80xf32>, vector<2x176xf32> -> vector<2x256xf32>
    %640 = vector.extract_strided_slice %606 {offsets = [0, 0], sizes = [2, 1], strides = [1, 1]} : vector<5x9xf32> to vector<2x1xf32>
    %641 = vector.broadcast %640 : vector<2x1xf32> to vector<2x256xf32>
    %642 = arith.mulf %639, %641 : vector<2x256xf32>
    %643 = arith.addf %631, %642 : vector<2x256xf32>
    %644 = vector.extract_strided_slice %606 {offsets = [0, 3], sizes = [2, 1], strides = [1, 1]} : vector<5x9xf32> to vector<2x1xf32>
    %645 = vector.broadcast %644 : vector<2x1xf32> to vector<2x256xf32>
    %646 = arith.mulf %636, %645 : vector<2x256xf32>
    %647 = arith.addf %643, %646 : vector<2x256xf32>
    %cst_170 = arith.constant 0.000000e+00 : f32
    %648 = vector.broadcast %cst_170 : f32 to vector<2x80xf32>
    %649 = vector.extract_strided_slice %636 {offsets = [0, 80], sizes = [2, 176], strides = [1, 1]} : vector<2x256xf32> to vector<2x176xf32>
    %650 = tpu.concatenate %649, %648 in 1 : vector<2x176xf32>, vector<2x80xf32> -> vector<2x256xf32>
    %651 = vector.extract_strided_slice %606 {offsets = [0, 6], sizes = [2, 1], strides = [1, 1]} : vector<5x9xf32> to vector<2x1xf32>
    %652 = vector.broadcast %651 : vector<2x1xf32> to vector<2x256xf32>
    %653 = arith.mulf %650, %652 : vector<2x256xf32>
    %654 = arith.addf %647, %653 : vector<2x256xf32>
    %cst_171 = arith.constant 0.000000e+00 : f32
    %655 = vector.broadcast %cst_171 : f32 to vector<2x80xf32>
    %656 = vector.extract_strided_slice %628 {offsets = [0, 0], sizes = [2, 176], strides = [1, 1]} : vector<2x256xf32> to vector<2x176xf32>
    %657 = tpu.concatenate %655, %656 in 1 : vector<2x80xf32>, vector<2x176xf32> -> vector<2x256xf32>
    %658 = vector.extract_strided_slice %606 {offsets = [0, 1], sizes = [2, 1], strides = [1, 1]} : vector<5x9xf32> to vector<2x1xf32>
    %659 = vector.broadcast %658 : vector<2x1xf32> to vector<2x256xf32>
    %660 = arith.mulf %657, %659 : vector<2x256xf32>
    %661 = arith.addf %654, %660 : vector<2x256xf32>
    %662 = vector.extract_strided_slice %606 {offsets = [0, 4], sizes = [2, 1], strides = [1, 1]} : vector<5x9xf32> to vector<2x1xf32>
    %663 = vector.broadcast %662 : vector<2x1xf32> to vector<2x256xf32>
    %664 = arith.mulf %628, %663 : vector<2x256xf32>
    %665 = arith.addf %661, %664 : vector<2x256xf32>
    %cst_172 = arith.constant 0.000000e+00 : f32
    %666 = vector.broadcast %cst_172 : f32 to vector<2x80xf32>
    %667 = vector.extract_strided_slice %628 {offsets = [0, 80], sizes = [2, 176], strides = [1, 1]} : vector<2x256xf32> to vector<2x176xf32>
    %668 = tpu.concatenate %667, %666 in 1 : vector<2x176xf32>, vector<2x80xf32> -> vector<2x256xf32>
    %669 = vector.extract_strided_slice %606 {offsets = [0, 7], sizes = [2, 1], strides = [1, 1]} : vector<5x9xf32> to vector<2x1xf32>
    %670 = vector.broadcast %669 : vector<2x1xf32> to vector<2x256xf32>
    %671 = arith.mulf %668, %670 : vector<2x256xf32>
    %672 = arith.addf %665, %671 : vector<2x256xf32>
    %cst_173 = arith.constant 0.000000e+00 : f32
    %673 = vector.broadcast %cst_173 : f32 to vector<2x5xf32>
    %674 = vector.extract_strided_slice %628 {offsets = [0, 5], sizes = [2, 251], strides = [1, 1]} : vector<2x256xf32> to vector<2x251xf32>
    %675 = tpu.concatenate %674, %673 in 1 : vector<2x251xf32>, vector<2x5xf32> -> vector<2x256xf32>
    %676 = vector.broadcast %618 : vector<1x256xf32> to vector<2x256xf32>
    %677 = arith.mulf %675, %676 : vector<2x256xf32>
    %cst_174 = arith.constant 0.000000e+00 : f32
    %678 = vector.broadcast %cst_174 : f32 to vector<2x80xf32>
    %679 = vector.extract_strided_slice %677 {offsets = [0, 0], sizes = [2, 176], strides = [1, 1]} : vector<2x256xf32> to vector<2x176xf32>
    %680 = tpu.concatenate %678, %679 in 1 : vector<2x80xf32>, vector<2x176xf32> -> vector<2x256xf32>
    %681 = vector.extract_strided_slice %606 {offsets = [0, 2], sizes = [2, 1], strides = [1, 1]} : vector<5x9xf32> to vector<2x1xf32>
    %682 = vector.broadcast %681 : vector<2x1xf32> to vector<2x256xf32>
    %683 = arith.mulf %680, %682 : vector<2x256xf32>
    %684 = arith.addf %672, %683 : vector<2x256xf32>
    %685 = vector.extract_strided_slice %606 {offsets = [0, 5], sizes = [2, 1], strides = [1, 1]} : vector<5x9xf32> to vector<2x1xf32>
    %686 = vector.broadcast %685 : vector<2x1xf32> to vector<2x256xf32>
    %687 = arith.mulf %677, %686 : vector<2x256xf32>
    %688 = arith.addf %684, %687 : vector<2x256xf32>
    %cst_175 = arith.constant 0.000000e+00 : f32
    %689 = vector.broadcast %cst_175 : f32 to vector<2x80xf32>
    %690 = vector.extract_strided_slice %677 {offsets = [0, 80], sizes = [2, 176], strides = [1, 1]} : vector<2x256xf32> to vector<2x176xf32>
    %691 = tpu.concatenate %690, %689 in 1 : vector<2x176xf32>, vector<2x80xf32> -> vector<2x256xf32>
    %692 = vector.extract_strided_slice %606 {offsets = [0, 8], sizes = [2, 1], strides = [1, 1]} : vector<5x9xf32> to vector<2x1xf32>
    %693 = vector.broadcast %692 : vector<2x1xf32> to vector<2x256xf32>
    %694 = arith.mulf %691, %693 : vector<2x256xf32>
    %695 = arith.addf %688, %694 : vector<2x256xf32>
    %c2_176 = arith.constant 2 : index
    %c0_177 = arith.constant 0 : index
    %c0_178 = arith.constant 0 : index
    %696 = vector.load %arg14[%c2_176, %c0_177, %c0_178] : memref<4x5x256xf32, #tpu.memory_space<vmem>>, vector<1x2x256xf32>
    %697 = vector.shape_cast %696 : vector<1x2x256xf32> to vector<2x256xf32>
    %698 = vector.shape_cast %695 : vector<2x256xf32> to vector<1x2x256xf32>
    tpu.vector_store %arg14[%c2_176, %c0_177, %c0_178], %698 {strides = array<i32>} : memref<4x5x256xf32, #tpu.memory_space<vmem>>, vector<1x2x256xf32>,
    %699 = vector.extract_strided_slice %602 {offsets = [2, 0], sizes = [2, 1], strides = [1, 1]} : vector<5x1xf32> to vector<2x1xf32>
    %700 = vector.extract_strided_slice %604 {offsets = [2, 0], sizes = [2, 1], strides = [1, 1]} : vector<5x1xf32> to vector<2x1xf32>
    %701 = vector.broadcast %591 : vector<1x256xf32> to vector<2x256xf32>
    %702 = arith.subf %574, %701 : vector<2x256xf32>
    %703 = vector.broadcast %600 : vector<1x256xf32> to vector<2x256xf32>
    %704 = arith.mulf %702, %703 : vector<2x256xf32>
    %705 = vector.broadcast %699 : vector<2x1xf32> to vector<2x256xf32>
    %706 = arith.mulf %704, %705 : vector<2x256xf32>
    %707 = vector.broadcast %700 : vector<2x1xf32> to vector<2x256xf32>
    %708 = arith.addf %706, %707 : vector<2x256xf32>
    %709 = vector.extract_strided_slice %608 {offsets = [2, 0], sizes = [2, 1], strides = [1, 1]} : vector<5x1xf32> to vector<2x1xf32>
    %710 = vector.shape_cast %709 : vector<2x1xf32> to vector<2x1xf32>
    %711 = vector.broadcast %710 : vector<2x1xf32> to vector<2x256xf32>
    %cst_179 = arith.constant 0.000000e+00 : f32
    %712 = vector.broadcast %cst_179 : f32 to vector<2x5xf32>
    %713 = vector.extract_strided_slice %708 {offsets = [0, 0], sizes = [2, 251], strides = [1, 1]} : vector<2x256xf32> to vector<2x251xf32>
    %714 = tpu.concatenate %712, %713 in 1 : vector<2x5xf32>, vector<2x251xf32> -> vector<2x256xf32>
    %715 = vector.broadcast %613 : vector<1x256xf32> to vector<2x256xf32>
    %716 = arith.mulf %714, %715 : vector<2x256xf32>
    %cst_180 = arith.constant 0.000000e+00 : f32
    %717 = vector.broadcast %cst_180 : f32 to vector<2x80xf32>
    %718 = vector.extract_strided_slice %716 {offsets = [0, 0], sizes = [2, 176], strides = [1, 1]} : vector<2x256xf32> to vector<2x176xf32>
    %719 = tpu.concatenate %717, %718 in 1 : vector<2x80xf32>, vector<2x176xf32> -> vector<2x256xf32>
    %720 = vector.extract_strided_slice %606 {offsets = [2, 0], sizes = [2, 1], strides = [1, 1]} : vector<5x9xf32> to vector<2x1xf32>
    %721 = vector.broadcast %720 : vector<2x1xf32> to vector<2x256xf32>
    %722 = arith.mulf %719, %721 : vector<2x256xf32>
    %723 = arith.addf %711, %722 : vector<2x256xf32>
    %724 = vector.extract_strided_slice %606 {offsets = [2, 3], sizes = [2, 1], strides = [1, 1]} : vector<5x9xf32> to vector<2x1xf32>
    %725 = vector.broadcast %724 : vector<2x1xf32> to vector<2x256xf32>
    %726 = arith.mulf %716, %725 : vector<2x256xf32>
    %727 = arith.addf %723, %726 : vector<2x256xf32>
    %cst_181 = arith.constant 0.000000e+00 : f32
    %728 = vector.broadcast %cst_181 : f32 to vector<2x80xf32>
    %729 = vector.extract_strided_slice %716 {offsets = [0, 80], sizes = [2, 176], strides = [1, 1]} : vector<2x256xf32> to vector<2x176xf32>
    %730 = tpu.concatenate %729, %728 in 1 : vector<2x176xf32>, vector<2x80xf32> -> vector<2x256xf32>
    %731 = vector.extract_strided_slice %606 {offsets = [2, 6], sizes = [2, 1], strides = [1, 1]} : vector<5x9xf32> to vector<2x1xf32>
    %732 = vector.broadcast %731 : vector<2x1xf32> to vector<2x256xf32>
    %733 = arith.mulf %730, %732 : vector<2x256xf32>
    %734 = arith.addf %727, %733 : vector<2x256xf32>
    %cst_182 = arith.constant 0.000000e+00 : f32
    %735 = vector.broadcast %cst_182 : f32 to vector<2x80xf32>
    %736 = vector.extract_strided_slice %708 {offsets = [0, 0], sizes = [2, 176], strides = [1, 1]} : vector<2x256xf32> to vector<2x176xf32>
    %737 = tpu.concatenate %735, %736 in 1 : vector<2x80xf32>, vector<2x176xf32> -> vector<2x256xf32>
    %738 = vector.extract_strided_slice %606 {offsets = [2, 1], sizes = [2, 1], strides = [1, 1]} : vector<5x9xf32> to vector<2x1xf32>
    %739 = vector.broadcast %738 : vector<2x1xf32> to vector<2x256xf32>
    %740 = arith.mulf %737, %739 : vector<2x256xf32>
    %741 = arith.addf %734, %740 : vector<2x256xf32>
    %742 = vector.extract_strided_slice %606 {offsets = [2, 4], sizes = [2, 1], strides = [1, 1]} : vector<5x9xf32> to vector<2x1xf32>
    %743 = vector.broadcast %742 : vector<2x1xf32> to vector<2x256xf32>
    %744 = arith.mulf %708, %743 : vector<2x256xf32>
    %745 = arith.addf %741, %744 : vector<2x256xf32>
    %cst_183 = arith.constant 0.000000e+00 : f32
    %746 = vector.broadcast %cst_183 : f32 to vector<2x80xf32>
    %747 = vector.extract_strided_slice %708 {offsets = [0, 80], sizes = [2, 176], strides = [1, 1]} : vector<2x256xf32> to vector<2x176xf32>
    %748 = tpu.concatenate %747, %746 in 1 : vector<2x176xf32>, vector<2x80xf32> -> vector<2x256xf32>
    %749 = vector.extract_strided_slice %606 {offsets = [2, 7], sizes = [2, 1], strides = [1, 1]} : vector<5x9xf32> to vector<2x1xf32>
    %750 = vector.broadcast %749 : vector<2x1xf32> to vector<2x256xf32>
    %751 = arith.mulf %748, %750 : vector<2x256xf32>
    %752 = arith.addf %745, %751 : vector<2x256xf32>
    %cst_184 = arith.constant 0.000000e+00 : f32
    %753 = vector.broadcast %cst_184 : f32 to vector<2x5xf32>
    %754 = vector.extract_strided_slice %708 {offsets = [0, 5], sizes = [2, 251], strides = [1, 1]} : vector<2x256xf32> to vector<2x251xf32>
    %755 = tpu.concatenate %754, %753 in 1 : vector<2x251xf32>, vector<2x5xf32> -> vector<2x256xf32>
    %756 = vector.broadcast %618 : vector<1x256xf32> to vector<2x256xf32>
    %757 = arith.mulf %755, %756 : vector<2x256xf32>
    %cst_185 = arith.constant 0.000000e+00 : f32
    %758 = vector.broadcast %cst_185 : f32 to vector<2x80xf32>
    %759 = vector.extract_strided_slice %757 {offsets = [0, 0], sizes = [2, 176], strides = [1, 1]} : vector<2x256xf32> to vector<2x176xf32>
    %760 = tpu.concatenate %758, %759 in 1 : vector<2x80xf32>, vector<2x176xf32> -> vector<2x256xf32>
    %761 = vector.extract_strided_slice %606 {offsets = [2, 2], sizes = [2, 1], strides = [1, 1]} : vector<5x9xf32> to vector<2x1xf32>
    %762 = vector.broadcast %761 : vector<2x1xf32> to vector<2x256xf32>
    %763 = arith.mulf %760, %762 : vector<2x256xf32>
    %764 = arith.addf %752, %763 : vector<2x256xf32>
    %765 = vector.extract_strided_slice %606 {offsets = [2, 5], sizes = [2, 1], strides = [1, 1]} : vector<5x9xf32> to vector<2x1xf32>
    %766 = vector.broadcast %765 : vector<2x1xf32> to vector<2x256xf32>
    %767 = arith.mulf %757, %766 : vector<2x256xf32>
    %768 = arith.addf %764, %767 : vector<2x256xf32>
    %cst_186 = arith.constant 0.000000e+00 : f32
    %769 = vector.broadcast %cst_186 : f32 to vector<2x80xf32>
    %770 = vector.extract_strided_slice %757 {offsets = [0, 80], sizes = [2, 176], strides = [1, 1]} : vector<2x256xf32> to vector<2x176xf32>
    %771 = tpu.concatenate %770, %769 in 1 : vector<2x176xf32>, vector<2x80xf32> -> vector<2x256xf32>
    %772 = vector.extract_strided_slice %606 {offsets = [2, 8], sizes = [2, 1], strides = [1, 1]} : vector<5x9xf32> to vector<2x1xf32>
    %773 = vector.broadcast %772 : vector<2x1xf32> to vector<2x256xf32>
    %774 = arith.mulf %771, %773 : vector<2x256xf32>
    %775 = arith.addf %768, %774 : vector<2x256xf32>
    %c2_187 = arith.constant 2 : index
    %c2_188 = arith.constant 2 : index
    %c0_189 = arith.constant 0 : index
    %776 = vector.load %arg14[%c2_187, %c2_188, %c0_189] : memref<4x5x256xf32, #tpu.memory_space<vmem>>, vector<1x2x256xf32>
    %777 = vector.shape_cast %776 : vector<1x2x256xf32> to vector<2x256xf32>
    %778 = vector.shape_cast %775 : vector<2x256xf32> to vector<1x2x256xf32>
    tpu.vector_store %arg14[%c2_187, %c2_188, %c0_189], %778 {strides = array<i32>} : memref<4x5x256xf32, #tpu.memory_space<vmem>>, vector<1x2x256xf32>,
    %779 = vector.extract_strided_slice %602 {offsets = [4, 0], sizes = [1, 1], strides = [1, 1]} : vector<5x1xf32> to vector<1x1xf32>
    %780 = vector.extract_strided_slice %604 {offsets = [4, 0], sizes = [1, 1], strides = [1, 1]} : vector<5x1xf32> to vector<1x1xf32>
    %781 = arith.subf %2, %591 : vector<1x256xf32>
    %782 = arith.mulf %781, %600 : vector<1x256xf32>
    %783 = vector.broadcast %779 : vector<1x1xf32> to vector<1x256xf32>
    %784 = arith.mulf %782, %783 : vector<1x256xf32>
    %785 = vector.broadcast %780 : vector<1x1xf32> to vector<1x256xf32>
    %786 = arith.addf %784, %785 : vector<1x256xf32>
    %787 = vector.extract_strided_slice %608 {offsets = [4, 0], sizes = [1, 1], strides = [1, 1]} : vector<5x1xf32> to vector<1x1xf32>
    %788 = vector.shape_cast %787 : vector<1x1xf32> to vector<1x1xf32>
    %789 = vector.broadcast %788 : vector<1x1xf32> to vector<1x256xf32>
    %cst_190 = arith.constant 0.000000e+00 : f32
    %790 = vector.broadcast %cst_190 : f32 to vector<1x5xf32>
    %791 = vector.extract_strided_slice %786 {offsets = [0, 0], sizes = [1, 251], strides = [1, 1]} : vector<1x256xf32> to vector<1x251xf32>
    %792 = tpu.concatenate %790, %791 in 1 : vector<1x5xf32>, vector<1x251xf32> -> vector<1x256xf32>
    %793 = arith.mulf %792, %613 : vector<1x256xf32>
    %cst_191 = arith.constant 0.000000e+00 : f32
    %794 = vector.broadcast %cst_191 : f32 to vector<1x80xf32>
    %795 = vector.extract_strided_slice %793 {offsets = [0, 0], sizes = [1, 176], strides = [1, 1]} : vector<1x256xf32> to vector<1x176xf32>
    %796 = tpu.concatenate %794, %795 in 1 : vector<1x80xf32>, vector<1x176xf32> -> vector<1x256xf32>
    %797 = vector.extract_strided_slice %606 {offsets = [4, 0], sizes = [1, 1], strides = [1, 1]} : vector<5x9xf32> to vector<1x1xf32>
    %798 = vector.broadcast %797 : vector<1x1xf32> to vector<1x256xf32>
    %799 = arith.mulf %796, %798 : vector<1x256xf32>
    %800 = arith.addf %789, %799 : vector<1x256xf32>
    %801 = vector.extract_strided_slice %606 {offsets = [4, 3], sizes = [1, 1], strides = [1, 1]} : vector<5x9xf32> to vector<1x1xf32>
    %802 = vector.broadcast %801 : vector<1x1xf32> to vector<1x256xf32>
    %803 = arith.mulf %793, %802 : vector<1x256xf32>
    %804 = arith.addf %800, %803 : vector<1x256xf32>
    %cst_192 = arith.constant 0.000000e+00 : f32
    %805 = vector.broadcast %cst_192 : f32 to vector<1x80xf32>
    %806 = vector.extract_strided_slice %793 {offsets = [0, 80], sizes = [1, 176], strides = [1, 1]} : vector<1x256xf32> to vector<1x176xf32>
    %807 = tpu.concatenate %806, %805 in 1 : vector<1x176xf32>, vector<1x80xf32> -> vector<1x256xf32>
    %808 = vector.extract_strided_slice %606 {offsets = [4, 6], sizes = [1, 1], strides = [1, 1]} : vector<5x9xf32> to vector<1x1xf32>
    %809 = vector.broadcast %808 : vector<1x1xf32> to vector<1x256xf32>
    %810 = arith.mulf %807, %809 : vector<1x256xf32>
    %811 = arith.addf %804, %810 : vector<1x256xf32>
    %cst_193 = arith.constant 0.000000e+00 : f32
    %812 = vector.broadcast %cst_193 : f32 to vector<1x80xf32>
    %813 = vector.extract_strided_slice %786 {offsets = [0, 0], sizes = [1, 176], strides = [1, 1]} : vector<1x256xf32> to vector<1x176xf32>
    %814 = tpu.concatenate %812, %813 in 1 : vector<1x80xf32>, vector<1x176xf32> -> vector<1x256xf32>
    %815 = vector.extract_strided_slice %606 {offsets = [4, 1], sizes = [1, 1], strides = [1, 1]} : vector<5x9xf32> to vector<1x1xf32>
    %816 = vector.broadcast %815 : vector<1x1xf32> to vector<1x256xf32>
    %817 = arith.mulf %814, %816 : vector<1x256xf32>
    %818 = arith.addf %811, %817 : vector<1x256xf32>
    %819 = vector.extract_strided_slice %606 {offsets = [4, 4], sizes = [1, 1], strides = [1, 1]} : vector<5x9xf32> to vector<1x1xf32>
    %820 = vector.broadcast %819 : vector<1x1xf32> to vector<1x256xf32>
    %821 = arith.mulf %786, %820 : vector<1x256xf32>
    %822 = arith.addf %818, %821 : vector<1x256xf32>
    %cst_194 = arith.constant 0.000000e+00 : f32
    %823 = vector.broadcast %cst_194 : f32 to vector<1x80xf32>
    %824 = vector.extract_strided_slice %786 {offsets = [0, 80], sizes = [1, 176], strides = [1, 1]} : vector<1x256xf32> to vector<1x176xf32>
    %825 = tpu.concatenate %824, %823 in 1 : vector<1x176xf32>, vector<1x80xf32> -> vector<1x256xf32>
    %826 = vector.extract_strided_slice %606 {offsets = [4, 7], sizes = [1, 1], strides = [1, 1]} : vector<5x9xf32> to vector<1x1xf32>
    %827 = vector.broadcast %826 : vector<1x1xf32> to vector<1x256xf32>
    %828 = arith.mulf %825, %827 : vector<1x256xf32>
    %829 = arith.addf %822, %828 : vector<1x256xf32>
    %cst_195 = arith.constant 0.000000e+00 : f32
    %830 = vector.broadcast %cst_195 : f32 to vector<1x5xf32>
    %831 = vector.extract_strided_slice %786 {offsets = [0, 5], sizes = [1, 251], strides = [1, 1]} : vector<1x256xf32> to vector<1x251xf32>
    %832 = tpu.concatenate %831, %830 in 1 : vector<1x251xf32>, vector<1x5xf32> -> vector<1x256xf32>
    %833 = arith.mulf %832, %618 : vector<1x256xf32>
    %cst_196 = arith.constant 0.000000e+00 : f32
    %834 = vector.broadcast %cst_196 : f32 to vector<1x80xf32>
    %835 = vector.extract_strided_slice %833 {offsets = [0, 0], sizes = [1, 176], strides = [1, 1]} : vector<1x256xf32> to vector<1x176xf32>
    %836 = tpu.concatenate %834, %835 in 1 : vector<1x80xf32>, vector<1x176xf32> -> vector<1x256xf32>
    %837 = vector.extract_strided_slice %606 {offsets = [4, 2], sizes = [1, 1], strides = [1, 1]} : vector<5x9xf32> to vector<1x1xf32>
    %838 = vector.broadcast %837 : vector<1x1xf32> to vector<1x256xf32>
    %839 = arith.mulf %836, %838 : vector<1x256xf32>
    %840 = arith.addf %829, %839 : vector<1x256xf32>
    %841 = vector.extract_strided_slice %606 {offsets = [4, 5], sizes = [1, 1], strides = [1, 1]} : vector<5x9xf32> to vector<1x1xf32>
    %842 = vector.broadcast %841 : vector<1x1xf32> to vector<1x256xf32>
    %843 = arith.mulf %833, %842 : vector<1x256xf32>
    %844 = arith.addf %840, %843 : vector<1x256xf32>
    %cst_197 = arith.constant 0.000000e+00 : f32
    %845 = vector.broadcast %cst_197 : f32 to vector<1x80xf32>
    %846 = vector.extract_strided_slice %833 {offsets = [0, 80], sizes = [1, 176], strides = [1, 1]} : vector<1x256xf32> to vector<1x176xf32>
    %847 = tpu.concatenate %846, %845 in 1 : vector<1x176xf32>, vector<1x80xf32> -> vector<1x256xf32>
    %848 = vector.extract_strided_slice %606 {offsets = [4, 8], sizes = [1, 1], strides = [1, 1]} : vector<5x9xf32> to vector<1x1xf32>
    %849 = vector.broadcast %848 : vector<1x1xf32> to vector<1x256xf32>
    %850 = arith.mulf %847, %849 : vector<1x256xf32>
    %851 = arith.addf %844, %850 : vector<1x256xf32>
    %c2_198 = arith.constant 2 : index
    %c4_199 = arith.constant 4 : index
    %c0_200 = arith.constant 0 : index
    %852 = vector.load %arg14[%c2_198, %c4_199, %c0_200] : memref<4x5x256xf32, #tpu.memory_space<vmem>>, vector<1x1x256xf32>
    %853 = vector.shape_cast %852 : vector<1x1x256xf32> to vector<1x256xf32>
    %854 = vector.shape_cast %851 : vector<1x256xf32> to vector<1x1x256xf32>
    tpu.vector_store %arg14[%c2_198, %c4_199, %c0_200], %854 {strides = array<i32>} : memref<4x5x256xf32, #tpu.memory_space<vmem>>, vector<1x1x256xf32>,
    %c0_201 = arith.constant 0 : index
    %c3 = arith.constant 3 : index
    %c0_202 = arith.constant 0 : index
    %c0_203 = arith.constant 0 : index
    %855 = vector.load %arg1[%c0_201, %c3, %c0_202, %c0_203] : memref<1x4x2x256xf32, #tpu.memory_space<vmem>>, vector<1x1x2x256xf32>
    %856 = vector.shape_cast %855 : vector<1x1x2x256xf32> to vector<2x256xf32>
    %c0_204 = arith.constant 0 : index
    %c3_205 = arith.constant 3 : index
    %c0_206 = arith.constant 0 : index
    %c0_207 = arith.constant 0 : index
    %857 = vector.load %arg2[%c0_204, %c3_205, %c0_206, %c0_207] : memref<1x4x2x256xf32, #tpu.memory_space<vmem>>, vector<1x1x2x256xf32>
    %858 = vector.shape_cast %857 : vector<1x1x2x256xf32> to vector<2x256xf32>
    %cst_208 = arith.constant dense<0.000000e+00> : vector<256xf32>
    %859 = vector.multi_reduction <add>, %856, %cst_208 [0] : vector<2x256xf32> to vector<256xf32>
    %860 = vector.shape_cast %859 : vector<256xf32> to vector<1x256xf32>
    %cst_209 = arith.constant dense<0.000000e+00> : vector<256xf32>
    %861 = vector.multi_reduction <add>, %858, %cst_209 [0] : vector<2x256xf32> to vector<256xf32>
    %862 = vector.shape_cast %861 : vector<256xf32> to vector<1x256xf32>
    %863 = arith.addf %860, %862 : vector<1x256xf32>
    %864 = arith.addf %863, %2 : vector<1x256xf32>
    %865 = arith.mulf %856, %856 : vector<2x256xf32>
    %cst_210 = arith.constant dense<0.000000e+00> : vector<256xf32>
    %866 = vector.multi_reduction <add>, %865, %cst_210 [0] : vector<2x256xf32> to vector<256xf32>
    %867 = vector.shape_cast %866 : vector<256xf32> to vector<1x256xf32>
    %868 = arith.mulf %858, %858 : vector<2x256xf32>
    %cst_211 = arith.constant dense<0.000000e+00> : vector<256xf32>
    %869 = vector.multi_reduction <add>, %868, %cst_211 [0] : vector<2x256xf32> to vector<256xf32>
    %870 = vector.shape_cast %869 : vector<256xf32> to vector<1x256xf32>
    %871 = arith.addf %867, %870 : vector<1x256xf32>
    %872 = arith.mulf %2, %2 : vector<1x256xf32>
    %873 = arith.addf %871, %872 : vector<1x256xf32>
    %cst_212 = arith.constant 2.000000e-01 : f32
    %874 = vector.broadcast %cst_212 : f32 to vector<1x256xf32>
    %875 = arith.mulf %864, %874 : vector<1x256xf32>
    %cst_213 = arith.constant 2.000000e-01 : f32
    %876 = vector.broadcast %cst_213 : f32 to vector<1x256xf32>
    %877 = arith.mulf %873, %876 : vector<1x256xf32>
    %878 = arith.mulf %875, %875 : vector<1x256xf32>
    %879 = arith.subf %877, %878 : vector<1x256xf32>
    %cst_214 = arith.constant 0.000000e+00 : f32
    %880 = vector.broadcast %cst_214 : f32 to vector<1x256xf32>
    %881 = arith.maximumf %879, %880 : vector<1x256xf32>
    %cst_215 = arith.constant 9.99999997E-7 : f32
    %882 = vector.broadcast %cst_215 : f32 to vector<1x256xf32>
    %883 = arith.addf %881, %882 : vector<1x256xf32>
    %884 = math.rsqrt %883 : vector<1x256xf32>
    %c3_216 = arith.constant 3 : index
    %c0_217 = arith.constant 0 : index
    %c0_218 = arith.constant 0 : index
    %885 = vector.load %arg5[%c3_216, %c0_217, %c0_218] : memref<4x5x1xf32, #tpu.memory_space<vmem>>, vector<1x5x1xf32>
    %886 = vector.shape_cast %885 : vector<1x5x1xf32> to vector<5x1xf32>
    %c3_219 = arith.constant 3 : index
    %c0_220 = arith.constant 0 : index
    %c0_221 = arith.constant 0 : index
    %887 = vector.load %arg6[%c3_219, %c0_220, %c0_221] : memref<4x5x1xf32, #tpu.memory_space<vmem>>, vector<1x5x1xf32>
    %888 = vector.shape_cast %887 : vector<1x5x1xf32> to vector<5x1xf32>
    %c3_222 = arith.constant 3 : index
    %c0_223 = arith.constant 0 : index
    %c0_224 = arith.constant 0 : index
    %889 = vector.load %arg7[%c3_222, %c0_223, %c0_224] : memref<4x5x9xf32, #tpu.memory_space<vmem>>, vector<1x5x9xf32>
    %890 = vector.shape_cast %889 : vector<1x5x9xf32> to vector<5x9xf32>
    %c3_225 = arith.constant 3 : index
    %c0_226 = arith.constant 0 : index
    %c0_227 = arith.constant 0 : index
    %891 = vector.load %arg8[%c3_225, %c0_226, %c0_227] : memref<4x5x1xf32, #tpu.memory_space<vmem>>, vector<1x5x1xf32>
    %892 = vector.shape_cast %891 : vector<1x5x1xf32> to vector<5x1xf32>
    %cst_228 = arith.constant 7.000000e+00 : f32
    %893 = vector.broadcast %cst_228 : f32 to vector<1x256xf32>
    %894 = arith.cmpf oge, %0, %893 : vector<1x256xf32>
    %cst_229 = arith.constant 1.000000e+00 : f32
    %cst_230 = arith.constant 0.000000e+00 : f32
    %895 = vector.broadcast %cst_229 : f32 to vector<1x256xf32>
    %896 = vector.broadcast %cst_230 : f32 to vector<1x256xf32>
    %897 = arith.select %894, %895, %896 : vector<1x256xi1>, vector<1x256xf32>
    %cst_231 = arith.constant 9.000000e+00 : f32
    %898 = vector.broadcast %cst_231 : f32 to vector<1x256xf32>
    %899 = arith.cmpf olt, %0, %898 : vector<1x256xf32>
    %cst_232 = arith.constant 1.000000e+00 : f32
    %cst_233 = arith.constant 0.000000e+00 : f32
    %900 = vector.broadcast %cst_232 : f32 to vector<1x256xf32>
    %901 = vector.broadcast %cst_233 : f32 to vector<1x256xf32>
    %902 = arith.select %899, %900, %901 : vector<1x256xi1>, vector<1x256xf32>
    %903 = vector.extract_strided_slice %886 {offsets = [0, 0], sizes = [2, 1], strides = [1, 1]} : vector<5x1xf32> to vector<2x1xf32>
    %904 = vector.extract_strided_slice %888 {offsets = [0, 0], sizes = [2, 1], strides = [1, 1]} : vector<5x1xf32> to vector<2x1xf32>
    %905 = vector.broadcast %875 : vector<1x256xf32> to vector<2x256xf32>
    %906 = arith.subf %856, %905 : vector<2x256xf32>
    %907 = vector.broadcast %884 : vector<1x256xf32> to vector<2x256xf32>
    %908 = arith.mulf %906, %907 : vector<2x256xf32>
    %909 = vector.broadcast %903 : vector<2x1xf32> to vector<2x256xf32>
    %910 = arith.mulf %908, %909 : vector<2x256xf32>
    %911 = vector.broadcast %904 : vector<2x1xf32> to vector<2x256xf32>
    %912 = arith.addf %910, %911 : vector<2x256xf32>
    %913 = vector.extract_strided_slice %892 {offsets = [0, 0], sizes = [2, 1], strides = [1, 1]} : vector<5x1xf32> to vector<2x1xf32>
    %914 = vector.shape_cast %913 : vector<2x1xf32> to vector<2x1xf32>
    %915 = vector.broadcast %914 : vector<2x1xf32> to vector<2x256xf32>
    %cst_234 = arith.constant 0.000000e+00 : f32
    %916 = vector.broadcast %cst_234 : f32 to vector<2x7xf32>
    %917 = vector.extract_strided_slice %912 {offsets = [0, 0], sizes = [2, 249], strides = [1, 1]} : vector<2x256xf32> to vector<2x249xf32>
    %918 = tpu.concatenate %916, %917 in 1 : vector<2x7xf32>, vector<2x249xf32> -> vector<2x256xf32>
    %919 = vector.broadcast %897 : vector<1x256xf32> to vector<2x256xf32>
    %920 = arith.mulf %918, %919 : vector<2x256xf32>
    %cst_235 = arith.constant 0.000000e+00 : f32
    %921 = vector.broadcast %cst_235 : f32 to vector<2x112xf32>
    %922 = vector.extract_strided_slice %920 {offsets = [0, 0], sizes = [2, 144], strides = [1, 1]} : vector<2x256xf32> to vector<2x144xf32>
    %923 = tpu.concatenate %921, %922 in 1 : vector<2x112xf32>, vector<2x144xf32> -> vector<2x256xf32>
    %924 = vector.extract_strided_slice %890 {offsets = [0, 0], sizes = [2, 1], strides = [1, 1]} : vector<5x9xf32> to vector<2x1xf32>
    %925 = vector.broadcast %924 : vector<2x1xf32> to vector<2x256xf32>
    %926 = arith.mulf %923, %925 : vector<2x256xf32>
    %927 = arith.addf %915, %926 : vector<2x256xf32>
    %928 = vector.extract_strided_slice %890 {offsets = [0, 3], sizes = [2, 1], strides = [1, 1]} : vector<5x9xf32> to vector<2x1xf32>
    %929 = vector.broadcast %928 : vector<2x1xf32> to vector<2x256xf32>
    %930 = arith.mulf %920, %929 : vector<2x256xf32>
    %931 = arith.addf %927, %930 : vector<2x256xf32>
    %cst_236 = arith.constant 0.000000e+00 : f32
    %932 = vector.broadcast %cst_236 : f32 to vector<2x112xf32>
    %933 = vector.extract_strided_slice %920 {offsets = [0, 112], sizes = [2, 144], strides = [1, 1]} : vector<2x256xf32> to vector<2x144xf32>
    %934 = tpu.concatenate %933, %932 in 1 : vector<2x144xf32>, vector<2x112xf32> -> vector<2x256xf32>
    %935 = vector.extract_strided_slice %890 {offsets = [0, 6], sizes = [2, 1], strides = [1, 1]} : vector<5x9xf32> to vector<2x1xf32>
    %936 = vector.broadcast %935 : vector<2x1xf32> to vector<2x256xf32>
    %937 = arith.mulf %934, %936 : vector<2x256xf32>
    %938 = arith.addf %931, %937 : vector<2x256xf32>
    %cst_237 = arith.constant 0.000000e+00 : f32
    %939 = vector.broadcast %cst_237 : f32 to vector<2x112xf32>
    %940 = vector.extract_strided_slice %912 {offsets = [0, 0], sizes = [2, 144], strides = [1, 1]} : vector<2x256xf32> to vector<2x144xf32>
    %941 = tpu.concatenate %939, %940 in 1 : vector<2x112xf32>, vector<2x144xf32> -> vector<2x256xf32>
    %942 = vector.extract_strided_slice %890 {offsets = [0, 1], sizes = [2, 1], strides = [1, 1]} : vector<5x9xf32> to vector<2x1xf32>
    %943 = vector.broadcast %942 : vector<2x1xf32> to vector<2x256xf32>
    %944 = arith.mulf %941, %943 : vector<2x256xf32>
    %945 = arith.addf %938, %944 : vector<2x256xf32>
    %946 = vector.extract_strided_slice %890 {offsets = [0, 4], sizes = [2, 1], strides = [1, 1]} : vector<5x9xf32> to vector<2x1xf32>
    %947 = vector.broadcast %946 : vector<2x1xf32> to vector<2x256xf32>
    %948 = arith.mulf %912, %947 : vector<2x256xf32>
    %949 = arith.addf %945, %948 : vector<2x256xf32>
    %cst_238 = arith.constant 0.000000e+00 : f32
    %950 = vector.broadcast %cst_238 : f32 to vector<2x112xf32>
    %951 = vector.extract_strided_slice %912 {offsets = [0, 112], sizes = [2, 144], strides = [1, 1]} : vector<2x256xf32> to vector<2x144xf32>
    %952 = tpu.concatenate %951, %950 in 1 : vector<2x144xf32>, vector<2x112xf32> -> vector<2x256xf32>
    %953 = vector.extract_strided_slice %890 {offsets = [0, 7], sizes = [2, 1], strides = [1, 1]} : vector<5x9xf32> to vector<2x1xf32>
    %954 = vector.broadcast %953 : vector<2x1xf32> to vector<2x256xf32>
    %955 = arith.mulf %952, %954 : vector<2x256xf32>
    %956 = arith.addf %949, %955 : vector<2x256xf32>
    %cst_239 = arith.constant 0.000000e+00 : f32
    %957 = vector.broadcast %cst_239 : f32 to vector<2x7xf32>
    %958 = vector.extract_strided_slice %912 {offsets = [0, 7], sizes = [2, 249], strides = [1, 1]} : vector<2x256xf32> to vector<2x249xf32>
    %959 = tpu.concatenate %958, %957 in 1 : vector<2x249xf32>, vector<2x7xf32> -> vector<2x256xf32>
    %960 = vector.broadcast %902 : vector<1x256xf32> to vector<2x256xf32>
    %961 = arith.mulf %959, %960 : vector<2x256xf32>
    %cst_240 = arith.constant 0.000000e+00 : f32
    %962 = vector.broadcast %cst_240 : f32 to vector<2x112xf32>
    %963 = vector.extract_strided_slice %961 {offsets = [0, 0], sizes = [2, 144], strides = [1, 1]} : vector<2x256xf32> to vector<2x144xf32>
    %964 = tpu.concatenate %962, %963 in 1 : vector<2x112xf32>, vector<2x144xf32> -> vector<2x256xf32>
    %965 = vector.extract_strided_slice %890 {offsets = [0, 2], sizes = [2, 1], strides = [1, 1]} : vector<5x9xf32> to vector<2x1xf32>
    %966 = vector.broadcast %965 : vector<2x1xf32> to vector<2x256xf32>
    %967 = arith.mulf %964, %966 : vector<2x256xf32>
    %968 = arith.addf %956, %967 : vector<2x256xf32>
    %969 = vector.extract_strided_slice %890 {offsets = [0, 5], sizes = [2, 1], strides = [1, 1]} : vector<5x9xf32> to vector<2x1xf32>
    %970 = vector.broadcast %969 : vector<2x1xf32> to vector<2x256xf32>
    %971 = arith.mulf %961, %970 : vector<2x256xf32>
    %972 = arith.addf %968, %971 : vector<2x256xf32>
    %cst_241 = arith.constant 0.000000e+00 : f32
    %973 = vector.broadcast %cst_241 : f32 to vector<2x112xf32>
    %974 = vector.extract_strided_slice %961 {offsets = [0, 112], sizes = [2, 144], strides = [1, 1]} : vector<2x256xf32> to vector<2x144xf32>
    %975 = tpu.concatenate %974, %973 in 1 : vector<2x144xf32>, vector<2x112xf32> -> vector<2x256xf32>
    %976 = vector.extract_strided_slice %890 {offsets = [0, 8], sizes = [2, 1], strides = [1, 1]} : vector<5x9xf32> to vector<2x1xf32>
    %977 = vector.broadcast %976 : vector<2x1xf32> to vector<2x256xf32>
    %978 = arith.mulf %975, %977 : vector<2x256xf32>
    %979 = arith.addf %972, %978 : vector<2x256xf32>
    %c3_242 = arith.constant 3 : index
    %c0_243 = arith.constant 0 : index
    %c0_244 = arith.constant 0 : index
    %980 = vector.load %arg14[%c3_242, %c0_243, %c0_244] : memref<4x5x256xf32, #tpu.memory_space<vmem>>, vector<1x2x256xf32>
    %981 = vector.shape_cast %980 : vector<1x2x256xf32> to vector<2x256xf32>
    %982 = vector.shape_cast %979 : vector<2x256xf32> to vector<1x2x256xf32>
    tpu.vector_store %arg14[%c3_242, %c0_243, %c0_244], %982 {strides = array<i32>} : memref<4x5x256xf32, #tpu.memory_space<vmem>>, vector<1x2x256xf32>,
    %983 = vector.extract_strided_slice %886 {offsets = [2, 0], sizes = [2, 1], strides = [1, 1]} : vector<5x1xf32> to vector<2x1xf32>
    %984 = vector.extract_strided_slice %888 {offsets = [2, 0], sizes = [2, 1], strides = [1, 1]} : vector<5x1xf32> to vector<2x1xf32>
    %985 = vector.broadcast %875 : vector<1x256xf32> to vector<2x256xf32>
    %986 = arith.subf %858, %985 : vector<2x256xf32>
    %987 = vector.broadcast %884 : vector<1x256xf32> to vector<2x256xf32>
    %988 = arith.mulf %986, %987 : vector<2x256xf32>
    %989 = vector.broadcast %983 : vector<2x1xf32> to vector<2x256xf32>
    %990 = arith.mulf %988, %989 : vector<2x256xf32>
    %991 = vector.broadcast %984 : vector<2x1xf32> to vector<2x256xf32>
    %992 = arith.addf %990, %991 : vector<2x256xf32>
    %993 = vector.extract_strided_slice %892 {offsets = [2, 0], sizes = [2, 1], strides = [1, 1]} : vector<5x1xf32> to vector<2x1xf32>
    %994 = vector.shape_cast %993 : vector<2x1xf32> to vector<2x1xf32>
    %995 = vector.broadcast %994 : vector<2x1xf32> to vector<2x256xf32>
    %cst_245 = arith.constant 0.000000e+00 : f32
    %996 = vector.broadcast %cst_245 : f32 to vector<2x7xf32>
    %997 = vector.extract_strided_slice %992 {offsets = [0, 0], sizes = [2, 249], strides = [1, 1]} : vector<2x256xf32> to vector<2x249xf32>
    %998 = tpu.concatenate %996, %997 in 1 : vector<2x7xf32>, vector<2x249xf32> -> vector<2x256xf32>
    %999 = vector.broadcast %897 : vector<1x256xf32> to vector<2x256xf32>
    %1000 = arith.mulf %998, %999 : vector<2x256xf32>
    %cst_246 = arith.constant 0.000000e+00 : f32
    %1001 = vector.broadcast %cst_246 : f32 to vector<2x112xf32>
    %1002 = vector.extract_strided_slice %1000 {offsets = [0, 0], sizes = [2, 144], strides = [1, 1]} : vector<2x256xf32> to vector<2x144xf32>
    %1003 = tpu.concatenate %1001, %1002 in 1 : vector<2x112xf32>, vector<2x144xf32> -> vector<2x256xf32>
    %1004 = vector.extract_strided_slice %890 {offsets = [2, 0], sizes = [2, 1], strides = [1, 1]} : vector<5x9xf32> to vector<2x1xf32>
    %1005 = vector.broadcast %1004 : vector<2x1xf32> to vector<2x256xf32>
    %1006 = arith.mulf %1003, %1005 : vector<2x256xf32>
    %1007 = arith.addf %995, %1006 : vector<2x256xf32>
    %1008 = vector.extract_strided_slice %890 {offsets = [2, 3], sizes = [2, 1], strides = [1, 1]} : vector<5x9xf32> to vector<2x1xf32>
    %1009 = vector.broadcast %1008 : vector<2x1xf32> to vector<2x256xf32>
    %1010 = arith.mulf %1000, %1009 : vector<2x256xf32>
    %1011 = arith.addf %1007, %1010 : vector<2x256xf32>
    %cst_247 = arith.constant 0.000000e+00 : f32
    %1012 = vector.broadcast %cst_247 : f32 to vector<2x112xf32>
    %1013 = vector.extract_strided_slice %1000 {offsets = [0, 112], sizes = [2, 144], strides = [1, 1]} : vector<2x256xf32> to vector<2x144xf32>
    %1014 = tpu.concatenate %1013, %1012 in 1 : vector<2x144xf32>, vector<2x112xf32> -> vector<2x256xf32>
    %1015 = vector.extract_strided_slice %890 {offsets = [2, 6], sizes = [2, 1], strides = [1, 1]} : vector<5x9xf32> to vector<2x1xf32>
    %1016 = vector.broadcast %1015 : vector<2x1xf32> to vector<2x256xf32>
    %1017 = arith.mulf %1014, %1016 : vector<2x256xf32>
    %1018 = arith.addf %1011, %1017 : vector<2x256xf32>
    %cst_248 = arith.constant 0.000000e+00 : f32
    %1019 = vector.broadcast %cst_248 : f32 to vector<2x112xf32>
    %1020 = vector.extract_strided_slice %992 {offsets = [0, 0], sizes = [2, 144], strides = [1, 1]} : vector<2x256xf32> to vector<2x144xf32>
    %1021 = tpu.concatenate %1019, %1020 in 1 : vector<2x112xf32>, vector<2x144xf32> -> vector<2x256xf32>
    %1022 = vector.extract_strided_slice %890 {offsets = [2, 1], sizes = [2, 1], strides = [1, 1]} : vector<5x9xf32> to vector<2x1xf32>
    %1023 = vector.broadcast %1022 : vector<2x1xf32> to vector<2x256xf32>
    %1024 = arith.mulf %1021, %1023 : vector<2x256xf32>
    %1025 = arith.addf %1018, %1024 : vector<2x256xf32>
    %1026 = vector.extract_strided_slice %890 {offsets = [2, 4], sizes = [2, 1], strides = [1, 1]} : vector<5x9xf32> to vector<2x1xf32>
    %1027 = vector.broadcast %1026 : vector<2x1xf32> to vector<2x256xf32>
    %1028 = arith.mulf %992, %1027 : vector<2x256xf32>
    %1029 = arith.addf %1025, %1028 : vector<2x256xf32>
    %cst_249 = arith.constant 0.000000e+00 : f32
    %1030 = vector.broadcast %cst_249 : f32 to vector<2x112xf32>
    %1031 = vector.extract_strided_slice %992 {offsets = [0, 112], sizes = [2, 144], strides = [1, 1]} : vector<2x256xf32> to vector<2x144xf32>
    %1032 = tpu.concatenate %1031, %1030 in 1 : vector<2x144xf32>, vector<2x112xf32> -> vector<2x256xf32>
    %1033 = vector.extract_strided_slice %890 {offsets = [2, 7], sizes = [2, 1], strides = [1, 1]} : vector<5x9xf32> to vector<2x1xf32>
    %1034 = vector.broadcast %1033 : vector<2x1xf32> to vector<2x256xf32>
    %1035 = arith.mulf %1032, %1034 : vector<2x256xf32>
    %1036 = arith.addf %1029, %1035 : vector<2x256xf32>
    %cst_250 = arith.constant 0.000000e+00 : f32
    %1037 = vector.broadcast %cst_250 : f32 to vector<2x7xf32>
    %1038 = vector.extract_strided_slice %992 {offsets = [0, 7], sizes = [2, 249], strides = [1, 1]} : vector<2x256xf32> to vector<2x249xf32>
    %1039 = tpu.concatenate %1038, %1037 in 1 : vector<2x249xf32>, vector<2x7xf32> -> vector<2x256xf32>
    %1040 = vector.broadcast %902 : vector<1x256xf32> to vector<2x256xf32>
    %1041 = arith.mulf %1039, %1040 : vector<2x256xf32>
    %cst_251 = arith.constant 0.000000e+00 : f32
    %1042 = vector.broadcast %cst_251 : f32 to vector<2x112xf32>
    %1043 = vector.extract_strided_slice %1041 {offsets = [0, 0], sizes = [2, 144], strides = [1, 1]} : vector<2x256xf32> to vector<2x144xf32>
    %1044 = tpu.concatenate %1042, %1043 in 1 : vector<2x112xf32>, vector<2x144xf32> -> vector<2x256xf32>
    %1045 = vector.extract_strided_slice %890 {offsets = [2, 2], sizes = [2, 1], strides = [1, 1]} : vector<5x9xf32> to vector<2x1xf32>
    %1046 = vector.broadcast %1045 : vector<2x1xf32> to vector<2x256xf32>
    %1047 = arith.mulf %1044, %1046 : vector<2x256xf32>
    %1048 = arith.addf %1036, %1047 : vector<2x256xf32>
    %1049 = vector.extract_strided_slice %890 {offsets = [2, 5], sizes = [2, 1], strides = [1, 1]} : vector<5x9xf32> to vector<2x1xf32>
    %1050 = vector.broadcast %1049 : vector<2x1xf32> to vector<2x256xf32>
    %1051 = arith.mulf %1041, %1050 : vector<2x256xf32>
    %1052 = arith.addf %1048, %1051 : vector<2x256xf32>
    %cst_252 = arith.constant 0.000000e+00 : f32
    %1053 = vector.broadcast %cst_252 : f32 to vector<2x112xf32>
    %1054 = vector.extract_strided_slice %1041 {offsets = [0, 112], sizes = [2, 144], strides = [1, 1]} : vector<2x256xf32> to vector<2x144xf32>
    %1055 = tpu.concatenate %1054, %1053 in 1 : vector<2x144xf32>, vector<2x112xf32> -> vector<2x256xf32>
    %1056 = vector.extract_strided_slice %890 {offsets = [2, 8], sizes = [2, 1], strides = [1, 1]} : vector<5x9xf32> to vector<2x1xf32>
    %1057 = vector.broadcast %1056 : vector<2x1xf32> to vector<2x256xf32>
    %1058 = arith.mulf %1055, %1057 : vector<2x256xf32>
    %1059 = arith.addf %1052, %1058 : vector<2x256xf32>
    %c3_253 = arith.constant 3 : index
    %c2_254 = arith.constant 2 : index
    %c0_255 = arith.constant 0 : index
    %1060 = vector.load %arg14[%c3_253, %c2_254, %c0_255] : memref<4x5x256xf32, #tpu.memory_space<vmem>>, vector<1x2x256xf32>
    %1061 = vector.shape_cast %1060 : vector<1x2x256xf32> to vector<2x256xf32>
    %1062 = vector.shape_cast %1059 : vector<2x256xf32> to vector<1x2x256xf32>
    tpu.vector_store %arg14[%c3_253, %c2_254, %c0_255], %1062 {strides = array<i32>} : memref<4x5x256xf32, #tpu.memory_space<vmem>>, vector<1x2x256xf32>,
    %1063 = vector.extract_strided_slice %886 {offsets = [4, 0], sizes = [1, 1], strides = [1, 1]} : vector<5x1xf32> to vector<1x1xf32>
    %1064 = vector.extract_strided_slice %888 {offsets = [4, 0], sizes = [1, 1], strides = [1, 1]} : vector<5x1xf32> to vector<1x1xf32>
    %1065 = arith.subf %2, %875 : vector<1x256xf32>
    %1066 = arith.mulf %1065, %884 : vector<1x256xf32>
    %1067 = vector.broadcast %1063 : vector<1x1xf32> to vector<1x256xf32>
    %1068 = arith.mulf %1066, %1067 : vector<1x256xf32>
    %1069 = vector.broadcast %1064 : vector<1x1xf32> to vector<1x256xf32>
    %1070 = arith.addf %1068, %1069 : vector<1x256xf32>
    %1071 = vector.extract_strided_slice %892 {offsets = [4, 0], sizes = [1, 1], strides = [1, 1]} : vector<5x1xf32> to vector<1x1xf32>
    %1072 = vector.shape_cast %1071 : vector<1x1xf32> to vector<1x1xf32>
    %1073 = vector.broadcast %1072 : vector<1x1xf32> to vector<1x256xf32>
    %cst_256 = arith.constant 0.000000e+00 : f32
    %1074 = vector.broadcast %cst_256 : f32 to vector<1x7xf32>
    %1075 = vector.extract_strided_slice %1070 {offsets = [0, 0], sizes = [1, 249], strides = [1, 1]} : vector<1x256xf32> to vector<1x249xf32>
    %1076 = tpu.concatenate %1074, %1075 in 1 : vector<1x7xf32>, vector<1x249xf32> -> vector<1x256xf32>
    %1077 = arith.mulf %1076, %897 : vector<1x256xf32>
    %cst_257 = arith.constant 0.000000e+00 : f32
    %1078 = vector.broadcast %cst_257 : f32 to vector<1x112xf32>
    %1079 = vector.extract_strided_slice %1077 {offsets = [0, 0], sizes = [1, 144], strides = [1, 1]} : vector<1x256xf32> to vector<1x144xf32>
    %1080 = tpu.concatenate %1078, %1079 in 1 : vector<1x112xf32>, vector<1x144xf32> -> vector<1x256xf32>
    %1081 = vector.extract_strided_slice %890 {offsets = [4, 0], sizes = [1, 1], strides = [1, 1]} : vector<5x9xf32> to vector<1x1xf32>
    %1082 = vector.broadcast %1081 : vector<1x1xf32> to vector<1x256xf32>
    %1083 = arith.mulf %1080, %1082 : vector<1x256xf32>
    %1084 = arith.addf %1073, %1083 : vector<1x256xf32>
    %1085 = vector.extract_strided_slice %890 {offsets = [4, 3], sizes = [1, 1], strides = [1, 1]} : vector<5x9xf32> to vector<1x1xf32>
    %1086 = vector.broadcast %1085 : vector<1x1xf32> to vector<1x256xf32>
    %1087 = arith.mulf %1077, %1086 : vector<1x256xf32>
    %1088 = arith.addf %1084, %1087 : vector<1x256xf32>
    %cst_258 = arith.constant 0.000000e+00 : f32
    %1089 = vector.broadcast %cst_258 : f32 to vector<1x112xf32>
    %1090 = vector.extract_strided_slice %1077 {offsets = [0, 112], sizes = [1, 144], strides = [1, 1]} : vector<1x256xf32> to vector<1x144xf32>
    %1091 = tpu.concatenate %1090, %1089 in 1 : vector<1x144xf32>, vector<1x112xf32> -> vector<1x256xf32>
    %1092 = vector.extract_strided_slice %890 {offsets = [4, 6], sizes = [1, 1], strides = [1, 1]} : vector<5x9xf32> to vector<1x1xf32>
    %1093 = vector.broadcast %1092 : vector<1x1xf32> to vector<1x256xf32>
    %1094 = arith.mulf %1091, %1093 : vector<1x256xf32>
    %1095 = arith.addf %1088, %1094 : vector<1x256xf32>
    %cst_259 = arith.constant 0.000000e+00 : f32
    %1096 = vector.broadcast %cst_259 : f32 to vector<1x112xf32>
    %1097 = vector.extract_strided_slice %1070 {offsets = [0, 0], sizes = [1, 144], strides = [1, 1]} : vector<1x256xf32> to vector<1x144xf32>
    %1098 = tpu.concatenate %1096, %1097 in 1 : vector<1x112xf32>, vector<1x144xf32> -> vector<1x256xf32>
    %1099 = vector.extract_strided_slice %890 {offsets = [4, 1], sizes = [1, 1], strides = [1, 1]} : vector<5x9xf32> to vector<1x1xf32>
    %1100 = vector.broadcast %1099 : vector<1x1xf32> to vector<1x256xf32>
    %1101 = arith.mulf %1098, %1100 : vector<1x256xf32>
    %1102 = arith.addf %1095, %1101 : vector<1x256xf32>
    %1103 = vector.extract_strided_slice %890 {offsets = [4, 4], sizes = [1, 1], strides = [1, 1]} : vector<5x9xf32> to vector<1x1xf32>
    %1104 = vector.broadcast %1103 : vector<1x1xf32> to vector<1x256xf32>
    %1105 = arith.mulf %1070, %1104 : vector<1x256xf32>
    %1106 = arith.addf %1102, %1105 : vector<1x256xf32>
    %cst_260 = arith.constant 0.000000e+00 : f32
    %1107 = vector.broadcast %cst_260 : f32 to vector<1x112xf32>
    %1108 = vector.extract_strided_slice %1070 {offsets = [0, 112], sizes = [1, 144], strides = [1, 1]} : vector<1x256xf32> to vector<1x144xf32>
    %1109 = tpu.concatenate %1108, %1107 in 1 : vector<1x144xf32>, vector<1x112xf32> -> vector<1x256xf32>
    %1110 = vector.extract_strided_slice %890 {offsets = [4, 7], sizes = [1, 1], strides = [1, 1]} : vector<5x9xf32> to vector<1x1xf32>
    %1111 = vector.broadcast %1110 : vector<1x1xf32> to vector<1x256xf32>
    %1112 = arith.mulf %1109, %1111 : vector<1x256xf32>
    %1113 = arith.addf %1106, %1112 : vector<1x256xf32>
    %cst_261 = arith.constant 0.000000e+00 : f32
    %1114 = vector.broadcast %cst_261 : f32 to vector<1x7xf32>
    %1115 = vector.extract_strided_slice %1070 {offsets = [0, 7], sizes = [1, 249], strides = [1, 1]} : vector<1x256xf32> to vector<1x249xf32>
    %1116 = tpu.concatenate %1115, %1114 in 1 : vector<1x249xf32>, vector<1x7xf32> -> vector<1x256xf32>
    %1117 = arith.mulf %1116, %902 : vector<1x256xf32>
    %cst_262 = arith.constant 0.000000e+00 : f32
    %1118 = vector.broadcast %cst_262 : f32 to vector<1x112xf32>
    %1119 = vector.extract_strided_slice %1117 {offsets = [0, 0], sizes = [1, 144], strides = [1, 1]} : vector<1x256xf32> to vector<1x144xf32>
    %1120 = tpu.concatenate %1118, %1119 in 1 : vector<1x112xf32>, vector<1x144xf32> -> vector<1x256xf32>
    %1121 = vector.extract_strided_slice %890 {offsets = [4, 2], sizes = [1, 1], strides = [1, 1]} : vector<5x9xf32> to vector<1x1xf32>
    %1122 = vector.broadcast %1121 : vector<1x1xf32> to vector<1x256xf32>
    %1123 = arith.mulf %1120, %1122 : vector<1x256xf32>
    %1124 = arith.addf %1113, %1123 : vector<1x256xf32>
    %1125 = vector.extract_strided_slice %890 {offsets = [4, 5], sizes = [1, 1], strides = [1, 1]} : vector<5x9xf32> to vector<1x1xf32>
    %1126 = vector.broadcast %1125 : vector<1x1xf32> to vector<1x256xf32>
    %1127 = arith.mulf %1117, %1126 : vector<1x256xf32>
    %1128 = arith.addf %1124, %1127 : vector<1x256xf32>
    %cst_263 = arith.constant 0.000000e+00 : f32
    %1129 = vector.broadcast %cst_263 : f32 to vector<1x112xf32>
    %1130 = vector.extract_strided_slice %1117 {offsets = [0, 112], sizes = [1, 144], strides = [1, 1]} : vector<1x256xf32> to vector<1x144xf32>
    %1131 = tpu.concatenate %1130, %1129 in 1 : vector<1x144xf32>, vector<1x112xf32> -> vector<1x256xf32>
    %1132 = vector.extract_strided_slice %890 {offsets = [4, 8], sizes = [1, 1], strides = [1, 1]} : vector<5x9xf32> to vector<1x1xf32>
    %1133 = vector.broadcast %1132 : vector<1x1xf32> to vector<1x256xf32>
    %1134 = arith.mulf %1131, %1133 : vector<1x256xf32>
    %1135 = arith.addf %1128, %1134 : vector<1x256xf32>
    %c3_264 = arith.constant 3 : index
    %c4_265 = arith.constant 4 : index
    %c0_266 = arith.constant 0 : index
    %1136 = vector.load %arg14[%c3_264, %c4_265, %c0_266] : memref<4x5x256xf32, #tpu.memory_space<vmem>>, vector<1x1x256xf32>
    %1137 = vector.shape_cast %1136 : vector<1x1x256xf32> to vector<1x256xf32>
    %1138 = vector.shape_cast %1135 : vector<1x256xf32> to vector<1x1x256xf32>
    tpu.vector_store %arg14[%c3_264, %c4_265, %c0_266], %1138 {strides = array<i32>} : memref<4x5x256xf32, #tpu.memory_space<vmem>>, vector<1x1x256xf32>,
    %cst_267 = arith.constant 0.000000e+00 : f32
    %1139 = vector.broadcast %cst_267 : f32 to vector<1x256xf32>
    %cst_268 = arith.constant 0.000000e+00 : f32
    %1140 = vector.broadcast %cst_268 : f32 to vector<1x256xf32>
    %c0_269 = arith.constant 0 : index
    %c0_270 = arith.constant 0 : index
    %c0_271 = arith.constant 0 : index
    %1141 = vector.load %arg14[%c0_269, %c0_270, %c0_271] : memref<4x5x256xf32, #tpu.memory_space<vmem>>, vector<1x5x256xf32>
    %1142 = vector.shape_cast %1141 : vector<1x5x256xf32> to vector<5x256xf32>
    %cst_272 = arith.constant dense<0.000000e+00> : vector<256xf32>
    %1143 = vector.multi_reduction <add>, %1142, %cst_272 [0] : vector<5x256xf32> to vector<256xf32>
    %1144 = vector.shape_cast %1143 : vector<256xf32> to vector<1x256xf32>
    %1145 = arith.addf %1139, %1144 : vector<1x256xf32>
    %1146 = arith.mulf %1142, %1142 : vector<5x256xf32>
    %cst_273 = arith.constant dense<0.000000e+00> : vector<256xf32>
    %1147 = vector.multi_reduction <add>, %1146, %cst_273 [0] : vector<5x256xf32> to vector<256xf32>
    %1148 = vector.shape_cast %1147 : vector<256xf32> to vector<1x256xf32>
    %1149 = arith.addf %1140, %1148 : vector<1x256xf32>
    %c1_274 = arith.constant 1 : index
    %c0_275 = arith.constant 0 : index
    %c0_276 = arith.constant 0 : index
    %1150 = vector.load %arg14[%c1_274, %c0_275, %c0_276] : memref<4x5x256xf32, #tpu.memory_space<vmem>>, vector<1x5x256xf32>
    %1151 = vector.shape_cast %1150 : vector<1x5x256xf32> to vector<5x256xf32>
    %cst_277 = arith.constant dense<0.000000e+00> : vector<256xf32>
    %1152 = vector.multi_reduction <add>, %1151, %cst_277 [0] : vector<5x256xf32> to vector<256xf32>
    %1153 = vector.shape_cast %1152 : vector<256xf32> to vector<1x256xf32>
    %1154 = arith.addf %1145, %1153 : vector<1x256xf32>
    %1155 = arith.mulf %1151, %1151 : vector<5x256xf32>
    %cst_278 = arith.constant dense<0.000000e+00> : vector<256xf32>
    %1156 = vector.multi_reduction <add>, %1155, %cst_278 [0] : vector<5x256xf32> to vector<256xf32>
    %1157 = vector.shape_cast %1156 : vector<256xf32> to vector<1x256xf32>
    %1158 = arith.addf %1149, %1157 : vector<1x256xf32>
    %c2_279 = arith.constant 2 : index
    %c0_280 = arith.constant 0 : index
    %c0_281 = arith.constant 0 : index
    %1159 = vector.load %arg14[%c2_279, %c0_280, %c0_281] : memref<4x5x256xf32, #tpu.memory_space<vmem>>, vector<1x5x256xf32>
    %1160 = vector.shape_cast %1159 : vector<1x5x256xf32> to vector<5x256xf32>
    %cst_282 = arith.constant dense<0.000000e+00> : vector<256xf32>
    %1161 = vector.multi_reduction <add>, %1160, %cst_282 [0] : vector<5x256xf32> to vector<256xf32>
    %1162 = vector.shape_cast %1161 : vector<256xf32> to vector<1x256xf32>
    %1163 = arith.addf %1154, %1162 : vector<1x256xf32>
    %1164 = arith.mulf %1160, %1160 : vector<5x256xf32>
    %cst_283 = arith.constant dense<0.000000e+00> : vector<256xf32>
    %1165 = vector.multi_reduction <add>, %1164, %cst_283 [0] : vector<5x256xf32> to vector<256xf32>
    %1166 = vector.shape_cast %1165 : vector<256xf32> to vector<1x256xf32>
    %1167 = arith.addf %1158, %1166 : vector<1x256xf32>
    %c3_284 = arith.constant 3 : index
    %c0_285 = arith.constant 0 : index
    %c0_286 = arith.constant 0 : index
    %1168 = vector.load %arg14[%c3_284, %c0_285, %c0_286] : memref<4x5x256xf32, #tpu.memory_space<vmem>>, vector<1x5x256xf32>
    %1169 = vector.shape_cast %1168 : vector<1x5x256xf32> to vector<5x256xf32>
    %cst_287 = arith.constant dense<0.000000e+00> : vector<256xf32>
    %1170 = vector.multi_reduction <add>, %1169, %cst_287 [0] : vector<5x256xf32> to vector<256xf32>
    %1171 = vector.shape_cast %1170 : vector<256xf32> to vector<1x256xf32>
    %1172 = arith.addf %1163, %1171 : vector<1x256xf32>
    %1173 = arith.mulf %1169, %1169 : vector<5x256xf32>
    %cst_288 = arith.constant dense<0.000000e+00> : vector<256xf32>
    %1174 = vector.multi_reduction <add>, %1173, %cst_288 [0] : vector<5x256xf32> to vector<256xf32>
    %1175 = vector.shape_cast %1174 : vector<256xf32> to vector<1x256xf32>
    %1176 = arith.addf %1167, %1175 : vector<1x256xf32>
    %cst_289 = arith.constant 5.000000e-02 : f32
    %1177 = vector.broadcast %cst_289 : f32 to vector<1x256xf32>
    %1178 = arith.mulf %1172, %1177 : vector<1x256xf32>
    %cst_290 = arith.constant 5.000000e-02 : f32
    %1179 = vector.broadcast %cst_290 : f32 to vector<1x256xf32>
    %1180 = arith.mulf %1176, %1179 : vector<1x256xf32>
    %1181 = arith.mulf %1178, %1178 : vector<1x256xf32>
    %1182 = arith.subf %1180, %1181 : vector<1x256xf32>
    %cst_291 = arith.constant 0.000000e+00 : f32
    %1183 = vector.broadcast %cst_291 : f32 to vector<1x256xf32>
    %1184 = arith.maximumf %1182, %1183 : vector<1x256xf32>
    %cst_292 = arith.constant 9.99999997E-7 : f32
    %1185 = vector.broadcast %cst_292 : f32 to vector<1x256xf32>
    %1186 = arith.addf %1184, %1185 : vector<1x256xf32>
    %1187 = math.rsqrt %1186 : vector<1x256xf32>
    %c0_293 = arith.constant 0 : index
    %c0_294 = arith.constant 0 : index
    %1188 = vector.load %arg12[%c0_293, %c0_294] : memref<8x1xf32, #tpu.memory_space<vmem>>, vector<8x1xf32>
    %1189 = vector.shape_cast %1188 : vector<8x1xf32> to vector<8x1xf32>
    %1190 = vector.broadcast %1189 : vector<8x1xf32> to vector<8x256xf32>
    %c0_295 = arith.constant 0 : index
    %c0_296 = arith.constant 0 : index
    %c0_297 = arith.constant 0 : index
    %1191 = vector.load %arg14[%c0_295, %c0_296, %c0_297] : memref<4x5x256xf32, #tpu.memory_space<vmem>>, vector<1x5x256xf32>
    %1192 = vector.shape_cast %1191 : vector<1x5x256xf32> to vector<5x256xf32>
    %1193 = vector.broadcast %1178 : vector<1x256xf32> to vector<5x256xf32>
    %1194 = arith.subf %1192, %1193 : vector<5x256xf32>
    %1195 = vector.broadcast %1187 : vector<1x256xf32> to vector<5x256xf32>
    %1196 = arith.mulf %1194, %1195 : vector<5x256xf32>
    %c0_298 = arith.constant 0 : index
    %c0_299 = arith.constant 0 : index
    %c0_300 = arith.constant 0 : index
    %1197 = vector.load %arg9[%c0_298, %c0_299, %c0_300] : memref<4x5x1xf32, #tpu.memory_space<vmem>>, vector<1x5x1xf32>
    %1198 = vector.shape_cast %1197 : vector<1x5x1xf32> to vector<5x1xf32>
    %1199 = vector.broadcast %1198 : vector<5x1xf32> to vector<5x256xf32>
    %1200 = arith.mulf %1196, %1199 : vector<5x256xf32>
    %c0_301 = arith.constant 0 : index
    %c0_302 = arith.constant 0 : index
    %c0_303 = arith.constant 0 : index
    %1201 = vector.load %arg10[%c0_301, %c0_302, %c0_303] : memref<4x5x1xf32, #tpu.memory_space<vmem>>, vector<1x5x1xf32>
    %1202 = vector.shape_cast %1201 : vector<1x5x1xf32> to vector<5x1xf32>
    %1203 = vector.broadcast %1202 : vector<5x1xf32> to vector<5x256xf32>
    %1204 = arith.addf %1200, %1203 : vector<5x256xf32>
    %c0_304 = arith.constant 0 : index
    %c0_305 = arith.constant 0 : index
    %c0_306 = arith.constant 0 : index
    %1205 = vector.load %arg11[%c0_304, %c0_305, %c0_306] : memref<4x8x5xf32, #tpu.memory_space<vmem>>, vector<1x8x5xf32>
    %1206 = vector.shape_cast %1205 : vector<1x8x5xf32> to vector<8x5xf32>
    %cst_307 = arith.constant dense<0.000000e+00> : vector<8x256xf32>
    %1207 = tpu.matmul %1206, %1204, %cst_307 {dimension_numbers = #tpu.dot_dimension_numbers<[1], [0], [0], [1], [0, 0, 1, 1], [], []>} : vector<8x5xf32>, vector<5x256xf32>, vector<8x256xf32> -> vector<8x256xf32>
    %1208 = arith.addf %1190, %1207 : vector<8x256xf32>
    %c1_308 = arith.constant 1 : index
    %c0_309 = arith.constant 0 : index
    %c0_310 = arith.constant 0 : index
    %1209 = vector.load %arg14[%c1_308, %c0_309, %c0_310] : memref<4x5x256xf32, #tpu.memory_space<vmem>>, vector<1x5x256xf32>
    %1210 = vector.shape_cast %1209 : vector<1x5x256xf32> to vector<5x256xf32>
    %1211 = vector.broadcast %1178 : vector<1x256xf32> to vector<5x256xf32>
    %1212 = arith.subf %1210, %1211 : vector<5x256xf32>
    %1213 = vector.broadcast %1187 : vector<1x256xf32> to vector<5x256xf32>
    %1214 = arith.mulf %1212, %1213 : vector<5x256xf32>
    %c1_311 = arith.constant 1 : index
    %c0_312 = arith.constant 0 : index
    %c0_313 = arith.constant 0 : index
    %1215 = vector.load %arg9[%c1_311, %c0_312, %c0_313] : memref<4x5x1xf32, #tpu.memory_space<vmem>>, vector<1x5x1xf32>
    %1216 = vector.shape_cast %1215 : vector<1x5x1xf32> to vector<5x1xf32>
    %1217 = vector.broadcast %1216 : vector<5x1xf32> to vector<5x256xf32>
    %1218 = arith.mulf %1214, %1217 : vector<5x256xf32>
    %c1_314 = arith.constant 1 : index
    %c0_315 = arith.constant 0 : index
    %c0_316 = arith.constant 0 : index
    %1219 = vector.load %arg10[%c1_314, %c0_315, %c0_316] : memref<4x5x1xf32, #tpu.memory_space<vmem>>, vector<1x5x1xf32>
    %1220 = vector.shape_cast %1219 : vector<1x5x1xf32> to vector<5x1xf32>
    %1221 = vector.broadcast %1220 : vector<5x1xf32> to vector<5x256xf32>
    %1222 = arith.addf %1218, %1221 : vector<5x256xf32>
    %c1_317 = arith.constant 1 : index
    %c0_318 = arith.constant 0 : index
    %c0_319 = arith.constant 0 : index
    %1223 = vector.load %arg11[%c1_317, %c0_318, %c0_319] : memref<4x8x5xf32, #tpu.memory_space<vmem>>, vector<1x8x5xf32>
    %1224 = vector.shape_cast %1223 : vector<1x8x5xf32> to vector<8x5xf32>
    %cst_320 = arith.constant dense<0.000000e+00> : vector<8x256xf32>
    %1225 = tpu.matmul %1224, %1222, %cst_320 {dimension_numbers = #tpu.dot_dimension_numbers<[1], [0], [0], [1], [0, 0, 1, 1], [], []>} : vector<8x5xf32>, vector<5x256xf32>, vector<8x256xf32> -> vector<8x256xf32>
    %1226 = arith.addf %1208, %1225 : vector<8x256xf32>
    %c2_321 = arith.constant 2 : index
    %c0_322 = arith.constant 0 : index
    %c0_323 = arith.constant 0 : index
    %1227 = vector.load %arg14[%c2_321, %c0_322, %c0_323] : memref<4x5x256xf32, #tpu.memory_space<vmem>>, vector<1x5x256xf32>
    %1228 = vector.shape_cast %1227 : vector<1x5x256xf32> to vector<5x256xf32>
    %1229 = vector.broadcast %1178 : vector<1x256xf32> to vector<5x256xf32>
    %1230 = arith.subf %1228, %1229 : vector<5x256xf32>
    %1231 = vector.broadcast %1187 : vector<1x256xf32> to vector<5x256xf32>
    %1232 = arith.mulf %1230, %1231 : vector<5x256xf32>
    %c2_324 = arith.constant 2 : index
    %c0_325 = arith.constant 0 : index
    %c0_326 = arith.constant 0 : index
    %1233 = vector.load %arg9[%c2_324, %c0_325, %c0_326] : memref<4x5x1xf32, #tpu.memory_space<vmem>>, vector<1x5x1xf32>
    %1234 = vector.shape_cast %1233 : vector<1x5x1xf32> to vector<5x1xf32>
    %1235 = vector.broadcast %1234 : vector<5x1xf32> to vector<5x256xf32>
    %1236 = arith.mulf %1232, %1235 : vector<5x256xf32>
    %c2_327 = arith.constant 2 : index
    %c0_328 = arith.constant 0 : index
    %c0_329 = arith.constant 0 : index
    %1237 = vector.load %arg10[%c2_327, %c0_328, %c0_329] : memref<4x5x1xf32, #tpu.memory_space<vmem>>, vector<1x5x1xf32>
    %1238 = vector.shape_cast %1237 : vector<1x5x1xf32> to vector<5x1xf32>
    %1239 = vector.broadcast %1238 : vector<5x1xf32> to vector<5x256xf32>
    %1240 = arith.addf %1236, %1239 : vector<5x256xf32>
    %c2_330 = arith.constant 2 : index
    %c0_331 = arith.constant 0 : index
    %c0_332 = arith.constant 0 : index
    %1241 = vector.load %arg11[%c2_330, %c0_331, %c0_332] : memref<4x8x5xf32, #tpu.memory_space<vmem>>, vector<1x8x5xf32>
    %1242 = vector.shape_cast %1241 : vector<1x8x5xf32> to vector<8x5xf32>
    %cst_333 = arith.constant dense<0.000000e+00> : vector<8x256xf32>
    %1243 = tpu.matmul %1242, %1240, %cst_333 {dimension_numbers = #tpu.dot_dimension_numbers<[1], [0], [0], [1], [0, 0, 1, 1], [], []>} : vector<8x5xf32>, vector<5x256xf32>, vector<8x256xf32> -> vector<8x256xf32>
    %1244 = arith.addf %1226, %1243 : vector<8x256xf32>
    %c3_334 = arith.constant 3 : index
    %c0_335 = arith.constant 0 : index
    %c0_336 = arith.constant 0 : index
    %1245 = vector.load %arg14[%c3_334, %c0_335, %c0_336] : memref<4x5x256xf32, #tpu.memory_space<vmem>>, vector<1x5x256xf32>
    %1246 = vector.shape_cast %1245 : vector<1x5x256xf32> to vector<5x256xf32>
    %1247 = vector.broadcast %1178 : vector<1x256xf32> to vector<5x256xf32>
    %1248 = arith.subf %1246, %1247 : vector<5x256xf32>
    %1249 = vector.broadcast %1187 : vector<1x256xf32> to vector<5x256xf32>
    %1250 = arith.mulf %1248, %1249 : vector<5x256xf32>
    %c3_337 = arith.constant 3 : index
    %c0_338 = arith.constant 0 : index
    %c0_339 = arith.constant 0 : index
    %1251 = vector.load %arg9[%c3_337, %c0_338, %c0_339] : memref<4x5x1xf32, #tpu.memory_space<vmem>>, vector<1x5x1xf32>
    %1252 = vector.shape_cast %1251 : vector<1x5x1xf32> to vector<5x1xf32>
    %1253 = vector.broadcast %1252 : vector<5x1xf32> to vector<5x256xf32>
    %1254 = arith.mulf %1250, %1253 : vector<5x256xf32>
    %c3_340 = arith.constant 3 : index
    %c0_341 = arith.constant 0 : index
    %c0_342 = arith.constant 0 : index
    %1255 = vector.load %arg10[%c3_340, %c0_341, %c0_342] : memref<4x5x1xf32, #tpu.memory_space<vmem>>, vector<1x5x1xf32>
    %1256 = vector.shape_cast %1255 : vector<1x5x1xf32> to vector<5x1xf32>
    %1257 = vector.broadcast %1256 : vector<5x1xf32> to vector<5x256xf32>
    %1258 = arith.addf %1254, %1257 : vector<5x256xf32>
    %c3_343 = arith.constant 3 : index
    %c0_344 = arith.constant 0 : index
    %c0_345 = arith.constant 0 : index
    %1259 = vector.load %arg11[%c3_343, %c0_344, %c0_345] : memref<4x8x5xf32, #tpu.memory_space<vmem>>, vector<1x8x5xf32>
    %1260 = vector.shape_cast %1259 : vector<1x8x5xf32> to vector<8x5xf32>
    %cst_346 = arith.constant dense<0.000000e+00> : vector<8x256xf32>
    %1261 = tpu.matmul %1260, %1258, %cst_346 {dimension_numbers = #tpu.dot_dimension_numbers<[1], [0], [0], [1], [0, 0, 1, 1], [], []>} : vector<8x5xf32>, vector<5x256xf32>, vector<8x256xf32> -> vector<8x256xf32>
    %1262 = arith.addf %1244, %1261 : vector<8x256xf32>
    %c0_347 = arith.constant 0 : index
    %c0_348 = arith.constant 0 : index
    %c0_349 = arith.constant 0 : index
    %1263 = vector.load %arg13[%c0_347, %c0_348, %c0_349] : memref<1x8x256xf32, #tpu.memory_space<vmem>>, vector<1x8x256xf32>
    %1264 = vector.shape_cast %1263 : vector<1x8x256xf32> to vector<8x256xf32>
    %1265 = vector.shape_cast %1262 : vector<8x256xf32> to vector<1x8x256xf32>
    tpu.vector_store %arg13[%c0_347, %c0_348, %c0_349], %1265 {strides = array<i32>} : memref<1x8x256xf32, #tpu.memory_space<vmem>>, vector<1x8x256xf32>,
    return
  }
  func.func @transform_0(%arg0: i32) -> (i32, i32, i32, i32) {
    %c0_i32 = arith.constant 0 : i32
    %c0_i32_0 = arith.constant 0 : i32
    %c0_i32_1 = arith.constant 0 : i32
    %c0_i32_2 = arith.constant 0 : i32
    return %arg0, %c0_i32, %c0_i32_0, %c0_i32_1 : i32, i32, i32, i32
  }
  func.func @transform_1(%arg0: i32) -> (i32, i32, i32, i32) {
    %c0_i32 = arith.constant 0 : i32
    %c0_i32_0 = arith.constant 0 : i32
    %c0_i32_1 = arith.constant 0 : i32
    %c0_i32_2 = arith.constant 0 : i32
    return %arg0, %c0_i32, %c0_i32_0, %c0_i32_1 : i32, i32, i32, i32
  }
  func.func @transform_2(%arg0: i32) -> (i32, i32, i32) {
    %c0_i32 = arith.constant 0 : i32
    %c0_i32_0 = arith.constant 0 : i32
    %c0_i32_1 = arith.constant 0 : i32
    return %arg0, %c0_i32, %c0_i32_0 : i32, i32, i32
  }
  func.func @transform_3(%arg0: i32) -> (i32, i32) {
    %c0_i32 = arith.constant 0 : i32
    %c0_i32_0 = arith.constant 0 : i32
    %c0_i32_1 = arith.constant 0 : i32
    return %c0_i32, %c0_i32_0 : i32, i32
  }
  func.func @transform_4(%arg0: i32) -> (i32, i32, i32) {
    %c0_i32 = arith.constant 0 : i32
    %c0_i32_0 = arith.constant 0 : i32
    %c0_i32_1 = arith.constant 0 : i32
    %c0_i32_2 = arith.constant 0 : i32
    return %c0_i32, %c0_i32_0, %c0_i32_1 : i32, i32, i32
  }
  func.func @transform_5(%arg0: i32) -> (i32, i32, i32) {
    %c0_i32 = arith.constant 0 : i32
    %c0_i32_0 = arith.constant 0 : i32
    %c0_i32_1 = arith.constant 0 : i32
    %c0_i32_2 = arith.constant 0 : i32
    return %c0_i32, %c0_i32_0, %c0_i32_1 : i32, i32, i32
  }
  func.func @transform_6(%arg0: i32) -> (i32, i32, i32) {
    %c0_i32 = arith.constant 0 : i32
    %c0_i32_0 = arith.constant 0 : i32
    %c0_i32_1 = arith.constant 0 : i32
    %c0_i32_2 = arith.constant 0 : i32
    return %c0_i32, %c0_i32_0, %c0_i32_1 : i32, i32, i32
  }
  func.func @transform_7(%arg0: i32) -> (i32, i32, i32) {
    %c0_i32 = arith.constant 0 : i32
    %c0_i32_0 = arith.constant 0 : i32
    %c0_i32_1 = arith.constant 0 : i32
    %c0_i32_2 = arith.constant 0 : i32
    return %c0_i32, %c0_i32_0, %c0_i32_1 : i32, i32, i32
  }
  func.func @transform_8(%arg0: i32) -> (i32, i32, i32) {
    %c0_i32 = arith.constant 0 : i32
    %c0_i32_0 = arith.constant 0 : i32
    %c0_i32_1 = arith.constant 0 : i32
    %c0_i32_2 = arith.constant 0 : i32
    return %c0_i32, %c0_i32_0, %c0_i32_1 : i32, i32, i32
  }
  func.func @transform_9(%arg0: i32) -> (i32, i32, i32) {
    %c0_i32 = arith.constant 0 : i32
    %c0_i32_0 = arith.constant 0 : i32
    %c0_i32_1 = arith.constant 0 : i32
    %c0_i32_2 = arith.constant 0 : i32
    return %c0_i32, %c0_i32_0, %c0_i32_1 : i32, i32, i32
  }
  func.func @transform_10(%arg0: i32) -> (i32, i32, i32) {
    %c0_i32 = arith.constant 0 : i32
    %c0_i32_0 = arith.constant 0 : i32
    %c0_i32_1 = arith.constant 0 : i32
    %c0_i32_2 = arith.constant 0 : i32
    return %c0_i32, %c0_i32_0, %c0_i32_1 : i32, i32, i32
  }
  func.func @transform_11(%arg0: i32) -> (i32, i32) {
    %c0_i32 = arith.constant 0 : i32
    %c0_i32_0 = arith.constant 0 : i32
    %c0_i32_1 = arith.constant 0 : i32
    return %c0_i32, %c0_i32_0 : i32, i32
  }
  func.func @transform_12(%arg0: i32) -> (i32, i32, i32) {
    %c0_i32 = arith.constant 0 : i32
    %c0_i32_0 = arith.constant 0 : i32
    %c0_i32_1 = arith.constant 0 : i32
    return %arg0, %c0_i32, %c0_i32_0 : i32, i32, i32
  }
}

</mosaic_0001>

<bundles_post_ra>
// kernel: group_aggregation_bridge_forward.3
= control target key start
LH: loop header
LB: loop body
LE: loop exit
PB: predicated region body
PF: predicated region fallthrough
CT: control target
= control target key end

     0   :  { %s459_s12 = smov 0   ;;  %s461_s13 = smov 0   ;;  %s498_s0 = inlined_call_operand.vmem [shape: f32[2,16,64], index: 0, kind: input, shape index: {}]   ;;  %s499_s1 = inlined_call_operand.vmem [shape: f32[8,16], index: 1, kind: input, shape index: {}]   ;;  %s500_s2 = inlined_call_operand.vmem [shape: f32[8,1], index: 2, kind: input, shape index: {}]   ;;  %s501_s3 = inlined_call_operand.vmem [shape: f32[2,8,64], index: 3, kind: output, shape index: {}]  }
   0x1   :  { %s463_s14 = smov 0  }
   0x2 LB: > { %s25_s15 = sadd.s32 1, %s430_s13  ;;  %p366_p0 = scmp.ge.s32.totalorder %s434_s14, 1  ;;  %s434_s14 = sphi %s463_s14, %s13_s14   ;;  %s430_s13 = sphi %s461_s13, %s503_s13   ;;  %s426_s12 = sphi %s459_s12, %s502_s12  }
   0x3   : > { %p27_p1 = scmp.ge.s32.totalorder %s25_s15, 2  ;;  %p156_p2 = scmp.lt.s32.totalorder %s434_s14, 3 }
   0x5   : > { %s505_s15 = smov (%p27_p1, %s25_s15), 0  ;;  %p157_p3 = pnand %p366_p0, %p156_p2 }
   0x6   : > { %p185_p4 = scmp.lt.s32.totalorder (!%p157_p3), %s426_s12, 1 }
   0x7   : > { %160 = sbr.rel (%p157_p3) target bundleno = 215 (0xd7), region = 32 }
   0xc   : > { %v436_v0 = vmov 0.0   ;;  %vm437_vm0 = vmmov 0   ;;  %v203_v1 = vld [vmem:[%s500_s2] sm:$0xff]  ;;  %s507_s12 = smov (!%p185_p4, %s426_s12), 1  ;;  %v438_v2 = vmov 0   ;;  %vm209_vm1 = vcmask 130048  }
   0xd   : > { %377 = vmatprep.subr.mxu0 %v436_v0  ;;  %381 = vmatprep.mubr.msk.f32.mxu0 %vm437_vm0, %v436_v0  ;;  %s373_s18 = sshll.u32 %s507_s12, 4  ;;  %v200_v5 = vld [vmem:[%s499_s1] sm:$0xff]  ;;  %s369_s24 = sshll.u32 %s507_s12, 3  ;;  %vm283_vm2 = vcmask 523264  }
   0xe   : > { %411 = vset.pattern.permute.xlu0 %v438_v2  ;;  %s192_s21 = scalar_lea.vmem %s498_s0, %s373_s18  ;;  %s199_s27 = scalar_lea.vmem %s501_s3, %s369_s24 }
   0xf   : > { %206 = vperm.xlu0 %411, %v203_v1   ;;  %v202_v3 = vld [vmem:[%s192_s21 + $0x8] sm:$0xff]  ;;  %v201_v4 = vld [vmem:[%s192_s21] sm:$0xff] }
  0x10   : > { %378 = vmatpush3.msra.mxu0 %v202_v3 }
  0x11   : > { %379 = vmatprep.subr.mxu0 %v436_v0 }
  0x12   : > { %380 = vmatpush3.msra.mxu0 %v201_v4 }
  0x13   : > { %382 = vmatmul.mubr.msk.f32.vlgmr.msra.gmra.mxu0 %vm209_vm1, %v200_v5 }
  0x8a   : > { %v207_v6 = vpop.permute.xlu0 %206 }
  0xd3   : > { %v279_v7 = vpop.f32.mrf.mxu0 }
  0xd4   : > { %v280_v8 = vadd.f32 %v279_v7, %v207_v6 }
  0xd5   : > { %v383_v9 = vpop.f32.mrf.mxu0 }
  0xd6   : > { %284 = vst.msk [vmem:[%s199_s27] sm:$0xff] %vm283_vm2, %v280_v8 }
  0xd7 PF: > { %s13_s14 = sadd.s32 1, %s434_s14   ;;  %s502_s12 = smov %s430_s13 }
  0xd8   : > { %p10_p5 = scmp.ge.s32.totalorder %s13_s14, 4   ;;  %s503_s13 = smov %s505_s15 }
  0xda   :  { %12 = sbr.rel (!%p10_p5) target bundleno = 2 (0x2), region = 62 }

// kernel: group_aggregation_bridge_forward.4
= control target key start
LH: loop header
LB: loop body
LE: loop exit
PB: predicated region body
PF: predicated region fallthrough
CT: control target
= control target key end

     0   :  { %s1753_s12 = smov 0   ;;  %s1859_s0 = inlined_call_operand.vmem [shape: f32[2,8,8,8], index: 0, kind: input, shape index: {}]   ;;  %s1860_s1 = inlined_call_operand.vmem [shape: f32[16,8], index: 1, kind: input, shape index: {}]   ;;  %s1861_s2 = inlined_call_operand.vmem [shape: f32[8,16], index: 2, kind: input, shape index: {}]   ;;  %s1862_s3 = inlined_call_operand.vmem [shape: f32[2,8,16,16], index: 3, kind: output, shape index: {}]  }
   0x1 LB: > { %s1523_s13 = sadd.s32 4294967295, %s1731_s12   ;;  %p1527_p0 = scmp.ge.s32.totalorder %s1731_s12, 1  ;;  %s1731_s12 = sphi %s1753_s12, %s13_s12  }
   0x2   : > { %p137_p1 = scmp.lt.s32.totalorder %s1731_s12, 3 }
   0x4   : > { %p138_p2 = pnand %p1527_p0, %p137_p1 }
   0x5   : > { %p161_p3 = scmp.lt.s32.totalorder (!%p138_p2), %s1523_s13, 1 }
   0x6   : > { %141 = sbr.rel (%p138_p2) target bundleno = 437 (0x1b5), region = 32 }
   0xb   : > { %v171_v0 = vld [vmem:[%s1860_s1] sm:$0xff]  ;;  %vm175_vm0 = vcmask 64512   ;;  %s1864_s13 = smov (!%p161_p3, %s1523_s13), 1  ;;  %v172_v2 = vld [vmem:[%s1860_s1 + $0x8] sm:$0xff]  ;;  %vm338_vm1 = vcmask 130048  }
   0xc   : > { %1639 = vmatprep.mubr.msk.f32.mxu0 %vm175_vm0, %v171_v0  ;;  %s1587_s16 = sshll.u32 %s1864_s13, 6  ;;  %v173_v10 = vld [vmem:[%s1861_s2] sm:$0xff]  ;;  %s1588_s24 = sshll.u32 %s1864_s13, 7 }
   0xd   : > { %s1771_s19 = scalar_lea.vmem %s1859_s0, %s1587_s16  ;;  %1642 = vmatprep.subr.mxu1 %v173_v10  ;;  %s1822_s27 = scalar_lea.vmem %s1862_s3, %s1588_s24 }
   0xe   : > { %v174_v1 = vld [vmem:[%s1771_s19] sm:$0xff]  ;;  %v1536_v3 = vld [vmem:[%s1771_s19 + $0x8] sm:$0xff]  ;;  %v1543_v4 = vld [vmem:[%s1771_s19 + $0x10] sm:$0xff]  ;;  %1643 = vmatpush3.msra.mxu1 %v173_v10 }
   0xf   : > { %1637 = vmatprep.subr.mxu0 %v174_v1  ;;  %v1550_v5 = vld [vmem:[%s1771_s19 + $0x18] sm:$0xff]  ;;  %v1557_v6 = vld [vmem:[%s1771_s19 + $0x20] sm:$0xff]  ;;  %v1564_v7 = vld [vmem:[%s1771_s19 + $0x28] sm:$0xff]  ;;  %1652 = vmatprep.subr.mxu1 %v173_v10 }
  0x10   : > { %1638 = vmatpush3.msra.mxu0 %v174_v1  ;;  %v1571_v8 = vld [vmem:[%s1771_s19 + $0x30] sm:$0xff]  ;;  %v1578_v9 = vld [vmem:[%s1771_s19 + $0x38] sm:$0xff] }
  0x11   : > { %1640 = vmatmul.mubr.msk.f32.vlgmr.msra.gmra.mxu0 %vm175_vm0, %v172_v2  ;;  %1647 = vmatprep.subr.mxu0 %v1536_v3 }
  0x12   : > { %1648 = vmatpush3.msra.mxu0 %v1536_v3  ;;  %1649 = vmatprep.mubr.msk.f32.mxu0 %vm175_vm0, %v171_v0 }
  0x13   : > { %1657 = vmatprep.subr.mxu0 %v1543_v4 }
  0x15   : > { %1650 = vmatmul.mubr.msk.f32.vlgmr.msra.gmra.mxu0 %vm175_vm0, %v172_v2 }
  0x16   : > { %1658 = vmatpush3.msra.mxu0 %v1543_v4  ;;  %1659 = vmatprep.mubr.msk.f32.mxu0 %vm175_vm0, %v171_v0 }
  0x17   : > { %1667 = vmatprep.subr.mxu0 %v1550_v5 }
  0x19   : > { %1660 = vmatmul.mubr.msk.f32.vlgmr.msra.gmra.mxu0 %vm175_vm0, %v172_v2 }
  0x1a   : > { %1668 = vmatpush3.msra.mxu0 %v1550_v5  ;;  %1669 = vmatprep.mubr.msk.f32.mxu0 %vm175_vm0, %v171_v0 }
  0x1b   : > { %1677 = vmatprep.subr.mxu0 %v1557_v6 }
  0x1d   : > { %1670 = vmatmul.mubr.msk.f32.vlgmr.msra.gmra.mxu0 %vm175_vm0, %v172_v2 }
  0x1e   : > { %1678 = vmatpush3.msra.mxu0 %v1557_v6  ;;  %1679 = vmatprep.mubr.msk.f32.mxu0 %vm175_vm0, %v171_v0 }
  0x1f   : > { %1687 = vmatprep.subr.mxu0 %v1564_v7 }
  0x21   : > { %1680 = vmatmul.mubr.msk.f32.vlgmr.msra.gmra.mxu0 %vm175_vm0, %v172_v2 }
  0x22   : > { %1688 = vmatpush3.msra.mxu0 %v1564_v7  ;;  %1689 = vmatprep.mubr.msk.f32.mxu0 %vm175_vm0, %v171_v0 }
  0x23   : > { %1697 = vmatprep.subr.mxu0 %v1571_v8 }
  0x25   : > { %1690 = vmatmul.mubr.msk.f32.vlgmr.msra.gmra.mxu0 %vm175_vm0, %v172_v2 }
  0x26   : > { %1698 = vmatpush3.msra.mxu0 %v1571_v8  ;;  %1699 = vmatprep.mubr.msk.f32.mxu0 %vm175_vm0, %v171_v0 }
  0x27   : > { %1707 = vmatprep.subr.mxu0 %v1578_v9 }
  0x29   : > { %1700 = vmatmul.mubr.msk.f32.vlgmr.msra.gmra.mxu0 %vm175_vm0, %v172_v2 }
  0x2a   : > { %1708 = vmatpush3.msra.mxu0 %v1578_v9  ;;  %1709 = vmatprep.mubr.msk.f32.mxu0 %vm175_vm0, %v171_v0 }
  0x2d   : > { %1710 = vmatmul.mubr.msk.f32.vlgmr.msra.gmra.mxu0 %vm175_vm0, %v172_v2 }
  0xd1   : > { %v1641_v11 = vpop.f32.mrf.mxu0 }
  0xd3   : > { %v248_v12 = vpop.f32.mrf.mxu0 }
  0xd4   : > { %1644 = vmatprep.mubr.msk.f32.mxu1 %vm175_vm0, %v248_v12 }
  0xd5   : > { %1645 = vmatmul.mubr.msk.f32.vlgmr.msra.gmra.mxu1 %vm175_vm0, %v1641_v11  ;;  %v1651_v13 = vpop.f32.mrf.mxu0 }
  0xd6   : > { %1653 = vmatpush3.msra.mxu1 %v173_v10 }
  0xd7   : > { %v409_v14 = vpop.f32.mrf.mxu0  ;;  %1662 = vmatprep.subr.mxu1 %v173_v10 }
  0xd8   : > { %1654 = vmatprep.mubr.msk.f32.mxu1 %vm175_vm0, %v409_v14 }
  0xd9   : > { %1655 = vmatmul.mubr.msk.f32.vlgmr.msra.gmra.mxu1 %vm175_vm0, %v1651_v13  ;;  %v1661_v15 = vpop.f32.mrf.mxu0 }
  0xda   : > { %1663 = vmatpush3.msra.mxu1 %v173_v10 }
  0xdb   : > { %v570_v16 = vpop.f32.mrf.mxu0  ;;  %1672 = vmatprep.subr.mxu1 %v173_v10 }
  0xdc   : > { %1664 = vmatprep.mubr.msk.f32.mxu1 %vm175_vm0, %v570_v16 }
  0xdd   : > { %1665 = vmatmul.mubr.msk.f32.vlgmr.msra.gmra.mxu1 %vm175_vm0, %v1661_v15  ;;  %v1671_v17 = vpop.f32.mrf.mxu0 }
  0xde   : > { %1673 = vmatpush3.msra.mxu1 %v173_v10 }
  0xdf   : > { %v731_v18 = vpop.f32.mrf.mxu0  ;;  %1682 = vmatprep.subr.mxu1 %v173_v10 }
  0xe0   : > { %1674 = vmatprep.mubr.msk.f32.mxu1 %vm175_vm0, %v731_v18 }
  0xe1   : > { %1675 = vmatmul.mubr.msk.f32.vlgmr.msra.gmra.mxu1 %vm175_vm0, %v1671_v17  ;;  %v1681_v19 = vpop.f32.mrf.mxu0 }
  0xe2   : > { %1683 = vmatpush3.msra.mxu1 %v173_v10 }
  0xe3   : > { %v892_v20 = vpop.f32.mrf.mxu0  ;;  %1692 = vmatprep.subr.mxu1 %v173_v10 }
  0xe4   : > { %1684 = vmatprep.mubr.msk.f32.mxu1 %vm175_vm0, %v892_v20 }
  0xe5   : > { %1685 = vmatmul.mubr.msk.f32.vlgmr.msra.gmra.mxu1 %vm175_vm0, %v1681_v19  ;;  %v1691_v21 = vpop.f32.mrf.mxu0 }
  0xe6   : > { %1693 = vmatpush3.msra.mxu1 %v173_v10 }
  0xe7   : > { %v1053_v22 = vpop.f32.mrf.mxu0  ;;  %1702 = vmatprep.subr.mxu1 %v173_v10 }
  0xe8   : > { %1694 = vmatprep.mubr.msk.f32.mxu1 %vm175_vm0, %v1053_v22 }
  0xe9   : > { %1695 = vmatmul.mubr.msk.f32.vlgmr.msra.gmra.mxu1 %vm175_vm0, %v1691_v21  ;;  %v1701_v23 = vpop.f32.mrf.mxu0 }
  0xea   : > { %1703 = vmatpush3.msra.mxu1 %v173_v10 }
  0xeb   : > { %v1214_v24 = vpop.f32.mrf.mxu0  ;;  %1712 = vmatprep.subr.mxu1 %v173_v10 }
  0xec   : > { %1704 = vmatprep.mubr.msk.f32.mxu1 %vm175_vm0, %v1214_v24 }
  0xed   : > { %1705 = vmatmul.mubr.msk.f32.vlgmr.msra.gmra.mxu1 %vm175_vm0, %v1701_v23  ;;  %v1711_v25 = vpop.f32.mrf.mxu0 }
  0xee   : > { %1713 = vmatpush3.msra.mxu1 %v173_v10 }
  0xef   : > { %v1375_v26 = vpop.f32.mrf.mxu0 }
  0xf0   : > { %1714 = vmatprep.mubr.msk.f32.mxu1 %vm175_vm0, %v1375_v26 }
  0xf1   : > { %1715 = vmatmul.mubr.msk.f32.vlgmr.msra.gmra.mxu1 %vm175_vm0, %v1711_v25 }
 0x195   : > { %v1646_v27 = vpop.f32.mrf.mxu1 }
 0x196   : > { %340 = vst.msk [vmem:[%s1822_s27 + $0x8] sm:$0xff] %vm338_vm1, %v1646_v27 }
 0x197   : > { %v329_v28 = vpop.f32.mrf.mxu1 }
 0x198   : > { %339 = vst.msk [vmem:[%s1822_s27] sm:$0xff] %vm338_vm1, %v329_v28 }
 0x199   : > { %v1656_v29 = vpop.f32.mrf.mxu1 }
 0x19a   : > { %1542 = vst.msk [vmem:[%s1822_s27 + $0x18] sm:$0xff] %vm338_vm1, %v1656_v29 }
 0x19b   : > { %v490_v30 = vpop.f32.mrf.mxu1 }
 0x19c   : > { %1541 = vst.msk [vmem:[%s1822_s27 + $0x10] sm:$0xff] %vm338_vm1, %v490_v30 }
 0x19d   : > { %v1666_v31 = vpop.f32.mrf.mxu1 }
 0x19e   : > { %1549 = vst.msk [vmem:[%s1822_s27 + $0x28] sm:$0xff] %vm338_vm1, %v1666_v31 }
 0x19f   : > { %v651_v32 = vpop.f32.mrf.mxu1 }
 0x1a0   : > { %1548 = vst.msk [vmem:[%s1822_s27 + $0x20] sm:$0xff] %vm338_vm1, %v651_v32 }
 0x1a1   : > { %v1676_v33 = vpop.f32.mrf.mxu1 }
 0x1a2   : > { %1556 = vst.msk [vmem:[%s1822_s27 + $0x38] sm:$0xff] %vm338_vm1, %v1676_v33 }
 0x1a3   : > { %v812_v34 = vpop.f32.mrf.mxu1 }
 0x1a4   : > { %1555 = vst.msk [vmem:[%s1822_s27 + $0x30] sm:$0xff] %vm338_vm1, %v812_v34 }
 0x1a5   : > { %v1686_v35 = vpop.f32.mrf.mxu1 }
 0x1a6   : > { %1563 = vst.msk [vmem:[%s1822_s27 + $0x48] sm:$0xff] %vm338_vm1, %v1686_v35 }
 0x1a7   : > { %v973_v36 = vpop.f32.mrf.mxu1 }
 0x1a8   : > { %1562 = vst.msk [vmem:[%s1822_s27 + $0x40] sm:$0xff] %vm338_vm1, %v973_v36 }
 0x1a9   : > { %v1696_v37 = vpop.f32.mrf.mxu1 }
 0x1aa   : > { %1570 = vst.msk [vmem:[%s1822_s27 + $0x58] sm:$0xff] %vm338_vm1, %v1696_v37 }
 0x1ab   : > { %v1134_v38 = vpop.f32.mrf.mxu1 }
 0x1ac   : > { %1569 = vst.msk [vmem:[%s1822_s27 + $0x50] sm:$0xff] %vm338_vm1, %v1134_v38 }
 0x1ad   : > { %v1706_v39 = vpop.f32.mrf.mxu1 }
 0x1ae   : > { %1577 = vst.msk [vmem:[%s1822_s27 + $0x68] sm:$0xff] %vm338_vm1, %v1706_v39 }
 0x1af   : > { %v1295_v40 = vpop.f32.mrf.mxu1 }
 0x1b0   : > { %1576 = vst.msk [vmem:[%s1822_s27 + $0x60] sm:$0xff] %vm338_vm1, %v1295_v40 }
 0x1b1   : > { %v1716_v41 = vpop.f32.mrf.mxu1 }
 0x1b2   : > { %1584 = vst.msk [vmem:[%s1822_s27 + $0x78] sm:$0xff] %vm338_vm1, %v1716_v41 }
 0x1b3   : > { %v1456_v42 = vpop.f32.mrf.mxu1 }
 0x1b4   : > { %1583 = vst.msk [vmem:[%s1822_s27 + $0x70] sm:$0xff] %vm338_vm1, %v1456_v42 }
 0x1b5 PF: > { %s13_s12 = sadd.s32 1, %s1731_s12  }
 0x1b6   : > { %p10_p4 = scmp.ge.s32.totalorder %s13_s12, 4  }
 0x1b8   :  { %12 = sbr.rel (!%p10_p4) target bundleno = 1 (0x1), region = 76 }

// kernel: group_aggregation_bridge_forward.5
= control target key start
LH: loop header
LB: loop body
LE: loop exit
PB: predicated region body
PF: predicated region fallthrough
CT: control target
= control target key end

     0   :  { %s4986_s21 = smov 0   ;;  %s7692_s0 = inlined_call_operand.vmem [shape: f32[2,4,2,256], index: 0, kind: input, shape index: {}]   ;;  %s7693_s1 = inlined_call_operand.vmem [shape: f32[2,4,2,256], index: 1, kind: input, shape index: {}]   ;;  %s7694_s2 = inlined_call_operand.vmem [shape: f32[2,1,256], index: 2, kind: input, shape index: {}]   ;;  %s7695_s3 = inlined_call_operand.vmem [shape: f32[1,256], index: 3, kind: input, shape index: {}]   ;;  %s7696_s4 = inlined_call_operand.vmem [shape: f32[4,5,1], index: 4, kind: input, shape index: {}]   ;;  %s7697_s5 = inlined_call_operand.vmem [shape: f32[4,5,1], index: 5, kind: input, shape index: {}]   ;;  %s7698_s6 = inlined_call_operand.vmem [shape: f32[4,5,9], index: 6, kind: input, shape index: {}]   ;;  %s7699_s7 = inlined_call_operand.vmem [shape: f32[4,5,1], index: 7, kind: input, shape index: {}]   ;;  %s7700_s8 = inlined_call_operand.vmem [shape: f32[4,5,1], index: 8, kind: input, shape index: {}]   ;;  %s7701_s9 = inlined_call_operand.vmem [shape: f32[4,5,1], index: 9, kind: input, shape index: {}]   ;;  %s7702_s10 = inlined_call_operand.vmem [shape: f32[4,8,5], index: 10, kind: input, shape index: {}]   ;;  %s7703_s11 = inlined_call_operand.vmem [shape: f32[8,1], index: 11, kind: input, shape index: {}]   ;;  %s7704_s12 = inlined_call_operand.vmem [shape: f32[2,8,256], index: 12, kind: output, shape index: {}]  }
   0x1 LB: > { %s4742_s22 = sadd.s32 4294967295, %s4891_s21   ;;  %p4746_p0 = scmp.ge.s32.totalorder %s4891_s21, 1  ;;  %s4891_s21 = sphi %s4986_s21, %s22_s21  }
   0x2   : > { %p381_p1 = scmp.lt.s32.totalorder %s4891_s21, 3 }
   0x4   : > { %p382_p2 = pnand %p4746_p0, %p381_p1 }
   0x6   : > { %385 = sbr.rel (%p382_p2) target bundleno = 1031 (0x407), region = 68 }
   0xb   : > { %v606_v0 = vld [vmem:[%s7699_s7] sm:$0x1f]  ;;  %v7714_v2 = vmov 3   ;;  %v7715_v3 = vmov 0   ;;  %p432_p3 = scmp.lt.s32.totalorder %s4742_s22, 1  ;;  %v7705_v5 = vlaneseq  ;;  %v7717_v9 = vmov 4  }
   0xc   : > { %v5000_v1 = vld [vmem:[%s7698_s6] sm:$0x1f]  ;;  %4835 = vset.pattern.permute.xlu0 %v7714_v2  ;;  %4834 = vset.pattern.permute.xlu1 %v7715_v3  ;;  %v4895_v6 = vmov 1983009808   ;;  %v4756_v12 = vld [vmem:[%s7696_s4 + $0x8] sm:$0x1f] }
   0xd   : > { %679 = vperm.xlu1 %4834, %v606_v0   ;;  %734 = vperm.xlu0 %4835, %v5000_v1   ;;  %v603_v4 = vld [vmem:[%s7696_s4] sm:$0x1f]  ;;  %v457_v7 = vunpack.c.l.s4 %v4895_v6  ;;  %s8382_s22 = smov (!%p432_p3, %s4742_s22), 1  ;;  %v5020_v11 = vshrl.u32 %v7705_v5, 7  ;;  %v7711_v14 = vmov 7   ;;  %v7708_v20 = vmov 5  }
   0xe   : > { %v604_v8 = vld [vmem:[%s7697_s5] sm:$0x1f]  ;;  %s5017_s13 = sshll.u32 %s8382_s22, 4  ;;  %v4763_v16 = vld [vmem:[%s7697_s5 + $0x10] sm:$0x1f]  ;;  %vm466_vm0 = vcmask 1041408  }
   0xf   : > { %v458_v10 = vunpack.c.0.s8 %v457_v7  ;;  %s5030_s18 = scalar_lea.vmem %s7692_s0, %s5017_s13  ;;  %s5036_s23 = scalar_lea.vmem %s7693_s1, %s5017_s13  ;;  %v4769_v21 = vld [vmem:[%s7697_s5 + $0x18] sm:$0x1f]  ;;  %v7706_v28 = vmov 8   ;;  %v7712_v32 = vmov 1   ;;  %v4757_v36 = vld [vmem:[%s7697_s5 + $0x8] sm:$0x1f] }
  0x10   : > { %v5043_v15 = vld [vmem:[%s5030_s18] sm:$0xf]  ;;  %v5082_v38 = vld [vmem:[%s7698_s6 + $0x8] sm:$0x1f]  ;;  %v4762_v47 = vld [vmem:[%s7696_s4 + $0x10] sm:$0x1f]  ;;  %s450_s24 = scalar_lea.vmem %s7704_s12, %s5017_s13 }
  0x11   : > { %4836 = vset.pattern.permute.xlu0 %v7715_v3  ;;  %726 = vperm.xlu1 %4834, %v5000_v1   ;;  %v5039_v13 = vsub.s32 %v458_v10, %v5020_v11  ;;  %v5050_v17 = vld [vmem:[%s5036_s23] sm:$0xf]  ;;  %v521_v22 = vmul.f32 %v5043_v15, %v5043_v15  ;;  %v4768_v56 = vld [vmem:[%s7696_s4 + $0x18] sm:$0x1f]  ;;  %v7710_v57 = vmov 6   ;;  %s4751_s25 = sshll.u32 %s8382_s22, 1 }
  0x12   : > { %653 = vperm.xlu0 %4836, %v603_v4   ;;  %v547_v23 = vmul.f32 %v5050_v17, %v5050_v17  ;;  %v4759_v6 = vld [vmem:[%s7699_s7 + $0x8] sm:$0x1f]  ;;  %s445_s28 = scalar_lea.vmem %s7694_s2, %s4751_s25  ;;  %s4906_s22 = smov 127   ;;  %vm695_vm2 = vcmask 7168   ;;  %vm819_vm4 = vcmask 1039360   ;;  %vm1598_vm6 = vcmask 15360  }
  0x13   : > { %7907 = vst [vmem:[#allocation3_spill] sm:$0xff] %v5039_v13  ;;  %v462_v18 = vrot.slane %v5043_v15, %v5039_v13  ;;  %v488_v19 = vrot.slane %v5050_v17, %v5039_v13  ;;  %v529_v29 = vrot.slane %v521_v22, %v5039_v13  ;;  %v5109_v22 = vld [vmem:[%s5036_s23 + $0x4] sm:$0xf]  ;;  %s4909_s29 = smov 112   ;;  %s4910_s30 = smov 32   ;;  %vm3398_vm8 = vcmask 56320  }
  0x14   : > { %v555_v30 = vrot.slane %v547_v23, %v5039_v13  ;;  %7909 = vst [vmem:[#allocation5_spill] sm:$0xff] %v5109_v22  ;;  %s4911_s14 = smov 2   ;;  %s4912_s15 = smov 5   ;;  %vm2498_vm10 = vcmask 39936   ;;  %vm1722_vm12 = vcmask 1031168   ;;  %vm2622_vm14 = vcmask 1006592  }
  0x15   : > { %4837 = vset.pattern.permute.xlu1 %v7717_v9  ;;  %v463_v24 = vcombine.high %v462_v18, %v462_v18  ;;  %v489_v25 = vcombine.high %v488_v19, %v488_v19  ;;  %v467_v26 = vsel %vm466_vm0, %v462_v18, 0.0  ;;  %v492_v27 = vsel %vm466_vm0, %v488_v19, 0.0  ;;  %s4913_s16 = smov 7   ;;  %s4914_s17 = smov 126  }
  0x16   : > { %775 = vperm.xlu1 %4837, %v5000_v1   ;;  %666 = vperm.xlu0 %4836, %v604_v8   ;;  %v468_v33 = vrot.slane %v467_v26, 4  ;;  %v493_v34 = vrot.slane %v492_v27, 4  ;;  %v533_v37 = vsel %vm466_vm0, %v529_v29, 0.0  ;;  %v530_v40 = vcombine.high %v529_v29, %v529_v29  ;;  %s4915_s19 = smov 123   ;;  %s4916_s20 = smov 121  }
  0x17   : > { %v474_v31 = vsel %vm466_vm0, %v463_v24, 0.0  ;;  %v499_v35 = vsel %vm466_vm0, %v489_v25, 0.0  ;;  %v556_v41 = vcombine.high %v555_v30, %v555_v30  ;;  %v559_v42 = vsel %vm466_vm0, %v555_v30, 0.0  ;;  %v5116_v30 = vld [vmem:[%s445_s28] sm:$0x3]  ;;  %s4920_s25 = smov 48  }
  0x18   : > { %v475_v39 = vrot.slane %v474_v31, 4  ;;  %v500_v43 = vrot.slane %v499_v35, 4  ;;  %v469_v44 = vadd.f32 %v468_v33, %v467_v26  ;;  %v494_v45 = vadd.f32 %v493_v34, %v492_v27 }
  0x19   : > { %v534_v46 = vrot.slane %v533_v37, 4  ;;  %v560_v48 = vrot.slane %v559_v42, 4  ;;  %v540_v50 = vsel %vm466_vm0, %v530_v40, 0.0  ;;  %v566_v51 = vsel %vm466_vm0, %v556_v41, 0.0 }
  0x1a   : > { %4838 = vset.pattern.permute.xlu1 %v7711_v14  ;;  %1556 = vperm.xlu0 %4836, %v4756_v12   ;;  %v476_v49 = vadd.f32 %v475_v39, %v474_v31  ;;  %v501_v52 = vadd.f32 %v500_v43, %v499_v35  ;;  %v470_v53 = vrot.slane %v469_v44, 2  ;;  %v495_v54 = vrot.slane %v494_v45, 2 }
  0x1b   : > { %808 = vperm.xlu1 %4838, %v5000_v1   ;;  %v535_v55 = vadd.f32 %v534_v46, %v533_v37  ;;  %v541_v58 = vrot.slane %v540_v50, 4  ;;  %v561_v59 = vadd.f32 %v560_v48, %v559_v42  ;;  %v567_v60 = vrot.slane %v566_v51, 4 }
  0x1c   : > { %v477_v61 = vrot.slane %v476_v49, 2  ;;  %v502_v62 = vrot.slane %v501_v52, 2  ;;  %v471_v63 = vadd.f32 %v470_v53, %v469_v44  ;;  %v496_v0 = vadd.f32 %v495_v54, %v494_v45 }
  0x1d   : > { %v536_v4 = vrot.slane %v535_v55, 2  ;;  %v542_v7 = vadd.f32 %v541_v58, %v540_v50  ;;  %v562_v8 = vrot.slane %v561_v59, 2  ;;  %v568_v10 = vadd.f32 %v567_v60, %v566_v51 }
  0x1e   : > { %2469 = vperm.xlu0 %4836, %v4763_v16   ;;  %v478_v12 = vadd.f32 %v477_v61, %v476_v49  ;;  %v503_v16 = vadd.f32 %v502_v62, %v501_v52  ;;  %v472_v18 = vrot.slane %v471_v63, 1  ;;  %v497_v19 = vrot.slane %v496_v0, 1 }
  0x1f   : > { %4839 = vset.pattern.permute.xlu1 %v7708_v20  ;;  %v543_v23 = vrot.slane %v542_v7, 2  ;;  %v563_v24 = vadd.f32 %v562_v8, %v561_v59  ;;  %v569_v25 = vrot.slane %v568_v10, 2  ;;  %v5112_v27 = vsub.s32 0, %v5020_v11 }
  0x20   : > { %856 = vperm.xlu1 %4839, %v5000_v1   ;;  %v479_v26 = vrot.slane %v478_v12, 1  ;;  %v504_v31 = vrot.slane %v503_v16, 1  ;;  %v1410_v33 = vrot.slane %v5109_v22, %v5039_v13  ;;  %v473_v34 = vadd.f32 %v472_v18, %v471_v63 }
  0x21   : > { %7910 = vst [vmem:[#allocation6_spill] sm:$0xff] %v5112_v27  ;;  %v498_v35 = vadd.f32 %v497_v19, %v496_v0  ;;  %v544_v39 = vadd.f32 %v543_v23, %v542_v7  ;;  %v564_v40 = vrot.slane %v563_v24, 1  ;;  %v570_v41 = vadd.f32 %v569_v25, %v568_v10 }
  0x22   : > { %3369 = vperm.xlu0 %4836, %v4769_v21   ;;  %v537_v21 = vadd.f32 %v536_v4, %v535_v55  ;;  %v1414_v42 = vsel %vm466_vm0, %v1410_v33, 0.0  ;;  %v480_v43 = vadd.f32 %v479_v26, %v478_v12  ;;  %v5126_v44 = vrot.slane %v5116_v30, %v5112_v27 }
  0x23   : > { %v5129_v45 = vsub.s32 1, %v5020_v11  ;;  %v575_v46 = vmul.f32 %v5116_v30, %v5116_v30  ;;  %v506_v50 = vadd.f32 %v498_v35, %v473_v34  ;;  %v1415_v52 = vrot.slane %v1414_v42, 4 }
  0x24   : > { %4840 = vset.pattern.permute.xlu1 %v7706_v28  ;;  %v1458_v53 = vmul.f32 %v5109_v22, %v5109_v22  ;;  %v545_v54 = vrot.slane %v544_v39, 1  ;;  %v565_v55 = vadd.f32 %v564_v40, %v563_v24  ;;  %v1411_v58 = vcombine.high %v1410_v33, %v1410_v33 }
  0x25   : > { %872 = vperm.xlu1 %4840, %v5000_v1   ;;  %7911 = vst [vmem:[#allocation7_spill] sm:$0xff] %v5129_v45  ;;  %v5139_v59 = vrot.slane %v5116_v30, %v5129_v45  ;;  %v5142_v60 = vrot.slane %v575_v46, %v5112_v27  ;;  %v519_v4 = vadd.f32 %v5126_v44, %v506_v50 }
  0x26   : > { %4842 = vset.pattern.permute.xlu0 %v7712_v32  ;;  %v1466_v7 = vrot.slane %v1458_v53, %v5039_v13  ;;  %v546_v8 = vadd.f32 %v545_v54, %v544_v39  ;;  %v5154_v33 = vrot.slane %v575_v46, %v5129_v45 }
  0x27   : > { %767 = vperm.xlu0 %4842, %v5000_v1   ;;  %v5157_v35 = vmul.f32 0.2, %v519_v4 }
  0x28   : > { %v1467_v26 = vcombine.high %v1466_v7, %v1466_v7 }
  0x29   : > { %4841 = vset.pattern.permute.xlu1 %v7715_v3 }
  0x2a   : > { %1569 = vperm.xlu1 %4841, %v4757_v36   ;;  %v538_v36 = vrot.slane %v537_v21, 1 }
  0x2b   : > { %1670 = vperm.xlu0 %4842, %v5082_v38  }
  0x2c   : > { %v539_v51 = vadd.f32 %v538_v36, %v537_v21 }
  0x2e   : > { %2456 = vperm.xlu1 %4841, %v4762_v47   ;;  %v505_v47 = vadd.f32 %v504_v31, %v503_v16  ;;  %v573_v12 = vadd.f32 %v565_v55, %v539_v51  ;;  %v1421_v16 = vsel %vm466_vm0, %v1411_v58, 0.0  ;;  %v593_v51 = vmul.f32 %v5157_v35, %v5157_v35 }
  0x2f   : > { %4844 = vset.pattern.permute.xlu0 %v7710_v57  ;;  %v1422_v25 = vrot.slane %v1421_v16, 4 }
  0x30   : > { %751 = vperm.xlu0 %4844, %v5000_v1   ;;  %v5103_v1 = vld [vmem:[%s5030_s18 + $0x4] sm:$0xf]  ;;  %v507_v0 = vadd.f32 %v505_v47, %v480_v43  ;;  %v587_v34 = vadd.f32 %v5142_v60, %v573_v12 }
  0x31   : > { %7908 = vst [vmem:[#allocation4_spill] sm:$0xff] %v5103_v1  ;;  %v1385_v29 = vrot.slane %v5103_v1, %v5039_v13  ;;  %v1423_v46 = vadd.f32 %v1422_v25, %v1421_v16 }
  0x32   : > { %3356 = vperm.xlu1 %4841, %v4768_v56   ;;  %v571_v56 = vrot.slane %v570_v41, 1  ;;  %v520_v23 = vadd.f32 %v5139_v59, %v507_v0  ;;  %v591_v50 = vmul.f32 0.2, %v587_v34 }
  0x33   : > { %v1389_v37 = vsel %vm466_vm0, %v1385_v29, 0.0  ;;  %v1386_v48 = vcombine.high %v1385_v29, %v1385_v29  ;;  %v5151_v29 = vld [vmem:[%s5030_s18 + $0x8] sm:$0xf]  ;;  %v1424_v4 = vrot.slane %v1423_v46, 2 }
  0x34   : > { %1654 = vperm.xlu0 %4844, %v5082_v38   ;;  %v1390_v49 = vrot.slane %v1389_v37, 4  ;;  %v572_v10 = vadd.f32 %v571_v56, %v570_v41  ;;  %7912 = vst [vmem:[#allocation8_spill] sm:$0xff] %v5151_v29  ;;  %v1470_v41 = vsel %vm466_vm0, %v1466_v7, 0.0  ;;  %v5164_v43 = vmul.f32 0.2, %v520_v23 }
  0x35   : > { %v1396_v62 = vsel %vm466_vm0, %v1386_v48, 0.0  ;;  %v1477_v48 = vsel %vm466_vm0, %v1467_v26, 0.0  ;;  %v1471_v55 = vrot.slane %v1470_v41, 4  ;;  %v595_v7 = vsub.f32 %v591_v50, %v593_v51 }
  0x36   : > { %1582 = vperm.xlu1 %4841, %v4759_v6   ;;  %v1391_v61 = vadd.f32 %v1390_v49, %v1389_v37  ;;  %v1416_v6 = vadd.f32 %v1415_v52, %v1414_v42  ;;  %v1397_v18 = vrot.slane %v1396_v62, 4  ;;  %v574_v31 = vadd.f32 %v572_v10, %v546_v8  ;;  %v5168_v49 = vld [vmem:[%s5036_s23 + $0x8] sm:$0xf] }
  0x37   : > { %v2285_v42 = vrot.slane %v5151_v29, %v5039_v13  ;;  %7913 = vst [vmem:[#allocation9_spill] sm:$0xff] %v5168_v49  ;;  %v1478_v58 = vrot.slane %v1477_v48, 4  ;;  %v1425_v26 = vadd.f32 %v1424_v4, %v1423_v46  ;;  %v597_v28 = vmax.f32 %v595_v7, 0.0 }
  0x38   : > { %v1392_v19 = vrot.slane %v1391_v61, 2  ;;  %v1417_v24 = vrot.slane %v1416_v6, 2  ;;  %v1398_v36 = vadd.f32 %v1397_v18, %v1396_v62  ;;  %v2310_v62 = vrot.slane %v5168_v49, %v5039_v13 }
  0x39   : > { %v2289_v10 = vsel %vm466_vm0, %v2285_v42, 0.0  ;;  %v1472_v18 = vadd.f32 %v1471_v55, %v1470_v41  ;;  %v1426_v51 = vrot.slane %v1425_v26, 1  ;;  %v599_v55 = vadd.f32 1e-06, %v597_v28 }
  0x3a   : > { %4843 = vset.pattern.permute.xlu1 %v7714_v2  ;;  %v1393_v39 = vadd.f32 %v1392_v19, %v1391_v61  ;;  %v1418_v47 = vadd.f32 %v1417_v24, %v1416_v6  ;;  %v1399_v53 = vrot.slane %v1398_v36, 2  ;;  %v2286_v61 = vcombine.high %v2285_v42, %v2285_v42 }
  0x3b   : > { %1637 = vperm.xlu1 %4843, %v5082_v38   ;;  %v1432_v38 = vmul.f32 %v5103_v1, %v5103_v1  ;;  %v2311_v24 = vcombine.high %v2310_v62, %v2310_v62  ;;  %v2314_v34 = vsel %vm466_vm0, %v2310_v62, 0.0  ;;  %v1427_v57 = vadd.f32 %v1426_v51, %v1425_v26 }
  0x3c   : > { %v1394_v56 = vrot.slane %v1393_v39, 1  ;;  %v1419_v0 = vrot.slane %v1418_v47, 1  ;;  %v1400_v12 = vadd.f32 %v1399_v53, %v1398_v36  ;;  %v2296_v23 = vsel %vm466_vm0, %v2286_v61, 0.0  ;;  %v5189_v61 = vld [vmem:[%s5030_s18 + $0xc] sm:$0xf]  ;;  %s4907_s18 = smov 1  }
  0x3d   : > { %v1440_v63 = vrot.slane %v1432_v38, %v5039_v13  ;;  %v588_v38 = vadd.f32 %v5154_v33, %v574_v31  ;;  %v2290_v31 = vrot.slane %v2289_v10, 4  ;;  %v2321_v50 = vsel %vm466_vm0, %v2311_v24, 0.0  ;;  %7914 = vst [vmem:[#allocation10_spill] sm:$0xff] %v5189_v61 }
  0x3e   : > { %v1395_v19 = vadd.f32 %v1394_v56, %v1393_v39  ;;  %v1420_v25 = vadd.f32 %v1419_v0, %v1418_v47  ;;  %v1401_v42 = vrot.slane %v1400_v12, 1  ;;  %v2297_v39 = vrot.slane %v2296_v23, 4 }
  0x3f   : > { %v1441_v21 = vcombine.high %v1440_v63, %v1440_v63  ;;  %v1444_v37 = vsel %vm466_vm0, %v1440_v63, 0.0  ;;  %v594_v63 = vmul.f32 %v5164_v43, %v5164_v43  ;;  %v592_v6 = vmul.f32 0.2, %v588_v38 }
  0x40   : > { %v1445_v52 = vrot.slane %v1444_v37, 4  ;;  %v2358_v47 = vmul.f32 %v5168_v49, %v5168_v49  ;;  %v2291_v53 = vadd.f32 %v2290_v31, %v2289_v10  ;;  %v1402_v62 = vadd.f32 %v1401_v42, %v1400_v12 }
  0x41   : > { %v1451_v40 = vsel %vm466_vm0, %v1441_v21, 0.0  ;;  %v1479_v21 = vadd.f32 %v1478_v58, %v1477_v48  ;;  %v596_v5 = vsub.f32 %v592_v6, %v594_v63  ;;  %v2315_v48 = vrot.slane %v2314_v34, 4 }
  0x42   : > { %v1452_v54 = vrot.slane %v1451_v40, 4  ;;  %v1446_v8 = vadd.f32 %v1445_v52, %v1444_v37  ;;  %v2332_v37 = vmul.f32 %v5151_v29, %v5151_v29  ;;  %v1428_v52 = vadd.f32 %v1420_v25, %v1395_v19 }
  0x43   : > { %v1480_v41 = vrot.slane %v1479_v21, 2  ;;  %v2322_v4 = vrot.slane %v2321_v50, 4  ;;  %v2298_v7 = vadd.f32 %v2297_v39, %v2296_v23  ;;  %v2316_v24 = vadd.f32 %v2315_v48, %v2314_v34 }
  0x44   : > { %v1453_v16 = vadd.f32 %v1452_v54, %v1451_v40  ;;  %v1447_v38 = vrot.slane %v1446_v8, 2  ;;  %v1473_v40 = vrot.slane %v1472_v18, 2  ;;  %v598_v54 = vmax.f32 %v596_v5, 0.0 }
  0x45   : > { %v2340_v58 = vrot.slane %v2332_v37, %v5039_v13  ;;  %v1481_v6 = vadd.f32 %v1480_v41, %v1479_v21  ;;  %v2366_v20 = vrot.slane %v2358_v47, %v5039_v13  ;;  %v1430_v19 = vadd.f32 %v1428_v52, %v5126_v44 }
  0x46   : > { %v1454_v36 = vrot.slane %v1453_v16, 2  ;;  %v1448_v56 = vadd.f32 %v1447_v38, %v1446_v8  ;;  %v1474_v0 = vadd.f32 %v1473_v40, %v1472_v18  ;;  %v2292_v10 = vrot.slane %v2291_v53, 2 }
  0x47   : > { %v3185_v5 = vrot.slane %v5189_v61, %v5039_v13  ;;  %v600_v28 = vadd.f32 1e-06, %v598_v54  ;;  %4863 = vrsqrt.f32 %v599_v55  ;;  %v2323_v23 = vadd.f32 %v2322_v4, %v2321_v50 }
  0x48   : > { %v1455_v63 = vadd.f32 %v1454_v36, %v1453_v16  ;;  %v1449_v12 = vrot.slane %v1448_v56, 1  ;;  %v2341_v16 = vcombine.high %v2340_v58, %v2340_v58  ;;  %v1475_v21 = vrot.slane %v1474_v0, 1 }
  0x49   : > { %v1482_v25 = vrot.slane %v1481_v6, 1  ;;  %v2299_v31 = vrot.slane %v2298_v7, 2  ;;  %v2317_v34 = vrot.slane %v2316_v24, 2  ;;  %v2367_v26 = vcombine.high %v2366_v20, %v2366_v20 }
  0x4a   : > { %v1456_v18 = vrot.slane %v1455_v63, 1  ;;  %v1429_v38 = vadd.f32 %v1427_v57, %v1402_v62  ;;  %v5197_v37 = vmul.f32 0.2, %v1430_v19  ;;  %v2293_v42 = vadd.f32 %v2292_v10, %v2291_v53 }
  0x4b   : > { %v3186_v36 = vcombine.high %v3185_v5, %v3185_v5  ;;  %v1450_v40 = vadd.f32 %v1449_v12, %v1448_v56  ;;  %v2344_v39 = vsel %vm466_vm0, %v2340_v58, 0.0  ;;  %v2351_v41 = vsel %vm466_vm0, %v2341_v16, 0.0  ;;  %v5205_v56 = vld [vmem:[%s5036_s23 + $0xc] sm:$0xf]  ;;  %s4908_s23 = smov 16  }
  0x4c   : > { %v2370_v48 = vsel %vm466_vm0, %v2366_v20, 0.0  ;;  %v1457_v47 = vadd.f32 %v1456_v18, %v1455_v63  ;;  %v1476_v51 = vadd.f32 %v1475_v21, %v1474_v0  ;;  %v2324_v50 = vrot.slane %v2323_v23, 2  ;;  %7915 = vst [vmem:[#allocation11_spill] sm:$0xff] %v5205_v56 }
  0x4d   : > { %v3189_v52 = vsel %vm466_vm0, %v3185_v5, 0.0  ;;  %v1483_v54 = vadd.f32 %v1482_v25, %v1481_v6  ;;  %v2300_v55 = vadd.f32 %v2299_v31, %v2298_v7  ;;  %v2318_v57 = vadd.f32 %v2317_v34, %v2316_v24 }
  0x4e   : > { %v2377_v62 = vsel %vm466_vm0, %v2367_v26, 0.0  ;;  %v2345_v53 = vrot.slane %v2344_v39, 4  ;;  %v2352_v4 = vrot.slane %v2351_v41, 4  ;;  %v2371_v19 = vrot.slane %v2370_v48, 4 }
  0x4f   : > { %v3196_v58 = vsel %vm466_vm0, %v3186_v36, 0.0  ;;  %4865 = vrsqrt.f32 %v600_v28  ;;  %v1431_v20 = vadd.f32 %v1429_v38, %v5139_v59  ;;  %v5211_v63 = vmul.f32 %v5197_v37, %v5197_v37 }
  0x50   : > { %v3190_v0 = vrot.slane %v3189_v52, 4  ;;  %v1484_v6 = vadd.f32 %v1476_v51, %v1450_v40  ;;  %v2294_v7 = vrot.slane %v2293_v42, 1  ;;  %v2325_v24 = vadd.f32 %v2324_v50, %v2323_v23 }
  0x51   : > { %v2378_v10 = vrot.slane %v2377_v62, 4  ;;  %v1485_v5 = vadd.f32 %v1483_v54, %v1457_v47  ;;  %v2319_v12 = vrot.slane %v2318_v57, 1  ;;  %v3197_v16 = vrot.slane %v3196_v58, 4 }
  0x52   : > { %v3210_v18 = vrot.slane %v5205_v56, %v5039_v13  ;;  %v2301_v21 = vrot.slane %v2300_v55, 1  ;;  %v2346_v25 = vadd.f32 %v2345_v53, %v2344_v39  ;;  %v2353_v28 = vadd.f32 %v2352_v4, %v2351_v41 }
  0x53   : > { %v2372_v31 = vadd.f32 %v2371_v19, %v2370_v48  ;;  %v5215_v34 = vmul.f32 0.2, %v1431_v20  ;;  %v3191_v26 = vadd.f32 %v3190_v0, %v3189_v52  ;;  %v5219_v40 = vadd.f32 %v1484_v6, %v5142_v60 }
  0x54   : > { %v3211_v38 = vcombine.high %v3210_v18, %v3210_v18  ;;  %v3214_v36 = vsel %vm466_vm0, %v3210_v18, 0.0  ;;  %v2295_v23 = vadd.f32 %v2294_v7, %v2293_v42  ;;  %v2326_v47 = vrot.slane %v2325_v24, 1  ;;  %v5221_v50 = vpop.eup %4863 }
  0x55   : > { %v2379_v51 = vadd.f32 %v2378_v10, %v2377_v62  ;;  %v5224_v54 = vadd.f32 %v1485_v5, %v5154_v33  ;;  %v2320_v39 = vadd.f32 %v2319_v12, %v2318_v57  ;;  %v3198_v41 = vadd.f32 %v3197_v16, %v3196_v58 }
  0x56   : > { %v3215_v48 = vrot.slane %v3214_v36, 4  ;;  %v2302_v53 = vadd.f32 %v2301_v21, %v2300_v55  ;;  %v2347_v4 = vrot.slane %v2346_v25, 2  ;;  %v2354_v52 = vrot.slane %v2353_v28, 2 }
  0x57   : > { %v2373_v19 = vrot.slane %v2372_v31, 2  ;;  %v3192_v20 = vrot.slane %v3191_v26, 2  ;;  %v3221_v6 = vsel %vm466_vm0, %v3211_v38, 0.0  ;;  %v3232_v42 = vmul.f32 %v5189_v61, %v5189_v61 }
  0x58   : > { %v3216_v0 = vadd.f32 %v3215_v48, %v3214_v36  ;;  %v2327_v62 = vadd.f32 %v2326_v47, %v2325_v24  ;;  %v2380_v7 = vrot.slane %v2379_v51, 2  ;;  %v3222_v10 = vrot.slane %v3221_v6, 4 }
  0x59   : > { %v3258_v5 = vmul.f32 %v5205_v56, %v5205_v56  ;;  %v2328_v57 = vadd.f32 %v2320_v39, %v2295_v23  ;;  %v3199_v58 = vrot.slane %v3198_v41, 2  ;;  %v3240_v55 = vrot.slane %v3232_v42, %v5039_v13 }
  0x5a   : > { %v3217_v12 = vrot.slane %v3216_v0, 2  ;;  %v2348_v16 = vadd.f32 %v2347_v4, %v2346_v25  ;;  %v2355_v18 = vadd.f32 %v2354_v52, %v2353_v28  ;;  %v3223_v21 = vadd.f32 %v3222_v10, %v3221_v6 }
  0x5b   : > { %v3266_v36 = vrot.slane %v3258_v5, %v5039_v13  ;;  %v2374_v38 = vadd.f32 %v2373_v19, %v2372_v31  ;;  %v3193_v48 = vadd.f32 %v3192_v20, %v3191_v26  ;;  %v3241_v14 = vcombine.high %v3240_v55, %v3240_v55 }
  0x5c   : > { %v3244_v24 = vsel %vm466_vm0, %v3240_v55, 0.0  ;;  %v5234_v47 = vpop.eup %4865  ;;  %v2381_v32 = vadd.f32 %v2380_v7, %v2379_v51  ;;  %v3224_v2 = vrot.slane %v3223_v21, 2  ;;  %v3200_v39 = vadd.f32 %v3199_v58, %v3198_v41 }
  0x5d   : > { %v3245_v3 = vrot.slane %v3244_v24, 4  ;;  %v3267_v23 = vcombine.high %v3266_v36, %v3266_v36  ;;  %v3218_v9 = vadd.f32 %v3217_v12, %v3216_v0  ;;  %v3251_v42 = vsel %vm466_vm0, %v3241_v14, 0.0 }
  0x5e   : > { %v3270_v25 = vsel %vm466_vm0, %v3266_v36, 0.0  ;;  %v2349_v28 = vrot.slane %v2348_v16, 1  ;;  %v3225_v4 = vadd.f32 %v3224_v2, %v3223_v21  ;;  %v3252_v31 = vrot.slane %v3251_v42, 4 }
  0x5f   : > { %v3246_v52 = vadd.f32 %v3245_v3, %v3244_v24  ;;  %v2356_v26 = vrot.slane %v2355_v18, 1  ;;  %v2375_v19 = vrot.slane %v2374_v38, 1  ;;  %v3271_v20 = vrot.slane %v3270_v25, 4 }
  0x60   : > { %v3277_v6 = vsel %vm466_vm0, %v3267_v23, 0.0  ;;  %v3194_v10 = vrot.slane %v3193_v48, 1  ;;  %v3253_v7 = vadd.f32 %v3252_v31, %v3251_v42  ;;  %v2382_v55 = vrot.slane %v2381_v32, 1 }
  0x61   : > { %v3247_v51 = vrot.slane %v3246_v52, 2  ;;  %v3278_v5 = vrot.slane %v3277_v6, 4  ;;  %v3201_v41 = vrot.slane %v3200_v39, 1  ;;  %v3219_v0 = vrot.slane %v3218_v9, 1 }
  0x62   : > { %v3272_v58 = vadd.f32 %v3271_v20, %v3270_v25  ;;  %v3226_v14 = vrot.slane %v3225_v4, 1  ;;  %v3254_v36 = vrot.slane %v3253_v7, 2  ;;  %v2329_v2 = vadd.f32 %v2327_v62, %v2302_v53 }
  0x63   : > { %v3248_v12 = vadd.f32 %v3247_v51, %v3246_v52  ;;  %v3279_v46 = vadd.f32 %v3278_v5, %v3277_v6  ;;  %v2350_v3 = vadd.f32 %v2349_v28, %v2348_v16  ;;  %v2357_v21 = vadd.f32 %v2356_v26, %v2355_v18 }
  0x64   : > { %v3273_v24 = vrot.slane %v3272_v58, 2  ;;  %v2376_v8 = vadd.f32 %v2375_v19, %v2374_v38  ;;  %v3195_v61 = vadd.f32 %v3194_v10, %v3193_v48  ;;  %v3255_v56 = vadd.f32 %v3254_v36, %v3253_v7 }
  0x65   : > { %v3280_v23 = vrot.slane %v3279_v46, 2  ;;  %v2383_v29 = vadd.f32 %v2382_v55, %v2381_v32  ;;  %v3220_v49 = vadd.f32 %v3219_v0, %v3218_v9  ;;  %v3249_v42 = vrot.slane %v3248_v12, 1 }
  0x66   : > { %v3274_v31 = vadd.f32 %v3273_v24, %v3272_v58  ;;  %v3202_v22 = vadd.f32 %v3201_v41, %v3200_v39  ;;  %v3227_v1 = vadd.f32 %v3226_v14, %v3225_v4  ;;  %v3256_v45 = vrot.slane %v3255_v56, 1 }
  0x67   : > { %v3281_v25 = vadd.f32 %v3280_v23, %v3279_v46  ;;  %v1490_v52 = vmul.f32 0.2, %v5219_v40  ;;  %v1491_v20 = vmul.f32 0.2, %v5224_v54  ;;  %v1493_v53 = vmul.f32 %v5215_v34, %v5215_v34 }
  0x68   : > { %v3275_v62 = vrot.slane %v3274_v31, 1  ;;  %v2330_v16 = vadd.f32 %v2328_v57, %v5126_v44  ;;  %v2331_v18 = vadd.f32 %v2329_v2, %v5139_v59  ;;  %v2384_v32 = vadd.f32 %v2376_v8, %v2350_v3 }
  0x69   : > { %v3282_v9 = vrot.slane %v3281_v25, 1  ;;  %v2385_v38 = vadd.f32 %v2383_v29, %v2357_v21  ;;  %v3228_v48 = vadd.f32 %v3220_v49, %v3195_v61  ;;  %v3250_v39 = vadd.f32 %v3249_v42, %v3248_v12 }
  0x6a   : > { %v3276_v28 = vadd.f32 %v3275_v62, %v3274_v31  ;;  %v3229_v4 = vadd.f32 %v3227_v1, %v3202_v22  ;;  %v3257_v46 = vadd.f32 %v3256_v45, %v3255_v56  ;;  %v4902_v40 = vmov 269488144  }
  0x6b   : > { %v3283_v26 = vadd.f32 %v3282_v9, %v3281_v25  ;;  %v656_v19 = vunpack.c.l.s4 %v4902_v40  ;;  %v4903_v54 = vmov 1966171168   ;;  %v1494_v10 = vsub.f32 %v1490_v52, %v5211_v63 }
  0x6c   : > { %v1107_v6 = vunpack.c.l.s4 %v4903_v54  ;;  %v7916_v57 = vrot.slane %v5164_v43, %v5112_v27  ;;  %v7917_v8 = vrot.slane %v5157_v35, %v5112_v27  ;;  %v1495_v29 = vsub.f32 %v1491_v20, %v1493_v53 }
  0x6d   : > { %v5252_v49 = vmul.f32 0.2, %v2330_v16  ;;  %v5254_v61 = vmul.f32 0.2, %v2331_v18  ;;  %v2386_v1 = vadd.f32 %v2384_v32, %v5142_v60  ;;  %v2387_v22 = vadd.f32 %v2385_v38, %v5154_v33 }
  0x6e   : > { %v621_v51 = vcombine.low %v7917_v8, %v7916_v57  ;;  %v3230_v45 = vadd.f32 %v3228_v48, %v5126_v44  ;;  %v3284_v56 = vadd.f32 %v3276_v28, %v3250_v39  ;;  %v634_v63 = vrot.slane %v5221_v50, %v5112_v27 }
  0x6f   : > { %v638_v7 = vrot.slane %v5234_v47, %v5112_v27  ;;  %v3231_v5 = vadd.f32 %v3229_v4, %v5139_v59  ;;  %v3285_v55 = vadd.f32 %v3283_v26, %v3257_v46  ;;  %v657_v41 = vunpack.c.0.s8 %v656_v19 }
  0x70   : > { %v4904_v0 = vmov 842150450   ;;  %v1496_v14 = vmax.f32 %v1494_v10, 0.0  ;;  %v1108_v12 = vunpack.c.0.s8 %v1107_v6  ;;  %v1497_v36 = vmax.f32 %v1495_v29, 0.0 }
  0x71   : > { %v884_v58 = vunpack.c.l.s4 %v4904_v0  ;;  %v2392_v2 = vmul.f32 %v5252_v49, %v5252_v49  ;;  %v2393_v44 = vmul.f32 %v5254_v61, %v5254_v61  ;;  %v2390_v3 = vmul.f32 0.2, %v2386_v1 }
  0x72   : > { %v2391_v21 = vmul.f32 0.2, %v2387_v22  ;;  %v3286_v24 = vadd.f32 %v3284_v56, %v5142_v60  ;;  %v5269_v23 = vmul.f32 0.2, %v3230_v45  ;;  %v628_v59 = vrot.slane %v621_v51, %v5039_v13 }
  0x73   : > { %v641_v42 = vcombine.low %v634_v63, %v638_v7  ;;  %v3287_v31 = vadd.f32 %v3285_v55, %v5154_v33  ;;  %v5273_v25 = vmul.f32 0.2, %v3231_v5  ;;  %v885_v52 = vunpack.c.0.s8 %v884_v58 }
  0x74   : > { %v1498_v20 = vadd.f32 1e-06, %v1496_v14  ;;  %v5280_v16 = vsub.s32 %v657_v41, %v5020_v11  ;;  %v1105_v60 = vcombine.low %v5157_v35, %v5164_v43  ;;  %v5285_v18 = vsub.s32 %v1108_v12, %v5020_v11 }
  0x75   : > { %v1499_v32 = vadd.f32 1e-06, %v1497_v36  ;;  %v2394_v9 = vsub.f32 %v2390_v3, %v2392_v2  ;;  %v2395_v33 = vsub.f32 %v2391_v21, %v2393_v44  ;;  %v3290_v38 = vmul.f32 0.2, %v3286_v24 }
  0x76   : > { %7918 = vst [vmem:[#allocation12_spill] sm:$0xff] %v5280_v16  ;;  %7919 = vst [vmem:[#allocation13_spill] sm:$0xff] %v5285_v18  ;;  %v3292_v48 = vmul.f32 %v5269_v23, %v5269_v23  ;;  %v630_v39 = vsub.f32 %v5043_v15, %v628_v59  ;;  %v648_v28 = vrot.slane %v641_v42, %v5039_v13  ;;  %v3291_v4 = vmul.f32 0.2, %v3287_v31 }
  0x77   : > { %v3293_v46 = vmul.f32 %v5273_v25, %v5273_v25  ;;  %v5294_v35 = vsub.s32 %v885_v52, %v5020_v11  ;;  %4867 = vrsqrt.f32 %v1498_v20  ;;  %v881_v43 = vsub.f32 %v5050_v17, %v628_v59 }
  0x78   : > { %v1112_v26 = vrot.slane %v1105_v60, %v5285_v18  ;;  %v1124_v40 = vcombine.low %v5221_v50, %v5234_v47  ;;  %4869 = vrsqrt.f32 %v1499_v32  ;;  %v2396_v54 = vmax.f32 %v2394_v9, 0.0 }
  0x79   : > { %7920 = vst [vmem:[#allocation14_spill] sm:$0xff] %v5294_v35  ;;  %v2397_v6 = vmax.f32 %v2395_v33, 0.0  ;;  %v3294_v10 = vsub.f32 %v3290_v38, %v3292_v48  ;;  %v650_v57 = vmul.f32 %v648_v28, %v630_v39  ;;  %v3295_v51 = vsub.f32 %v3291_v4, %v3293_v46 }
  0x7a   : > { %v7727_v29 = vmov 0.0   ;;  %v882_v17 = vmul.f32 %v881_v43, %v648_v28  ;;  %v1119_v50 = vrot.slane %v1112_v26, %v5285_v18  ;;  %v1131_v47 = vrot.slane %v1124_v40, %v5285_v18 }
  0x7b   : > { %4331 = vmatprep.mubr.f32.mxu0 %v7727_v29  ;;  %4437 = vmatprep.mubr.f32.mxu1 %v7727_v29  ;;  %v2398_v45 = vadd.f32 1e-06, %v2396_v54  ;;  %v2399_v56 = vadd.f32 1e-06, %v2397_v6  ;;  %v3296_v63 = vmax.f32 %v3294_v10, 0.0  ;;  %v3297_v0 = vmax.f32 %v3295_v51, 0.0 }
  0x7c   : > { %v5313_v58 = vsub.s32 4, %v5020_v11  ;;  %v1121_v12 = vsub.f32 %v5116_v30, %v1119_v50  ;;  %v1138_v36 = vrot.slane %v1131_v47, %v5285_v18  ;;  %v1517_v20 = vrot.slane %v5197_v37, %v5112_v27  ;;  %v7926_v6 = vld [vmem:[#allocation7_spill] sm:$0xff]  ;;  %v7927_v51 = vld [vmem:[#allocation4_spill] sm:$0xff] }
  0x7d   : > { %4871 = vrsqrt.f32 %v2398_v45  ;;  %v3298_v44 = vadd.f32 1e-06, %v3296_v63  ;;  %v3299_v11 = vadd.f32 1e-06, %v3297_v0  ;;  %v1521_v60 = vrot.slane %v5215_v34, %v5112_v27 }
  0x7e   : > { %7921 = vst [vmem:[#allocation15_spill] sm:$0xff] %v5313_v58  ;;  %4873 = vrsqrt.f32 %v2399_v56  ;;  %v1140_v42 = vmul.f32 %v1138_v36, %v1121_v12  ;;  %v2009_v48 = vcombine.low %v5197_v37, %v5215_v34  ;;  %v3807_v63 = vcombine.low %v5269_v23, %v5273_v25 }
  0x7f   : > { %4875 = vrsqrt.f32 %v3298_v44  ;;  %v1524_v39 = vcombine.low %v1517_v20, %v1521_v60  ;;  %v2421_v20 = vrot.slane %v5254_v61, %v5112_v27  ;;  %vm3520_vm0 = vcmask 990208  }
  0x80   : > { %4877 = vrsqrt.f32 %v3299_v11  ;;  %v2016_v43 = vrot.slane %v2009_v48, %v5285_v18 }
  0x81   : > { %v5359_v37 = vrot.slane %v1524_v39, %v5039_v13 }
  0x84   : > { %v4868_v59 = vpop.eup %4867 }
  0x85   : > { %v4870_v52 = vpop.eup %4869  ;;  %v1537_v28 = vrot.slane %v4868_v59, %v5112_v27 }
  0x86   : > { %v1541_v4 = vrot.slane %v4870_v52, %v5112_v27  ;;  %v2028_v26 = vcombine.low %v4868_v59, %v4870_v52  ;;  %v3814_v59 = vrot.slane %v3807_v63, %v5285_v18  ;;  %v2417_v52 = vrot.slane %v5252_v49, %v5112_v27 }
  0x88   : > { %v5275_v53 = vpop.permute.xlu0 %734  ;;  %v5277_v62 = vpop.permute.xlu1 %679  ;;  %v1544_v34 = vcombine.low %v1537_v28, %v1541_v4  ;;  %v2035_v50 = vrot.slane %v2028_v26, %v5285_v18 }
  0x8a   : > { %v4872_v54 = vpop.eup %4871  ;;  %v2042_v12 = vrot.slane %v2035_v50, %v5285_v18 }
  0x8c   : > { %v5300_v19 = vpop.permute.xlu1 %726 }
  0x8d   : > { %v654_v15 = vpop.permute.xlu0 %653 }
  0x8e   : > { %v661_v8 = vrot.slane %v654_v15, %v5280_v16  ;;  %v889_v1 = vrot.slane %v654_v15, %v5294_v35  ;;  %v1144_v31 = vrot.slane %v654_v15, %v5313_v58  ;;  %v2909_v15 = vcombine.low %v5252_v49, %v5254_v61 }
  0x8f   : > { %v3821_v49 = vrot.slane %v3814_v59, %v5285_v18 }
  0x90   : > { %v663_v7 = vmul.f32 %v661_v8, %v650_v57  ;;  %v891_v14 = vmul.f32 %v889_v1, %v882_v17  ;;  %v1146_v38 = vmul.f32 %v1144_v31, %v1140_v42  ;;  %v4874_v57 = vpop.eup %4873  ;;  %v2023_v8 = vrot.slane %v2016_v43, %v5285_v18 }
  0x91   : > { %v667_v22 = vpop.permute.xlu0 %666  ;;  %v5310_v41 = vpop.permute.xlu1 %775  ;;  %v1533_v17 = vsub.f32 %v7927_v51, %v5359_v37  ;;  %v5377_v1 = vrot.slane %v1544_v34, %v5039_v13  ;;  %v2916_v47 = vrot.slane %v2909_v15, %v5285_v18  ;;  %v2928_v56 = vcombine.low %v4872_v54, %v4874_v57 }
  0x92   : > { %v674_v5 = vrot.slane %v667_v22, %v5280_v16  ;;  %v898_v55 = vrot.slane %v667_v22, %v5294_v35  ;;  %v1150_v9 = vrot.slane %v667_v22, %v5313_v58  ;;  %v5381_v22 = vpop.eup %4875  ;;  %v2424_v34 = vcombine.low %v2417_v52, %v2421_v20 }
  0x93   : > { %v1553_v0 = vmul.f32 %v5377_v1, %v1533_v17  ;;  %v2923_v36 = vrot.slane %v2916_v47, %v5285_v18  ;;  %v2935_v44 = vrot.slane %v2928_v56, %v5285_v18  ;;  %v2437_v15 = vrot.slane %v4872_v54, %v5112_v27 }
  0x94   : > { %v5317_v2 = vadd.f32 %v674_v5, %v663_v7  ;;  %v5323_v21 = vadd.f32 %v898_v55, %v891_v14  ;;  %v5351_v46 = vadd.f32 %v1150_v9, %v1146_v38  ;;  %v5387_v7 = vpop.eup %4877  ;;  %v2025_v55 = vsub.f32 %v5116_v30, %v2023_v8 }
  0x95   : > { %v5383_v45 = vpop.permute.xlu0 %1556  ;;  %v3826_v42 = vcombine.low %v5381_v22, %v5387_v7  ;;  %v2925_v39 = vsub.f32 %v5116_v30, %v2923_v36  ;;  %v2942_v28 = vrot.slane %v2935_v44, %v5285_v18  ;;  %v2441_v8 = vrot.slane %v4874_v57, %v5112_v27 }
  0x96   : > { %v5321_v3 = vrot.slane %v5317_v2, %v5039_v13  ;;  %7922 = vst [vmem:[#allocation16_spill] sm:$0xff] %v5323_v21  ;;  %v5325_v24 = vpop.permute.xlu1 %808  ;;  %v5338_v32 = vrot.slane %v5323_v21, %v5039_v13  ;;  %v5367_v10 = vrot.slane %v5351_v46, %v7926_v6  ;;  %v1564_v14 = vrot.slane %v5383_v45, %v5280_v16 }
  0x97   : > { %7923 = vst [vmem:[#allocation17_spill] sm:$0xff] %v5325_v24  ;;  %v1157_v11 = vrot.slane %v5351_v46, %v5112_v27  ;;  %v2044_v9 = vmul.f32 %v2042_v12, %v2025_v55  ;;  %v2048_v38 = vrot.slane %v5383_v45, %v5313_v58  ;;  %v3833_v61 = vrot.slane %v3826_v42, %v5285_v18 }
  0x98   : > { %815 = vrot.lane.b32.xlu0 %v5321_v3, %s4906_s22  ;;  %691 = vrot.lane.b32.xlu1 %v5321_v3, %s4907_s18  ;;  %v1566_v60 = vmul.f32 %v1564_v14, %v1553_v0  ;;  %v2944_v51 = vmul.f32 %v2942_v28, %v2925_v39  ;;  %v3823_v50 = vsub.f32 %v5116_v30, %v3821_v49 }
  0x99   : > { %v2050_v26 = vmul.f32 %v2048_v38, %v2044_v9  ;;  %v3840_v47 = vrot.slane %v3833_v61, %v5285_v18  ;;  %v5436_v56 = vpop.permute.xlu0 %2469  ;;  %v2431_v57 = vrot.slane %v2424_v34, %v5039_v13  ;;  %v2444_v0 = vcombine.low %v2437_v15, %v2441_v8 }
  0x9a   : > { %v3317_v30 = vrot.slane %v5269_v23, %v5112_v27  ;;  %v3321_v14 = vrot.slane %v5273_v25, %v5112_v27  ;;  %v2954_v23 = vrot.slane %v5436_v56, %v5313_v58  ;;  %v7933_v25 = vld [vmem:[#allocation9_spill] sm:$0xff]  ;;  %v3337_v9 = vrot.slane %v5381_v22, %v5112_v27 }
  0x9b   : > { %v5341_v33 = vpop.permute.xlu1 %856  ;;  %v3842_v36 = vmul.f32 %v3840_v47, %v3823_v50  ;;  %v2451_v20 = vrot.slane %v2444_v0, %v5039_v13  ;;  %v3341_v38 = vrot.slane %v5387_v7, %v5112_v27  ;;  %v1793_v49 = vrot.slane %v5383_v45, %v5294_v35  ;;  %v7935_v7 = vld [vmem:[#allocation8_spill] sm:$0xff]  ;;  %v7937_v47 = vld [vmem:[#allocation11_spill] sm:$0xff] }
  0x9c   : > { %7924 = vst [vmem:[#allocation18_spill] sm:$0xff] %v5341_v33  ;;  %910 = vrot.lane.b32.xlu0 %v5338_v32, %s4907_s18  ;;  %758 = vrot.lane.b32.xlu1 %v5321_v3, %s4908_s23  ;;  %v2433_v61 = vsub.f32 %v7935_v7, %v2431_v57 }
  0x9d   : > { %v5467_v52 = vpop.permute.xlu0 %3369 }
  0x9e   : > { %v3852_v22 = vrot.slane %v5467_v52, %v5313_v58  ;;  %v2453_v50 = vmul.f32 %v2451_v20, %v2433_v61 }
  0xa0   : > { %974 = vrot.lane.b32.xlu0 %v5338_v32, %s4908_s23  ;;  %799 = vrot.lane.b32.xlu1 %v5321_v3, %s4909_s29  ;;  %v5361_v40 = vpop.permute.xlu1 %872 }
  0xa1   : > { %7925 = vst [vmem:[#allocation19_spill] sm:$0xff] %v5361_v40 }
  0xa4   : > { %1017 = vrot.lane.b32.xlu0 %v5338_v32, %s4909_s29  ;;  %1164 = vrot.lane.b32.xlu1 %v5367_v10, %s4907_s18 }
  0xa5   : > { %v5389_v5 = vpop.permute.xlu1 %1569 }
  0xa6   : > { %v1577_v31 = vrot.slane %v5389_v5, %v5280_v16  ;;  %v2054_v43 = vrot.slane %v5389_v5, %v5313_v58 }
  0xa8   : > { %1037 = vrot.lane.b32.xlu0 %v5338_v32, %s4906_s22  ;;  %1228 = vrot.lane.b32.xlu1 %v5367_v10, %s4908_s23  ;;  %v5424_v4 = vadd.f32 %v1577_v31, %v1566_v60  ;;  %v5442_v55 = vadd.f32 %v2054_v43, %v2050_v26  ;;  %v2685_v31 = vsub.f32 %v7933_v25, %v2431_v57 }
  0xa9   : > { %v5418_v48 = vpop.permute.xlu1 %2456  ;;  %v3324_v60 = vcombine.low %v3317_v30, %v3321_v14  ;;  %v3344_v26 = vcombine.low %v3337_v9, %v3341_v38 }
  0xaa   : > { %7928 = vst [vmem:[#allocation4_spill] sm:$0xff] %v5424_v4  ;;  %v2948_v17 = vrot.slane %v5418_v48, %v5313_v58  ;;  %v5440_v63 = vrot.slane %v5424_v4, %v5039_v13  ;;  %7930 = vst [vmem:[#allocation21_spill] sm:$0xff] %v5442_v55  ;;  %v5458_v59 = vrot.slane %v5442_v55, %v5112_v27 }
  0xab   : > { %v2686_v43 = vmul.f32 %v2685_v31, %v2451_v20  ;;  %v3331_v34 = vrot.slane %v3324_v60, %v5039_v13  ;;  %v2693_v45 = vrot.slane %v5418_v48, %v5294_v35  ;;  %v2464_v30 = vrot.slane %v5418_v48, %v5280_v16 }
  0xac   : > { %1162 = vrot.lane.b32.xlu0 %v1157_v11, %s4907_s18  ;;  %1267 = vrot.lane.b32.xlu1 %v5367_v10, %s4909_s29  ;;  %7929 = vst [vmem:[#allocation20_spill] sm:$0xff] %v5440_v63  ;;  %v2950_v12 = vmul.f32 %v2948_v17, %v2944_v51  ;;  %7931 = vst [vmem:[#allocation22_spill] sm:$0xff] %v5458_v59  ;;  %v690_v31 = vcombine.high %v5321_v3, %v5321_v3 }
  0xad   : > { %v5444_v54 = vpop.permute.xlu1 %3356  ;;  %v3583_v57 = vsub.f32 %v7937_v47, %v3331_v34  ;;  %v2695_v14 = vmul.f32 %v2693_v45, %v2686_v43  ;;  %v2477_v20 = vrot.slane %v5436_v56, %v5280_v16 }
  0xae   : > { %v3846_v44 = vrot.slane %v5444_v54, %v5313_v58  ;;  %v3591_v25 = vrot.slane %v5444_v54, %v5294_v35 }
  0xb0   : > { %1226 = vrot.lane.b32.xlu0 %v1157_v11, %s4908_s23  ;;  %1285 = vrot.lane.b32.xlu1 %v1157_v11, %s4906_s22  ;;  %v3848_v39 = vmul.f32 %v3846_v44, %v3842_v36  ;;  %v2702_v44 = vrot.slane %v5436_v56, %v5294_v35 }
  0xb2   : > { %v5497_v15 = vadd.f32 %v3852_v22, %v3848_v39  ;;  %v3600_v39 = vrot.slane %v5467_v52, %v5294_v35 }
  0xb4   : > { %1265 = vrot.lane.b32.xlu0 %v1157_v11, %s4909_s29  ;;  %1661 = vrot.lane.b32.xlu1 %v5440_v63, %s4910_s30  ;;  %v7932_v11 = vld [vmem:[#allocation5_spill] sm:$0xff]  ;;  %7936 = vst [vmem:[#allocation9_spill] sm:$0xff] %v5497_v15  ;;  %v5523_v36 = vrot.slane %v5497_v15, %v7926_v6 }
  0xb5   : > { %v1785_v42 = vsub.f32 %v7932_v11, %v5359_v37  ;;  %v5476_v37 = vadd.f32 %v2954_v23, %v2950_v12  ;;  %v5519_v12 = vrot.slane %v5497_v15, %v5112_v27  ;;  %v5535_v23 = vadd.f32 %v2702_v44, %v2695_v14 }
  0xb6   : > { %7940 = vst [vmem:[#allocation23_spill] sm:$0xff] %v5523_v36 }
  0xb7   : > { %7934 = vst [vmem:[#allocation5_spill] sm:$0xff] %v5476_v37  ;;  %v1786_v28 = vmul.f32 %v1785_v42, %v5377_v1  ;;  %v1802_v1 = vrot.slane %v5389_v5, %v5294_v35  ;;  %v5501_v8 = vrot.slane %v5476_v37, %v5112_v27  ;;  %v5505_v51 = vrot.slane %v5476_v37, %v7926_v6  ;;  %v5733_v37 = vld [vmem:[%s7698_s6 + $0x18] sm:$0x1f] }
  0xb8   : > { %1287 = vrot.lane.b32.xlu0 %v5367_v10, %s4906_s22  ;;  %2066 = vrot.lane.b32.xlu1 %v5458_v59, %s4911_s14  ;;  %v5480_v10 = vrot.slane %v5442_v55, %v7926_v6  ;;  %v3351_v5 = vrot.slane %v3344_v26, %v5039_v13  ;;  %7939 = vst [vmem:[#allocation11_spill] sm:$0xff] %v5519_v12  ;;  %7942 = vst [vmem:[#allocation25_spill] sm:$0xff] %v5535_v23 }
  0xb9   : > { %v1795_v17 = vmul.f32 %v1793_v49, %v1786_v28  ;;  %v2466_v42 = vmul.f32 %v2464_v30, %v2453_v50  ;;  %v5550_v9 = vrot.slane %v5535_v23, %v5039_v13  ;;  %v909_v28 = vcombine.high %v5338_v32, %v5338_v32  ;;  %v7947_v49 = vld [vmem:[#allocation10_spill] sm:$0xff]  ;;  %v5650_v30 = vpop.permute.xlu1 %1582 }
  0xba   : > { %v3584_v11 = vmul.f32 %v3583_v57, %v3351_v5  ;;  %v3333_v22 = vsub.f32 %v7947_v49, %v3331_v34  ;;  %v3364_v32 = vrot.slane %v5444_v54, %v5280_v16  ;;  %v3377_v34 = vrot.slane %v5467_v52, %v5280_v16  ;;  %7958 = vst [vmem:[#allocation39_spill] sm:$0xff] %v5650_v30 }
  0xbb   : > { %v5513_v0 = vadd.f32 %v1802_v1, %v1795_v17  ;;  %v5546_v60 = vadd.f32 %v2477_v20, %v2466_v42  ;;  %7944 = vst [vmem:[#allocation27_spill] sm:$0xff] %v5550_v9  ;;  %v5589_v1 = vcombine.high %v5440_v63, %v5440_v63  ;;  %v5612_v45 = vcombine.high %v5550_v9, %v5550_v9  ;;  %v5672_v42 = vld [vmem:[%s7695_s3] sm:$0x3] }
  0xbc   : > { %1594 = vrot.lane.b32.xlu0 %v5440_v63, %s4911_s14  ;;  %2068 = vrot.lane.b32.xlu1 %v5480_v10, %s4911_s14  ;;  %v3593_v38 = vmul.f32 %v3591_v25, %v3584_v11  ;;  %v3353_v61 = vmul.f32 %v3351_v5, %v3333_v22  ;;  %v5632_v5 = vpop.permute.xlu0 %767  ;;  %v5667_v11 = vld [vmem:[%s7698_s6 + $0x10] sm:$0x1f]  ;;  %vm607_vm1 = vcmp.ge.f32.partialorder %v5672_v42, 1.0  ;;  %vm609_vm3 = vcmp.lt.f32.partialorder %v5672_v42, 15.0 }
  0xbd   : > { %7938 = vst [vmem:[#allocation8_spill] sm:$0xff] %v5513_v0  ;;  %v5533_v48 = vrot.slane %v5513_v0, %v5039_v13  ;;  %7943 = vst [vmem:[#allocation26_spill] sm:$0xff] %v5546_v60  ;;  %v5559_v3 = vrot.slane %v5546_v60, %v5039_v13  ;;  %v5660_v44 = vpop.permute.xlu1 %1637  ;;  %v7968_v23 = vmov 0   ;;  %vm1510_vm5 = vcmp.ge.f32.partialorder %v5672_v42, 2.0 }
  0xbe   : > { %v5561_v56 = vadd.f32 %v3600_v39, %v3593_v38  ;;  %v3366_v43 = vmul.f32 %v3364_v32, %v3353_v61  ;;  %7950 = vst [vmem:[#allocation31_spill] sm:$0xff] %v5589_v1  ;;  %7953 = vst [vmem:[#allocation34_spill] sm:$0xff] %v5612_v45  ;;  %v608_v38 = vsel %vm607_vm1, 1.0, %v7727_v29  ;;  %v7961_v39 = vmov 4  }
  0xbf   : > { %7941 = vst [vmem:[#allocation24_spill] sm:$0xff] %v5533_v48  ;;  %7945 = vst [vmem:[#allocation28_spill] sm:$0xff] %v5559_v3  ;;  %v5604_v52 = vcombine.high %v5533_v48, %v5533_v48  ;;  %v5620_v17 = vcombine.high %v5559_v3, %v5559_v3  ;;  %v704_v22 = vrot.slane %v608_v38, %v5112_v27  ;;  %vm3310_vm7 = vcmp.ge.f32.partialorder %v5672_v42, 7.0 }
  0xc0   : > { %2966 = vrot.lane.b32.xlu0 %v5501_v8, %s4912_s15  ;;  %2968 = vrot.lane.b32.xlu1 %v5505_v51, %s4912_s15  ;;  %7946 = vst [vmem:[#allocation29_spill] sm:$0xff] %v5561_v56  ;;  %v5571_v7 = vrot.slane %v5561_v56, %v5039_v13  ;;  %v5585_v26 = vadd.f32 %v3377_v34, %v3366_v43  ;;  %v5640_v47 = vpop.permute.xlu0 %1670  ;;  %7959 = vst [vmem:[#allocation40_spill] sm:$0xff] %v5660_v44  ;;  %vm2410_vm9 = vcmp.ge.f32.partialorder %v5672_v42, 5.0  ;;  %vm719_vm1 = vcmask 130048  }
  0xc1   : > { %7952 = vst [vmem:[#allocation33_spill] sm:$0xff] %v5604_v52  ;;  %7954 = vst [vmem:[#allocation35_spill] sm:$0xff] %v5620_v17  ;;  %v5767_v33 = vrot.slane %v608_v38, %v7926_v6  ;;  %vm1512_vm11 = vcmp.lt.f32.partialorder %v5672_v42, 14.0  ;;  %vm2412_vm13 = vcmp.lt.f32.partialorder %v5672_v42, 11.0  ;;  %vm3312_vm15 = vcmp.lt.f32.partialorder %v5672_v42, 9.0 }
  0xc2   : > { %7948 = vst [vmem:[#allocation10_spill] sm:$0xff] %v5571_v7  ;;  %7949 = vst [vmem:[#allocation30_spill] sm:$0xff] %v5585_v26  ;;  %v5596_v54 = vrot.slane %v5585_v26, %v5039_v13  ;;  %v5628_v50 = vcombine.high %v5571_v7, %v5571_v7  ;;  %v4771_v42 = vld [vmem:[%s7699_s7 + $0x18] sm:$0x1f] }
  0xc3   : > { %7956 = vst [vmem:[#allocation37_spill] sm:$0xff] %v5640_v47 }
  0xc4   : > { %3864 = vrot.lane.b32.xlu0 %v5519_v12, %s4913_s16  ;;  %3866 = vrot.lane.b32.xlu1 %v5523_v36, %s4913_s16  ;;  %7951 = vst [vmem:[#allocation32_spill] sm:$0xff] %v5596_v54  ;;  %7955 = vst [vmem:[#allocation36_spill] sm:$0xff] %v5628_v50  ;;  %v5644_v57 = vcombine.high %v5596_v54, %v5596_v54  ;;  %v5652_v14 = vpop.permute.xlu0 %751 }
  0xc6   : > { %7957 = vst [vmem:[#allocation38_spill] sm:$0xff] %v5644_v57 }
  0xc8   : > { %1814 = vrot.lane.b32.xlu0 %v5533_v48, %s4911_s14  ;;  %760 = vrot.lane.b32.xlu1 %v690_v31, %s4908_s23  ;;  %v5674_v25 = vpop.permute.xlu0 %1654 }
  0xc9   : > { %7960 = vst [vmem:[#allocation41_spill] sm:$0xff] %v5674_v25  ;;  %v7969_v25 = vmov 0.0  }
  0xcc   : > { %2714 = vrot.lane.b32.xlu0 %v5550_v9, %s4912_s15  ;;  %817 = vrot.lane.b32.xlu1 %v690_v31, %s4906_s22 }
  0xd0   : > { %2494 = vrot.lane.b32.xlu0 %v5559_v3, %s4912_s15  ;;  %912 = vrot.lane.b32.xlu1 %v909_v28, %s4907_s18 }
  0xd4   : > { %3612 = vrot.lane.b32.xlu0 %v5571_v7, %s4913_s16  ;;  %976 = vrot.lane.b32.xlu1 %v909_v28, %s4908_s23 }
  0xd8   : > { %2189 = vrot.lane.b32.xlu0 %v5458_v59, %s4914_s17  ;;  %1019 = vrot.lane.b32.xlu1 %v909_v28, %s4909_s29 }
  0xdc   : > { %693 = vrot.lane.b32.xlu0 %v690_v31, %s4907_s18  ;;  %1039 = vrot.lane.b32.xlu1 %v909_v28, %s4906_s22  ;;  %s4917_s18 = smov 96  }
  0xe0   : > { %801 = vrot.lane.b32.xlu0 %v690_v31, %s4909_s29  ;;  %1596 = vrot.lane.b32.xlu1 %v5589_v1, %s4911_s14 }
  0xe4   : > { %3394 = vrot.lane.b32.xlu0 %v5596_v54, %s4913_s16  ;;  %1663 = vrot.lane.b32.xlu1 %v5589_v1, %s4910_s30 }
  0xe8   : > { %3089 = vrot.lane.b32.xlu0 %v5501_v8, %s4915_s19  ;;  %1816 = vrot.lane.b32.xlu1 %v5604_v52, %s4911_s14  ;;  %s4918_s14 = smov 80  }
  0xec   : > { %3987 = vrot.lane.b32.xlu0 %v5519_v12, %s4916_s20  ;;  %2716 = vrot.lane.b32.xlu1 %v5612_v45, %s4912_s15 }
  0xf0   : > { %1941 = vrot.lane.b32.xlu0 %v5533_v48, %s4914_s17  ;;  %2496 = vrot.lane.b32.xlu1 %v5620_v17, %s4912_s15 }
  0xf4   : > { %1718 = vrot.lane.b32.xlu0 %v5440_v63, %s4914_s17  ;;  %3614 = vrot.lane.b32.xlu1 %v5628_v50, %s4913_s16 }
  0xf8   : > { %2841 = vrot.lane.b32.xlu0 %v5550_v9, %s4915_s19  ;;  %2191 = vrot.lane.b32.xlu1 %v5480_v10, %s4914_s17 }
  0xfc   : > { %2618 = vrot.lane.b32.xlu0 %v5559_v3, %s4915_s19  ;;  %3396 = vrot.lane.b32.xlu1 %v5644_v57, %s4913_s16 }
 0x100   : > { %3739 = vrot.lane.b32.xlu0 %v5571_v7, %s4916_s20  ;;  %3091 = vrot.lane.b32.xlu1 %v5505_v51, %s4915_s19 }
 0x104   : > { %3516 = vrot.lane.b32.xlu0 %v5596_v54, %s4916_s20  ;;  %3989 = vrot.lane.b32.xlu1 %v5523_v36, %s4916_s20 }
 0x108   : > { %2554 = vperm.xlu0 %4844, %v5667_v11   ;;  %1943 = vrot.lane.b32.xlu1 %v5604_v52, %s4914_s17 }
 0x10a   : > { %v5680_v31 = vpop.permute.xlu0 %815  ;;  %v5682_v20 = vpop.permute.xlu1 %691 }
 0x10b   : > { %v699_v54 = vsel %vm695_vm2, 0.0, %v5682_v20 }
 0x10c   : > { %4850 = vset.pattern.permute.xlu0 %v7961_v39  ;;  %1720 = vrot.lane.b32.xlu1 %v5589_v1, %s4914_s17  ;;  %v7972_v1 = vmov 3  }
 0x10e   : > { %v5688_v28 = vpop.permute.xlu0 %910  ;;  %v5690_v49 = vpop.permute.xlu1 %758 }
 0x10f   : > { %7962 = vst [vmem:[#allocation42_spill] sm:$0xff] %v5690_v49  ;;  %v917_v61 = vsel %vm695_vm2, 0.0, %v5688_v28 }
 0x110   : > { %v5695_v32 = vmul.f32 %v917_v61, %v704_v22  ;;  %2843 = vrot.lane.b32.xlu1 %v5612_v45, %s4915_s19 }
 0x112   : > { %7963 = vst [vmem:[#allocation43_spill] sm:$0xff] %v5695_v32  ;;  %v5699_v43 = vpop.permute.xlu0 %974  ;;  %v5701_v34 = vpop.permute.xlu1 %799  ;;  %922 = vrot.lane.b32.xlu0 %v5695_v32, %s4908_s23 }
 0x113   : > { %7964 = vst [vmem:[#allocation44_spill] sm:$0xff] %v5699_v43  ;;  %7965 = vst [vmem:[#allocation45_spill] sm:$0xff] %v5701_v34 }
 0x114   : > { %2620 = vrot.lane.b32.xlu1 %v5620_v17, %s4915_s19 }
 0x116   : > { %v5707_v29 = vpop.permute.xlu0 %1017  ;;  %v1165_v56 = vpop.permute.xlu1 %1164  ;;  %954 = vrot.lane.b32.xlu0 %v5695_v32, %s4909_s29 }
 0x117   : > { %7966 = vst [vmem:[#allocation46_spill] sm:$0xff] %v5707_v29 }
 0x118   : > { %3741 = vrot.lane.b32.xlu1 %v5628_v50, %s4916_s20 }
 0x11a   : > { %v5713_v61 = vpop.permute.xlu0 %1037  ;;  %v5715_v60 = vpop.permute.xlu1 %1228 }
 0x11c   : > { %3518 = vrot.lane.b32.xlu1 %v5644_v57, %s4916_s20 }
 0x11e   : > { %v1163_v4 = vpop.permute.xlu0 %1162  ;;  %v5719_v26 = vpop.permute.xlu1 %1267 }
 0x11f   : > { %7967 = vst [vmem:[#allocation47_spill] sm:$0xff] %v5719_v26  ;;  %v1169_v0 = vsel %vm695_vm2, 0.0, %v1163_v4 }
 0x120   : > { %v5722_v55 = vmul.f32 %v1169_v0, %v704_v22  ;;  %2537 = vperm.xlu1 %4843, %v5667_v11   ;;  %v610_v0 = vsel %vm609_vm3, 1.0, %v7969_v25 }
 0x121   : > { %v5745_v44 = vrot.slane %v610_v0, %v7926_v6 }
 0x122   : > { %v5725_v30 = vpop.permute.xlu0 %1226  ;;  %1174 = vrot.lane.b32.xlu0 %v5722_v55, %s4908_s23  ;;  %v1286_v15 = vpop.permute.xlu1 %1285 }
 0x124   : > { %4845 = vset.pattern.permute.xlu1 %v7968_v23 }
 0x125   : > { %3428 = vperm.xlu1 %4845, %v5733_v37  }
 0x126   : > { %v5738_v47 = vpop.permute.xlu0 %1265  ;;  %1206 = vrot.lane.b32.xlu0 %v5722_v55, %s4909_s29  ;;  %v5742_v63 = vpop.permute.xlu1 %1661 }
 0x127   : > { %7970 = vst [vmem:[#allocation48_spill] sm:$0xff] %v5738_v47  ;;  %7971 = vst [vmem:[#allocation49_spill] sm:$0xff] %v5742_v63  ;;  %v5756_v63 = vmul.f32 %v704_v22, %v699_v54 }
 0x129   : > { %4846 = vset.pattern.permute.xlu1 %v7972_v1  ;;  %v1511_v1 = vsel %vm1510_vm5, 1.0, %v7969_v25  ;;  %vm1622_vm5 = vcmask 261120  }
 0x12a   : > { %v1288_v7 = vpop.permute.xlu0 %1287  ;;  %v2067_v18 = vpop.permute.xlu1 %2066  ;;  %3436 = vperm.xlu1 %4846, %v5733_v37   ;;  %v1607_v45 = vrot.slane %v1511_v1, %v5112_v27 }
 0x12b   : > { %v1292_v17 = vsel %vm819_vm4, %v1288_v7, 0.0 }
 0x12c   : > { %v5754_v57 = vmul.f32 %v1292_v17, %v5745_v44  ;;  %v1166_v17 = vsel %vm695_vm2, %v1163_v4, %v1165_v56  ;;  %v828_v56 = vrot.slane %v610_v0, %v5112_v27 }
 0x12d   : > { %v5784_v38 = vmul.f32 %v1166_v17, %v5767_v33 }
 0x12e   : > { %7973 = vst [vmem:[#allocation50_spill] sm:$0xff] %v5754_v57  ;;  %v5758_v34 = vpop.permute.xlu0 %1594  ;;  %1299 = vrot.lane.b32.xlu0 %v5754_v57, %s4908_s23  ;;  %v2069_v40 = vpop.permute.xlu1 %2068  ;;  %715 = vrot.lane.b32.xlu1 %v5756_v63, %s4908_s23 }
 0x12f   : > { %4847 = vset.pattern.permute.xlu1 %v7961_v39  ;;  %v1602_v54 = vsel %vm1598_vm6, 0.0, %v5758_v34 }
 0x130   : > { %v5781_v39 = vmul.f32 %v1607_v45, %v1602_v54  ;;  %v1289_v54 = vsel %vm819_vm4, %v1286_v15, %v1288_v7  ;;  %v5818_v7 = vrot.slane %v1511_v1, %v7926_v6 }
 0x131   : > { %v5808_v0 = vmul.f32 %v1289_v54, %v828_v56 }
 0x132   : > { %v5772_v22 = vpop.permute.xlu0 %2966  ;;  %1331 = vrot.lane.b32.xlu0 %v5754_v57, %s4909_s29  ;;  %v5777_v29 = vpop.permute.xlu1 %2968  ;;  %741 = vrot.lane.b32.xlu1 %v5756_v63, %s4909_s29  ;;  %7974 = vst [vmem:[#allocation51_spill] sm:$0xff] %v5781_v39  ;;  %v2073_v57 = vsel %vm1598_vm6, 0.0, %v2067_v18 }
 0x133   : > { %v5806_v3 = vmul.f32 %v2073_v57, %v1607_v45  ;;  %7978 = vst [vmem:[#allocation55_spill] sm:$0xff] %v5808_v0  ;;  %v3311_v57 = vsel %vm3310_vm7, 1.0, %v7969_v25  ;;  %vm1648_vm7 = vcmask 785408  }
 0x134   : > { %v5830_v36 = vrot.slane %v3311_v57, %v5112_v27 }
 0x135   : > { %7977 = vst [vmem:[#allocation54_spill] sm:$0xff] %v5806_v3 }
 0x136   : > { %v5786_v24 = vpop.permute.xlu0 %3864  ;;  %1618 = vrot.lane.b32.xlu0 %v5781_v39, %s4910_s30  ;;  %v5790_v4 = vpop.permute.xlu1 %3866  ;;  %1176 = vrot.lane.b32.xlu1 %v5784_v38, %s4908_s23 }
 0x13a   : > { %v1815_v47 = vpop.permute.xlu0 %1814  ;;  %1644 = vrot.lane.b32.xlu0 %v5781_v39, %s4917_s18  ;;  %1208 = vrot.lane.b32.xlu1 %v5784_v38, %s4909_s29  ;;  %v5802_v26 = vpop.permute.xlu1 %760 }
 0x13b   : > { %v1821_v17 = vsel %vm1598_vm6, 0.0, %v1815_v47  ;;  %7975 = vst [vmem:[#allocation52_spill] sm:$0xff] %v5802_v26 }
 0x13c   : > { %v5804_v50 = vmul.f32 %v1821_v17, %v1607_v45  ;;  %v2070_v17 = vsel %vm1598_vm6, %v2067_v18, %v2069_v40 }
 0x13d   : > { %v5827_v39 = vmul.f32 %v2070_v17, %v5818_v7 }
 0x13e   : > { %7976 = vst [vmem:[#allocation53_spill] sm:$0xff] %v5804_v50  ;;  %v5810_v48 = vpop.permute.xlu0 %2714  ;;  %2078 = vrot.lane.b32.xlu0 %v5806_v3, %s4910_s30  ;;  %1297 = vrot.lane.b32.xlu1 %v5808_v0, %s4908_s23  ;;  %v818_v15 = vpop.permute.xlu1 %817 }
 0x13f   : > { %7979 = vst [vmem:[#allocation56_spill] sm:$0xff] %v5827_v39  ;;  %v820_v26 = vsel %vm819_vm4, %v5680_v31, %v818_v15 }
 0x142   : > { %v5821_v45 = vpop.permute.xlu0 %2494  ;;  %1329 = vrot.lane.b32.xlu1 %v5808_v0, %s4909_s29  ;;  %v913_v54 = vpop.permute.xlu1 %912 }
 0x146   : > { %v3613_v32 = vpop.permute.xlu0 %3612  ;;  %2080 = vrot.lane.b32.xlu1 %v5827_v39, %s4910_s30  ;;  %v5835_v18 = vpop.permute.xlu1 %976 }
 0x147   : > { %v3619_v1 = vsel %vm3398_vm8, 0.0, %v3613_v32  ;;  %7980 = vst [vmem:[#allocation57_spill] sm:$0xff] %v5835_v18  ;;  %v823_v18 = vsel %vm819_vm4, %v818_v15, 0.0 }
 0x148   : > { %v5838_v40 = vmul.f32 %v3619_v1, %v5830_v36 }
 0x14a   : > { %7981 = vst [vmem:[#allocation58_spill] sm:$0xff] %v5838_v40  ;;  %v5840_v0 = vpop.permute.xlu0 %2189  ;;  %v5842_v43 = vpop.permute.xlu1 %1019 }
 0x14b   : > { %7982 = vst [vmem:[#allocation59_spill] sm:$0xff] %v5840_v0  ;;  %7983 = vst [vmem:[#allocation60_spill] sm:$0xff] %v5842_v43  ;;  %v5858_v0 = vmul.f32 %v828_v56, %v820_v26  ;;  %v914_v26 = vsel %vm695_vm2, %v5688_v28, %v913_v54  ;;  %v2411_v28 = vsel %vm2410_vm9, 1.0, %v7969_v25 }
 0x14d   : > { %7986 = vst [vmem:[#allocation63_spill] sm:$0xff] %v5858_v0 }
 0x14e   : > { %v694_v17 = vpop.permute.xlu0 %693  ;;  %v1040_v21 = vpop.permute.xlu1 %1039 }
 0x14f   : > { %v696_v35 = vsel %vm695_vm2, %v5682_v20, %v694_v17  ;;  %v5861_v20 = vmul.f32 %v5745_v44, %v823_v18  ;;  %v1041_v18 = vsel %vm819_vm4, %v5713_v61, %v1040_v21  ;;  %vm745_vm2 = vcmask 916480  }
 0x150   : > { %v5847_v9 = vmul.f32 %v5767_v33, %v696_v35 }
 0x151   : > { %7987 = vst [vmem:[#allocation64_spill] sm:$0xff] %v5861_v20 }
 0x152   : > { %7984 = vst [vmem:[#allocation61_spill] sm:$0xff] %v5847_v9  ;;  %743 = vrot.lane.b32.xlu1 %v5847_v9, %s4909_s29  ;;  %717 = vrot.lane.b32.xlu0 %v5847_v9, %s4908_s23  ;;  %v5856_v1 = vpop.permute.xlu0 %801  ;;  %v1597_v43 = vpop.permute.xlu1 %1596 }
 0x153   : > { %7985 = vst [vmem:[#allocation62_spill] sm:$0xff] %v5856_v1  ;;  %v5886_v1 = vmul.f32 %v914_v26, %v5767_v33  ;;  %v5902_v33 = vrot.slane %v2411_v28, %v7926_v6 }
 0x155   : > { %7990 = vst [vmem:[#allocation67_spill] sm:$0xff] %v5886_v1 }
 0x156   : > { %841 = vrot.lane.b32.xlu1 %v5861_v20, %s4908_s23  ;;  %839 = vrot.lane.b32.xlu0 %v5858_v0, %s4908_s23  ;;  %v5867_v35 = vpop.permute.xlu0 %3394  ;;  %v5869_v31 = vpop.permute.xlu1 %1663 }
 0x157   : > { %7988 = vst [vmem:[#allocation65_spill] sm:$0xff] %v5869_v31  ;;  %v3402_v15 = vsel %vm3398_vm8, 0.0, %v5867_v35 }
 0x158   : > { %v5874_v17 = vmul.f32 %v5830_v36, %v3402_v15  ;;  %v5888_v15 = vmul.f32 %v1041_v18, %v828_v56 }
 0x15a   : > { %7989 = vst [vmem:[#allocation66_spill] sm:$0xff] %v5874_v17  ;;  %863 = vrot.lane.b32.xlu1 %v5858_v0, %s4909_s29  ;;  %865 = vrot.lane.b32.xlu0 %v5861_v20, %s4909_s29  ;;  %v1817_v31 = vpop.permute.xlu1 %1816  ;;  %7991 = vst [vmem:[#allocation68_spill] sm:$0xff] %v5888_v15  ;;  %v5904_v56 = vpop.permute.xlu0 %3089 }
 0x15b   : > { %v1818_v17 = vsel %vm1598_vm6, %v1815_v47, %v1817_v31  ;;  %7992 = vst [vmem:[#allocation69_spill] sm:$0xff] %v5904_v56  ;;  %v2970_v47 = vsel %vm2498_vm10, %v5772_v22, %v5777_v29  ;;  %v1044_v31 = vsel %vm819_vm4, %v1040_v21, 0.0  ;;  %v5929_v29 = vrot.slane %v3311_v57, %v7926_v6 }
 0x15c   : > { %v5893_v61 = vmul.f32 %v1818_v17, %v5818_v7  ;;  %v5917_v26 = vmul.f32 %v2970_v47, %v5902_v33  ;;  %v5920_v18 = vmul.f32 %v1044_v31, %v5745_v44  ;;  %v3871_v47 = vsel %vm3398_vm8, 0.0, %v5786_v24 }
 0x15d   : > { %v1599_v44 = vsel %vm1598_vm6, %v5758_v34, %v1597_v43  ;;  %v5945_v57 = vmul.f32 %v3871_v47, %v5830_v36  ;;  %v1513_v47 = vsel %vm1512_vm11, 1.0, %v7969_v25  ;;  %vm2548_vm4 = vcmask 392192  }
 0x15e   : > { %924 = vrot.lane.b32.xlu1 %v5886_v1, %s4908_s23  ;;  %1049 = vrot.lane.b32.xlu0 %v5888_v15, %s4908_s23  ;;  %v5899_v54 = vpop.permute.xlu1 %2716  ;;  %7993 = vst [vmem:[#allocation70_spill] sm:$0xff] %v5917_v26  ;;  %7994 = vst [vmem:[#allocation71_spill] sm:$0xff] %v5920_v18  ;;  %v5922_v20 = vpop.permute.xlu0 %3987  ;;  %vm2522_vm6 = vcmask 654336  }
 0x15f   : > { %7995 = vst [vmem:[#allocation72_spill] sm:$0xff] %v5922_v20  ;;  %7997 = vst [vmem:[#allocation74_spill] sm:$0xff] %v5945_v57 }
 0x162   : > { %956 = vrot.lane.b32.xlu1 %v5886_v1, %s4909_s29  ;;  %1081 = vrot.lane.b32.xlu0 %v5888_v15, %s4909_s29  ;;  %v5914_v17 = vpop.permute.xlu1 %2496  ;;  %v8002_v15 = vmov 1  }
 0x166   : > { %1051 = vrot.lane.b32.xlu1 %v5920_v18, %s4908_s23  ;;  %2980 = vrot.lane.b32.xlu0 %v5917_v26, %s4918_s14  ;;  %v3615_v21 = vpop.permute.xlu1 %3614 }
 0x167   : > { %v3616_v0 = vsel %vm3398_vm8, %v3613_v32, %v3615_v21  ;;  %v5948_v32 = vmul.f32 %v5818_v7, %v1599_v44  ;;  %v5950_v21 = vpop.permute.xlu0 %1941 }
 0x168   : > { %v5937_v31 = vmul.f32 %v3616_v0, %v5929_v29  ;;  %7999 = vst [vmem:[#allocation76_spill] sm:$0xff] %v5950_v21  ;;  %v5968_v0 = vld [vmem:[%s7698_s6 + $0x8] sm:$0x1f]  ;;  %v8003_v21 = vmov 7  }
 0x169   : > { %7998 = vst [vmem:[#allocation75_spill] sm:$0xff] %v5948_v32 }
 0x16a   : > { %7996 = vst [vmem:[#allocation73_spill] sm:$0xff] %v5937_v31  ;;  %1083 = vrot.lane.b32.xlu1 %v5920_v18, %s4909_s29  ;;  %2578 = vperm.xlu0 %4850, %v5667_v11   ;;  %v5942_v20 = vpop.permute.xlu1 %2191  ;;  %v2973_v18 = vsel %vm2498_vm10, 0.0, %v5772_v22  ;;  %v5983_v31 = vrot.slane %v1513_v47, %v7926_v6 }
 0x16b   : > { %v1719_v34 = vpop.permute.xlu0 %1718 }
 0x16e   : > { %1620 = vrot.lane.b32.xlu1 %v5948_v32, %s4910_s30  ;;  %3876 = vrot.lane.b32.xlu0 %v5945_v57, %s4909_s29  ;;  %v5956_v43 = vpop.permute.xlu1 %3396 }
 0x16f   : > { %v2842_v44 = vpop.permute.xlu0 %2841 }
 0x172   : > { %1646 = vrot.lane.b32.xlu1 %v5948_v32, %s4917_s18  ;;  %2130 = vrot.lane.b32.xlu0 %v5458_v59, %s4910_s30  ;;  %v5962_v36 = vpop.permute.xlu1 %3091  ;;  %v5976_v32 = vrot.slane %v2411_v28, %v5112_v27  ;;  %v6001_v59 = vrot.slane %v1513_v47, %v5112_v27 }
 0x173   : > { %8000 = vst [vmem:[#allocation77_spill] sm:$0xff] %v5962_v36  ;;  %v2619_v1 = vpop.permute.xlu0 %2618 }
 0x176   : > { %1678 = vperm.xlu1 %4847, %v5968_v0   ;;  %3476 = vperm.xlu0 %4850, %v5733_v37   ;;  %v5972_v7 = vpop.permute.xlu1 %3989 }
 0x177   : > { %8001 = vst [vmem:[#allocation78_spill] sm:$0xff] %v5972_v7  ;;  %v5992_v7 = vmul.f32 %v2973_v18, %v5976_v32  ;;  %v2413_v18 = vsel %vm2412_vm13, 1.0, %v7969_v25 }
 0x178   : > { %v6020_v9 = vrot.slane %v2413_v18, %v5112_v27 }
 0x179   : > { %8005 = vst [vmem:[#allocation80_spill] sm:$0xff] %v5992_v7 }
 0x17a   : > { %4848 = vset.pattern.permute.xlu1 %v8002_v15  ;;  %4853 = vset.pattern.permute.xlu0 %v8003_v21  ;;  %v5985_v40 = vpop.permute.xlu1 %1943  ;;  %v2721_v21 = vsel %vm2498_vm10, 0.0, %v5810_v48 }
 0x17b   : > { %8004 = vst [vmem:[#allocation79_spill] sm:$0xff] %v5985_v40  ;;  %2570 = vperm.xlu1 %4848, %v5667_v11   ;;  %1711 = vperm.xlu0 %4853, %v5968_v0   ;;  %v1948_v28 = vsel %vm1722_vm12, %v5985_v40, 0.0  ;;  %v6011_v56 = vmul.f32 %v2721_v21, %v5976_v32 }
 0x17c   : > { %v5996_v22 = vmul.f32 %v1948_v28, %v5983_v31 }
 0x17e   : > { %8006 = vst [vmem:[#allocation81_spill] sm:$0xff] %v5996_v22  ;;  %v1721_v13 = vpop.permute.xlu1 %1720  ;;  %v8007_v22 = vmov 6  }
 0x17f   : > { %2978 = vrot.lane.b32.xlu1 %v5992_v7, %s4918_s14  ;;  %2611 = vperm.xlu0 %4853, %v5667_v11   ;;  %v1723_v40 = vsel %vm1722_vm12, %v1719_v34, %v1721_v13  ;;  %v1726_v28 = vsel %vm1722_vm12, %v1721_v13, 0.0  ;;  %v6027_v13 = vpop.permute.xlu0 %3739 }
 0x180   : > { %4849 = vset.pattern.permute.xlu1 %v8007_v22  ;;  %v6014_v47 = vmul.f32 %v6001_v59, %v1723_v40  ;;  %v6017_v36 = vmul.f32 %v5983_v31, %v1726_v28  ;;  %8011 = vst [vmem:[#allocation85_spill] sm:$0xff] %v6027_v13  ;;  %v6035_v22 = vrot.slane %v2413_v18, %v7926_v6 }
 0x182   : > { %8008 = vst [vmem:[#allocation82_spill] sm:$0xff] %v6014_v47  ;;  %8009 = vst [vmem:[#allocation83_spill] sm:$0xff] %v6017_v36  ;;  %v6022_v49 = vpop.permute.xlu1 %2843 }
 0x183   : > { %8010 = vst [vmem:[#allocation84_spill] sm:$0xff] %v6022_v49  ;;  %3452 = vperm.xlu1 %4849, %v5733_v37   ;;  %2726 = vrot.lane.b32.xlu0 %v6011_v56, %s4918_s14  ;;  %v2845_v40 = vsel %vm2622_vm14, %v2842_v44, %v6022_v49  ;;  %8013 = vst [vmem:[#allocation87_spill] sm:$0xff] %v6035_v22 }
 0x184   : > { %v6032_v34 = vmul.f32 %v2845_v40, %v6020_v9  ;;  %v6051_v40 = vpop.permute.xlu0 %3516 }
 0x185   : > { %8016 = vst [vmem:[#allocation90_spill] sm:$0xff] %v6051_v40  ;;  %v4884_v40 = vld [vmem:[%s7698_s6] sm:$0x1f] }
 0x186   : > { %8012 = vst [vmem:[#allocation86_spill] sm:$0xff] %v6032_v34  ;;  %v2621_v21 = vpop.permute.xlu1 %2620 }
 0x187   : > { %2110 = vrot.lane.b32.xlu1 %v5806_v3, %s4917_s18  ;;  %3030 = vrot.lane.b32.xlu0 %v5501_v8, %s4918_s14  ;;  %v2623_v28 = vsel %vm2622_vm14, %v2619_v1, %v2621_v21  ;;  %v2626_v47 = vsel %vm2622_vm14, %v2621_v21, 0.0  ;;  %v6059_v1 = vsel %vm3312_vm15, 1.0, %v7969_v25 }
 0x188   : > { %4851 = vset.pattern.permute.xlu1 %v7968_v23  ;;  %v6046_v44 = vmul.f32 %v6020_v9, %v2623_v28  ;;  %v6049_v18 = vmul.f32 %v6035_v22, %v2626_v47  ;;  %8018 = vst [vmem:[#allocation92_spill] sm:$0xff] %v6059_v1  ;;  %v6064_v21 = vpop.permute.xlu0 %2554  ;;  %v6068_v47 = vrot.slane %v6059_v1, %v7926_v6  ;;  %v2196_v1 = vsel %vm1722_vm12, %v5942_v20, 0.0 }
 0x189   : > { %8019 = vst [vmem:[#allocation93_spill] sm:$0xff] %v6064_v21 }
 0x18a   : > { %8014 = vst [vmem:[#allocation88_spill] sm:$0xff] %v6046_v44  ;;  %8015 = vst [vmem:[#allocation89_spill] sm:$0xff] %v6049_v18  ;;  %v6053_v13 = vpop.permute.xlu1 %3741  ;;  %v4919_v18 = vmov 2   ;;  %v1194_v44 = vrot.slane %v5275_v53, 4 }
 0x18b   : > { %8017 = vst [vmem:[#allocation91_spill] sm:$0xff] %v6053_v13  ;;  %2112 = vrot.lane.b32.xlu1 %v5827_v39, %s4917_s18  ;;  %3509 = vperm.xlu0 %4853, %v5733_v37   ;;  %v3868_v39 = vsel %vm3398_vm8, %v5786_v24, %v5790_v4  ;;  %v8023_v24 = vmov 5  }
 0x18e   : > { %v6070_v28 = vpop.permute.xlu1 %3518 }
 0x18f   : > { %8020 = vst [vmem:[#allocation94_spill] sm:$0xff] %v6070_v28  ;;  %3382 = vperm.xlu1 %4851, %v4771_v42   ;;  %4856 = vset.pattern.permute.xlu0 %v4919_v18  ;;  %v3524_v25 = vsel %vm3520_vm0, %v6070_v28, 0.0  ;;  %v6084_v42 = vpop.permute.xlu0 %922  ;;  %v6089_v28 = vmul.f32 %v3868_v39, %v5929_v29 }
 0x190   : > { %848 = vperm.xlu0 %4856, %v4884_v40   ;;  %v6078_v21 = vmul.f32 %v6068_v47, %v3524_v25  ;;  %v2499_v25 = vsel %vm2498_vm10, %v5821_v45, %v5914_v17 }
 0x191   : > { %8022 = vst [vmem:[#allocation96_spill] sm:$0xff] %v6089_v28  ;;  %v6100_v4 = vmul.f32 %v5902_v33, %v2499_v25 }
 0x192   : > { %8021 = vst [vmem:[#allocation95_spill] sm:$0xff] %v6078_v21  ;;  %v8026_v21 = vmov 8  }
 0x193   : > { %4852 = vset.pattern.permute.xlu1 %v8002_v15  ;;  %v6102_v15 = vpop.permute.xlu0 %954 }
 0x194   : > { %3468 = vperm.xlu1 %4852, %v5733_v37   ;;  %1751 = vperm.xlu0 %4856, %v5968_v0  }
 0x197   : > { %v1175_v17 = vpop.permute.xlu0 %1174 }
 0x198   : > { %3878 = vrot.lane.b32.xlu1 %v6089_v28, %s4909_s29  ;;  %2171 = vrot.lane.b32.xlu0 %v5480_v10, %s4917_s18 }
 0x199   : > { %4854 = vset.pattern.permute.xlu1 %v8023_v24 }
 0x19b   : > { %v6108_v39 = vpop.permute.xlu1 %2537  ;;  %v1207_v25 = vpop.permute.xlu0 %1206 }
 0x19c   : > { %1826 = vrot.lane.b32.xlu1 %v5804_v50, %s4910_s30  ;;  %2520 = vrot.lane.b32.xlu0 %v6100_v4, %s4918_s14  ;;  %8024 = vst [vmem:[#allocation97_spill] sm:$0xff] %v6108_v39  ;;  %v1182_v39 = vrot.slane %v5300_v19, 4 }
 0x1a0   : > { %1828 = vrot.lane.b32.xlu1 %v5893_v61, %s4910_s30  ;;  %3549 = vperm.xlu0 %4856, %v5733_v37   ;;  %v6113_v40 = vpop.permute.xlu1 %3428  ;;  %v6121_v49 = vpop.permute.xlu0 %1299 }
 0x1a1   : > { %8025 = vst [vmem:[#allocation98_spill] sm:$0xff] %v6113_v40  ;;  %8028 = vst [vmem:[#allocation100_spill] sm:$0xff] %v6121_v49 }
 0x1a4   : > { %2132 = vrot.lane.b32.xlu1 %v5480_v10, %s4910_s30  ;;  %4858 = vset.pattern.permute.xlu0 %v8026_v21  ;;  %v1181_v10 = vsel %vm719_vm1, 0.0, %v1175_v17  ;;  %v6135_v13 = vpop.permute.xlu0 %1331 }
 0x1a5   : > { %1775 = vperm.xlu0 %4858, %v5968_v0   ;;  %v6119_v3 = vpop.permute.xlu1 %3436  ;;  %8029 = vst [vmem:[#allocation101_spill] sm:$0xff] %v6135_v13  ;;  %v1197_v13 = vmul.f32 %v1194_v44, %v5784_v38 }
 0x1a6   : > { %8027 = vst [vmem:[#allocation99_spill] sm:$0xff] %v6119_v3  ;;  %v1184_v3 = vmul.f32 %v1182_v39, %v1181_v10  ;;  %v1230_v10 = vsel %vm719_vm1, %v5725_v30, %v5715_v60  ;;  %v1249_v60 = vrot.slane %v5310_v41, %v5313_v58 }
 0x1a8   : > { %3010 = vrot.lane.b32.xlu1 %v5992_v7, %s4920_s25  ;;  %v1188_v34 = vrot.slane %v1184_v3, 4  ;;  %v6160_v3 = vpop.permute.xlu0 %1618 }
 0x1a9   : > { %3928 = vrot.lane.b32.xlu0 %v5519_v12, %s4909_s29  ;;  %v6127_v40 = vpop.permute.xlu1 %715  ;;  %v6152_v12 = vmul.f32 %v2196_v1, %v5983_v31  ;;  %8031 = vst [vmem:[#allocation103_spill] sm:$0xff] %v6160_v3 }
 0x1ab   : > { %8030 = vst [vmem:[#allocation102_spill] sm:$0xff] %v6152_v12 }
 0x1ac   : > { %3012 = vrot.lane.b32.xlu1 %v5917_v26, %s4920_s25  ;;  %v1196_v26 = vmul.f32 %v1194_v44, %v5722_v55  ;;  %v2718_v55 = vsel %vm2498_vm10, %v5810_v48, %v5899_v54 }
 0x1ad   : > { %1858 = vrot.lane.b32.xlu0 %v5804_v50, %s4917_s18  ;;  %v6137_v7 = vpop.permute.xlu1 %741  ;;  %v1233_v50 = vsel %vm719_vm1, 0.0, %v5725_v30  ;;  %v1214_v30 = vrot.slane %v5652_v14, 4 }
 0x1ae   : > { %v1200_v44 = vrot.slane %v1196_v26, 4 }
 0x1b0   : > { %1759 = vperm.xlu1 %4854, %v5968_v0  }
 0x1b1   : > { %1880 = vrot.lane.b32.xlu0 %v5604_v52, %s4910_s30  ;;  %v1177_v36 = vpop.permute.xlu1 %1176  ;;  %v1234_v52 = vrot.slane %v5632_v5, 4 }
 0x1b2   : > { %v1178_v49 = vsel %vm719_vm1, %v1175_v17, %v1177_v36  ;;  %v1192_v36 = vadd.f32 %v1188_v34, %v5277_v62 }
 0x1b3   : > { %v1185_v22 = vmul.f32 %v1182_v39, %v1178_v49  ;;  %v1236_v38 = vmul.f32 %v1234_v52, %v1233_v50  ;;  %v1237_v31 = vmul.f32 %v1234_v52, %v1230_v10  ;;  %v6170_v49 = vmul.f32 %v2718_v55, %v5902_v33  ;;  %v6180_v52 = vpop.permute.xlu0 %1644 }
 0x1b4   : > { %4855 = vset.pattern.permute.xlu1 %v4919_v18  ;;  %v1201_v39 = vrot.slane %v1197_v13, 4  ;;  %v1251_v50 = vmul.f32 %v1249_v60, %v5351_v46  ;;  %8032 = vst [vmem:[#allocation104_spill] sm:$0xff] %v6180_v52  ;;  %v1204_v26 = vadd.f32 %v1200_v44, %v1192_v36  ;;  %v3399_v46 = vsel %vm3398_vm8, %v5867_v35, %v5956_v43 }
 0x1b5   : > { %2651 = vperm.xlu1 %4855, %v5667_v11   ;;  %2203 = vrot.lane.b32.xlu0 %v6152_v12, %s4910_s30  ;;  %v1189_v48 = vrot.slane %v1185_v22, 4  ;;  %v1209_v54 = vpop.permute.xlu1 %1208  ;;  %v1240_v13 = vrot.slane %v1236_v38, 4  ;;  %v1241_v10 = vrot.slane %v1237_v31, 4  ;;  %v6199_v35 = vmul.f32 %v5929_v29, %v3399_v46  ;;  %v8038_v46 = vld [vmem:[#allocation77_spill] sm:$0xff] }
 0x1b6   : > { %v1210_v18 = vsel %vm745_vm2, %v1207_v25, %v1209_v54  ;;  %v1213_v1 = vsel %vm745_vm2, %v1209_v54, 0.0  ;;  %vm4074_vm8 = vcmask 1044480  }
 0x1b7   : > { %v1193_v17 = vadd.f32 %v1189_v48, %v5277_v62  ;;  %v1216_v3 = vmul.f32 %v1214_v30, %v1210_v18  ;;  %v1217_v58 = vmul.f32 %v1214_v30, %v1213_v1  ;;  %v723_v30 = vsel %vm719_vm1, 0.0, %v6127_v40  ;;  %8033 = vst [vmem:[#allocation105_spill] sm:$0xff] %v6199_v35  ;;  %v6202_v48 = vpop.permute.xlu0 %2078 }
 0x1b8   : > { %v729_v43 = vmul.f32 %v5300_v19, %v723_v30  ;;  %8034 = vst [vmem:[#allocation106_spill] sm:$0xff] %v6202_v48  ;;  %v8091_v48 = vld [vmem:[#allocation71_spill] sm:$0xff] }
 0x1b9   : > { %2728 = vrot.lane.b32.xlu1 %v6170_v49, %s4918_s14  ;;  %2760 = vrot.lane.b32.xlu0 %v6170_v49, %s4920_s25  ;;  %v1205_v33 = vadd.f32 %v1201_v39, %v1193_v17  ;;  %v1220_v34 = vrot.slane %v1216_v3, 4  ;;  %v1221_v22 = vrot.slane %v1217_v58, 4  ;;  %v6182_v25 = vpop.permute.xlu1 %1297  ;;  %v1256_v58 = vrot.slane %v1251_v50, %v5112_v27 }
 0x1ba   : > { %4857 = vset.pattern.permute.xlu1 %v8023_v24  ;;  %v1260_v3 = vrot.slane %v1251_v50, %v7926_v6  ;;  %v731_v29 = vadd.f32 %v729_v43, %v5277_v62  ;;  %v737_v50 = vmul.f32 %v5275_v53, %v5756_v63 }
 0x1bb   : > { %v1224_v55 = vadd.f32 %v1220_v34, %v1204_v26  ;;  %v1225_v60 = vadd.f32 %v1221_v22, %v1205_v33  ;;  %v8036_v34 = vld [vmem:[#allocation42_spill] sm:$0xff] }
 0x1bc   : > { %v765_v22 = vsel %vm719_vm1, 0.0, %v8036_v34  ;;  %v739_v30 = vadd.f32 %v737_v50, %v731_v29 }
 0x1bd   : > { %3032 = vrot.lane.b32.xlu1 %v5505_v51, %s4918_s14  ;;  %3071 = vrot.lane.b32.xlu0 %v5505_v51, %s4920_s25  ;;  %v1244_v38 = vadd.f32 %v1240_v13, %v1224_v55  ;;  %v1245_v31 = vadd.f32 %v1241_v10, %v1225_v60  ;;  %v6196_v36 = vpop.permute.xlu1 %1329  ;;  %v783_v51 = vrot.slane %v5310_v41, %v5280_v16  ;;  %v8037_v13 = vld [vmem:[#allocation61_spill] sm:$0xff]  ;;  %v8076_v16 = vld [vmem:[#allocation48_spill] sm:$0xff] }
 0x1be   : > { %v8039_v55 = vld [vmem:[#allocation69_spill] sm:$0xff] }
 0x1bf   : > { %v6204_v54 = vadd.f32 %v1256_v58, %v1244_v38  ;;  %v6206_v44 = vadd.f32 %v1260_v3, %v1245_v31  ;;  %v785_v39 = vmul.f32 %v783_v51, %v5317_v2  ;;  %v738_v2 = vmul.f32 %v5275_v53, %v8037_v13  ;;  %v8040_v3 = vld [vmem:[#allocation3_spill] sm:$0xff]  ;;  %v8041_v31 = vld [vmem:[#allocation52_spill] sm:$0xff] }
 0x1c0   : > { %v3093_v60 = vsel %vm2622_vm14, %v8039_v55, %v8038_v46  ;;  %v762_v43 = vsel %vm719_vm1, %v8036_v34, %v8041_v31  ;;  %v929_v34 = vsel %vm719_vm1, 0.0, %v6084_v42  ;;  %v8044_v55 = vld [vmem:[#allocation14_spill] sm:$0xff] }
 0x1c1   : > { %3908 = vrot.lane.b32.xlu1 %v5945_v57, %s4908_s23  ;;  %3420 = vrot.lane.b32.xlu0 %v6199_v35, %s4909_s29  ;;  %v6214_v18 = vpop.permute.xlu1 %2080  ;;  %v793_v38 = vrot.slane %v785_v39, %v8040_v3  ;;  %v6254_v39 = vmul.f32 %v3093_v60, %v6020_v9  ;;  %v771_v13 = vmul.f32 %v5632_v5, %v762_v43 }
 0x1c2   : > { %8035 = vst [vmem:[#allocation107_spill] sm:$0xff] %v6214_v18 }
 0x1c3   : > { %8043 = vst [vmem:[#allocation42_spill] sm:$0xff] %v6254_v39 }
 0x1c4   : > { %v718_v1 = vpop.permute.xlu0 %717 }
 0x1c5   : > { %v720_v17 = vsel %vm719_vm1, %v6127_v40, %v718_v1  ;;  %3910 = vrot.lane.b32.xlu1 %v6089_v28, %s4908_s23  ;;  %2758 = vrot.lane.b32.xlu0 %v6011_v56, %s4920_s25  ;;  %v744_v26 = vpop.permute.xlu1 %743  ;;  %v770_v1 = vmul.f32 %v5632_v5, %v765_v22 }
 0x1c6   : > { %v730_v33 = vmul.f32 %v5300_v19, %v720_v17  ;;  %v746_v40 = vsel %vm745_vm2, %v6137_v7, %v744_v26  ;;  %v749_v10 = vsel %vm745_vm2, %v744_v26, 0.0  ;;  %v8042_v7 = vld [vmem:[#allocation27_spill] sm:$0xff]  ;;  %v930_v26 = vrot.slane %v5300_v19, 2 }
 0x1c7   : > { %v754_v58 = vmul.f32 %v5652_v14, %v746_v40  ;;  %v755_v29 = vmul.f32 %v5652_v14, %v749_v10  ;;  %v2502_v40 = vsel %vm2498_vm10, 0.0, %v5821_v45  ;;  %v1000_v10 = vrot.slane %v5310_v41, %v8044_v55 }
 0x1c8   : > { %v732_v63 = vadd.f32 %v730_v33, %v5277_v62  ;;  %v6243_v51 = vpop.permute.xlu0 %839  ;;  %v794_v19 = vcombine.high %v793_v38, %v793_v38  ;;  %v932_v9 = vmul.f32 %v930_v26, %v929_v34  ;;  %v6273_v45 = vmul.f32 %v5976_v32, %v2502_v40  ;;  %v8048_v32 = vld [vmem:[#allocation43_spill] sm:$0xff] }
 0x1c9   : > { %1860 = vrot.lane.b32.xlu1 %v5893_v61, %s4917_s18  ;;  %2778 = vrot.lane.b32.xlu0 %v8042_v7, %s4918_s14  ;;  %v756_v50 = vadd.f32 %v754_v58, %v739_v30  ;;  %v6251_v33 = vpop.permute.xlu1 %841  ;;  %v942_v41 = vrot.slane %v5275_v53, 2  ;;  %v8049_v40 = vld [vmem:[#allocation67_spill] sm:$0xff]  ;;  %v982_v53 = vrot.slane %v5632_v5, 2 }
 0x1ca   : > { %v740_v17 = vadd.f32 %v738_v2, %v732_v63  ;;  %v8045_v63 = vld [vmem:[#allocation22_spill] sm:$0xff] }
 0x1cb   : > { %v772_v2 = vadd.f32 %v770_v1, %v756_v50  ;;  %v8046_v1 = vld [vmem:[#allocation16_spill] sm:$0xff] }
 0x1cc   : > { %v757_v22 = vadd.f32 %v755_v29, %v740_v17  ;;  %v6275_v31 = vpop.permute.xlu0 %865  ;;  %v1002_v17 = vmul.f32 %v1000_v10, %v8046_v1  ;;  %v8047_v50 = vld [vmem:[#allocation44_spill] sm:$0xff] }
 0x1cd   : > { %2169 = vrot.lane.b32.xlu1 %v8045_v63, %s4917_s18  ;;  %3101 = vrot.lane.b32.xlu0 %v6254_v39, %s4918_s14  ;;  %v6268_v30 = vadd.f32 %v793_v38, %v772_v2  ;;  %v6270_v58 = vpop.permute.xlu1 %863  ;;  %v936_v38 = vrot.slane %v932_v9, 6  ;;  %v981_v34 = vsel %vm719_vm1, 0.0, %v8047_v50 }
 0x1ce   : > { %v773_v60 = vadd.f32 %v771_v13, %v757_v22  ;;  %v944_v13 = vmul.f32 %v942_v41, %v8048_v32  ;;  %v945_v22 = vmul.f32 %v942_v41, %v8049_v40  ;;  %v1004_v63 = vcombine.low %v1002_v17, %v1002_v17 }
 0x1cf   : > { %v984_v1 = vmul.f32 %v982_v53, %v981_v34  ;;  %v940_v41 = vadd.f32 %v936_v38, %v5277_v62 }
 0x1d0   : > { %v6277_v43 = vadd.f32 %v794_v19, %v773_v60  ;;  %v8050_v19 = vld [vmem:[#allocation57_spill] sm:$0xff]  ;;  %v6294_v9 = vpop.permute.xlu0 %1049  ;;  %v948_v5 = vrot.slane %v944_v13, 6  ;;  %v1011_v38 = vrot.slane %v1004_v63, %v8040_v3  ;;  %v8080_v3 = vld [vmem:[#allocation60_spill] sm:$0xff] }
 0x1d1   : > { %2518 = vrot.lane.b32.xlu1 %v6273_v45, %s4918_s14  ;;  %3573 = vperm.xlu0 %4858, %v5733_v37   ;;  %v925_v29 = vpop.permute.xlu1 %924  ;;  %v978_v60 = vsel %vm719_vm1, %v8047_v50, %v8050_v19 }
 0x1d2   : > { %v926_v2 = vsel %vm719_vm1, %v6084_v42, %v925_v29  ;;  %v962_v42 = vrot.slane %v5652_v14, 2  ;;  %v985_v40 = vmul.f32 %v982_v53, %v978_v60  ;;  %v952_v52 = vadd.f32 %v948_v5, %v940_v41  ;;  %v8052_v41 = vld [vmem:[#allocation73_spill] sm:$0xff] }
 0x1d3   : > { %v933_v10 = vmul.f32 %v930_v26, %v926_v2  ;;  %v949_v26 = vrot.slane %v945_v22, 6  ;;  %v988_v53 = vrot.slane %v984_v1, 6  ;;  %v8054_v1 = vld [vmem:[#allocation23_spill] sm:$0xff] }
 0x1d4   : > { %v989_v63 = vrot.slane %v985_v40, 6 }
 0x1d5   : > { %2659 = vperm.xlu1 %4857, %v5667_v11   ;;  %4861 = vset.pattern.permute.xlu0 %v7968_v23  ;;  %v937_v32 = vrot.slane %v933_v10, 6  ;;  %v957_v29 = vpop.permute.xlu1 %956  ;;  %v8051_v10 = vld [vmem:[#allocation58_spill] sm:$0xff] }
 0x1d6   : > { %1629 = vperm.xlu0 %4861, %v5968_v0   ;;  %v958_v17 = vsel %vm745_vm2, %v6102_v15, %v957_v29  ;;  %v961_v50 = vsel %vm745_vm2, %v957_v29, 0.0  ;;  %v6310_v15 = vpop.permute.xlu0 %1081 }
 0x1d7   : > { %v941_v2 = vadd.f32 %v937_v32, %v5277_v62  ;;  %v964_v19 = vmul.f32 %v962_v42, %v958_v17  ;;  %v965_v34 = vmul.f32 %v962_v42, %v961_v50  ;;  %v4765_v62 = vld [vmem:[%s7699_s7 + $0x10] sm:$0x1f]  ;;  %v1012_v42 = vcombine.high %v1011_v38, %v1011_v38 }
 0x1d9   : > { %3624 = vrot.lane.b32.xlu1 %v8051_v10, %s4909_s29  ;;  %v953_v14 = vadd.f32 %v949_v26, %v941_v2  ;;  %v968_v0 = vrot.slane %v964_v19, 6  ;;  %v969_v13 = vrot.slane %v965_v34, 6  ;;  %v6312_v22 = vpop.permute.xlu1 %1051  ;;  %v8056_v2 = vld [vmem:[#allocation24_spill] sm:$0xff] }
 0x1da   : > { %2529 = vperm.xlu0 %4861, %v5667_v11   ;;  %4859 = vset.pattern.permute.xlu1 %v8026_v21  ;;  %v6323_v17 = vpop.permute.xlu0 %2980 }
 0x1db   : > { %v972_v60 = vadd.f32 %v968_v0, %v952_v52  ;;  %v973_v32 = vadd.f32 %v969_v13, %v953_v14  ;;  %8053 = vst [vmem:[#allocation61_spill] sm:$0xff] %v6323_v17  ;;  %v8055_v52 = vld [vmem:[#allocation59_spill] sm:$0xff]  ;;  %v8062_v13 = vld [vmem:[#allocation28_spill] sm:$0xff] }
 0x1dc   : > { %v2193_v40 = vsel %vm1722_vm12, %v8055_v52, %v5942_v20  ;;  %v8074_v52 = vld [vmem:[#allocation76_spill] sm:$0xff] }
 0x1dd   : > { %3626 = vrot.lane.b32.xlu1 %v8052_v41, %s4909_s29  ;;  %v992_v29 = vadd.f32 %v988_v53, %v972_v60  ;;  %v993_v5 = vadd.f32 %v989_v63, %v973_v32  ;;  %v6325_v50 = vpop.permute.xlu1 %1083  ;;  %v6341_v34 = vmul.f32 %v2193_v40, %v6001_v59  ;;  %v8065_v63 = vld [vmem:[#allocation78_spill] sm:$0xff] }
 0x1de   : > { %2482 = vperm.xlu0 %4861, %v4765_v62   ;;  %v8066_v60 = vld [vmem:[#allocation66_spill] sm:$0xff] }
 0x1df   : > { %v6319_v21 = vadd.f32 %v1011_v38, %v992_v29  ;;  %v6321_v26 = vadd.f32 %v1012_v42, %v993_v5  ;;  %8058 = vst [vmem:[#allocation69_spill] sm:$0xff] %v6341_v34  ;;  %v8068_v42 = vld [vmem:[#allocation36_spill] sm:$0xff] }
 0x1e1   : > { %3930 = vrot.lane.b32.xlu1 %v8054_v1, %s4909_s29  ;;  %v6343_v38 = vpop.permute.xlu1 %1620 }
 0x1e2   : > { %3969 = vrot.lane.b32.xlu0 %v8054_v1, %s4908_s23  ;;  %8059 = vst [vmem:[#allocation52_spill] sm:$0xff] %v6343_v38  ;;  %v8073_v1 = vld [vmem:[#allocation79_spill] sm:$0xff]  ;;  %v8090_v38 = vld [vmem:[#allocation68_spill] sm:$0xff] }
 0x1e3   : > { %v1945_v40 = vsel %vm1722_vm12, %v8074_v52, %v8073_v1  ;;  %v8079_v1 = vld [vmem:[#allocation17_spill] sm:$0xff] }
 0x1e4   : > { %v1273_v52 = vrot.slane %v8079_v1, 4 }
 0x1e5   : > { %1878 = vrot.lane.b32.xlu1 %v8056_v2, %s4910_s30  ;;  %v6336_v19 = vpop.permute.xlu0 %2578  ;;  %v6351_v20 = vpop.permute.xlu1 %1646 }
 0x1e6   : > { %8057 = vst [vmem:[#allocation77_spill] sm:$0xff] %v6336_v19  ;;  %3656 = vrot.lane.b32.xlu0 %v8051_v10, %s4908_s23  ;;  %8060 = vst [vmem:[#allocation27_spill] sm:$0xff] %v6351_v20  ;;  %v8075_v20 = vld [vmem:[#allocation47_spill] sm:$0xff] }
 0x1e9   : > { %2201 = vrot.lane.b32.xlu1 %v6341_v34, %s4910_s30  ;;  %v6347_v14 = vpop.permute.xlu0 %3876 }
 0x1ea   : > { %2233 = vrot.lane.b32.xlu0 %v6341_v34, %s4917_s18 }
 0x1ed   : > { %2675 = vperm.xlu1 %4859, %v5667_v11   ;;  %v6354_v0 = vpop.permute.xlu0 %2130  ;;  %v3994_v11 = vsel %vm3520_vm0, %v8065_v63, 0.0 }
 0x1ee   : > { %8061 = vst [vmem:[#allocation22_spill] sm:$0xff] %v6354_v0  ;;  %2561 = vrot.lane.b32.xlu0 %v8062_v13, %s4918_s14  ;;  %v6378_v29 = vmul.f32 %v3994_v11, %v6068_v47  ;;  %v1272_v11 = vsel %vm745_vm2, %v8075_v20, 0.0  ;;  %v1024_v13 = vsel %vm745_vm2, %v8080_v3, 0.0 }
 0x1f0   : > { %8070 = vst [vmem:[#allocation57_spill] sm:$0xff] %v6378_v29 }
 0x1f1   : > { %3069 = vrot.lane.b32.xlu1 %v5501_v8, %s4920_s25  ;;  %v6360_v62 = vpop.permute.xlu1 %1678  ;;  %v6362_v53 = vpop.permute.xlu0 %3476 }
 0x1f2   : > { %8063 = vst [vmem:[#allocation16_spill] sm:$0xff] %v6360_v62  ;;  %8064 = vst [vmem:[#allocation44_spill] sm:$0xff] %v6362_v53  ;;  %3445 = vrot.lane.b32.xlu0 %v6199_v35, %s4908_s23  ;;  %4860 = vset.pattern.permute.xlu1 %v8023_v24  ;;  %v8081_v62 = vld [vmem:[#allocation46_spill] sm:$0xff] }
 0x1f3   : > { %v1021_v0 = vsel %vm745_vm2, %v8081_v62, %v8080_v3  ;;  %v8085_v3 = vld [vmem:[#allocation19_spill] sm:$0xff] }
 0x1f5   : > { %3418 = vrot.lane.b32.xlu1 %v8066_v60, %s4909_s29 }
 0x1f6   : > { %v6371_v32 = vpop.permute.xlu1 %2570  ;;  %3678 = vrot.lane.b32.xlu0 %v8068_v42, %s4909_s29  ;;  %v6375_v8 = vpop.permute.xlu0 %1711 }
 0x1f7   : > { %8067 = vst [vmem:[#allocation43_spill] sm:$0xff] %v6371_v32  ;;  %8069 = vst [vmem:[#allocation67_spill] sm:$0xff] %v6375_v8  ;;  %v1337_v32 = vrot.slane %v8085_v3, 4 }
 0x1f9   : > { %3557 = vperm.xlu1 %4860, %v5733_v37   ;;  %v1269_v37 = vsel %vm745_vm2, %v8076_v16, %v8075_v20  ;;  %v3096_v16 = vsel %vm2622_vm14, %v8038_v46, 0.0  ;;  %v6413_v20 = vmul.f32 %v1945_v40, %v6001_v59 }
 0x1fa   : > { %v6381_v5 = vpop.permute.xlu1 %2978  ;;  %4001 = vrot.lane.b32.xlu0 %v6378_v29, %s4909_s29  ;;  %v6385_v24 = vpop.permute.xlu0 %2611 }
 0x1fb   : > { %8071 = vst [vmem:[#allocation23_spill] sm:$0xff] %v6381_v5  ;;  %8072 = vst [vmem:[#allocation59_spill] sm:$0xff] %v6385_v24  ;;  %v8083_v24 = vld [vmem:[#allocation34_spill] sm:$0xff] }
 0x1fc   : > { %8082 = vst [vmem:[#allocation36_spill] sm:$0xff] %v6413_v20  ;;  %v8084_v5 = vld [vmem:[#allocation18_spill] sm:$0xff] }
 0x1fd   : > { %2546 = vrot.lane.b32.xlu1 %v6100_v4, %s4920_s25  ;;  %v1069_v62 = vrot.slane %v8084_v5, 2  ;;  %v1317_v17 = vrot.slane %v8084_v5, 4 }
 0x1fe   : > { %v6397_v34 = vpop.permute.xlu1 %3452  ;;  %3443 = vrot.lane.b32.xlu0 %v8066_v60, %s4908_s23  ;;  %v6401_v8 = vpop.permute.xlu0 %2726  ;;  %4862 = vset.pattern.permute.xlu1 %v7968_v23  ;;  %v1025_v23 = vrot.slane %v8079_v1, 2  ;;  %v8092_v60 = vld [vmem:[#allocation62_spill] sm:$0xff] }
 0x1ff   : > { %8077 = vst [vmem:[#allocation24_spill] sm:$0xff] %v6397_v34  ;;  %8078 = vst [vmem:[#allocation78_spill] sm:$0xff] %v6401_v8  ;;  %v6415_v34 = vmul.f32 %v1273_v52, %v1272_v11  ;;  %v6417_v8 = vmul.f32 %v1273_v52, %v1269_v37  ;;  %v8088_v11 = vld [vmem:[#allocation87_spill] sm:$0xff]  ;;  %v1089_v52 = vrot.slane %v8085_v3, 2  ;;  %v6436_v18 = vmul.f32 %v1069_v62, %v8090_v38 }
 0x200   : > { %v1027_v46 = vmul.f32 %v1025_v23, %v1021_v0  ;;  %v1028_v40 = vmul.f32 %v1025_v23, %v1024_v13  ;;  %v6432_v37 = vmul.f32 %v3096_v16, %v8088_v11  ;;  %v6439_v35 = vmul.f32 %v1069_v62, %v8091_v48  ;;  %v8094_v16 = vld [vmem:[#allocation55_spill] sm:$0xff] }
 0x201   : > { %2780 = vrot.lane.b32.xlu1 %v8083_v24, %s4918_s14  ;;  %v1280_v0 = vrot.slane %v6415_v34, 4  ;;  %v1279_v13 = vrot.slane %v6417_v8, 4  ;;  %v6449_v23 = vmul.f32 %v1317_v17, %v8094_v16  ;;  %v8096_v48 = vld [vmem:[#allocation63_spill] sm:$0xff] }
 0x202   : > { %v6425_v6 = vpop.permute.xlu1 %2110  ;;  %1953 = vrot.lane.b32.xlu0 %v6413_v20, %s4910_s30  ;;  %v6429_v59 = vpop.permute.xlu0 %3030  ;;  %8089 = vst [vmem:[#allocation47_spill] sm:$0xff] %v6432_v37  ;;  %v806_v20 = vsel %vm745_vm2, %v8092_v60, 0.0  ;;  %v859_v62 = vmul.f32 %v8084_v5, %v8096_v48  ;;  %v1032_v53 = vrot.slane %v1028_v40, 6  ;;  %v1088_v40 = vsel %vm745_vm2, %v6325_v50, 0.0 }
 0x203   : > { %8086 = vst [vmem:[#allocation79_spill] sm:$0xff] %v6425_v6  ;;  %8087 = vst [vmem:[#allocation76_spill] sm:$0xff] %v6429_v59  ;;  %v8093_v6 = vld [vmem:[#allocation45_spill] sm:$0xff]  ;;  %v8095_v59 = vld [vmem:[#allocation50_spill] sm:$0xff] }
 0x204   : > { %v803_v10 = vsel %vm745_vm2, %v8093_v6, %v8092_v60  ;;  %v6452_v38 = vmul.f32 %v1317_v17, %v8095_v59  ;;  %v8097_v6 = vld [vmem:[#allocation64_spill] sm:$0xff]  ;;  %v8098_v60 = vld [vmem:[#allocation101_spill] sm:$0xff]  ;;  %v1031_v59 = vrot.slane %v1027_v46, 6 }
 0x205   : > { %3103 = vrot.lane.b32.xlu1 %v6432_v37, %s4918_s14  ;;  %v860_v28 = vmul.f32 %v8084_v5, %v8097_v6  ;;  %v1336_v34 = vsel %vm745_vm2, %v8098_v60, 0.0  ;;  %v1333_v8 = vsel %vm745_vm2, %v6196_v36, %v8098_v60  ;;  %v811_v48 = vmul.f32 %v8079_v1, %v803_v10 }
 0x206   : > { %v6465_v16 = vpop.permute.xlu1 %2112  ;;  %2823 = vrot.lane.b32.xlu0 %v8083_v24, %s4920_s25  ;;  %v6469_v17 = vpop.permute.xlu0 %3509  ;;  %v812_v5 = vmul.f32 %v8079_v1, %v806_v20  ;;  %v870_v36 = vsel %vm745_vm2, %v6275_v31, 0.0  ;;  %v867_v60 = vsel %vm745_vm2, %v6270_v58, %v6275_v31  ;;  %v6480_v24 = vmul.f32 %v1337_v32, %v1336_v34 }
 0x207   : > { %8099 = vst [vmem:[#allocation48_spill] sm:$0xff] %v6465_v16  ;;  %8100 = vst [vmem:[#allocation17_spill] sm:$0xff] %v6469_v17  ;;  %v8101_v16 = vld [vmem:[#allocation100_spill] sm:$0xff]  ;;  %v1304_v10 = vsel %vm719_vm1, 0.0, %v6182_v25  ;;  %v6487_v1 = vmul.f32 %v1337_v32, %v1333_v8  ;;  %v846_v20 = vsel %vm719_vm1, 0.0, %v6243_v51  ;;  %v843_v58 = vsel %vm719_vm1, %v6243_v51, %v6251_v33 }
 0x208   : > { %v1301_v46 = vsel %vm719_vm1, %v6182_v25, %v8101_v16  ;;  %v1085_v31 = vsel %vm745_vm2, %v6310_v15, %v6325_v50  ;;  %v876_v32 = vmul.f32 %v8085_v3, %v870_v36  ;;  %v875_v34 = vmul.f32 %v8085_v3, %v867_v60  ;;  %v8103_v3 = vld [vmem:[#allocation11_spill] sm:$0xff]  ;;  %v8104_v60 = vld [vmem:[#allocation38_spill] sm:$0xff] }
 0x209   : > { %3658 = vrot.lane.b32.xlu1 %v8052_v41, %s4908_s23  ;;  %v813_v8 = vadd.f32 %v811_v48, %v6268_v30  ;;  %v814_v51 = vadd.f32 %v812_v5, %v6277_v43  ;;  %v1056_v50 = vsel %vm719_vm1, 0.0, %v6294_v9  ;;  %v1091_v17 = vmul.f32 %v1089_v52, %v1085_v31 }
 0x20a   : > { %v6501_v25 = vpop.permute.xlu1 %3382  ;;  %3135 = vrot.lane.b32.xlu0 %v6432_v37, %s4920_s25  ;;  %v1053_v37 = vsel %vm719_vm1, %v6294_v9, %v6312_v22  ;;  %v1092_v36 = vmul.f32 %v1089_v52, %v1088_v40 }
 0x20b   : > { %8102 = vst [vmem:[#allocation60_spill] sm:$0xff] %v6501_v25  ;;  %v849_v33 = vpop.permute.xlu0 %848 }
 0x20c   : > { %v851_v16 = vmul.f32 %v849_v33, %v846_v20  ;;  %v852_v57 = vmul.f32 %v849_v33, %v843_v58  ;;  %v1057_v15 = vrot.slane %v849_v33, 2  ;;  %v1305_v6 = vrot.slane %v849_v33, 4 }
 0x20d   : > { %3967 = vrot.lane.b32.xlu1 %v8103_v3, %s4908_s23  ;;  %v1035_v20 = vadd.f32 %v1031_v59, %v6319_v21  ;;  %v1036_v58 = vadd.f32 %v1032_v53, %v6321_v26 }
 0x20e   : > { %v853_v30 = vadd.f32 %v851_v16, %v813_v8  ;;  %v854_v48 = vadd.f32 %v852_v57, %v814_v51  ;;  %v1059_v43 = vmul.f32 %v1057_v15, %v1056_v50  ;;  %v1060_v5 = vmul.f32 %v1057_v15, %v1053_v37  ;;  %3461 = vrot.lane.b32.xlu0 %v8104_v60, %s4909_s29  ;;  %v8109_v15 = vld [vmem:[#allocation33_spill] sm:$0xff] }
 0x20f   : > { %v1307_v33 = vmul.f32 %v1305_v6, %v1304_v10  ;;  %v1308_v25 = vmul.f32 %v1305_v6, %v1301_v46  ;;  %v6520_v41 = vpop.permute.xlu1 %3468  ;;  %v6522_v9 = vpop.permute.xlu0 %1751  ;;  %v1283_v57 = vadd.f32 %v1279_v13, %v6204_v54  ;;  %v1284_v37 = vadd.f32 %v1280_v0, %v6206_v44 }
 0x210   : > { %8105 = vst [vmem:[#allocation46_spill] sm:$0xff] %v6522_v9  ;;  %v861_v22 = vadd.f32 %v859_v62, %v853_v30  ;;  %v862_v52 = vadd.f32 %v860_v28, %v854_v48  ;;  %v1063_v31 = vrot.slane %v1059_v43, 6  ;;  %v1064_v40 = vrot.slane %v1060_v5, 6  ;;  %v8112_v48 = vld [vmem:[#allocation13_spill] sm:$0xff] }
 0x211   : > { %v1311_v8 = vrot.slane %v1307_v33, 4  ;;  %v1312_v51 = vrot.slane %v1308_v25, 4  ;;  %2544 = vrot.lane.b32.xlu1 %v6273_v45, %s4920_s25  ;;  %v1323_v28 = vrot.slane %v6449_v23, 4  ;;  %v1324_v62 = vrot.slane %v6452_v38, 4 }
 0x212   : > { %v877_v21 = vadd.f32 %v875_v34, %v861_v22  ;;  %v878_v26 = vadd.f32 %v876_v32, %v862_v52  ;;  %v1067_v53 = vadd.f32 %v1063_v31, %v1035_v20  ;;  %v1068_v59 = vadd.f32 %v1064_v40, %v1036_v58  ;;  %2821 = vrot.lane.b32.xlu0 %v8042_v7, %s4920_s25  ;;  %v8118_v52 = vld [vmem:[#allocation35_spill] sm:$0xff]  ;;  %v8119_v31 = vld [vmem:[#allocation92_spill] sm:$0xff] }
 0x213   : > { %v1315_v6 = vadd.f32 %v1311_v8, %v1283_v57  ;;  %v1316_v54 = vadd.f32 %v1312_v51, %v1284_v37  ;;  %v6532_v13 = vpop.permute.xlu1 %3878  ;;  %v6534_v44 = vpop.permute.xlu0 %2171  ;;  %v1095_v0 = vrot.slane %v1091_v17, 6  ;;  %v1096_v46 = vrot.slane %v1092_v36, 6  ;;  %v8110_v36 = vld [vmem:[#allocation83_spill] sm:$0xff]  ;;  %v8121_v37 = vld [vmem:[#allocation72_spill] sm:$0xff] }
 0x214   : > { %8106 = vst [vmem:[#allocation34_spill] sm:$0xff] %v6534_v44  ;;  %879 = vst [vmem:[#allocation2] sm:$0x3] %v877_v21  ;;  %v8107_v10 = vrot.slane %v6436_v18, 6  ;;  %v8108_v32 = vrot.slane %v6439_v35, 6  ;;  %v1344_v23 = vrot.slane %v6480_v24, 4  ;;  %v8114_v58 = vlaneseq }
 0x215   : > { %880 = vst [vmem:[#allocation2 + $0x8] sm:$0x3] %v878_v26  ;;  %v1343_v38 = vrot.slane %v6487_v1, 4  ;;  %v1327_v34 = vadd.f32 %v1323_v28, %v1315_v6  ;;  %v1328_v16 = vadd.f32 %v1324_v62, %v1316_v54  ;;  %1923 = vrot.lane.b32.xlu1 %v8109_v15, %s4917_s18  ;;  %v8111_v1 = vld [vmem:[#allocation86_spill] sm:$0xff]  ;;  %v8115_v33 = vmov 0  ;;  %v8125_v28 = vld [vmem:[#allocation88_spill] sm:$0xff] }
 0x216   : > { %v1079_v25 = vadd.f32 %v8107_v10, %v1067_v53  ;;  %v1080_v7 = vadd.f32 %v8108_v32, %v1068_v59  ;;  %1744 = vrot.lane.b32.xlu0 %v8110_v36, %s4910_s30  ;;  %vm6560_vm3 = vcmp.lt.s32.totalorder %v8114_v58, 256  ;;  %v6571_v40 = vrot.slane %v8119_v31, %v5112_v27  ;;  %v8123_v21 = vld [vmem:[#allocation10_spill] sm:$0xff]  ;;  %v8127_v54 = vld [vmem:[#allocation91_spill] sm:$0xff]  ;;  %v8132_v32 = vld [vmem:[#allocation81_spill] sm:$0xff] }
 0x217   : > { %v1347_v3 = vadd.f32 %v1343_v38, %v1327_v34  ;;  %v1348_v18 = vadd.f32 %v1344_v23, %v1328_v16  ;;  %v6546_v30 = vpop.permute.xlu1 %1826  ;;  %v6548_v35 = vpop.permute.xlu0 %2520  ;;  %v8116_v33 = vsel %vm6560_vm3, 4294967295, %v8115_v33  ;;  %v3991_v8 = vsel %vm3520_vm0, %v8121_v37, %v8065_v63  ;;  %v8133_v38 = vld [vmem:[#allocation84_spill] sm:$0xff]  ;;  %v8143_v37 = vld [vmem:[#allocation53_spill] sm:$0xff] }
 0x218   : > { %v1099_v50 = vadd.f32 %v1095_v0, %v1079_v25  ;;  %v1100_v17 = vadd.f32 %v1096_v46, %v1080_v7  ;;  %8117 = vst [vmem:[#allocation19_spill] sm:$0xff] %v8116_v33  ;;  %v3746_v0 = vsel %vm3520_vm0, %v8127_v54, 0.0  ;;  %v8128_v46 = vld [vmem:[#allocation31_spill] sm:$0xff]  ;;  %v8140_v58 = vld [vmem:[#allocation20_spill] sm:$0xff]  ;;  %v8147_v33 = vld [vmem:[#allocation97_spill] sm:$0xff] }
 0x219   : > { %v1351_v24 = vcombine.high %v1347_v3, %v1348_v18  ;;  %2235 = vrot.lane.b32.xlu1 %v6152_v12, %s4917_s18  ;;  %v6616_v10 = vmul.f32 %v3746_v0, %v6068_v47  ;;  %v8134_v47 = vld [vmem:[#allocation32_spill] sm:$0xff]  ;;  %v8136_v18 = vld [vmem:[#allocation54_spill] sm:$0xff] }
 0x21a   : > { %1101 = vst [vmem:[#allocation2] sm:$0xc] %v1099_v50  ;;  %1102 = vst [vmem:[#allocation2 + $0x8] sm:$0xc] %v1100_v17  ;;  %2853 = vrot.lane.b32.xlu0 %v8111_v1, %s4918_s14  ;;  %v8135_v50 = vld [vmem:[#allocation40_spill] sm:$0xff]  ;;  %v8153_v12 = vld [vmem:[#allocation94_spill] sm:$0xff] }
 0x21b   : > { %v1358_v43 = vrot.slane %v1351_v24, %v8112_v48  ;;  %v6555_v5 = vpop.permute.xlu1 %1828  ;;  %v6557_v20 = vpop.permute.xlu0 %3549  ;;  %8129 = vst [vmem:[#allocation45_spill] sm:$0xff] %v6616_v10  ;;  %v2098_v17 = vrot.slane %v8135_v50, 4  ;;  %v1846_v3 = vrot.slane %v8135_v50, 2 }
 0x21c   : > { %8113 = vst [vmem:[#allocation18_spill] sm:$0xff] %v6557_v20  ;;  %v8149_v20 = vld [vmem:[#allocation51_spill] sm:$0xff] }
 0x21d   : > { %v1365_v22 = vrot.slane %v1358_v43, %v8112_v48  ;;  %2563 = vrot.lane.b32.xlu1 %v8118_v52, %s4918_s14  ;;  %v6650_v24 = vmul.f32 %v2098_v17, %v8136_v18  ;;  %v6667_v0 = vmul.f32 %v1846_v3, %v5893_v61  ;;  %v6679_v61 = vmul.f32 %v8135_v50, %v8149_v20  ;;  %v8151_v18 = vld [vmem:[#allocation82_spill] sm:$0xff]  ;;  %v8152_v20 = vld [vmem:[#allocation75_spill] sm:$0xff] }
 0x21e   : > { %3721 = vrot.lane.b32.xlu0 %v8068_v42, %s4908_s23  ;;  %v6587_v42 = vmul.f32 %v3991_v8, %v6571_v40  ;;  %v6662_v8 = vmul.f32 %v1846_v3, %v8143_v37  ;;  %v8150_v3 = vld [vmem:[#allocation85_spill] sm:$0xff] }
 0x21f   : > { %v6573_v57 = vpop.permute.xlu1 %2132  ;;  %1372 = vst.msk [vmem:[#allocation2 + $0x4] ss:$8 sm:$0x3] %vm6560_vm3, %v1365_v22  ;;  %8137 = vst [vmem:[#allocation63_spill] sm:$0xff] %v6650_v24  ;;  %v8141_v22 = vld [vmem:[#allocation56_spill] sm:$0xff] }
 0x220   : > { %8120 = vst [vmem:[#allocation87_spill] sm:$0xff] %v6573_v57  ;;  %v6580_v51 = vpop.permute.xlu0 %1775  ;;  %8124 = vst [vmem:[#allocation71_spill] sm:$0xff] %v6587_v42  ;;  %v6659_v31 = vmul.f32 %v2098_v17, %v8141_v22  ;;  %v2746_v17 = vrot.slane %v8147_v33, 2  ;;  %v8168_v24 = vld [vmem:[#allocation96_spill] sm:$0xff]  ;;  %v8176_v57 = vld [vmem:[#allocation66_spill] sm:$0xff] }
 0x221   : > { %8122 = vst [vmem:[#allocation68_spill] sm:$0xff] %v6580_v51  ;;  %3676 = vrot.lane.b32.xlu1 %v8123_v21, %s4909_s29  ;;  %v6695_v51 = vmul.f32 %v8135_v50, %v8152_v20 }
 0x222   : > { %4033 = vrot.lane.b32.xlu0 %v6378_v29, %s4908_s23  ;;  %8142 = vst [vmem:[#allocation100_spill] sm:$0xff] %v6659_v31  ;;  %v6710_v50 = vmul.f32 %v2746_v17, %v6011_v56  ;;  %v6713_v20 = vmul.f32 %v2746_v17, %v6170_v49  ;;  %v8160_v29 = vld [vmem:[#allocation80_spill] sm:$0xff]  ;;  %v8161_v31 = vld [vmem:[#allocation70_spill] sm:$0xff]  ;;  %v6737_v17 = vmul.f32 %v8147_v33, %v6100_v4 }
 0x223   : > { %v6589_v26 = vpop.permute.xlu1 %3010  ;;  %v8167_v4 = vld [vmem:[#allocation44_spill] sm:$0xff] }
 0x224   : > { %v6591_v53 = vpop.permute.xlu0 %3928  ;;  %8157 = vst [vmem:[#allocation38_spill] sm:$0xff] %v6710_v50  ;;  %8162 = vst [vmem:[#allocation35_spill] sm:$0xff] %v6737_v17  ;;  %v1830_v50 = vsel %vm1622_vm5, %v6546_v30, %v6555_v5  ;;  %v8210_v5 = vld [vmem:[#allocation39_spill] sm:$0xff] }
 0x225   : > { %3999 = vrot.lane.b32.xlu1 %v6587_v42, %s4909_s29 }
 0x226   : > { %3719 = vrot.lane.b32.xlu0 %v8123_v21, %s4908_s23  ;;  %v8144_v21 = vld [vmem:[#allocation95_spill] sm:$0xff] }
 0x227   : > { %v6597_v63 = vpop.permute.xlu1 %3012 }
 0x228   : > { %v6599_v59 = vpop.permute.xlu0 %1858 }
 0x229   : > { %1921 = vrot.lane.b32.xlu1 %v8056_v2, %s4917_s18 }
 0x22a   : > { %2642 = vrot.lane.b32.xlu0 %v8125_v28, %s4918_s14 }
 0x22b   : > { %v6605_v62 = vpop.permute.xlu1 %1759 }
 0x22c   : > { %8126 = vst [vmem:[#allocation62_spill] sm:$0xff] %v6605_v62  ;;  %v6607_v6 = vpop.permute.xlu0 %1880  ;;  %v8155_v62 = vld [vmem:[#allocation99_spill] sm:$0xff] }
 0x22d   : > { %1704 = vrot.lane.b32.xlu1 %v8128_v46, %s4917_s18  ;;  %v8145_v46 = vld [vmem:[#allocation37_spill] sm:$0xff]  ;;  %v3896_v9 = vrot.slane %v8155_v62, 4 }
 0x22e   : > { %3502 = vrot.lane.b32.xlu0 %v8104_v60, %s4908_s23  ;;  %v2848_v60 = vsel %vm2622_vm14, %v8133_v38, 0.0  ;;  %v2998_v38 = vrot.slane %v8147_v33, 4 }
 0x22f   : > { %v6637_v34 = vmul.f32 %v2848_v60, %v8088_v11  ;;  %v8146_v60 = vld [vmem:[#allocation41_spill] sm:$0xff] }
 0x230   : > { %v6618_v2 = vpop.permute.xlu1 %2651  ;;  %v6620_v25 = vpop.permute.xlu0 %2203  ;;  %v6728_v56 = vmul.f32 %v2998_v38, %v8160_v29  ;;  %v6731_v49 = vmul.f32 %v2998_v38, %v8161_v31  ;;  %v3880_v29 = vsel %vm745_vm2, %v6347_v14, %v6532_v13  ;;  %v8164_v31 = vld [vmem:[#allocation74_spill] sm:$0xff] }
 0x231   : > { %8130 = vst [vmem:[#allocation55_spill] sm:$0xff] %v6618_v2  ;;  %8131 = vst [vmem:[#allocation50_spill] sm:$0xff] %v6620_v25  ;;  %1955 = vrot.lane.b32.xlu1 %v8132_v32, %s4910_s30  ;;  %v8156_v25 = vld [vmem:[#allocation93_spill] sm:$0xff]  ;;  %v6749_v38 = vmul.f32 %v3896_v9, %v8164_v31  ;;  %v1833_v2 = vsel %vm1622_vm5, 0.0, %v6546_v30 }
 0x232   : > { %3753 = vrot.lane.b32.xlu0 %v6616_v10, %s4909_s29  ;;  %v8173_v31 = vld [vmem:[#allocation73_spill] sm:$0xff] }
 0x233   : > { %8165 = vst [vmem:[#allocation92_spill] sm:$0xff] %v6749_v38  ;;  %v8192_v38 = vld [vmem:[#allocation76_spill] sm:$0xff]  ;;  %v4781_v30 = vld [vmem:[%s7700_s8 + $0x10] sm:$0x1f] }
 0x234   : > { %v6626_v7 = vpop.permute.xlu1 %2728  ;;  %v6628_v23 = vpop.permute.xlu0 %2760 }
 0x235   : > { %3133 = vrot.lane.b32.xlu1 %v6254_v39, %s4920_s25 }
 0x236   : > { %3500 = vrot.lane.b32.xlu0 %v8134_v47, %s4908_s23 }
 0x238   : > { %v6639_v16 = vpop.permute.xlu1 %3032  ;;  %v6641_v15 = vpop.permute.xlu0 %3071 }
 0x239   : > { %3459 = vrot.lane.b32.xlu1 %v8134_v47, %s4909_s29  ;;  %v3743_v47 = vsel %vm3520_vm0, %v8150_v3, %v8127_v54  ;;  %v8154_v54 = vld [vmem:[#allocation90_spill] sm:$0xff] }
 0x23a   : > { %2887 = vrot.lane.b32.xlu0 %v6637_v34, %s4920_s25  ;;  %v3521_v3 = vsel %vm3520_vm0, %v8154_v54, %v8153_v12  ;;  %v6707_v48 = vmul.f32 %v3743_v47, %v6571_v40  ;;  %v3644_v12 = vrot.slane %v8155_v62, 2  ;;  %v6725_v47 = vmul.f32 %v8147_v33, %v6273_v45 }
 0x23b   : > { %v6721_v44 = vmul.f32 %v6571_v40, %v3521_v3  ;;  %v2804_v40 = vrot.slane %v6336_v19, %v8044_v55  ;;  %v8163_v3 = vld [vmem:[#allocation15_spill] sm:$0xff]  ;;  %v6755_v55 = vmul.f32 %v3896_v9, %v8168_v24 }
 0x23c   : > { %v6652_v43 = vpop.permute.xlu1 %3908  ;;  %v6654_v11 = vpop.permute.xlu0 %3420  ;;  %8159 = vst [vmem:[#allocation86_spill] sm:$0xff] %v6725_v47  ;;  %v3053_v45 = vrot.slane %v6336_v19, %v8163_v3  ;;  %v3951_v33 = vrot.slane %v8167_v4, %v8163_v3  ;;  %v6767_v28 = vmul.f32 %v3644_v12, %v8173_v31  ;;  %v8180_v31 = vld [vmem:[#allocation25_spill] sm:$0xff]  ;;  %v8201_v3 = vld [vmem:[#allocation24_spill] sm:$0xff] }
 0x23d   : > { %8138 = vst [vmem:[#allocation64_spill] sm:$0xff] %v6652_v43  ;;  %8139 = vst [vmem:[#allocation101_spill] sm:$0xff] %v6654_v11  ;;  %1702 = vrot.lane.b32.xlu1 %v8140_v58, %s4917_s18  ;;  %v6785_v47 = vmul.f32 %v2804_v40, %v8180_v31  ;;  %v8182_v4 = vld [vmem:[#allocation5_spill] sm:$0xff]  ;;  %v8188_v31 = vld [vmem:[#allocation107_spill] sm:$0xff] }
 0x23e   : > { %3542 = vrot.lane.b32.xlu0 %v8144_v21, %s4909_s29  ;;  %8158 = vst [vmem:[#allocation33_spill] sm:$0xff] %v6721_v44  ;;  %8174 = vst [vmem:[#allocation31_spill] sm:$0xff] %v6767_v28  ;;  %v6788_v21 = vmul.f32 %v3053_v45, %v8182_v4  ;;  %v8185_v19 = vld [vmem:[#allocation9_spill] sm:$0xff] }
 0x23f   : > { %8181 = vst [vmem:[#allocation40_spill] sm:$0xff] %v6785_v47  ;;  %v6795_v11 = vmul.f32 %v3951_v33, %v8185_v19  ;;  %v8193_v19 = vld [vmem:[#allocation7_spill] sm:$0xff] }
 0x240   : > { %v6674_v22 = vpop.permute.xlu1 %3910  ;;  %v2759_v37 = vpop.permute.xlu0 %2758  ;;  %8183 = vst [vmem:[#allocation54_spill] sm:$0xff] %v6788_v21 }
 0x241   : > { %8148 = vst [vmem:[#allocation11_spill] sm:$0xff] %v6674_v22  ;;  %v6687_v58 = vsel %vm2548_vm4, %v2759_v37, %v6628_v23  ;;  %1742 = vrot.lane.b32.xlu1 %v8151_v18, %s4910_s30  ;;  %v8203_v18 = vld [vmem:[#allocation60_spill] sm:$0xff] }
 0x242   : > { %2885 = vrot.lane.b32.xlu0 %v8111_v1, %s4920_s25 }
 0x244   : > { %v6716_v54 = vpop.permute.xlu1 %1860  ;;  %v6718_v37 = vpop.permute.xlu0 %2778 }
 0x245   : > { %2604 = vrot.lane.b32.xlu1 %v8118_v52, %s4920_s25  ;;  %v8166_v52 = vld [vmem:[#allocation98_spill] sm:$0xff] }
 0x246   : > { %3785 = vrot.lane.b32.xlu0 %v6616_v10, %s4908_s23  ;;  %v8171_v10 = vld [vmem:[#allocation58_spill] sm:$0xff]  ;;  %v8175_v9 = vrot.slane %v8166_v52, 4 }
 0x247   : > { %v6764_v43 = vmul.f32 %v3644_v12, %v8171_v10  ;;  %v8178_v10 = vld [vmem:[#allocation105_spill] sm:$0xff] }
 0x248   : > { %v6759_v17 = vpop.permute.xlu1 %2169  ;;  %v6761_v13 = vpop.permute.xlu0 %3101  ;;  %v3887_v24 = vmul.f32 %v8175_v9, %v3880_v29  ;;  %v6782_v12 = vmul.f32 %v8155_v62, %v8178_v10  ;;  %v8184_v29 = vld [vmem:[#allocation103_spill] sm:$0xff]  ;;  %v8186_v10 = vld [vmem:[#allocation106_spill] sm:$0xff] }
 0x249   : > { %8169 = vst [vmem:[#allocation72_spill] sm:$0xff] %v6759_v17  ;;  %8170 = vst [vmem:[#allocation10_spill] sm:$0xff] %v6761_v13  ;;  %2855 = vrot.lane.b32.xlu1 %v6637_v34, %s4918_s14  ;;  %v6778_v17 = vmul.f32 %v8155_v62, %v8176_v57  ;;  %v1626_v9 = vsel %vm1622_vm5, 0.0, %v8184_v29  ;;  %v3903_v57 = vrot.slane %v6755_v55, 4  ;;  %v6801_v40 = vsel %vm1622_vm5, 0.0, %v8186_v10  ;;  %v8191_v55 = vld [vmem:[#allocation52_spill] sm:$0xff] }
 0x24a   : > { %8172 = vst [vmem:[#allocation91_spill] sm:$0xff] %v6764_v43  ;;  %8179 = vst [vmem:[#allocation32_spill] sm:$0xff] %v6782_v12  ;;  %3783 = vrot.lane.b32.xlu0 %v6707_v48, %s4908_s23  ;;  %v6806_v45 = vsel %vm1622_vm5, %v8186_v10, %v8188_v31  ;;  %v1623_v62 = vsel %vm1622_vm5, %v8184_v29, %v8191_v55  ;;  %v3037_v12 = vsel %vm2522_vm6, 0.0, %v8192_v38  ;;  %v8194_v29 = vld [vmem:[#allocation43_spill] sm:$0xff]  ;;  %v8204_v55 = vld [vmem:[#allocation89_spill] sm:$0xff] }
 0x24b   : > { %8177 = vst [vmem:[#allocation84_spill] sm:$0xff] %v6778_v17  ;;  %8187 = vst [vmem:[#allocation20_spill] sm:$0xff] %v6801_v40  ;;  %v3891_v40 = vrot.slane %v3887_v24, 4  ;;  %v8195_v24 = vld [vmem:[#allocation61_spill] sm:$0xff]  ;;  %v8199_v47 = vrot.slane %v8194_v29, 4 }
 0x24c   : > { %8189 = vst [vmem:[#allocation56_spill] sm:$0xff] %v6806_v45  ;;  %v2519_v4 = vpop.permute.xlu1 %2518  ;;  %v6808_v17 = vpop.permute.xlu0 %3573  ;;  %v8198_v45 = vld [vmem:[#allocation78_spill] sm:$0xff] }
 0x24d   : > { %8190 = vst [vmem:[#allocation53_spill] sm:$0xff] %v6808_v17  ;;  %v2523_v10 = vsel %vm2522_vm6, %v2519_v4, %v6548_v35  ;;  %4031 = vrot.lane.b32.xlu1 %v6587_v42, %s4908_s23  ;;  %v6827_v17 = vsel %vm745_vm2, 0.0, %v6347_v14  ;;  %v8196_v35 = vld [vmem:[#allocation23_spill] sm:$0xff]  ;;  %v2733_v39 = vsel %vm2522_vm6, 0.0, %v8198_v45  ;;  %v3895_v13 = vadd.f32 %v3891_v40, %v8203_v18 }
 0x24e   : > { %3564 = vrot.lane.b32.xlu0 %v6721_v44, %s4908_s23  ;;  %v6835_v28 = vsel %vm2522_vm6, %v8196_v35, %v8195_v24  ;;  %v6839_v31 = vsel %vm2522_vm6, 0.0, %v8196_v35  ;;  %v8197_v42 = vld [vmem:[#allocation59_spill] sm:$0xff]  ;;  %v6851_v24 = vmul.f32 %v8199_v47, %v3037_v12  ;;  %v3915_v35 = vsel %vm719_vm1, %v6674_v22, 0.0  ;;  %v8206_v47 = vld [vmem:[#allocation28_spill] sm:$0xff] }
 0x24f   : > { %v4249_v14 = vld [vmem:[%s7701_s9] sm:$0x1f] }
 0x250   : > { %8200 = vst [vmem:[#allocation97_spill] sm:$0xff] %v6851_v24  ;;  %v6856_v33 = vpop.permute.xlu1 %2659 }
 0x251   : > { %8202 = vst [vmem:[#allocation51_spill] sm:$0xff] %v6856_v33  ;;  %v6863_v43 = vmul.f32 %v6856_v33, %v8204_v55  ;;  %v2873_v21 = vrot.slane %v6856_v33, 2  ;;  %2602 = vrot.lane.b32.xlu1 %v8206_v47, %s4920_s25  ;;  %v6868_v12 = vpop.permute.xlu0 %1629  ;;  %v8208_v33 = vrot.slane %v8201_v3, 4 }
 0x252   : > { %8207 = vst [vmem:[#allocation75_spill] sm:$0xff] %v6868_v12  ;;  %v1632_v40 = vmul.f32 %v6868_v12, %v1626_v9  ;;  %v1633_v22 = vmul.f32 %v6868_v12, %v1623_v62  ;;  %v1834_v27 = vrot.slane %v6868_v12, 2  ;;  %4252 = vperm.xlu0 %4861, %v4249_v14  }
 0x253   : > { %8205 = vst [vmem:[#allocation85_spill] sm:$0xff] %v6863_v43  ;;  %v3014_v43 = vsel %vm2548_vm4, %v6589_v26, %v6597_v63  ;;  %v3919_v47 = vmul.f32 %v8208_v33, %v3915_v35  ;;  %v6882_v24 = vmul.f32 %v2873_v21, %v8111_v1  ;;  %v6885_v44 = vmul.f32 %v2873_v21, %v6637_v34  ;;  %v8211_v33 = vld [vmem:[#allocation17_spill] sm:$0xff] }
 0x254   : > { %v1634_v9 = vadd.f32 %v1632_v40, %v8210_v5  ;;  %v1635_v62 = vadd.f32 %v1633_v22, %v8210_v5  ;;  %v1836_v14 = vmul.f32 %v1834_v27, %v1833_v2  ;;  %v1837_v12 = vmul.f32 %v1834_v27, %v1830_v50  ;;  %v3625_v26 = vpop.permute.xlu1 %3624 }
 0x255   : > { %8209 = vst [vmem:[#allocation94_spill] sm:$0xff] %v6885_v44  ;;  %v1862_v1 = vsel %vm1648_vm7, %v6599_v59, %v6716_v54  ;;  %v2526_v34 = vsel %vm2522_vm6, 0.0, %v2519_v4  ;;  %1987 = vrot.lane.b32.xlu1 %v8132_v32, %s4917_s18  ;;  %v2530_v21 = vpop.permute.xlu0 %2529  ;;  %v3907_v50 = vadd.f32 %v3903_v57, %v3895_v13  ;;  %v3017_v59 = vsel %vm2548_vm4, %v6597_v63, 0.0 }
 0x256   : > { %v6901_v40 = vadd.f32 %v6679_v61, %v1634_v9  ;;  %v6904_v27 = vadd.f32 %v6695_v51, %v1635_v62  ;;  %v1840_v2 = vrot.slane %v1836_v14, 6  ;;  %v1841_v22 = vrot.slane %v1837_v12, 6  ;;  %4454 = vperm.xlu0 %4861, %v4781_v30   ;;  %v4787_v61 = vld [vmem:[%s7700_s8 + $0x18] sm:$0x1f] }
 0x257   : > { %v8214_v4 = vrot.slane %v8156_v25, 4  ;;  %v6912_v44 = vmul.f32 %v2530_v21, %v2526_v34  ;;  %v2765_v51 = vsel %vm2548_vm4, %v6628_v23, 0.0  ;;  %v3923_v9 = vrot.slane %v3919_v47, 4 }
 0x258   : > { %8212 = vst [vmem:[#allocation90_spill] sm:$0xff] %v6901_v40  ;;  %8213 = vst [vmem:[#allocation99_spill] sm:$0xff] %v6904_v27  ;;  %v1844_v12 = vadd.f32 %v1840_v2, %v8210_v5  ;;  %v2533_v13 = vmul.f32 %v2530_v21, %v2523_v10  ;;  %v3627_v57 = vpop.permute.xlu1 %3626  ;;  %v1865_v63 = vsel %vm1648_vm7, %v6716_v54, 0.0  ;;  %v2734_v62 = vrot.slane %v2530_v21, 2 }
 0x259   : > { %v6910_v3 = vmul.f32 %v8214_v4, %v3014_v43  ;;  %v8215_v43 = vrot.slane %v8146_v60, 2  ;;  %v2986_v14 = vrot.slane %v2530_v21, 4  ;;  %2644 = vrot.lane.b32.xlu1 %v8204_v55, %s4918_s14  ;;  %v6926_v34 = vpop.permute.xlu0 %2482  ;;  %v8216_v23 = vmov %v8214_v4 }
 0x25a   : > { %v6930_v47 = vmul.f32 %v8216_v23, %v3017_v59  ;;  %v1845_v10 = vadd.f32 %v1841_v22, %v8210_v5  ;;  %v3631_v2 = vsel %vm745_vm2, 0.0, %v3625_v26  ;;  %v6935_v54 = vsel %vm745_vm2, %v3625_v26, %v3627_v57  ;;  %4560 = vperm.xlu0 %4861, %v4787_v61   ;;  %v4231_v59 = vld [vmem:[%s7703_s11] sm:$0xff] }
 0x25b   : > { %v1868_v30 = vmul.f32 %v8215_v43, %v1862_v1  ;;  %v2730_v1 = vsel %vm2522_vm6, %v8198_v45, %v6626_v7  ;;  %v8217_v21 = vrot.slane %v8156_v25, 2  ;;  %v2736_v43 = vmul.f32 %v2734_v62, %v2733_v39 }
 0x25c   : > { %v8218_v22 = vrot.slane %v6662_v8, 6  ;;  %v8219_v26 = vrot.slane %v8146_v60, 2  ;;  %v2737_v61 = vmul.f32 %v2734_v62, %v2730_v1  ;;  %v2988_v35 = vmul.f32 %v2986_v14, %v6839_v31  ;;  %v3931_v45 = vpop.permute.xlu1 %3930 }
 0x25d   : > { %v6942_v4 = vmul.f32 %v8217_v21, %v2765_v51  ;;  %v2989_v7 = vmul.f32 %v2986_v14, %v6835_v28  ;;  %v3927_v40 = vadd.f32 %v3923_v9, %v3907_v50  ;;  %v1872_v51 = vrot.slane %v1868_v30, 6  ;;  %3751 = vrot.lane.b32.xlu1 %v6707_v48, %s4909_s29  ;;  %v6957_v8 = vpop.permute.xlu0 %3969 }
 0x25e   : > { %v1856_v23 = vadd.f32 %v8218_v22, %v1844_v12  ;;  %v1869_v57 = vmul.f32 %v8219_v26, %v1865_v63  ;;  %v8220_v39 = vrot.slane %v8166_v52, 2  ;;  %v2740_v27 = vrot.slane %v2736_v43, 6  ;;  %4234 = vperm.xlu0 %4861, %v4231_v59  }
 0x25f   : > { %v2992_v12 = vrot.slane %v2988_v35, 4  ;;  %v2993_v22 = vrot.slane %v2989_v7, 4  ;;  %v3932_v63 = vsel %vm745_vm2, %v6591_v53, %v3931_v45  ;;  %v8221_v28 = vrot.slane %v6667_v0, 6  ;;  %v8224_v45 = vld [vmem:[#allocation36_spill] sm:$0xff] }
 0x260   : > { %v3634_v21 = vmul.f32 %v8220_v39, %v3631_v2  ;;  %v6964_v50 = vadd.f32 %v2740_v27, %v6926_v34  ;;  %v8222_v9 = vrot.slane %v6520_v41, 4  ;;  %v3974_v62 = vsel %vm719_vm1, %v6957_v8, 0.0  ;;  %v1879_v59 = vpop.permute.xlu1 %1878 }
 0x261   : > { %v1857_v31 = vadd.f32 %v8221_v28, %v1845_v10  ;;  %v1876_v14 = vadd.f32 %v1872_v51, %v1856_v23  ;;  %v1873_v2 = vrot.slane %v1869_v57, 6  ;;  %v2741_v35 = vrot.slane %v2737_v61, 6  ;;  %1985 = vrot.lane.b32.xlu1 %v8224_v45, %s4917_s18  ;;  %v6979_v23 = vpop.permute.xlu0 %3656 }
 0x262   : > { %v3939_v30 = vmul.f32 %v8222_v9, %v3932_v63  ;;  %v2996_v1 = vadd.f32 %v2992_v12, %v6926_v34  ;;  %v2997_v43 = vadd.f32 %v2993_v22, %v6926_v34  ;;  %v8223_v0 = vrot.slane %v8211_v33, 4 }
 0x263   : > { %v1882_v27 = vsel %vm1622_vm5, %v1879_v59, %v6607_v6  ;;  %v1885_v7 = vsel %vm1622_vm5, 0.0, %v1879_v59  ;;  %v3034_v57 = vsel %vm2522_vm6, %v8192_v38, %v6639_v16  ;;  %v3638_v61 = vrot.slane %v3634_v21, 6 }
 0x264   : > { %v3943_v26 = vrot.slane %v3939_v30, 4  ;;  %v3978_v10 = vmul.f32 %v8223_v0, %v3974_v62  ;;  %v8225_v51 = vrot.slane %v8145_v46, 2  ;;  %v3076_v6 = vsel %vm2548_vm4, %v6641_v15, 0.0  ;;  %v6992_v0 = vpop.permute.xlu1 %2201 }
 0x265   : > { %v1877_v28 = vadd.f32 %v1873_v2, %v1857_v31  ;;  %v8227_v9 = vrot.slane %v6728_v56, 4  ;;  %v6995_v16 = vadd.f32 %v2533_v13, %v6926_v34  ;;  %v2745_v38 = vadd.f32 %v2741_v35, %v6926_v34  ;;  %1768 = vrot.lane.b32.xlu1 %v8110_v36, %s4917_s18  ;;  %v7007_v2 = vpop.permute.xlu0 %2233 }
 0x266   : > { %v1888_v39 = vmul.f32 %v8225_v51, %v1885_v7  ;;  %v8226_v12 = vmov %v8225_v51  ;;  %v3947_v63 = vadd.f32 %v3943_v26, %v3927_v40  ;;  %v8228_v21 = vrot.slane %v8194_v29, 4 }
 0x267   : > { %v1889_v22 = vmul.f32 %v8226_v12, %v1882_v27  ;;  %v3008_v30 = vadd.f32 %v8227_v9, %v2996_v1  ;;  %v8229_v7 = vrot.slane %v6731_v49, 4  ;;  %v8230_v40 = vrot.slane %v6795_v11, %v8193_v19 }
 0x268   : > { %v1892_v62 = vrot.slane %v1888_v39, 6  ;;  %v3041_v27 = vmul.f32 %v8228_v21, %v3034_v57  ;;  %v3982_v31 = vrot.slane %v3978_v10, 4  ;;  %v3024_v13 = vrot.slane %v6910_v3, 4  ;;  %v8240_v21 = vld [vmem:[#allocation97_spill] sm:$0xff] }
 0x269   : > { %v1893_v59 = vrot.slane %v1889_v22, 6  ;;  %v3009_v51 = vadd.f32 %v8229_v7, %v2997_v43  ;;  %v3966_v56 = vadd.f32 %v8230_v40, %v3947_v63  ;;  %v3642_v35 = vadd.f32 %v3638_v61, %v8203_v18  ;;  %v7028_v61 = vpop.permute.xlu1 %2675  ;;  %v8241_v40 = vld [vmem:[#allocation6_spill] sm:$0xff] }
 0x26a   : > { %v7011_v1 = vadd.f32 %v1892_v62, %v1876_v14  ;;  %v8233_v49 = vrot.slane %v8166_v52, 4  ;;  %v3025_v10 = vrot.slane %v6930_v47, 4  ;;  %v2773_v57 = vrot.slane %v6942_v4, 6  ;;  %8236 = vst [vmem:[#allocation74_spill] sm:$0xff] %v7028_v61  ;;  %v8239_v62 = vld [vmem:[#allocation33_spill] sm:$0xff]  ;;  %v8260_v61 = vld [vmem:[#allocation42_spill] sm:$0xff] }
 0x26b   : > { %v7013_v26 = vadd.f32 %v1893_v59, %v1877_v28  ;;  %v7022_v39 = vadd.f32 %v3982_v31, %v3966_v56  ;;  %v8235_v12 = vrot.slane %v8197_v42, 4  ;;  %v2785_v14 = vsel %vm2522_vm6, 0.0, %v6718_v37  ;;  %3540 = vrot.lane.b32.xlu1 %v8239_v62, %s4909_s29 }
 0x26c   : > { %8231 = vst [vmem:[#allocation93_spill] sm:$0xff] %v7011_v1  ;;  %v7018_v43 = vmul.f32 %v8233_v49, %v6827_v17  ;;  %v3028_v22 = vadd.f32 %v3024_v13, %v3008_v30  ;;  %v8237_v63 = vrot.slane %v6713_v20, 6  ;;  %v3045_v17 = vrot.slane %v3041_v27, 4  ;;  %v8242_v30 = vld [vmem:[#allocation54_spill] sm:$0xff]  ;;  %v8245_v13 = vld [vmem:[#allocation55_spill] sm:$0xff] }
 0x26d   : > { %8232 = vst [vmem:[#allocation80_spill] sm:$0xff] %v7013_v26  ;;  %8234 = vst [vmem:[#allocation70_spill] sm:$0xff] %v7022_v39  ;;  %v3080_v3 = vmul.f32 %v8235_v12, %v3076_v6  ;;  %v8238_v47 = vrot.slane %v8156_v25, 2  ;;  %v7895_v4 = vrot.slane %v8194_v29, 2  ;;  %v7038_v6 = vpop.permute.xlu0 %2561  ;;  %v3029_v59 = vadd.f32 %v3025_v10, %v3009_v51  ;;  %v8246_v12 = vld [vmem:[#allocation10_spill] sm:$0xff]  ;;  %v3070_v36 = vpop.permute.xlu1 %3069  ;;  %v8276_v39 = vld [vmem:[#allocation32_spill] sm:$0xff] }
 0x26e   : > { %v2757_v28 = vadd.f32 %v8237_v63, %v2745_v38  ;;  %v3044_v7 = vrot.slane %v8240_v21, 4  ;;  %v3060_v56 = vrot.slane %v8242_v30, %v8241_v40  ;;  %v8243_v38 = vld [vmem:[#allocation91_spill] sm:$0xff]  ;;  %v7898_v49 = vrot.slane %v8245_v13, 4 }
 0x26f   : > { %v2768_v9 = vmul.f32 %v8238_v47, %v6687_v58  ;;  %v8244_v27 = vrot.slane %v8243_v38, 6  ;;  %v2788_v58 = vmul.f32 %v7895_v4, %v2785_v14  ;;  %v3108_v63 = vsel %vm2522_vm6, 0.0, %v8246_v12  ;;  %v8247_v47 = vld [vmem:[#allocation51_spill] sm:$0xff]  ;;  %v8248_v14 = vld [vmem:[#allocation82_spill] sm:$0xff] }
 0x270   : > { %v7043_v20 = vadd.f32 %v2773_v57, %v2757_v28  ;;  %v3049_v51 = vadd.f32 %v3045_v17, %v3029_v59  ;;  %v3084_v10 = vrot.slane %v3080_v3, 4  ;;  %v3048_v45 = vadd.f32 %v3044_v7, %v3028_v22  ;;  %1766 = vrot.lane.b32.xlu1 %v8248_v14, %s4917_s18  ;;  %v8250_v59 = vld [vmem:[#allocation38_spill] sm:$0xff]  ;;  %v8255_v21 = vld [vmem:[#allocation15_spill] sm:$0xff]  ;;  %v8256_v14 = vld [vmem:[#allocation16_spill] sm:$0xff] }
 0x271   : > { %v7047_v31 = vadd.f32 %v8244_v27, %v3642_v35  ;;  %v7057_v57 = vadd.f32 %v6912_v44, %v6926_v34  ;;  %v2772_v35 = vrot.slane %v2768_v9, 6  ;;  %v3073_v28 = vsel %vm2548_vm4, %v3070_v36, %v6641_v15  ;;  %v7063_v38 = vpop.permute.xlu0 %3445  ;;  %v8252_v27 = vld [vmem:[#allocation22_spill] sm:$0xff]  ;;  %v8253_v36 = vld [vmem:[#allocation75_spill] sm:$0xff] }
 0x272   : > { %v8249_v3 = vrot.slane %v8242_v30, %v8193_v19  ;;  %v8251_v22 = vrot.slane %v8250_v59, 6  ;;  %v2137_v44 = vsel %vm1622_vm5, 0.0, %v8252_v27  ;;  %v3111_v34 = vmul.f32 %v7898_v49, %v3108_v63  ;;  %v8257_v59 = vld [vmem:[#allocation3_spill] sm:$0xff] }
 0x273   : > { %v2086_v15 = vrot.slane %v8253_v36, 4  ;;  %v8254_v9 = vrot.slane %v8197_v42, 4  ;;  %v2153_v32 = vrot.slane %v8256_v14, %v8255_v21  ;;  %v2792_v30 = vrot.slane %v2788_v58, 6  ;;  %v8263_v58 = vld [vmem:[#allocation101_spill] sm:$0xff] }
 0x274   : > { %v3068_v17 = vadd.f32 %v8249_v3, %v3049_v51  ;;  %v2756_v7 = vadd.f32 %v8251_v22, %v6964_v50  ;;  %v8258_v50 = vld [vmem:[#allocation40_spill] sm:$0xff]  ;;  %v8261_v63 = vrot.slane %v8247_v47, 4  ;;  %v3067_v49 = vadd.f32 %v3060_v56, %v3048_v45  ;;  %2668 = vrot.lane.b32.xlu1 %v8204_v55, %s4920_s25 }
 0x275   : > { %v3079_v4 = vmul.f32 %v8254_v9, %v3073_v28  ;;  %v8259_v22 = vcombine.low %v8258_v50, %v8258_v50  ;;  %v3419_v28 = vpop.permute.xlu1 %3418  ;;  %v8262_v9 = vrot.slane %v8145_v46, 4  ;;  %v8265_v45 = vld [vmem:[#allocation20_spill] sm:$0xff]  ;;  %v3450_v55 = vsel %vm719_vm1, %v7063_v38, 0.0 }
 0x276   : > { %v7080_v51 = vadd.f32 %v3084_v10, %v3068_v17  ;;  %v2776_v3 = vadd.f32 %v2772_v35, %v2756_v7  ;;  %v3123_v36 = vmul.f32 %v8261_v63, %v8260_v61  ;;  %v3422_v10 = vsel %vm745_vm2, %v3419_v28, %v8263_v58  ;;  %v7100_v17 = vpop.permute.xlu0 %3678  ;;  %v8267_v63 = vld [vmem:[#allocation48_spill] sm:$0xff] }
 0x277   : > { %v7086_v26 = vrot.slane %v8259_v22, %v8257_v59  ;;  %v3083_v1 = vrot.slane %v3079_v4, 4  ;;  %v7093_v21 = vmul.f32 %v8262_v9, %v2137_v44  ;;  %v3425_v35 = vsel %vm745_vm2, 0.0, %v3419_v28  ;;  %8264 = vst [vmem:[#allocation98_spill] sm:$0xff] %v7100_v17  ;;  %v8266_v44 = vld [vmem:[#allocation21_spill] sm:$0xff]  ;;  %v8268_v9 = vld [vmem:[#allocation79_spill] sm:$0xff]  ;;  %v8279_v59 = vld [vmem:[#allocation64_spill] sm:$0xff] }
 0x278   : > { %v7102_v7 = vadd.f32 %v2792_v30, %v2776_v3  ;;  %v3115_v61 = vrot.slane %v3111_v34, 4  ;;  %v2088_v4 = vmul.f32 %v2086_v15, %v8265_v45  ;;  %v3432_v50 = vmul.f32 %v8166_v52, %v3422_v10 }
 0x279   : > { %v3087_v56 = vadd.f32 %v3083_v1, %v3067_v49  ;;  %v7107_v22 = vmul.f32 %v2153_v32, %v8266_v44  ;;  %v2114_v28 = vsel %vm1648_vm7, %v8268_v9, %v8267_v63  ;;  %v3431_v58 = vmul.f32 %v8166_v52, %v3425_v35  ;;  %v7118_v49 = vpop.permute.xlu1 %3557  ;;  %v8270_v32 = vld [vmem:[#allocation56_spill] sm:$0xff]  ;;  %v8272_v44 = vld [vmem:[#allocation95_spill] sm:$0xff] }
 0x27a   : > { %v2117_v34 = vsel %vm1648_vm7, %v8267_v63, 0.0  ;;  %v3127_v30 = vrot.slane %v3123_v36, 4  ;;  %v3434_v1 = vadd.f32 %v3432_v50, %v8203_v18  ;;  %8269 = vst [vmem:[#allocation96_spill] sm:$0xff] %v7118_v49  ;;  %v2089_v10 = vmul.f32 %v2086_v15, %v8270_v32  ;;  %v8274_v63 = vld [vmem:[#allocation88_spill] sm:$0xff]  ;;  %v7132_v36 = vpop.permute.xlu0 %4001 }
 0x27b   : > { %v3119_v3 = vadd.f32 %v3115_v61, %v3087_v56  ;;  %v7123_v45 = vmul.f32 %v7118_v49, %v8239_v62  ;;  %v7127_v9 = vmul.f32 %v7118_v49, %v8272_v44  ;;  %2666 = vrot.lane.b32.xlu1 %v8274_v63, %s4920_s25  ;;  %v2092_v61 = vrot.slane %v2088_v4, 4  ;;  %v8275_v56 = vld [vmem:[#allocation24_spill] sm:$0xff] }
 0x27c   : > { %v3456_v50 = vmul.f32 %v8275_v56, %v3450_v55  ;;  %v3442_v15 = vadd.f32 %v8276_v39, %v3434_v1  ;;  %v3890_v62 = vrot.slane %v7018_v43, 4  ;;  %v3433_v35 = vadd.f32 %v3431_v58, %v8203_v18 }
 0x27d   : > { %8271 = vst [vmem:[#allocation58_spill] sm:$0xff] %v7123_v45  ;;  %8273 = vst [vmem:[#allocation73_spill] sm:$0xff] %v7127_v9  ;;  %v7136_v32 = vadd.f32 %v3127_v30, %v3119_v3  ;;  %v8278_v45 = vld [vmem:[#allocation11_spill] sm:$0xff]  ;;  %v8280_v63 = vrot.slane %v7118_v49, 2  ;;  %v7151_v55 = vpop.permute.xlu1 %2546  ;;  %v2816_v43 = vcombine.high %v7086_v26, %v7086_v26  ;;  %v8286_v4 = vrot.slane %v8275_v56, 4 }
 0x27e   : > { %v3912_v9 = vsel %vm719_vm1, %v8279_v59, %v8278_v45  ;;  %v7155_v30 = vadd.f32 %v3456_v50, %v3442_v15  ;;  %v8283_v59 = vrot.slane %v8146_v60, 4  ;;  %v3444_v39 = vpop.permute.xlu0 %3443  ;;  %v2552_v50 = vsel %vm2548_vm4, %v7151_v55, 0.0 }
 0x27f   : > { %8277 = vst [vmem:[#allocation66_spill] sm:$0xff] %v7136_v32  ;;  %v7146_v17 = vmul.f32 %v8280_v63, %v6707_v48  ;;  %v8285_v48 = vld [vmem:[#allocation67_spill] sm:$0xff]  ;;  %v2093_v63 = vrot.slane %v2089_v10, 4  ;;  %3566 = vrot.lane.b32.xlu1 %v8272_v44, %s4908_s23  ;;  %v2096_v32 = vadd.f32 %v2092_v61, %v8210_v5  ;;  %v2558_v44 = vmul.f32 %v8156_v25, %v2552_v50 }
 0x280   : > { %8282 = vst [vmem:[#allocation25_spill] sm:$0xff] %v7155_v30  ;;  %v2120_v58 = vmul.f32 %v8283_v59, %v2114_v28  ;;  %v8284_v3 = vmov %v8283_v59  ;;  %v3447_v28 = vsel %vm719_vm1, %v3444_v39, %v7063_v38  ;;  %v8287_v10 = vld [vmem:[#allocation35_spill] sm:$0xff]  ;;  %v8288_v59 = vld [vmem:[#allocation84_spill] sm:$0xff]  ;;  %v3935_v38 = vsel %vm745_vm2, 0.0, %v6591_v53 }
 0x281   : > { %8281 = vst [vmem:[#allocation105_spill] sm:$0xff] %v7146_v17  ;;  %v2121_v1 = vmul.f32 %v8284_v3, %v2117_v34  ;;  %v3918_v17 = vmul.f32 %v8286_v4, %v3912_v9  ;;  %v4241_v34 = vld [vmem:[%s7700_s8] sm:$0x1f]  ;;  %v2543_v15 = vadd.f32 %v8287_v10, %v6995_v16  ;;  %v3441_v3 = vadd.f32 %v8288_v59, %v3433_v35  ;;  %v2781_v16 = vpop.permute.xlu1 %2780 }
 0x282   : > { %v3455_v9 = vmul.f32 %v8275_v56, %v3447_v28  ;;  %v8289_v61 = vld [vmem:[#allocation87_spill] sm:$0xff]  ;;  %v3894_v39 = vadd.f32 %v3890_v62, %v8203_v18  ;;  %v8290_v45 = vrot.slane %v8166_v52, 2  ;;  %v2097_v50 = vadd.f32 %v2093_v63, %v8210_v5  ;;  %v8298_v5 = vld [vmem:[#allocation34_spill] sm:$0xff] }
 0x283   : > { %v2134_v4 = vsel %vm1622_vm5, %v8252_v27, %v8289_v61  ;;  %v7189_v10 = vadd.f32 %v2558_v44, %v2543_v15  ;;  %v2782_v28 = vsel %vm2522_vm6, %v6718_v37, %v2781_v16  ;;  %v7195_v27 = vpop.permute.xlu0 %1953  ;;  %4244 = vperm.xlu1 %4862, %v4241_v34   ;;  %v8293_v53 = vrot.slane %v8194_v29, 2  ;;  %v8295_v34 = vld [vmem:[#allocation63_spill] sm:$0xff] }
 0x284   : > { %v3635_v30 = vmul.f32 %v8290_v45, %v6935_v54  ;;  %v7191_v35 = vadd.f32 %v3455_v9, %v3441_v3  ;;  %8292 = vst [vmem:[#allocation103_spill] sm:$0xff] %v7195_v27  ;;  %v3664_v52 = vrot.slane %v8275_v56, 2  ;;  %v4775_v54 = vld [vmem:[%s7700_s8 + $0x8] sm:$0x1f]  ;;  %v2124_v45 = vrot.slane %v2120_v58, 4 }
 0x285   : > { %v2789_v62 = vmul.f32 %v8293_v53, %v2782_v28  ;;  %v8294_v37 = vrot.slane %v8145_v46, 4  ;;  %v3922_v15 = vrot.slane %v3918_v17, 4  ;;  %v8296_v44 = vrot.slane %v8295_v34, 4  ;;  %v3104_v53 = vpop.permute.xlu1 %3103  ;;  %v8301_v27 = vld [vmem:[#allocation100_spill] sm:$0xff] }
 0x286   : > { %8291 = vst [vmem:[#allocation5_spill] sm:$0xff] %v7191_v35  ;;  %v2125_v9 = vrot.slane %v2121_v1, 4  ;;  %v8297_v61 = vrot.slane %v6520_v41, 4  ;;  %v3639_v56 = vrot.slane %v3635_v30, 6  ;;  %v2176_v59 = vsel %vm1648_vm7, %v8298_v5, 0.0  ;;  %v8299_v35 = vld [vmem:[#allocation92_spill] sm:$0xff] }
 0x287   : > { %v2141_v63 = vmul.f32 %v8294_v37, %v2134_v4  ;;  %v2108_v3 = vadd.f32 %v8296_v44, %v2096_v32  ;;  %v2793_v28 = vrot.slane %v2789_v62, 6  ;;  %v8300_v60 = vrot.slane %v8299_v35, 4  ;;  %v7220_v32 = vpop.permute.xlu0 %2823  ;;  %4348 = vperm.xlu1 %4862, %v4775_v54   ;;  %v8303_v1 = vld [vmem:[#allocation47_spill] sm:$0xff] }
 0x288   : > { %v3938_v16 = vmul.f32 %v8297_v61, %v3935_v38  ;;  %v8302_v46 = vrot.slane %v8301_v27, 4  ;;  %v3105_v17 = vsel %vm2522_vm6, %v8246_v12, %v3104_v53  ;;  %v8304_v30 = vrot.slane %v8247_v47, 4 }
 0x289   : > { %v3906_v58 = vadd.f32 %v8300_v60, %v3894_v39  ;;  %v2797_v62 = vadd.f32 %v2793_v28, %v7043_v20  ;;  %v8305_v37 = vrot.slane %v8245_v13, 4  ;;  %v2828_v60 = vsel %vm2548_vm4, %v7220_v32, 0.0  ;;  %v3659_v28 = vpop.permute.xlu1 %3658 }
 0x28a   : > { %v2109_v4 = vadd.f32 %v8302_v46, %v2097_v50  ;;  %v3124_v38 = vmul.f32 %v8304_v30, %v8303_v1  ;;  %v4776_v46 = vld [vmem:[%s7701_s9 + $0x8] sm:$0x1f]  ;;  %v2145_v12 = vrot.slane %v2141_v63, 4  ;;  %v2128_v50 = vadd.f32 %v2124_v45, %v2108_v3 }
 0x28b   : > { %v3112_v34 = vmul.f32 %v8305_v37, %v3105_v17  ;;  %v3926_v39 = vadd.f32 %v3922_v15, %v3906_v58  ;;  %v8306_v35 = vrot.slane %v8197_v42, 2  ;;  %v3942_v54 = vrot.slane %v3938_v16, 4  ;;  %v7239_v37 = vpop.permute.xlu0 %3135  ;;  %4357 = vperm.xlu1 %4862, %v4776_v46  }
 0x28c   : > { %v3643_v44 = vadd.f32 %v3639_v56, %v8203_v18  ;;  %v2820_v61 = vadd.f32 %v2816_v43, %v2797_v62  ;;  %v2129_v53 = vadd.f32 %v2125_v9, %v2109_v4  ;;  %v3660_v1 = vsel %vm719_vm1, %v6979_v23, %v3659_v28  ;;  %v4782_v18 = vld [vmem:[%s7701_s9 + $0x10] sm:$0x1f]  ;;  %v8307_v9 = vld [vmem:[#allocation72_spill] sm:$0xff]  ;;  %v8309_v4 = vld [vmem:[#allocation31_spill] sm:$0xff] }
 0x28d   : > { %v2832_v27 = vmul.f32 %v8306_v35, %v2828_v60  ;;  %v3116_v20 = vrot.slane %v3112_v34, 4  ;;  %v3663_v30 = vsel %vm719_vm1, %v3659_v28, 0.0  ;;  %v3128_v45 = vrot.slane %v3124_v38, 4  ;;  %v3968_v60 = vpop.permute.xlu1 %3967  ;;  %v8311_v35 = vld [vmem:[#allocation50_spill] sm:$0xff] }
 0x28e   : > { %v3666_v15 = vmul.f32 %v3664_v52, %v3660_v1  ;;  %v3667_v3 = vmul.f32 %v3664_v52, %v3663_v30  ;;  %v3946_v43 = vadd.f32 %v3942_v54, %v3926_v39  ;;  %v2173_v16 = vsel %vm1648_vm7, %v8307_v9, %v8298_v5 }
 0x28f   : > { %v2836_v17 = vrot.slane %v2832_v27, 6  ;;  %v3120_v63 = vadd.f32 %v3116_v20, %v7080_v51  ;;  %v8308_v23 = vrot.slane %v7093_v21, 4  ;;  %v8310_v38 = vrot.slane %v8309_v4, 6  ;;  %4463 = vperm.xlu1 %4862, %v4782_v18   ;;  %v8312_v27 = vld [vmem:[#allocation46_spill] sm:$0xff] }
 0x290   : > { %v3670_v51 = vrot.slane %v3666_v15, 6  ;;  %v3671_v34 = vrot.slane %v3667_v3, 6  ;;  %v2149_v46 = vadd.f32 %v2145_v12, %v2129_v53  ;;  %v2205_v39 = vsel %vm1622_vm5, %v6992_v0, %v8311_v35 }
 0x291   : > { %v2148_v56 = vadd.f32 %v8308_v23, %v2128_v50  ;;  %v7250_v58 = vadd.f32 %v2836_v17, %v2820_v61  ;;  %v3655_v62 = vadd.f32 %v8310_v38, %v3643_v44  ;;  %v7254_v52 = vadd.f32 %v3128_v45, %v3120_v63  ;;  %v7263_v50 = vpop.permute.xlu0 %3461  ;;  %v8315_v17 = vld [vmem:[#allocation62_spill] sm:$0xff]  ;;  %v2545_v9 = vpop.permute.xlu1 %2544 }
 0x292   : > { %v2208_v5 = vsel %vm1622_vm5, 0.0, %v6992_v0  ;;  %v3971_v21 = vsel %vm719_vm1, %v3968_v60, %v6957_v8  ;;  %v2209_v54 = vrot.slane %v8312_v27, 4  ;;  %v7267_v44 = vadd.f32 %v3670_v51, %v7047_v31  ;;  %v4788_v0 = vld [vmem:[%s7701_s9 + $0x18] sm:$0x1f] }
 0x293   : > { %v7269_v20 = vadd.f32 %v3671_v34, %v3655_v62  ;;  %v8313_v12 = vrot.slane %v8211_v33, 4  ;;  %v2164_v8 = vrot.slane %v7107_v22, %v8193_v19  ;;  %v8314_v28 = vrot.slane %v8285_v48, 4  ;;  %4569 = vperm.xlu1 %4862, %v4788_v0   ;;  %v8320_v34 = vld [vmem:[#allocation69_spill] sm:$0xff] }
 0x294   : > { %v2221_v1 = vrot.slane %v8315_v17, 4  ;;  %v2211_v45 = vmul.f32 %v2209_v54, %v2208_v5  ;;  %v2212_v63 = vmul.f32 %v2209_v54, %v2205_v39  ;;  %v8317_v15 = vrot.slane %v6795_v11, %v8241_v40  ;;  %v8319_v11 = vld [vmem:[#allocation86_spill] sm:$0xff] }
 0x295   : > { %v3977_v61 = vmul.f32 %v8313_v12, %v3971_v21  ;;  %v2180_v53 = vmul.f32 %v8314_v28, %v2176_v59  ;;  %v8316_v31 = vmov %v8314_v28  ;;  %v8318_v23 = vrot.slane %v7107_v22, %v8241_v40  ;;  %v7302_v5 = vpop.permute.xlu1 %1923 }
 0x296   : > { %v2179_v30 = vmul.f32 %v8316_v31, %v2173_v16  ;;  %v3965_v3 = vadd.f32 %v8317_v15, %v3946_v43  ;;  %v2168_v4 = vadd.f32 %v2164_v8, %v2149_v46  ;;  %v2568_v59 = vsel %vm2522_vm6, 0.0, %v7038_v6  ;;  %v2822_v16 = vpop.permute.xlu0 %2821 }
 0x297   : > { %v3981_v18 = vrot.slane %v3977_v61, 4  ;;  %v2167_v19 = vadd.f32 %v8318_v23, %v2148_v56  ;;  %v2549_v38 = vsel %vm2548_vm4, %v2545_v9, %v7151_v55  ;;  %v2542_v43 = vadd.f32 %v8319_v11, %v7057_v57 }
 0x298   : > { %v2557_v51 = vmul.f32 %v8156_v25, %v2549_v38  ;;  %v2825_v40 = vsel %vm2548_vm4, %v2822_v16, %v7220_v32  ;;  %v2184_v22 = vrot.slane %v2180_v53, 4  ;;  %v2183_v56 = vrot.slane %v2179_v30, 4  ;;  %v8322_v32 = vld [vmem:[#allocation102_spill] sm:$0xff]  ;;  %v8323_v30 = vld [vmem:[#allocation68_spill] sm:$0xff] }
 0x299   : > { %v7293_v62 = vadd.f32 %v3981_v18, %v3965_v3  ;;  %v2223_v60 = vmul.f32 %v2221_v1, %v8320_v34  ;;  %v2215_v46 = vrot.slane %v2211_v45, 4  ;;  %v2216_v35 = vrot.slane %v2212_v63, 4  ;;  %v2236_v31 = vpop.permute.xlu1 %2235 }
 0x29a   : > { %v2573_v55 = vmul.f32 %v8194_v29, %v2568_v59  ;;  %v2559_v39 = vadd.f32 %v2557_v51, %v2542_v43  ;;  %v8321_v21 = vrot.slane %v8197_v42, 2  ;;  %v7306_v57 = vpop.permute.xlu0 %1744  ;;  %v2187_v25 = vadd.f32 %v2183_v56, %v2167_v19  ;;  %v8324_v59 = vld [vmem:[#allocation14_spill] sm:$0xff] }
 0x29b   : > { %v2188_v12 = vadd.f32 %v2184_v22, %v2168_v4  ;;  %v2224_v0 = vmul.f32 %v2221_v1, %v8322_v32  ;;  %v2227_v53 = vrot.slane %v2223_v60, 4  ;;  %v2241_v45 = vrot.slane %v8323_v30, 4 }
 0x29c   : > { %v2831_v54 = vmul.f32 %v8321_v21, %v2825_v40  ;;  %v7308_v61 = vadd.f32 %v2573_v55, %v2559_v39  ;;  %v2219_v8 = vadd.f32 %v2215_v46, %v2187_v25  ;;  %v2237_v15 = vsel %vm1648_vm7, %v7007_v2, %v2236_v31 }
 0x29d   : > { %v2220_v28 = vadd.f32 %v2216_v35, %v2188_v12  ;;  %v2240_v3 = vsel %vm1648_vm7, %v2236_v31, 0.0  ;;  %v7903_v18 = vrot.slane %v8245_v13, 2  ;;  %v2228_v23 = vrot.slane %v2224_v0, 4  ;;  %v2564_v22 = vpop.permute.xlu1 %2563 }
 0x29e   : > { %v2835_v63 = vrot.slane %v2831_v54, 6  ;;  %v7316_v9 = vpop.permute.xlu0 %2853  ;;  %v2243_v19 = vmul.f32 %v2241_v45, %v2237_v15  ;;  %v2244_v4 = vmul.f32 %v2241_v45, %v2240_v3  ;;  %v1904_v38 = vrot.slane %v8256_v14, %v8324_v59 }
 0x29f   : > { %v2860_v1 = vsel %vm2522_vm6, 0.0, %v7316_v9  ;;  %v2819_v16 = vadd.f32 %v7086_v26, %v7102_v7  ;;  %v2231_v11 = vadd.f32 %v2227_v53, %v2219_v8  ;;  %v2232_v43 = vadd.f32 %v2228_v23, %v2220_v28  ;;  %v8325_v26 = vld [vmem:[#allocation8_spill] sm:$0xff]  ;;  %v8326_v8 = vld [vmem:[#allocation98_spill] sm:$0xff] }
 0x2a0   : > { %v2863_v2 = vmul.f32 %v7903_v18, %v2860_v1  ;;  %v2247_v51 = vrot.slane %v2243_v19, 4  ;;  %v2248_v40 = vrot.slane %v2244_v4, 4  ;;  %v2565_v60 = vsel %vm2522_vm6, %v7038_v6, %v2564_v22  ;;  %v8328_v23 = vld [vmem:[#allocation18_spill] sm:$0xff]  ;;  %v8329_v4 = vld [vmem:[#allocation71_spill] sm:$0xff]  ;;  %v8348_v18 = vld [vmem:[#allocation4_spill] sm:$0xff] }
 0x2a1   : > { %v2839_v56 = vadd.f32 %v2835_v63, %v2819_v16  ;;  %v2574_v39 = vmul.f32 %v8194_v29, %v2565_v60  ;;  %v1906_v7 = vmul.f32 %v1904_v38, %v8325_v26  ;;  %v2879_v21 = vrot.slane %v6882_v24, 6  ;;  %v7337_v0 = vpop.permute.xlu1 %3676  ;;  %v8327_v24 = vld [vmem:[#allocation13_spill] sm:$0xff] }
 0x2a2   : > { %v2867_v34 = vrot.slane %v2863_v2, 6  ;;  %v7328_v46 = vpop.permute.xlu0 %3721  ;;  %v2251_v35 = vadd.f32 %v2247_v51, %v2231_v11  ;;  %v2252_v55 = vadd.f32 %v2248_v40, %v2232_v43  ;;  %v7902_v32 = vrot.slane %v6520_v41, 2  ;;  %v8330_v38 = vld [vmem:[#allocation57_spill] sm:$0xff]  ;;  %v8371_v51 = vld [vmem:[#allocation90_spill] sm:$0xff] }
 0x2a3   : > { %v7334_v12 = vadd.f32 %v2574_v39, %v7189_v10  ;;  %v4019_v6 = vrot.slane %v7118_v49, 4  ;;  %v3680_v28 = vsel %vm745_vm2, %v7337_v0, %v8326_v8  ;;  %v1908_v45 = vcombine.low %v1906_v7, %v1906_v7 }
 0x2a4   : > { %v2871_v54 = vadd.f32 %v2867_v34, %v2839_v56  ;;  %v2255_v25 = vcombine.high %v2251_v35, %v2252_v55  ;;  %v3687_v10 = vmul.f32 %v7902_v32, %v3680_v28  ;;  %v4007_v19 = vrot.slane %v8328_v23, 4  ;;  %v8333_v34 = vld [vmem:[#allocation3_spill] sm:$0xff] }
 0x2a5   : > { %v4000_v3 = vpop.permute.xlu1 %3999  ;;  %v4021_v1 = vmul.f32 %v4019_v6, %v8329_v4  ;;  %v4022_v16 = vmul.f32 %v4019_v6, %v8330_v38  ;;  %v1915_v60 = vrot.slane %v1908_v45, %v8333_v34  ;;  %v8334_v35 = vld [vmem:[#allocation103_spill] sm:$0xff]  ;;  %v1961_v39 = vrot.slane %v8312_v27, 2 }
 0x2a6   : > { %v7343_v29 = vpop.permute.xlu0 %4033  ;;  %v7345_v53 = vadd.f32 %v2879_v21, %v2871_v54  ;;  %v2262_v31 = vrot.slane %v2255_v25, %v8327_v24  ;;  %v3691_v15 = vrot.slane %v3687_v10, 6  ;;  %v4003_v2 = vsel %vm745_vm2, %v4000_v3, %v7132_v36  ;;  %v8335_v10 = vld [vmem:[#allocation70_spill] sm:$0xff]  ;;  %v8344_v32 = vld [vmem:[#allocation27_spill] sm:$0xff] }
 0x2a7   : > { %v4006_v11 = vsel %vm745_vm2, 0.0, %v4000_v3  ;;  %v4010_v56 = vmul.f32 %v4007_v19, %v4003_v2  ;;  %v1960_v55 = vsel %vm1622_vm5, 0.0, %v8334_v35  ;;  %v1929_v36 = vrot.slane %v8285_v48, 2 }
 0x2a8   : > { %v2269_v63 = vrot.slane %v2262_v31, %v8327_v24  ;;  %v7362_v40 = vadd.f32 %v3691_v15, %v7269_v20  ;;  %v4009_v22 = vmul.f32 %v4007_v19, %v4006_v11  ;;  %v4025_v54 = vrot.slane %v4021_v1, 4  ;;  %v8336_v15 = vld [vmem:[#allocation93_spill] sm:$0xff] }
 0x2a9   : > { %v4014_v7 = vrot.slane %v4010_v56, 4  ;;  %v1922_v21 = vpop.permute.xlu1 %1921  ;;  %v4026_v25 = vrot.slane %v4022_v16, 4  ;;  %v1928_v20 = vsel %vm1648_vm7, %v7302_v5, 0.0  ;;  %v1963_v28 = vmul.f32 %v1961_v39, %v1960_v55  ;;  %v8337_v56 = vld [vmem:[#allocation12_spill] sm:$0xff] }
 0x2aa   : > { %v7357_v43 = vpop.permute.xlu0 %3719  ;;  %2272 = vst.msk [vmem:[#allocation2 + $0x14] ss:$8 sm:$0x3] %vm6560_vm3, %v2269_v63  ;;  %8332 = vst [vmem:[#allocation9_spill] sm:$0xff] %v7362_v40  ;;  %v4013_v26 = vrot.slane %v4009_v22, 4  ;;  %v1925_v6 = vsel %vm1648_vm7, %v1922_v21, %v7302_v5  ;;  %v1919_v3 = vadd.f32 %v1915_v60, %v8336_v15  ;;  %v1932_v19 = vmul.f32 %v1929_v36, %v1928_v20  ;;  %v8338_v55 = vld [vmem:[#allocation44_spill] sm:$0xff] }
 0x2ab   : > { %v4018_v45 = vadd.f32 %v4014_v7, %v8335_v10  ;;  %v1931_v63 = vmul.f32 %v1929_v36, %v1925_v6  ;;  %v7904_v5 = vrot.slane %v8315_v17, 2  ;;  %v1967_v11 = vrot.slane %v1963_v28, 6  ;;  %v8339_v7 = vld [vmem:[#allocation74_spill] sm:$0xff] }
 0x2ac   : > { %v4017_v31 = vadd.f32 %v4013_v26, %v7293_v62  ;;  %v3140_v62 = vsel %vm2548_vm4, %v7239_v37, 0.0  ;;  %v3484_v26 = vrot.slane %v8338_v55, %v8337_v56  ;;  %v3141_v36 = vrot.slane %v8339_v7, 4 }
 0x2ad   : > { %v7378_v4 = vadd.f32 %v4026_v25, %v4018_v45  ;;  %v1935_v1 = vrot.slane %v1931_v63, 6  ;;  %v7380_v38 = vpop.permute.xlu1 %1704  ;;  %v1686_v21 = vrot.slane %v8256_v14, %v8337_v56  ;;  %v1916_v25 = vcombine.high %v1915_v60, %v1915_v60  ;;  %v8342_v45 = vld [vmem:[#allocation80_spill] sm:$0xff]  ;;  %v8345_v60 = vld [vmem:[#allocation30_spill] sm:$0xff] }
 0x2ae   : > { %v7373_v8 = vpop.permute.xlu0 %2642  ;;  %v7382_v16 = vadd.f32 %v4025_v54, %v4017_v31  ;;  %v1936_v20 = vrot.slane %v1932_v19, 6  ;;  %v3144_v31 = vmul.f32 %v3141_v36, %v3140_v62  ;;  %v1652_v14 = vsel %vm1648_vm7, %v8344_v32, 0.0 }
 0x2af   : > { %v1939_v22 = vadd.f32 %v1935_v1, %v1919_v3  ;;  %v1920_v63 = vadd.f32 %v1916_v25, %v8342_v45  ;;  %v8343_v3 = vld [vmem:[#allocation81_spill] sm:$0xff]  ;;  %v3486_v19 = vmul.f32 %v3484_v26, %v8345_v60 }
 0x2b0   : > { %v1976_v1 = vmul.f32 %v7904_v5, %v8343_v3  ;;  %v3148_v25 = vrot.slane %v3144_v31, 4  ;;  %v8349_v45 = vld [vmem:[#allocation41_spill] sm:$0xff] }
 0x2b1   : > { %v7392_v54 = vadd.f32 %v1967_v11, %v1939_v22  ;;  %v1956_v6 = vpop.permute.xlu1 %1955  ;;  %v8346_v11 = vld [vmem:[#allocation65_spill] sm:$0xff]  ;;  %v1658_v3 = vmul.f32 %v8349_v45, %v1652_v14  ;;  %v3494_v17 = vrot.slane %v3486_v19, %v8333_v34  ;;  %v8352_v14 = vld [vmem:[#allocation66_spill] sm:$0xff] }
 0x2b2   : > { %v3503_v2 = vpop.permute.xlu0 %3502  ;;  %v1957_v28 = vsel %vm1622_vm5, %v8334_v35, %v1956_v6  ;;  %v8347_v22 = vld [vmem:[#allocation49_spill] sm:$0xff]  ;;  %v1688_v35 = vmul.f32 %v1686_v21, %v8348_v18  ;;  %v1940_v6 = vadd.f32 %v1936_v20, %v1920_v63  ;;  %v1980_v40 = vrot.slane %v1976_v1, 6  ;;  %v8351_v18 = vld [vmem:[#allocation99_spill] sm:$0xff] }
 0x2b3   : > { %8340 = vst [vmem:[#allocation106_spill] sm:$0xff] %v7392_v54  ;;  %v1964_v15 = vmul.f32 %v1961_v39, %v1957_v28  ;;  %v1665_v62 = vsel %vm1622_vm5, %v8347_v22, %v8346_v11  ;;  %v8350_v26 = vld [vmem:[#allocation37_spill] sm:$0xff]  ;;  %v1660_v21 = vadd.f32 %v1658_v3, %v8351_v18  ;;  %v3507_v1 = vsel %vm719_vm1, %v3503_v2, 0.0 }
 0x2b4   : > { %v1674_v60 = vmul.f32 %v8350_v26, %v1665_v62  ;;  %v7415_v11 = vrot.slane %v1688_v35, %v8333_v34 }
 0x2b5   : > { %v1968_v54 = vrot.slane %v1964_v15, 6 }
 0x2b6   : > { %v7396_v10 = vpop.permute.xlu0 %3753  ;;  %v1676_v62 = vadd.f32 %v1674_v60, %v1660_v21  ;;  %v1697_v18 = vcombine.high %v7415_v11, %v7415_v11 }
 0x2b7   : > { %8341 = vst [vmem:[#allocation107_spill] sm:$0xff] %v7396_v10  ;;  %v3134_v10 = vpop.permute.xlu1 %3133  ;;  %v1972_v5 = vadd.f32 %v1968_v54, %v1940_v6  ;;  %v1709_v54 = vsel %vm1648_vm7, %v7380_v38, 0.0  ;;  %v8353_v6 = vld [vmem:[#allocation5_spill] sm:$0xff] }
 0x2b8   : > { %v3137_v39 = vsel %vm2548_vm4, %v3134_v10, %v7239_v37  ;;  %v3152_v37 = vadd.f32 %v3148_v25, %v7254_v52  ;;  %v3495_v52 = vcombine.high %v3494_v17, %v3494_v17 }
 0x2b9   : > { %v3143_v49 = vmul.f32 %v3141_v36, %v3137_v39  ;;  %v7418_v63 = vadd.f32 %v1980_v40, %v1972_v5  ;;  %v8354_v39 = vld [vmem:[#allocation25_spill] sm:$0xff] }
 0x2ba   : > { %v3501_v28 = vpop.permute.xlu0 %3500 }
 0x2bb   : > { %v3147_v20 = vrot.slane %v3143_v49, 4  ;;  %v3460_v31 = vpop.permute.xlu1 %3459  ;;  %v3504_v5 = vsel %vm719_vm1, %v3501_v28, %v3503_v2 }
 0x2bc   : > { %v3463_v36 = vsel %vm745_vm2, %v3460_v31, %v7263_v50  ;;  %v3466_v10 = vsel %vm745_vm2, 0.0, %v3460_v31  ;;  %v3513_v31 = vmul.f32 %v8211_v33, %v3507_v1  ;;  %v3512_v28 = vmul.f32 %v8211_v33, %v3504_v5 }
 0x2bd   : > { %v3151_v19 = vadd.f32 %v3147_v20, %v8352_v14  ;;  %v3471_v49 = vmul.f32 %v6520_v41, %v3466_v10  ;;  %v3472_v40 = vmul.f32 %v6520_v41, %v3463_v36  ;;  %v1715_v20 = vmul.f32 %v8285_v48, %v1709_v54 }
 0x2be   : > { %v2888_v15 = vpop.permute.xlu0 %2887  ;;  %v2893_v54 = vrot.slane %v8339_v7, 2 }
 0x2bf   : > { %v3155_v35 = vcombine.high %v3151_v19, %v3152_v37  ;;  %v3473_v25 = vadd.f32 %v3471_v49, %v8353_v6  ;;  %v3474_v50 = vadd.f32 %v3472_v40, %v8354_v39  ;;  %v7433_v3 = vpop.permute.xlu1 %1702  ;;  %v1701_v37 = vadd.f32 %v1697_v18, %v1676_v62 }
 0x2c1   : > { %v3162_v2 = vrot.slane %v3155_v35, %v8327_v24  ;;  %v3498_v60 = vadd.f32 %v3494_v17, %v3473_v25  ;;  %v3499_v21 = vadd.f32 %v3495_v52, %v3474_v50  ;;  %v1717_v35 = vadd.f32 %v1715_v20, %v1701_v37  ;;  %v8355_v25 = vld [vmem:[#allocation77_spill] sm:$0xff] }
 0x2c2   : > { %v7439_v10 = vpop.permute.xlu0 %3542  ;;  %v2586_v39 = vrot.slane %v8355_v25, %v8337_v56  ;;  %v8357_v37 = vld [vmem:[#allocation53_spill] sm:$0xff] }
 0x2c3   : > { %v3169_v36 = vrot.slane %v3162_v2, %v8327_v24  ;;  %v7444_v14 = vpop.permute.xlu1 %1742  ;;  %v7446_v19 = vadd.f32 %v3512_v28, %v3498_v60  ;;  %v7448_v49 = vadd.f32 %v3513_v31, %v3499_v21  ;;  %v8356_v31 = vld [vmem:[#allocation26_spill] sm:$0xff]  ;;  %v4038_v28 = vsel %vm719_vm1, %v7343_v29, 0.0 }
 0x2c4   : > { %v1746_v1 = vsel %vm1622_vm5, %v7444_v14, %v7306_v57  ;;  %v3702_v57 = vrot.slane %v8338_v55, %v8324_v59  ;;  %v2588_v2 = vmul.f32 %v2586_v39, %v8356_v31  ;;  %v2892_v60 = vsel %vm2548_vm4, %v2888_v15, 0.0  ;;  %v8359_v59 = vld [vmem:[#allocation29_spill] sm:$0xff] }
 0x2c5   : > { %3172 = vst.msk [vmem:[#allocation2 + $0x24] ss:$8 sm:$0x3] %vm6560_vm3, %v3169_v36  ;;  %v1755_v17 = vmul.f32 %v8312_v27, %v1746_v1  ;;  %v4039_v56 = vrot.slane %v8357_v37, 4  ;;  %v8358_v36 = vrot.slane %v8245_v13, 2 }
 0x2c6   : > { %v2886_v40 = vpop.permute.xlu0 %2885  ;;  %v3704_v55 = vmul.f32 %v3702_v57, %v8359_v59 }
 0x2c7   : > { %v2889_v5 = vsel %vm2548_vm4, %v2886_v40, %v2888_v15  ;;  %v7458_v62 = vadd.f32 %v1755_v17, %v1717_v35  ;;  %v2605_v6 = vpop.permute.xlu1 %2604  ;;  %v4042_v40 = vmul.f32 %v4039_v56, %v4038_v28  ;;  %v2896_v35 = vmul.f32 %v2893_v54, %v2892_v60 }
 0x2c8   : > { %v2895_v52 = vmul.f32 %v2893_v54, %v2889_v5  ;;  %v2596_v15 = vrot.slane %v2588_v2, %v8333_v34 }
 0x2c9   : > { %v4046_v31 = vrot.slane %v4042_v40, 4  ;;  %v2900_v28 = vrot.slane %v2896_v35, 6  ;;  %v2609_v40 = vsel %vm2548_vm4, %v2605_v6, 0.0  ;;  %v1993_v35 = vrot.slane %v8323_v30, 2 }
 0x2ca   : > { %v2899_v50 = vrot.slane %v2895_v52, 6 }
 0x2cb   : > { %v2856_v20 = vpop.permute.xlu1 %2855  ;;  %v4050_v59 = vadd.f32 %v4046_v31, %v7378_v4 }
 0x2cc   : > { %v2903_v18 = vadd.f32 %v2899_v50, %v7345_v53  ;;  %v2857_v21 = vsel %vm2522_vm6, %v7316_v9, %v2856_v20  ;;  %v3683_v53 = vsel %vm745_vm2, 0.0, %v7337_v0  ;;  %v8360_v9 = vld [vmem:[#allocation94_spill] sm:$0xff]  ;;  %v3706_v20 = vcombine.low %v3704_v55, %v3704_v55 }
 0x2cd   : > { %v2864_v1 = vmul.f32 %v8358_v36, %v2857_v21  ;;  %v2880_v25 = vrot.slane %v8360_v9, 6  ;;  %v8362_v0 = vrot.slane %v6520_v41, 2  ;;  %v2597_v36 = vcombine.high %v2596_v15, %v2596_v15 }
 0x2ce   : > { %2905 = vst [vmem:[#allocation2 + $0x20] sm:$0xc] %v2903_v18  ;;  %v8361_v18 = vld [vmem:[#allocation104_spill] sm:$0xff]  ;;  %v3713_v55 = vrot.slane %v3706_v20, %v8333_v34  ;;  %v3727_v34 = vrot.slane %v8211_v33, 2  ;;  %v1668_v20 = vsel %vm1622_vm5, 0.0, %v8347_v22  ;;  %v3759_v22 = vrot.slane %v8328_v23, 2 }
 0x2cf   : > { %v2868_v17 = vrot.slane %v2864_v1, 6  ;;  %v4032_v5 = vpop.permute.xlu1 %4031  ;;  %v1649_v57 = vsel %vm1648_vm7, %v8361_v18, %v8344_v32  ;;  %v3686_v54 = vmul.f32 %v8362_v0, %v3683_v53 }
 0x2d0   : > { %v4035_v52 = vsel %vm719_vm1, %v4032_v5, %v7343_v29  ;;  %v2649_v29 = vsel %vm2522_vm6, 0.0, %v7373_v8  ;;  %v3786_v5 = vpop.permute.xlu0 %3785 }
 0x2d1   : > { %v2872_v39 = vadd.f32 %v2868_v17, %v7250_v58  ;;  %v4041_v50 = vmul.f32 %v4039_v56, %v4035_v52  ;;  %v2600_v58 = vadd.f32 %v2596_v15, %v7308_v61  ;;  %v3690_v53 = vrot.slane %v3686_v54, 6  ;;  %v8363_v52 = vld [vmem:[#allocation88_spill] sm:$0xff] }
 0x2d2   : > { %v3723_v61 = vsel %vm719_vm1, %v7357_v43, %v7328_v46  ;;  %v2654_v17 = vmul.f32 %v8245_v13, %v2649_v29  ;;  %v2662_v9 = vmul.f32 %v8247_v47, %v8363_v52  ;;  %v1657_v47 = vmul.f32 %v8349_v45, %v1649_v57  ;;  %v8365_v57 = vld [vmem:[#allocation62_spill] sm:$0xff] }
 0x2d3   : > { %v2884_v60 = vadd.f32 %v2880_v25, %v2872_v39  ;;  %v4045_v2 = vrot.slane %v4041_v50, 4  ;;  %v2603_v21 = vpop.permute.xlu1 %2602  ;;  %v2615_v39 = vmul.f32 %v8197_v42, %v2609_v40  ;;  %v3694_v33 = vadd.f32 %v3690_v53, %v7267_v44  ;;  %v8369_v53 = vld [vmem:[#allocation96_spill] sm:$0xff] }
 0x2d4   : > { %v2606_v56 = vsel %vm2548_vm4, %v2603_v21, %v2605_v6  ;;  %v3726_v6 = vsel %vm719_vm1, %v7328_v46, 0.0  ;;  %v3729_v0 = vmul.f32 %v3727_v34, %v3723_v61  ;;  %v2601_v46 = vadd.f32 %v2597_v36, %v7334_v12  ;;  %v3784_v45 = vpop.permute.xlu0 %3783 }
 0x2d5   : > { %v2904_v1 = vadd.f32 %v2900_v28, %v2884_v60  ;;  %v4049_v32 = vadd.f32 %v4045_v2, %v7382_v16  ;;  %v2614_v41 = vmul.f32 %v8197_v42, %v2606_v56  ;;  %v3730_v60 = vmul.f32 %v3727_v34, %v3726_v6  ;;  %v8367_v56 = vld [vmem:[#allocation9_spill] sm:$0xff] }
 0x2d6   : > { %v3714_v2 = vcombine.high %v3713_v55, %v3713_v55  ;;  %v2617_v29 = vadd.f32 %v2615_v39, %v2601_v46  ;;  %v8366_v36 = vrot.slane %v8365_v57, 2  ;;  %v8370_v40 = vrot.slane %v8369_v53, 2 }
 0x2d7   : > { %2906 = vst [vmem:[#allocation2 + $0x28] sm:$0xc] %v2904_v1  ;;  %v4053_v16 = vcombine.high %v4049_v32, %v4050_v59  ;;  %v2616_v15 = vadd.f32 %v2614_v41, %v2600_v58  ;;  %v1988_v4 = vpop.permute.xlu1 %1987  ;;  %v3717_v32 = vadd.f32 %v3713_v55, %v3694_v33  ;;  %v3733_v59 = vrot.slane %v3729_v0, 6  ;;  %v8368_v41 = vld [vmem:[#allocation45_spill] sm:$0xff] }
 0x2d8   : > { %v1992_v25 = vsel %vm1648_vm7, %v1988_v4, 0.0  ;;  %v3718_v1 = vadd.f32 %v3714_v2, %v8367_v56  ;;  %v3774_v61 = vmul.f32 %v8370_v40, %v8368_v41  ;;  %v3787_v52 = vsel %vm719_vm1, %v3784_v45, %v3786_v5 }
 0x2d9   : > { %v4060_v43 = vrot.slane %v4053_v16, %v8327_v24  ;;  %v2656_v50 = vadd.f32 %v2654_v17, %v2616_v15  ;;  %v1996_v18 = vmul.f32 %v1993_v35, %v1992_v25  ;;  %v1659_v17 = vadd.f32 %v1657_v47, %v8371_v51 }
 0x2da   : > { %v3734_v15 = vrot.slane %v3730_v60, 6  ;;  %v1673_v6 = vmul.f32 %v8350_v26, %v1668_v20  ;;  %v8374_v60 = vld [vmem:[#allocation105_spill] sm:$0xff]  ;;  %v3778_v26 = vrot.slane %v3774_v61, 6 }
 0x2db   : > { %v4067_v54 = vrot.slane %v4060_v43, %v8327_v24  ;;  %v2000_v31 = vrot.slane %v1996_v18, 6  ;;  %v2645_v42 = vpop.permute.xlu1 %2644  ;;  %v7517_v28 = vadd.f32 %v2662_v9, %v2656_v50  ;;  %v8364_v24 = vld [vmem:[#allocation36_spill] sm:$0xff]  ;;  %v8372_v9 = vld [vmem:[#allocation107_spill] sm:$0xff]  ;;  %v8373_v43 = vld [vmem:[#allocation85_spill] sm:$0xff]  ;;  %v3737_v18 = vadd.f32 %v3733_v59, %v3717_v32 }
 0x2dc   : > { %v2646_v21 = vsel %vm2522_vm6, %v7373_v8, %v2645_v42  ;;  %v1975_v58 = vmul.f32 %v8366_v36, %v8364_v24  ;;  %v3791_v8 = vrot.slane %v8357_v37, 2  ;;  %v3738_v33 = vadd.f32 %v3734_v15, %v3718_v1  ;;  %v8376_v36 = vld [vmem:[#allocation106_spill] sm:$0xff] }
 0x2dd   : > { %4070 = vst.msk [vmem:[#allocation2 + $0x34] ss:$8 sm:$0x3] %vm6560_vm3, %v4067_v54  ;;  %v2004_v44 = vadd.f32 %v2000_v31, %v7418_v63  ;;  %v2655_v12 = vmul.f32 %v8245_v13, %v2646_v21  ;;  %v3790_v63 = vsel %vm719_vm1, %v3786_v5, 0.0  ;;  %v1706_v5 = vsel %vm1648_vm7, %v7433_v3, %v7380_v38 }
 0x2de   : > { %v3794_v47 = vmul.f32 %v3791_v8, %v3790_v63  ;;  %v1979_v0 = vrot.slane %v1975_v58, 6  ;;  %v3793_v46 = vmul.f32 %v3791_v8, %v3787_v52  ;;  %v3777_v2 = vrot.slane %v8374_v60, 6  ;;  %v7569_v52 = vld [vmem:[#allocation2 + $0x8] sm:$0x1f] }
 0x2df   : > { %2006 = vst [vmem:[#allocation2 + $0x18] sm:$0xc] %v2004_v44  ;;  %v2657_v13 = vadd.f32 %v2655_v12, %v2617_v29  ;;  %v3752_v16 = vpop.permute.xlu1 %3751  ;;  %v1675_v20 = vadd.f32 %v1673_v6, %v1659_v17  ;;  %v8375_v12 = vld [vmem:[#allocation83_spill] sm:$0xff]  ;;  %v1714_v3 = vmul.f32 %v8285_v48, %v1706_v5 }
 0x2e0   : > { %v3755_v55 = vsel %vm745_vm2, %v3752_v16, %v8372_v9  ;;  %v3758_v34 = vsel %vm745_vm2, 0.0, %v3752_v16  ;;  %v1763_v38 = vmul.f32 %v8365_v57, %v8375_v12  ;;  %v3798_v24 = vrot.slane %v3794_v47, 6 }
 0x2e1   : > { %v3761_v25 = vmul.f32 %v3759_v22, %v3758_v34  ;;  %v3762_v39 = vmul.f32 %v3759_v22, %v3755_v55  ;;  %v7542_v50 = vadd.f32 %v8373_v43, %v2657_v13  ;;  %v1749_v22 = vsel %vm1622_vm5, 0.0, %v7444_v14  ;;  %v7562_v13 = vld [vmem:[#allocation2] sm:$0x1f]  ;;  %v8377_v55 = vld [vmem:[#allocation82_spill] sm:$0xff] }
 0x2e2   : > { %v1983_v58 = vadd.f32 %v1979_v0, %v8376_v36  ;;  %v3797_v56 = vrot.slane %v3793_v46, 6  ;;  %v1700_v14 = vadd.f32 %v7415_v11, %v1675_v20  ;;  %v1754_v8 = vmul.f32 %v8312_v27, %v1749_v22 }
 0x2e3   : > { %v3765_v54 = vrot.slane %v3761_v25, 6  ;;  %v3766_v31 = vrot.slane %v3762_v39, 6  ;;  %v1986_v42 = vpop.permute.xlu1 %1985  ;;  %v1765_v41 = vadd.f32 %v1763_v38, %v7458_v62  ;;  %v4075_v9 = vsel %vm4074_vm8, %v7562_v13, 0.0 }
 0x2e4   : > { %v1989_v21 = vsel %vm1648_vm7, %v1986_v42, %v1988_v4  ;;  %v1716_v51 = vadd.f32 %v1714_v3, %v1700_v14  ;;  %v1762_v34 = vmul.f32 %v8365_v57, %v8377_v55  ;;  %v4091_v39 = vmul.f32 %v7562_v13, %v7562_v13  ;;  %v8378_v57 = vld [vmem:[#allocation58_spill] sm:$0xff] }
 0x2e5   : > { %v3769_v29 = vadd.f32 %v3765_v54, %v3737_v18  ;;  %v3770_v45 = vadd.f32 %v3766_v31, %v3738_v33  ;;  %v1995_v44 = vmul.f32 %v1993_v35, %v1989_v21  ;;  %v4092_v18 = vmul.f32 %v7569_v52, %v7569_v52 }
 0x2e6   : > { %v1756_v62 = vadd.f32 %v1754_v8, %v1716_v51  ;;  %v4093_v42 = vsel %vm4074_vm8, %v4091_v39, 0.0 }
 0x2e7   : > { %v3781_v1 = vadd.f32 %v3777_v2, %v3769_v29  ;;  %v3782_v32 = vadd.f32 %v3778_v26, %v3770_v45  ;;  %v1999_v4 = vrot.slane %v1995_v44, 6  ;;  %v1769_v59 = vpop.permute.xlu1 %1768  ;;  %v4100_v20 = vsel %vm4074_vm8, %v4092_v18, 0.0 }
 0x2e8   : > { %v1773_v35 = vsel %vm1648_vm7, %v1769_v59, 0.0  ;;  %v1764_v47 = vadd.f32 %v1762_v34, %v1756_v62  ;;  %v4094_v22 = vrot.slane %v4093_v42, 4  ;;  %v4101_v3 = vrot.slane %v4100_v20, 4 }
 0x2e9   : > { %v3801_v53 = vadd.f32 %v3797_v56, %v3781_v1  ;;  %v3802_v40 = vadd.f32 %v3798_v24, %v3782_v32  ;;  %v2003_v61 = vadd.f32 %v1999_v4, %v1983_v58  ;;  %v1779_v48 = vmul.f32 %v8323_v30, %v1773_v35  ;;  %v3565_v1 = vpop.permute.xlu0 %3564 }
 0x2ea   : > { %v4095_v56 = vadd.f32 %v4094_v22, %v4093_v42 }
 0x2eb   : > { %3803 = vst [vmem:[#allocation2 + $0x30] sm:$0xc] %v3801_v53  ;;  %3804 = vst [vmem:[#allocation2 + $0x38] sm:$0xc] %v3802_v40  ;;  %v1781_v17 = vadd.f32 %v1779_v48, %v1765_v41  ;;  %v3541_v63 = vpop.permute.xlu1 %3540  ;;  %v4102_v41 = vadd.f32 %v4101_v3, %v4100_v20 }
 0x2ec   : > { %2005 = vst [vmem:[#allocation2 + $0x10] sm:$0xc] %v2003_v61  ;;  %v3544_v27 = vsel %vm745_vm2, %v3541_v63, %v7439_v10  ;;  %v3547_v11 = vsel %vm745_vm2, 0.0, %v3541_v63  ;;  %v4096_v51 = vrot.slane %v4095_v56, 2 }
 0x2ed   : > { %1784 = vst [vmem:[#allocation2 + $0x18] sm:$0x3] %v1781_v17  ;;  %v3552_v16 = vmul.f32 %v8328_v23, %v3547_v11  ;;  %v3553_v15 = vmul.f32 %v8328_v23, %v3544_v27  ;;  %v4082_v23 = vsel %vm4074_vm8, %v7569_v52, 0.0 }
 0x2ee   : > { %v4083_v31 = vrot.slane %v4082_v23, 4  ;;  %v7619_v39 = vadd.f32 %v4096_v51, %v4095_v56 }
 0x2ef   : > { %v3554_v6 = vadd.f32 %v3552_v16, %v7446_v19  ;;  %v3555_v10 = vadd.f32 %v3553_v15, %v7448_v49  ;;  %v1767_v25 = vpop.permute.xlu1 %1766  ;;  %v8379_v19 = vld [vmem:[#allocation73_spill] sm:$0xff]  ;;  %v4076_v49 = vrot.slane %v4075_v9, 4  ;;  %v4103_v15 = vrot.slane %v4102_v41, 2 }
 0x2f0   : > { %v1770_v43 = vsel %vm1648_vm7, %v1767_v25, %v1769_v59  ;;  %v4084_v44 = vadd.f32 %v4083_v31, %v4082_v23 }
 0x2f1   : > { %v1778_v33 = vmul.f32 %v8323_v30, %v1770_v43  ;;  %v3562_v0 = vadd.f32 %v8378_v57, %v3554_v6  ;;  %v3563_v5 = vadd.f32 %v8379_v19, %v3555_v10  ;;  %v4077_v21 = vadd.f32 %v4076_v49, %v4075_v9 }
 0x2f2   : > { %v4085_v59 = vrot.slane %v4084_v44, 2 }
 0x2f3   : > { %v1780_v46 = vadd.f32 %v1778_v33, %v1764_v47  ;;  %v2669_v54 = vpop.permute.xlu1 %2668  ;;  %v4078_v58 = vrot.slane %v4077_v21, 2 }
 0x2f4   : > { %v2673_v60 = vsel %vm2548_vm4, %v2669_v54, 0.0  ;;  %v7589_v2 = vld [vmem:[#allocation2 + $0x18] sm:$0x1f]  ;;  %v4086_v62 = vadd.f32 %v4085_v59, %v4084_v44 }
 0x2f5   : > { %1783 = vst [vmem:[#allocation2 + $0x10] sm:$0x3] %v1780_v46  ;;  %v2679_v26 = vmul.f32 %v8339_v7, %v2673_v60  ;;  %v4118_v30 = vsel %vm4074_vm8, %v7589_v2, 0.0  ;;  %v4128_v12 = vmul.f32 %v7589_v2, %v7589_v2  ;;  %v4079_v48 = vadd.f32 %v4078_v58, %v4077_v21 }
 0x2f6   : > { %v4119_v24 = vrot.slane %v4118_v30, 4  ;;  %v4087_v57 = vrot.slane %v4086_v62, 1 }
 0x2f7   : > { %v2681_v29 = vadd.f32 %v2679_v26, %v7542_v50  ;;  %v2667_v45 = vpop.permute.xlu1 %2666  ;;  %v4136_v50 = vsel %vm4074_vm8, %v4128_v12, 0.0  ;;  %v4080_v25 = vrot.slane %v4079_v48, 1  ;;  %v4098_v26 = vrot.slane %v7619_v39, 1 }
 0x2f8   : > { %v2670_v38 = vsel %vm2548_vm4, %v2667_v45, %v2669_v54  ;;  %v4120_v53 = vadd.f32 %v4119_v24, %v4118_v30  ;;  %v4137_v63 = vrot.slane %v4136_v50, 4  ;;  %v4088_v44 = vadd.f32 %v4087_v57, %v4086_v62 }
 0x2f9   : > { %2684 = vst [vmem:[#allocation2 + $0x28] sm:$0x3] %v2681_v29  ;;  %v2678_v36 = vmul.f32 %v8339_v7, %v2670_v38  ;;  %v4081_v60 = vadd.f32 %v4080_v25, %v4079_v48 }
 0x2fa   : > { %v4121_v55 = vrot.slane %v4120_v53, 2  ;;  %v4138_v23 = vadd.f32 %v4137_v63, %v4136_v50 }
 0x2fb   : > { %v2680_v32 = vadd.f32 %v2678_v36, %v7517_v28  ;;  %v3567_v4 = vpop.permute.xlu1 %3566 }
 0x2fc   : > { %v3568_v14 = vsel %vm719_vm1, %v3565_v1, %v3567_v4  ;;  %v3571_v8 = vsel %vm719_vm1, %v3567_v4, 0.0  ;;  %v7604_v35 = vld [vmem:[#allocation2 + $0x10] sm:$0x1f]  ;;  %v4122_v19 = vadd.f32 %v4121_v55, %v4120_v53  ;;  %v4139_v20 = vrot.slane %v4138_v23, 2 }
 0x2fd   : > { %2683 = vst [vmem:[#allocation2 + $0x20] sm:$0x3] %v2680_v32  ;;  %v3576_v7 = vmul.f32 %v8357_v37, %v3568_v14  ;;  %v3577_v40 = vmul.f32 %v8357_v37, %v3571_v8  ;;  %v4111_v28 = vsel %vm4074_vm8, %v7604_v35, 0.0  ;;  %v4127_v61 = vmul.f32 %v7604_v35, %v7604_v35 }
 0x2fe   : > { %v4112_v17 = vrot.slane %v4111_v28, 4  ;;  %v4123_v12 = vrot.slane %v4122_v19, 1  ;;  %v4140_v59 = vadd.f32 %v4139_v20, %v4138_v23 }
 0x2ff   : > { %v3578_v27 = vadd.f32 %v3576_v7, %v3562_v0  ;;  %v3579_v11 = vadd.f32 %v3577_v40, %v3563_v5  ;;  %v4129_v16 = vsel %vm4074_vm8, %v4127_v61, 0.0  ;;  %v7622_v0 = vadd.f32 %v4103_v15, %v4102_v41 }
 0x300   : > { %v4113_v9 = vadd.f32 %v4112_v17, %v4111_v28  ;;  %v4130_v34 = vrot.slane %v4129_v16, 4  ;;  %v7613_v37 = vld [vmem:[#allocation2 + $0x28] sm:$0x1f]  ;;  %v4124_v17 = vadd.f32 %v4123_v12, %v4122_v19 }
 0x301   : > { %3581 = vst [vmem:[#allocation2 + $0x30] sm:$0x3] %v3578_v27  ;;  %3582 = vst [vmem:[#allocation2 + $0x38] sm:$0x3] %v3579_v11  ;;  %v4154_v6 = vsel %vm4074_vm8, %v7613_v37, 0.0  ;;  %v4164_v10 = vmul.f32 %v7613_v37, %v7613_v37  ;;  %v4105_v4 = vrot.slane %v7622_v0, 1 }
 0x302   : > { %v4114_v43 = vrot.slane %v4113_v9, 2  ;;  %v4131_v18 = vadd.f32 %v4130_v34, %v4129_v16  ;;  %v4155_v47 = vrot.slane %v4154_v6, 4 }
 0x303   : > { %v4172_v33 = vsel %vm4074_vm8, %v4164_v10, 0.0 }
 0x304   : > { %v7624_v5 = vld [vmem:[#allocation2 + $0x20] sm:$0x1f]  ;;  %v4173_v49 = vrot.slane %v4172_v33, 4  ;;  %v4115_v46 = vadd.f32 %v4114_v43, %v4113_v9  ;;  %v4156_v31 = vadd.f32 %v4155_v47, %v4154_v6  ;;  %v4132_v21 = vrot.slane %v4131_v18, 2 }
 0x305   : > { %v4147_v54 = vsel %vm4074_vm8, %v7624_v5, 0.0  ;;  %v4163_v42 = vmul.f32 %v7624_v5, %v7624_v5  ;;  %v4141_v9 = vrot.slane %v4140_v59, 1 }
 0x306   : > { %v4148_v30 = vrot.slane %v4147_v54, 4  ;;  %v4157_v22 = vrot.slane %v4156_v31, 2  ;;  %v4174_v45 = vadd.f32 %v4173_v49, %v4172_v33  ;;  %v4116_v58 = vrot.slane %v4115_v46, 1 }
 0x307   : > { %v4165_v29 = vsel %vm4074_vm8, %v4163_v42, 0.0  ;;  %v4133_v8 = vadd.f32 %v4132_v21, %v4131_v18  ;;  %v4126_v49 = vadd.f32 %v4124_v17, %v4088_v44 }
 0x308   : > { %v4149_v38 = vadd.f32 %v4148_v30, %v4147_v54  ;;  %v4166_v3 = vrot.slane %v4165_v29, 4  ;;  %v7632_v24 = vld [vmem:[#allocation2 + $0x30] sm:$0x1f]  ;;  %v7634_v36 = vld [vmem:[#allocation2 + $0x38] sm:$0x1f]  ;;  %v4158_v56 = vadd.f32 %v4157_v22, %v4156_v31  ;;  %v4175_v41 = vrot.slane %v4174_v45, 2 }
 0x309   : > { %v4183_v1 = vsel %vm4074_vm8, %v7632_v24, 0.0  ;;  %v4190_v32 = vsel %vm4074_vm8, %v7634_v36, 0.0  ;;  %v4199_v48 = vmul.f32 %v7632_v24, %v7632_v24  ;;  %v4117_v51 = vadd.f32 %v4116_v58, %v4115_v46 }
 0x30a   : > { %v4150_v50 = vrot.slane %v4149_v38, 2  ;;  %v4167_v14 = vadd.f32 %v4166_v3, %v4165_v29  ;;  %v4184_v53 = vrot.slane %v4183_v1, 4  ;;  %v4191_v7 = vrot.slane %v4190_v32, 4 }
 0x30b   : > { %v4159_v28 = vrot.slane %v4158_v56, 1  ;;  %v4200_v16 = vmul.f32 %v7634_v36, %v7634_v36  ;;  %v4201_v15 = vsel %vm4074_vm8, %v4199_v48, 0.0  ;;  %v4176_v55 = vadd.f32 %v4175_v41, %v4174_v45 }
 0x30c   : > { %v4151_v40 = vadd.f32 %v4150_v50, %v4149_v38  ;;  %v4168_v61 = vrot.slane %v4167_v14, 2  ;;  %v4185_v63 = vadd.f32 %v4184_v53, %v4183_v1  ;;  %v4192_v27 = vadd.f32 %v4191_v7, %v4190_v32 }
 0x30d   : > { %v4134_v10 = vrot.slane %v4133_v8, 1  ;;  %v4160_v25 = vadd.f32 %v4159_v28, %v4158_v56  ;;  %v4202_v43 = vrot.slane %v4201_v15, 4  ;;  %v4208_v23 = vsel %vm4074_vm8, %v4200_v16, 0.0 }
 0x30e   : > { %v4152_v11 = vrot.slane %v4151_v40, 1  ;;  %v4169_v62 = vadd.f32 %v4168_v61, %v4167_v14  ;;  %v4186_v34 = vrot.slane %v4185_v63, 2  ;;  %v4193_v6 = vrot.slane %v4192_v27, 2 }
 0x30f   : > { %v4209_v57 = vrot.slane %v4208_v23, 4  ;;  %v4125_v19 = vadd.f32 %v4117_v51, %v4081_v60  ;;  %v4203_v54 = vadd.f32 %v4202_v43, %v4201_v15  ;;  %v4177_v31 = vrot.slane %v4176_v55, 1  ;;  %v4245_v15 = vpop.permute.xlu1 %4244 }
 0x310   : > { %v4153_v18 = vadd.f32 %v4152_v11, %v4151_v40  ;;  %v4187_v47 = vadd.f32 %v4186_v34, %v4185_v63  ;;  %v4194_v33 = vadd.f32 %v4193_v6, %v4192_v27  ;;  %v4170_v46 = vrot.slane %v4169_v62, 1 }
 0x311   : > { %v4210_v30 = vadd.f32 %v4209_v57, %v4208_v23  ;;  %v4135_v21 = vadd.f32 %v4134_v10, %v4133_v8  ;;  %v4142_v22 = vadd.f32 %v4141_v9, %v4140_v59  ;;  %v4162_v29 = vadd.f32 %v4160_v25, %v4126_v49  ;;  %v4253_v10 = vpop.permute.xlu0 %4252 }
 0x312   : > { %v4188_v42 = vrot.slane %v4187_v47, 1  ;;  %v4195_v20 = vrot.slane %v4194_v33, 1  ;;  %v4204_v45 = vrot.slane %v4203_v54, 2  ;;  %v4161_v12 = vadd.f32 %v4153_v18, %v4125_v19 }
 0x313   : > { %v4211_v58 = vrot.slane %v4210_v30, 2  ;;  %v4099_v56 = vadd.f32 %v4098_v26, %v7619_v39  ;;  %v4106_v60 = vadd.f32 %v4105_v4, %v7622_v0  ;;  %v4171_v44 = vadd.f32 %v4170_v46, %v4169_v62  ;;  %v4349_v6 = vpop.permute.xlu1 %4348 }
 0x314   : > { %v4189_v38 = vadd.f32 %v4188_v42, %v4187_v47  ;;  %v4196_v3 = vadd.f32 %v4195_v20, %v4194_v33  ;;  %v4205_v1 = vadd.f32 %v4204_v45, %v4203_v54  ;;  %v4178_v32 = vadd.f32 %v4177_v31, %v4176_v55 }
 0x315   : > { %v4212_v41 = vadd.f32 %v4211_v58, %v4210_v30  ;;  %v4143_v8 = vadd.f32 %v4135_v21, %v4099_v56  ;;  %v4144_v53 = vadd.f32 %v4142_v22, %v4106_v60  ;;  %v4455_v43 = vpop.permute.xlu0 %4454 }
 0x316   : > { %v4197_v50 = vadd.f32 %v4189_v38, %v4161_v12  ;;  %v4198_v14 = vadd.f32 %v4196_v3, %v4162_v29  ;;  %v4206_v59 = vrot.slane %v4205_v1, 1 }
 0x317   : > { %v4213_v7 = vrot.slane %v4212_v41, 1  ;;  %v4179_v61 = vadd.f32 %v4171_v44, %v4143_v8  ;;  %v4180_v51 = vadd.f32 %v4178_v32, %v4144_v53  ;;  %v4358_v25 = vpop.permute.xlu1 %4357  ;;  %v4783_v53 = vld [vmem:[%s7702_s10 + $0x10] sm:$0xff] }
 0x318   : > { %v4217_v40 = vmul.f32 0.05, %v4197_v50  ;;  %v4218_v28 = vmul.f32 0.05, %v4198_v14  ;;  %v4207_v48 = vadd.f32 %v4206_v59, %v4205_v1  ;;  %v4257_v1 = vld [vmem:[%s7702_s10] sm:$0xff]  ;;  %v4777_v14 = vld [vmem:[%s7702_s10 + $0x8] sm:$0xff] }
 0x319   : > { %v4214_v17 = vadd.f32 %v4213_v7, %v4212_v41  ;;  %v4561_v12 = vpop.permute.xlu0 %4560  ;;  %v4789_v7 = vld [vmem:[%s7702_s10 + $0x18] sm:$0xff] }
 0x31a   : > { %v4215_v63 = vadd.f32 %v4207_v48, %v4179_v61  ;;  %v4221_v39 = vmul.f32 %v4217_v40, %v4217_v40  ;;  %v4222_v0 = vmul.f32 %v4218_v28, %v4218_v28  ;;  %v4237_v23 = vsub.f32 %v7562_v13, %v4217_v40 }
 0x31b   : > { %v4216_v26 = vadd.f32 %v4214_v17, %v4180_v51  ;;  %v4340_v18 = vsub.f32 %v7604_v35, %v4217_v40  ;;  %v4446_v47 = vsub.f32 %v7624_v5, %v4217_v40  ;;  %v4552_v33 = vsub.f32 %v7632_v24, %v4217_v40  ;;  %v4464_v22 = vpop.permute.xlu1 %4463 }
 0x31c   : > { %v4219_v4 = vmul.f32 0.05, %v4215_v63  ;;  %v4238_v19 = vsub.f32 %v7569_v52, %v4218_v28  ;;  %v4341_v49 = vsub.f32 %v7589_v2, %v4218_v28  ;;  %v4447_v46 = vsub.f32 %v7613_v37, %v4218_v28 }
 0x31d   : > { %v4220_v27 = vmul.f32 0.05, %v4216_v26  ;;  %v4553_v54 = vsub.f32 %v7634_v36, %v4218_v28  ;;  %v8380_v40 = vmov 0.0   ;;  %v4235_v28 = vpop.permute.xlu0 %4234 }
 0x31e   : > { %v4223_v11 = vsub.f32 %v4219_v4, %v4221_v39 }
 0x31f   : > { %v4224_v62 = vsub.f32 %v4220_v27, %v4222_v0  ;;  %v4570_v50 = vpop.permute.xlu1 %4569 }
 0x320   : > { %v4225_v16 = vmax.f32 %v4223_v11, 0.0 }
 0x321   : > { %v4226_v9 = vmax.f32 %v4224_v62, 0.0 }
 0x322   : > { %v4227_v55 = vadd.f32 1e-06, %v4225_v16 }
 0x323   : > { %v4228_v34 = vadd.f32 1e-06, %v4226_v9 }
 0x324   : > { %4879 = vrsqrt.f32 %v4227_v55 }
 0x325   : > { %4881 = vrsqrt.f32 %v4228_v34 }
 0x331   : > { %v4880_v57 = vpop.eup %4879 }
 0x332   : > { %v4882_v31 = vpop.eup %4881  ;;  %v4239_v42 = vmul.f32 %v4880_v57, %v4237_v23  ;;  %v4342_v20 = vmul.f32 %v4880_v57, %v4340_v18  ;;  %v4448_v30 = vmul.f32 %v4880_v57, %v4446_v47  ;;  %v4554_v13 = vmul.f32 %v4880_v57, %v4552_v33 }
 0x333   : > { %v4240_v21 = vmul.f32 %v4882_v31, %v4238_v19  ;;  %v4343_v35 = vmul.f32 %v4882_v31, %v4341_v49  ;;  %v4449_v5 = vmul.f32 %v4882_v31, %v4447_v46  ;;  %v4555_v29 = vmul.f32 %v4882_v31, %v4553_v54 }
 0x334   : > { %v4247_v24 = vmul.f32 %v4245_v15, %v4239_v42  ;;  %v4351_v45 = vmul.f32 %v4349_v6, %v4342_v20  ;;  %v4457_v36 = vmul.f32 %v4455_v43, %v4448_v30  ;;  %v4563_v56 = vmul.f32 %v4561_v12, %v4554_v13 }
 0x335   : > { %v4248_v52 = vmul.f32 %v4245_v15, %v4240_v21  ;;  %v4352_v38 = vmul.f32 %v4349_v6, %v4343_v35  ;;  %v4458_v2 = vmul.f32 %v4455_v43, %v4449_v5  ;;  %v4564_v58 = vmul.f32 %v4561_v12, %v4555_v29 }
 0x336   : > { %v4255_v3 = vadd.f32 %v4253_v10, %v4247_v24  ;;  %v4360_v37 = vadd.f32 %v4358_v25, %v4351_v45  ;;  %v4466_v8 = vadd.f32 %v4464_v22, %v4457_v36  ;;  %v4572_v59 = vadd.f32 %v4570_v50, %v4563_v56 }
 0x337   : > { %v4256_v60 = vadd.f32 %v4253_v10, %v4248_v52  ;;  %v4361_v44 = vadd.f32 %v4358_v25, %v4352_v38  ;;  %v4467_v32 = vadd.f32 %v4464_v22, %v4458_v2  ;;  %v4573_v41 = vadd.f32 %v4570_v50, %v4564_v58 }
 0x339   : > { %4772 = vmatprep.subr.msk.mxu0 %vm4074_vm8, %v4256_v60  ;;  %4778 = vmatprep.subr.msk.mxu1 %vm4074_vm8, %v4361_v44 }
 0x33a   : > { %4773 = vmatpush1.msk.msra.mxu0 %vm4074_vm8, %v4255_v3  ;;  %4779 = vmatpush1.msk.msra.mxu1 %vm4074_vm8, %v4360_v37 }
 0x33b   : > { %4774 = vmatmul.mubr.msk.f32.vlgmr.msra.gmra.mxu0 %vm2498_vm10, %v4257_v1  ;;  %4784 = vmatprep.subr.msk.mxu0 %vm4074_vm8, %v4467_v32 }
 0x33c   : > { %4790 = vmatprep.subr.msk.mxu1 %vm4074_vm8, %v4573_v41  ;;  %4780 = vmatmul.mubr.msk.f32.vlgmr.msra.gmra.mxu1 %vm2498_vm10, %v4777_v14 }
 0x33d   : > { %4785 = vmatpush1.msk.msra.mxu0 %vm4074_vm8, %v4466_v8  ;;  %4791 = vmatpush1.msk.msra.mxu1 %vm4074_vm8, %v4572_v59 }
 0x33e   : > { %4543 = vmatprep.mubr.f32.mxu0 %v8380_v40  ;;  %4649 = vmatprep.mubr.f32.mxu1 %v8380_v40 }
 0x33f   : > { %4786 = vmatmul.mubr.msk.f32.vlgmr.msra.gmra.mxu0 %vm2498_vm10, %v4783_v53 }
 0x340   : > { %4792 = vmatmul.mubr.msk.f32.vlgmr.msra.gmra.mxu1 %vm2498_vm10, %v4789_v7 }
 0x3fb   : > { %v4333_v61 = vpop.f32.mrf.mxu0 }
 0x3fc   : > { %v4338_v48 = vadd.f32 %v4333_v61, %v4235_v28  ;;  %v4439_v51 = vpop.f32.mrf.mxu1 }
 0x3fd   : > { %v4335_v17 = vpop.f32.mrf.mxu0 }
 0x3fe   : > { %v4444_v63 = vadd.f32 %v4439_v51, %v4338_v48  ;;  %v4339_v39 = vadd.f32 %v4335_v17, %v4235_v28  ;;  %v4441_v26 = vpop.f32.mrf.mxu1 }
 0x3ff   : > { %v4545_v0 = vpop.f32.mrf.mxu0 }
 0x400   : > { %v4445_v4 = vadd.f32 %v4441_v26, %v4339_v39  ;;  %v4550_v27 = vadd.f32 %v4545_v0, %v4444_v63  ;;  %v4651_v11 = vpop.f32.mrf.mxu1 }
 0x401   : > { %v4547_v62 = vpop.f32.mrf.mxu0 }
 0x402   : > { %v4656_v16 = vadd.f32 %v4651_v11, %v4550_v27  ;;  %v4551_v15 = vadd.f32 %v4547_v62, %v4445_v4  ;;  %v4653_v9 = vpop.f32.mrf.mxu1 }
 0x404   : > { %4658 = vst [vmem:[%s450_s24] sm:$0xff] %v4656_v16  ;;  %v4657_v55 = vadd.f32 %v4653_v9, %v4551_v15 }
 0x406   : > { %4659 = vst [vmem:[%s450_s24 + $0x8] sm:$0xff] %v4657_v55 }
 0x407 PF: > { %s22_s21 = sadd.s32 1, %s4891_s21  }
 0x408   : > { %p19_p4 = scmp.ge.s32.totalorder %s22_s21, 4  }
 0x40a   :  { %21 = sbr.rel (!%p19_p4) target bundleno = 1 (0x1), region = 138 }

</bundles_post_ra>
